<compile_context>
chip_gen: v7x
topology: tpu7x:2x2x1
jax: 0.10.0
libtpu: 0.0.40
codegen_flags: <defaults>
</compile_context>

<pallas_src>
import functools

import jax
import jax.numpy as jnp
from jax.experimental import pallas as pl
from jax.experimental.pallas import tpu as pltpu


# ----------------------------------------------------------------------------- utilities
def _round_up(x, m):
    return (x + m - 1) // m * m


def _choose_tiles(M):
    """Row-tile choice: big tiles (<=512) but keep >=2 grid steps when the problem is
    large enough so v7x's 2 TensorCores both get work on the 'parallel' axis."""
    Mp = _round_up(M, 8)
    TM = min(512, Mp)
    Mp = _round_up(Mp, TM)
    if Mp == TM and TM >= 256 and TM % 16 == 0:
        TM //= 2
    return Mp, TM


# --------------------------------------------------------------------- Pallas kernel #1:
# fused  (x @ w) + bias  [+ ReLU]   ==  Conv3d (im2col) + BatchNorm (scale pre-folded
# into w) + ReLU.  bf16 operands on the MXU, f32 accumulate, bf16 store.
def _fused_matmul_kernel(x_ref, w_ref, b_ref, o_ref, *, relu):
    acc = jnp.dot(x_ref[...], w_ref[...], preferred_element_type=jnp.float32)
    acc = acc + b_ref[...]
    if relu:
        acc = jnp.maximum(acc, 0.0)
    o_ref[...] = acc.astype(o_ref.dtype)


def fused_matmul(x, wp, bp, relu):
    """out[M, Np] = relu?((x[M,K] @ wp[Kp,Np]) + bp[1,Np]).

    `wp` (bf16) and `bp` (f32) are pre-padded / pre-folded at parameter-prep time.
    Only the activation pattern is padded here (K to Kp, M to a tile multiple).
    """
    M, K = x.shape
    Kp, Np = wp.shape
    Mp, TM = _choose_tiles(M)

    x = x.astype(jnp.bfloat16)
    if (Mp, Kp) != (M, K):
        x = jnp.pad(x, ((0, Mp - M), (0, Kp - K)))

    # double-buffered bf16 tiles + bias; generous slack; capped under v7x's 32 MiB scoped.
    vmem_bytes = 2 * (TM * Kp + Kp * Np + TM * Np) * 2 + 2 * Np * 4 + (8 << 20)
    vmem_bytes = int(min(vmem_bytes, 32 * 1024 * 1024))

    out = pl.pallas_call(
        functools.partial(_fused_matmul_kernel, relu=relu),
        out_shape=jax.ShapeDtypeStruct((Mp, Np), jnp.bfloat16),
        grid_spec=pltpu.PrefetchScalarGridSpec(
            num_scalar_prefetch=0,
            grid=(Mp // TM,),
            in_specs=[
                pl.BlockSpec((TM, Kp), lambda i: (i, 0)),
                pl.BlockSpec((Kp, Np), lambda i: (0, 0)),
                pl.BlockSpec((1, Np), lambda i: (0, 0)),
            ],
            out_specs=pl.BlockSpec((TM, Np), lambda i: (i, 0)),
        ),
        compiler_params=pltpu.CompilerParams(
            dimension_semantics=("parallel",),
            vmem_limit_bytes=vmem_bytes,
        ),
    )(x, wp, bp)
    return out[:M]


# --------------------------------------------------------------------- Pallas kernel #2:
# per-point L2 normalization:  out = x / sqrt(||x||^2 + eps)   (channel reduction)
def _l2norm_kernel(x_ref, o_ref):
    x = x_ref[...]
    ss = jnp.sum(x * x, axis=-1, keepdims=True)
    o_ref[...] = x * jax.lax.rsqrt(ss + 1e-12)


def l2_normalize(x):
    M, C = x.shape
    Cp = _round_up(C, 128)
    Mp, TM = _choose_tiles(M)
    xp = jnp.zeros((Mp, Cp), jnp.float32).at[:M, :C].set(x.astype(jnp.float32))
    out = pl.pallas_call(
        _l2norm_kernel,
        out_shape=jax.ShapeDtypeStruct((Mp, Cp), jnp.float32),
        grid_spec=pltpu.PrefetchScalarGridSpec(
            num_scalar_prefetch=0,
            grid=(Mp // TM,),
            in_specs=[pl.BlockSpec((TM, Cp), lambda i: (i, 0))],
            out_specs=pl.BlockSpec((TM, Cp), lambda i: (i, 0)),
        ),
        compiler_params=pltpu.CompilerParams(dimension_semantics=("parallel",)),
    )(xp)
    return out[:M, :C]


# ------------------------------------------------------------------- conv glue (im2col)
# TODO(synk): for realistic grids, replace the HBM im2col materialization with a
#             tap-accumulating kernel (K grid axis over ks^3 taps + VMEM accumulator).
def conv3d(x, layer, *, ks, stride, cout, relu):
    """Dense 3D conv on bf16 [D,H,W,Cin] (same-centered offsets); matmul runs in Pallas."""
    D, H, W, Cin = x.shape
    if ks == 1:
        pat = x.reshape(D * H * W, Cin)
        Do, Ho, Wo = D, H, W
    else:
        pad = (ks - 1) // 2
        xp = jnp.pad(x, ((pad, pad), (pad, pad), (pad, pad), (0, 0)))

        def out_sz(n):
            return (n + 2 * pad - ks) // stride + 1

        Do, Ho, Wo = out_sz(D), out_sz(H), out_sz(W)
        slices = []
        for dz in range(ks):
            for dy in range(ks):
                for dx in range(ks):
                    sl = xp[
                        dz: dz + stride * (Do - 1) + 1: stride,
                        dy: dy + stride * (Ho - 1) + 1: stride,
                        dx: dx + stride * (Wo - 1) + 1: stride,
                        :,
                    ]
                    slices.append(sl)
        pat = jnp.concatenate(slices, axis=-1).reshape(Do * Ho * Wo, ks ** 3 * Cin)
    out = fused_matmul(pat, layer["w"], layer["b"], relu)
    return out[:, :cout].reshape(Do, Ho, Wo, cout)


def deconv3d_subpixel(x, layer, *, cout, relu):
    """Stride-2 ks=3 transposed conv as a sub-pixel conv: ONE stride-1 matmul at input
    resolution with K=8*Cin, N=8*Cout (one output-channel block per output parity),
    then a pixel shuffle.  Numerically identical to zero-stuff + same-padded conv."""
    D, H, W, Cin = x.shape
    xp = jnp.pad(x, ((0, 1), (0, 1), (0, 1), (0, 0)))   # far-side halo for the +1 taps
    slices = []
    for tz in (0, 1):
        for ty in (0, 1):
            for tx in (0, 1):
                slices.append(xp[tz:tz + D, ty:ty + H, tx:tx + W, :])
    pat = jnp.concatenate(slices, axis=-1).reshape(D * H * W, 8 * Cin)
    out = fused_matmul(pat, layer["w"], layer["b"], relu)          # [M, Np]
    out = out[:, :8 * cout].reshape(D, H, W, 2, 2, 2, cout)        # (i,j,k,pz,py,px,c)
    out = out.transpose(0, 3, 1, 4, 2, 5, 6).reshape(2 * D, 2 * H, 2 * W, cout)
    return out


# -------------------------------------------------------------- voxelize / devoxelize glue
def initial_voxelize(coords, feats, vsize, G):
    idx = jnp.clip(jnp.floor(coords / vsize).astype(jnp.int32), 0, G - 1)
    flat = (idx[:, 0] * G + idx[:, 1]) * G + idx[:, 2]
    sums = jax.ops.segment_sum(feats, flat, num_segments=G ** 3)
    cnts = jax.ops.segment_sum(jnp.ones((feats.shape[0], 1), feats.dtype), flat,
                               num_segments=G ** 3)
    dense = sums / jnp.maximum(cnts, 1.0)
    return dense.reshape(G, G, G, feats.shape[1]).astype(jnp.bfloat16)


def voxel_to_point(grid, coords, vsize):
    G = grid.shape[0]
    p = coords / vsize
    p0 = jnp.floor(p)
    frac = p - p0
    p0i = p0.astype(jnp.int32)
    out = jnp.zeros((coords.shape[0], grid.shape[-1]), jnp.float32)
    for dx in (0, 1):
        for dy in (0, 1):
            for dz in (0, 1):
                ix = jnp.clip(p0i[:, 0] + dx, 0, G - 1)
                iy = jnp.clip(p0i[:, 1] + dy, 0, G - 1)
                iz = jnp.clip(p0i[:, 2] + dz, 0, G - 1)
                wx = frac[:, 0] if dx else 1.0 - frac[:, 0]
                wy = frac[:, 1] if dy else 1.0 - frac[:, 1]
                wz = frac[:, 2] if dz else 1.0 - frac[:, 2]
                out = out + grid[ix, iy, iz] * (wx * wy * wz)[:, None]
    return out


# -------------------------------------------------------------------------- parameters
def init_params(key, num_feats, cs, out_channel=64):
    bn_scale = jnp.float32(1.0 / (1.0 + 1e-5) ** 0.5)  # BN: gamma=1, beta=0, mean=0, var=1
    keys = iter(jax.random.split(key, 64))

    def conv_w(ks, cin, cout):
        fan_in = ks ** 3 * cin
        return jax.random.normal(next(keys), (fan_in, cout), jnp.float32) * (2.0 / fan_in) ** 0.5

    def res(cin, cout, ks=3):
        p = {"w1": conv_w(ks, cin, cout), "w2": conv_w(ks, cout, cout)}
        if cin != cout:
            p["wd"] = conv_w(1, cin, cout)
        return p

    return {
        "bn_scale": bn_scale,
        "init":  {"b_w": conv_w(5, num_feats, cs[0]), "res": res(cs[0], cs[0])},
        "down1": {"b_w": conv_w(3, cs[0], cs[1]), "res": res(cs[1], cs[1])},
        "down2": {"b_w": conv_w(3, cs[1], cs[2]), "res": res(cs[2], cs[2])},
        "bottle": res(cs[2], cs[3]),
        "up1": {"res": res(cs[3] + cs[2], cs[3]), "up_w": conv_w(3, cs[3], cs[4])},
        "up2": {"res": res(cs[4] + cs[1], cs[4]), "up_w": conv_w(3, cs[4], cs[5])},
        "final_w": conv_w(1, cs[5], out_channel),
        "final_b": jax.random.normal(next(keys), (out_channel,), jnp.float32) * 0.01,
    }


def _build_subpixel_weight(w, scale):
    """[27*Cin, Cout] stride-2 ks=3 deconv weight -> [8*Cin, 8*Cout] sub-pixel weight."""
    cout = w.shape[1]
    cin = w.shape[0] // 27
    wb = jnp.zeros((8 * cin, 8 * cout), jnp.float32)
    for pz in (0, 1):
        for py in (0, 1):
            for px in (0, 1):
                pflat = pz * 4 + py * 2 + px
                for tz in (0, 1):
                    for ty in (0, 1):
                        for tx in (0, 1):
                            kk, ok = [], True
                            for p_ax, t_ax in ((pz, tz), (py, ty), (px, tx)):
                                if p_ax == 0:
                                    if t_ax != 0:
                                        ok = False
                                        break
                                    kk.append(1)
                                else:
                                    kk.append(0 if t_ax == 0 else 2)
                            if not ok:
                                continue
                            kz, ky, kx = kk
                            tap = (kz * 3 + ky) * 3 + kx
                            tflat = tz * 4 + ty * 2 + tx
                            wb = wb.at[tflat * cin:(tflat + 1) * cin,
                                       pflat * cout:(pflat + 1) * cout].set(
                                w[tap * cin:(tap + 1) * cin, :] * scale)
    return wb


def prepare_params(raw):
    """Fold BN scale into weights, pad/cast to lane-aligned bf16 ONCE."""
    s = raw["bn_scale"]

    def prep(w, scale, bias=None):
        K, N = w.shape
        Kp, Np = _round_up(K, 128), _round_up(N, 128)
        wp = jnp.zeros((Kp, Np), jnp.float32).at[:K, :N].set(w * scale)
        b = jnp.zeros((1, Np), jnp.float32)
        if bias is not None:
            b = b.at[0, :N].set(bias)
        return {"w": wp.astype(jnp.bfloat16), "b": b}

    def prep_res(p):
        q = {"w1": prep(p["w1"], s), "w2": prep(p["w2"], s)}
        if "wd" in p:
            q["wd"] = prep(p["wd"], s)
        return q

    def prep_deconv(w):
        wb = _build_subpixel_weight(w, s)
        K, N = wb.shape
        Kp, Np = _round_up(K, 128), _round_up(N, 128)
        wp = jnp.zeros((Kp, Np), jnp.float32).at[:K, :N].set(wb)
        return {"w": wp.astype(jnp.bfloat16), "b": jnp.zeros((1, Np), jnp.float32)}

    return {
        "init":  {"b": prep(raw["init"]["b_w"], s),  "res": prep_res(raw["init"]["res"])},
        "down1": {"b": prep(raw["down1"]["b_w"], s), "res": prep_res(raw["down1"]["res"])},
        "down2": {"b": prep(raw["down2"]["b_w"], s), "res": prep_res(raw["down2"]["res"])},
        "bottle": prep_res(raw["bottle"]),
        "up1": {"res": prep_res(raw["up1"]["res"]), "up": prep_deconv(raw["up1"]["up_w"])},
        "up2": {"res": prep_res(raw["up2"]["res"]), "up": prep_deconv(raw["up2"]["up_w"])},
        "final": prep(raw["final_w"], 1.0, raw["final_b"]),
    }


# ------------------------------------------------------------------------------ forward
@functools.partial(jax.jit, static_argnames=("vsize", "G", "cs", "out_channel"))
def minkunet_forward(coords, feats, params, *, vsize, G, cs, out_channel=64):
    def residual(x, p, cout):
        y = conv3d(x, p["w1"], ks=3, stride=1, cout=cout, relu=True)
        y = conv3d(y, p["w2"], ks=3, stride=1, cout=cout, relu=False)
        sc = conv3d(x, p["wd"], ks=1, stride=1, cout=cout, relu=False) if "wd" in p else x
        return jnp.maximum(y + sc, 0)

    def down(x, p, ks, stride, cout):
        y = conv3d(x, p["b"], ks=ks, stride=stride, cout=cout, relu=True)
        return residual(y, p["res"], cout)

    def up(x, skip, p, cout_res, cout_up):
        y = jnp.concatenate([x, skip], axis=-1)
        y = residual(y, p["res"], cout_res)
        return deconv3d_subpixel(y, p["up"], cout=cout_up, relu=True)

    v0 = initial_voxelize(coords, feats, vsize, G)               # [G,G,G,Cin] bf16
    s1 = down(v0, params["init"], 5, 1, cs[0])                   # [16,16,16,cs0]
    s2 = down(s1, params["down1"], 3, 2, cs[1])                  # [8,8,8,cs1]
    s4 = down(s2, params["down2"], 3, 2, cs[2])                  # [4,4,4,cs2]
    s4_tr = residual(s4, params["bottle"], cs[3])                # [4,4,4,cs3]
    s2_tr = up(s4_tr, s4, params["up1"], cs[3], cs[4])           # [8,8,8,cs4]
    s1_tr = up(s2_tr, s2, params["up2"], cs[4], cs[5])           # [16,16,16,cs5]
    final = conv3d(s1_tr, params["final"], ks=1, stride=1,
                   cout=out_channel, relu=False)                 # [16,16,16,64]
    pt = voxel_to_point(final.astype(jnp.float32), coords, vsize)  # [Np,64]
    return l2_normalize(pt)                                      # [Np,64], unit L2 rows


# --------------------------------------------------------------------------------- main
if __name__ == "__main__":
    key = jax.random.PRNGKey(0)
    num_feats = 4
    G = 16                       # dense voxel grid extent (small test size)
    vsize = 0.05
    cr = 1.0
    cs = tuple(int(c * cr) for c in [8, 16, 32, 32, 16, 16])
    n_points = 256

    kc, kf, kp = jax.random.split(key, 3)
    coords = jax.random.uniform(kc, (n_points, 3), minval=0.0, maxval=G * vsize)  # lidar.C
    feats = jax.random.normal(kf, (n_points, num_feats), dtype=jnp.float32)        # lidar.F

    raw_params = init_params(kp, num_feats, list(cs))
    params = prepare_params(raw_params)

    out = minkunet_forward(coords, feats, params, vsize=vsize, G=G, cs=cs, out_channel=64)
    out = jax.block_until_ready(out)

    assert out.shape == (n_points, 64), out.shape
    assert bool(jnp.all(jnp.isfinite(out)))
    print("KERNEL_OK")
</pallas_src>

<mosaic_0001>
module attributes {stable_mosaic.version = 11 : i64} {
  func.func private @main(%arg0: i32) attributes {dimension_semantics = [#tpu.dimension_semantics<core_parallel>], iteration_bounds = array<i64: 2>, tpu.core_type = #tpu.core_type<sc_scalar_subcore>, window_params = []} {
    return
  }
}

module attributes {stable_mosaic.version = 11 : i64} {
  func.func private @main(%arg0: i32) attributes {dimension_semantics = [#tpu.dimension_semantics<core_parallel>], iteration_bounds = array<i64: 2>, tpu.core_type = #tpu.core_type<sc_scalar_subcore>, window_params = []} {
    return
  }
}

module attributes {stable_mosaic.version = 11 : i64} {
  func.func @_fused_matmul_kernel(%arg0: i32, %arg1: memref<512x512xbf16, #tpu.memory_space<vmem>>, %arg2: memref<512x128xbf16, #tpu.memory_space<vmem>>, %arg3: memref<1x128xf32, #tpu.memory_space<vmem>>, %arg4: memref<512x128xbf16, #tpu.memory_space<vmem>>) attributes {dimension_semantics = [#tpu.dimension_semantics<parallel>], iteration_bounds = array<i64: 8>, scalar_prefetch = 0 : i64, scratch_operands = 0 : i64, tpu.core_type = #tpu.core_type<tc>, window_params = [{transform_indices = @transform_0, window_bounds = array<i64: 512, 512>}, {pipeline_mode = #tpu.pipeline_mode<synchronous>, transform_indices = @transform_1, window_bounds = array<i64: 512, 128>}, {pipeline_mode = #tpu.pipeline_mode<synchronous>, transform_indices = @transform_2, window_bounds = array<i64: 1, 128>}, {transform_indices = @transform_3, window_bounds = array<i64: 512, 128>}]} {
    %c0 = arith.constant 0 : index
    %c0_0 = arith.constant 0 : index
    %0 = vector.load %arg1[%c0, %c0_0] : memref<512x512xbf16, #tpu.memory_space<vmem>>, vector<512x512xbf16>
    %c0_1 = arith.constant 0 : index
    %c0_2 = arith.constant 0 : index
    %1 = vector.load %arg2[%c0_1, %c0_2] : memref<512x128xbf16, #tpu.memory_space<vmem>>, vector<512x128xbf16>
    %cst = arith.constant dense<0.000000e+00> : vector<512x128xf32>
    %2 = tpu.matmul %0, %1, %cst {dimension_numbers = #tpu.dot_dimension_numbers<[1], [0], [0], [1], [0, 0, 1, 1], [], []>} : vector<512x512xbf16>, vector<512x128xbf16>, vector<512x128xf32> -> vector<512x128xf32>
    %c0_3 = arith.constant 0 : index
    %c0_4 = arith.constant 0 : index
    %3 = vector.load %arg3[%c0_3, %c0_4] : memref<1x128xf32, #tpu.memory_space<vmem>>, vector<1x128xf32>
    %4 = vector.broadcast %3 : vector<1x128xf32> to vector<512x128xf32>
    %5 = arith.addf %2, %4 : vector<512x128xf32>
    %cst_5 = arith.constant 0.000000e+00 : f32
    %6 = vector.broadcast %cst_5 : f32 to vector<512x128xf32>
    %7 = arith.maximumf %5, %6 : vector<512x128xf32>
    %8 = arith.truncf %7 : vector<512x128xf32> to vector<512x128xbf16>
    %c0_6 = arith.constant 0 : index
    %c0_7 = arith.constant 0 : index
    %9 = vector.load %arg4[%c0_6, %c0_7] : memref<512x128xbf16, #tpu.memory_space<vmem>>, vector<512x128xbf16>
    tpu.vector_store %arg4[%c0_6, %c0_7], %8 {strides = array<i32>} : memref<512x128xbf16, #tpu.memory_space<vmem>>, vector<512x128xbf16>,
    return
  }
  func.func @transform_0(%arg0: i32) -> (i32, i32) {
    %c0_i32 = arith.constant 0 : i32
    %c0_i32_0 = arith.constant 0 : i32
    return %arg0, %c0_i32 : i32, i32
  }
  func.func @transform_1(%arg0: i32) -> (i32, i32) {
    %c0_i32 = arith.constant 0 : i32
    %c0_i32_0 = arith.constant 0 : i32
    %c0_i32_1 = arith.constant 0 : i32
    return %c0_i32, %c0_i32_0 : i32, i32
  }
  func.func @transform_2(%arg0: i32) -> (i32, i32) {
    %c0_i32 = arith.constant 0 : i32
    %c0_i32_0 = arith.constant 0 : i32
    %c0_i32_1 = arith.constant 0 : i32
    return %c0_i32, %c0_i32_0 : i32, i32
  }
  func.func @transform_3(%arg0: i32) -> (i32, i32) {
    %c0_i32 = arith.constant 0 : i32
    %c0_i32_0 = arith.constant 0 : i32
    return %arg0, %c0_i32 : i32, i32
  }
}

module attributes {stable_mosaic.version = 11 : i64} {
  func.func @_fused_matmul_kernel(%arg0: i32, %arg1: memref<512x256xbf16, #tpu.memory_space<vmem>>, %arg2: memref<256x128xbf16, #tpu.memory_space<vmem>>, %arg3: memref<1x128xf32, #tpu.memory_space<vmem>>, %arg4: memref<512x128xbf16, #tpu.memory_space<vmem>>) attributes {dimension_semantics = [#tpu.dimension_semantics<parallel>], iteration_bounds = array<i64: 8>, scalar_prefetch = 0 : i64, scratch_operands = 0 : i64, tpu.core_type = #tpu.core_type<tc>, window_params = [{transform_indices = @transform_0, window_bounds = array<i64: 512, 256>}, {pipeline_mode = #tpu.pipeline_mode<synchronous>, transform_indices = @transform_1, window_bounds = array<i64: 256, 128>}, {pipeline_mode = #tpu.pipeline_mode<synchronous>, transform_indices = @transform_2, window_bounds = array<i64: 1, 128>}, {transform_indices = @transform_3, window_bounds = array<i64: 512, 128>}]} {
    %c0 = arith.constant 0 : index
    %c0_0 = arith.constant 0 : index
    %0 = vector.load %arg1[%c0, %c0_0] : memref<512x256xbf16, #tpu.memory_space<vmem>>, vector<512x256xbf16>
    %c0_1 = arith.constant 0 : index
    %c0_2 = arith.constant 0 : index
    %1 = vector.load %arg2[%c0_1, %c0_2] : memref<256x128xbf16, #tpu.memory_space<vmem>>, vector<256x128xbf16>
    %cst = arith.constant dense<0.000000e+00> : vector<512x128xf32>
    %2 = tpu.matmul %0, %1, %cst {dimension_numbers = #tpu.dot_dimension_numbers<[1], [0], [0], [1], [0, 0, 1, 1], [], []>} : vector<512x256xbf16>, vector<256x128xbf16>, vector<512x128xf32> -> vector<512x128xf32>
    %c0_3 = arith.constant 0 : index
    %c0_4 = arith.constant 0 : index
    %3 = vector.load %arg3[%c0_3, %c0_4] : memref<1x128xf32, #tpu.memory_space<vmem>>, vector<1x128xf32>
    %4 = vector.broadcast %3 : vector<1x128xf32> to vector<512x128xf32>
    %5 = arith.addf %2, %4 : vector<512x128xf32>
    %cst_5 = arith.constant 0.000000e+00 : f32
    %6 = vector.broadcast %cst_5 : f32 to vector<512x128xf32>
    %7 = arith.maximumf %5, %6 : vector<512x128xf32>
    %8 = arith.truncf %7 : vector<512x128xf32> to vector<512x128xbf16>
    %c0_6 = arith.constant 0 : index
    %c0_7 = arith.constant 0 : index
    %9 = vector.load %arg4[%c0_6, %c0_7] : memref<512x128xbf16, #tpu.memory_space<vmem>>, vector<512x128xbf16>
    tpu.vector_store %arg4[%c0_6, %c0_7], %8 {strides = array<i32>} : memref<512x128xbf16, #tpu.memory_space<vmem>>, vector<512x128xbf16>,
    return
  }
  func.func @transform_0(%arg0: i32) -> (i32, i32) {
    %c0_i32 = arith.constant 0 : i32
    %c0_i32_0 = arith.constant 0 : i32
    return %arg0, %c0_i32 : i32, i32
  }
  func.func @transform_1(%arg0: i32) -> (i32, i32) {
    %c0_i32 = arith.constant 0 : i32
    %c0_i32_0 = arith.constant 0 : i32
    %c0_i32_1 = arith.constant 0 : i32
    return %c0_i32, %c0_i32_0 : i32, i32
  }
  func.func @transform_2(%arg0: i32) -> (i32, i32) {
    %c0_i32 = arith.constant 0 : i32
    %c0_i32_0 = arith.constant 0 : i32
    %c0_i32_1 = arith.constant 0 : i32
    return %c0_i32, %c0_i32_0 : i32, i32
  }
  func.func @transform_3(%arg0: i32) -> (i32, i32) {
    %c0_i32 = arith.constant 0 : i32
    %c0_i32_0 = arith.constant 0 : i32
    return %arg0, %c0_i32 : i32, i32
  }
}

module attributes {stable_mosaic.version = 11 : i64} {
  func.func @_fused_matmul_kernel(%arg0: i32, %arg1: memref<512x256xbf16, #tpu.memory_space<vmem>>, %arg2: memref<256x128xbf16, #tpu.memory_space<vmem>>, %arg3: memref<1x128xf32, #tpu.memory_space<vmem>>, %arg4: memref<512x128xbf16, #tpu.memory_space<vmem>>) attributes {dimension_semantics = [#tpu.dimension_semantics<parallel>], iteration_bounds = array<i64: 8>, scalar_prefetch = 0 : i64, scratch_operands = 0 : i64, tpu.core_type = #tpu.core_type<tc>, window_params = [{transform_indices = @transform_0, window_bounds = array<i64: 512, 256>}, {pipeline_mode = #tpu.pipeline_mode<synchronous>, transform_indices = @transform_1, window_bounds = array<i64: 256, 128>}, {pipeline_mode = #tpu.pipeline_mode<synchronous>, transform_indices = @transform_2, window_bounds = array<i64: 1, 128>}, {transform_indices = @transform_3, window_bounds = array<i64: 512, 128>}]} {
    %c0 = arith.constant 0 : index
    %c0_0 = arith.constant 0 : index
    %0 = vector.load %arg1[%c0, %c0_0] : memref<512x256xbf16, #tpu.memory_space<vmem>>, vector<512x256xbf16>
    %c0_1 = arith.constant 0 : index
    %c0_2 = arith.constant 0 : index
    %1 = vector.load %arg2[%c0_1, %c0_2] : memref<256x128xbf16, #tpu.memory_space<vmem>>, vector<256x128xbf16>
    %cst = arith.constant dense<0.000000e+00> : vector<512x128xf32>
    %2 = tpu.matmul %0, %1, %cst {dimension_numbers = #tpu.dot_dimension_numbers<[1], [0], [0], [1], [0, 0, 1, 1], [], []>} : vector<512x256xbf16>, vector<256x128xbf16>, vector<512x128xf32> -> vector<512x128xf32>
    %c0_3 = arith.constant 0 : index
    %c0_4 = arith.constant 0 : index
    %3 = vector.load %arg3[%c0_3, %c0_4] : memref<1x128xf32, #tpu.memory_space<vmem>>, vector<1x128xf32>
    %4 = vector.broadcast %3 : vector<1x128xf32> to vector<512x128xf32>
    %5 = arith.addf %2, %4 : vector<512x128xf32>
    %6 = arith.truncf %5 : vector<512x128xf32> to vector<512x128xbf16>
    %c0_5 = arith.constant 0 : index
    %c0_6 = arith.constant 0 : index
    %7 = vector.load %arg4[%c0_5, %c0_6] : memref<512x128xbf16, #tpu.memory_space<vmem>>, vector<512x128xbf16>
    tpu.vector_store %arg4[%c0_5, %c0_6], %6 {strides = array<i32>} : memref<512x128xbf16, #tpu.memory_space<vmem>>, vector<512x128xbf16>,
    return
  }
  func.func @transform_0(%arg0: i32) -> (i32, i32) {
    %c0_i32 = arith.constant 0 : i32
    %c0_i32_0 = arith.constant 0 : i32
    return %arg0, %c0_i32 : i32, i32
  }
  func.func @transform_1(%arg0: i32) -> (i32, i32) {
    %c0_i32 = arith.constant 0 : i32
    %c0_i32_0 = arith.constant 0 : i32
    %c0_i32_1 = arith.constant 0 : i32
    return %c0_i32, %c0_i32_0 : i32, i32
  }
  func.func @transform_2(%arg0: i32) -> (i32, i32) {
    %c0_i32 = arith.constant 0 : i32
    %c0_i32_0 = arith.constant 0 : i32
    %c0_i32_1 = arith.constant 0 : i32
    return %c0_i32, %c0_i32_0 : i32, i32
  }
  func.func @transform_3(%arg0: i32) -> (i32, i32) {
    %c0_i32 = arith.constant 0 : i32
    %c0_i32_0 = arith.constant 0 : i32
    return %arg0, %c0_i32 : i32, i32
  }
}

module attributes {stable_mosaic.version = 11 : i64} {
  func.func @_fused_matmul_kernel(%arg0: i32, %arg1: memref<256x256xbf16, #tpu.memory_space<vmem>>, %arg2: memref<256x128xbf16, #tpu.memory_space<vmem>>, %arg3: memref<1x128xf32, #tpu.memory_space<vmem>>, %arg4: memref<256x128xbf16, #tpu.memory_space<vmem>>) attributes {dimension_semantics = [#tpu.dimension_semantics<parallel>], iteration_bounds = array<i64: 2>, scalar_prefetch = 0 : i64, scratch_operands = 0 : i64, tpu.core_type = #tpu.core_type<tc>, window_params = [{transform_indices = @transform_0, window_bounds = array<i64: 256, 256>}, {pipeline_mode = #tpu.pipeline_mode<synchronous>, transform_indices = @transform_1, window_bounds = array<i64: 256, 128>}, {pipeline_mode = #tpu.pipeline_mode<synchronous>, transform_indices = @transform_2, window_bounds = array<i64: 1, 128>}, {transform_indices = @transform_3, window_bounds = array<i64: 256, 128>}]} {
    %c0 = arith.constant 0 : index
    %c0_0 = arith.constant 0 : index
    %0 = vector.load %arg1[%c0, %c0_0] : memref<256x256xbf16, #tpu.memory_space<vmem>>, vector<256x256xbf16>
    %c0_1 = arith.constant 0 : index
    %c0_2 = arith.constant 0 : index
    %1 = vector.load %arg2[%c0_1, %c0_2] : memref<256x128xbf16, #tpu.memory_space<vmem>>, vector<256x128xbf16>
    %cst = arith.constant dense<0.000000e+00> : vector<256x128xf32>
    %2 = tpu.matmul %0, %1, %cst {dimension_numbers = #tpu.dot_dimension_numbers<[1], [0], [0], [1], [0, 0, 1, 1], [], []>} : vector<256x256xbf16>, vector<256x128xbf16>, vector<256x128xf32> -> vector<256x128xf32>
    %c0_3 = arith.constant 0 : index
    %c0_4 = arith.constant 0 : index
    %3 = vector.load %arg3[%c0_3, %c0_4] : memref<1x128xf32, #tpu.memory_space<vmem>>, vector<1x128xf32>
    %4 = vector.broadcast %3 : vector<1x128xf32> to vector<256x128xf32>
    %5 = arith.addf %2, %4 : vector<256x128xf32>
    %cst_5 = arith.constant 0.000000e+00 : f32
    %6 = vector.broadcast %cst_5 : f32 to vector<256x128xf32>
    %7 = arith.maximumf %5, %6 : vector<256x128xf32>
    %8 = arith.truncf %7 : vector<256x128xf32> to vector<256x128xbf16>
    %c0_6 = arith.constant 0 : index
    %c0_7 = arith.constant 0 : index
    %9 = vector.load %arg4[%c0_6, %c0_7] : memref<256x128xbf16, #tpu.memory_space<vmem>>, vector<256x128xbf16>
    tpu.vector_store %arg4[%c0_6, %c0_7], %8 {strides = array<i32>} : memref<256x128xbf16, #tpu.memory_space<vmem>>, vector<256x128xbf16>,
    return
  }
  func.func @transform_0(%arg0: i32) -> (i32, i32) {
    %c0_i32 = arith.constant 0 : i32
    %c0_i32_0 = arith.constant 0 : i32
    return %arg0, %c0_i32 : i32, i32
  }
  func.func @transform_1(%arg0: i32) -> (i32, i32) {
    %c0_i32 = arith.constant 0 : i32
    %c0_i32_0 = arith.constant 0 : i32
    %c0_i32_1 = arith.constant 0 : i32
    return %c0_i32, %c0_i32_0 : i32, i32
  }
  func.func @transform_2(%arg0: i32) -> (i32, i32) {
    %c0_i32 = arith.constant 0 : i32
    %c0_i32_0 = arith.constant 0 : i32
    %c0_i32_1 = arith.constant 0 : i32
    return %c0_i32, %c0_i32_0 : i32, i32
  }
  func.func @transform_3(%arg0: i32) -> (i32, i32) {
    %c0_i32 = arith.constant 0 : i32
    %c0_i32_0 = arith.constant 0 : i32
    return %arg0, %c0_i32 : i32, i32
  }
}

module attributes {stable_mosaic.version = 11 : i64} {
  func.func @_fused_matmul_kernel(%arg0: i32, %arg1: memref<256x512xbf16, #tpu.memory_space<vmem>>, %arg2: memref<512x128xbf16, #tpu.memory_space<vmem>>, %arg3: memref<1x128xf32, #tpu.memory_space<vmem>>, %arg4: memref<256x128xbf16, #tpu.memory_space<vmem>>) attributes {dimension_semantics = [#tpu.dimension_semantics<parallel>], iteration_bounds = array<i64: 2>, scalar_prefetch = 0 : i64, scratch_operands = 0 : i64, tpu.core_type = #tpu.core_type<tc>, window_params = [{transform_indices = @transform_0, window_bounds = array<i64: 256, 512>}, {pipeline_mode = #tpu.pipeline_mode<synchronous>, transform_indices = @transform_1, window_bounds = array<i64: 512, 128>}, {pipeline_mode = #tpu.pipeline_mode<synchronous>, transform_indices = @transform_2, window_bounds = array<i64: 1, 128>}, {transform_indices = @transform_3, window_bounds = array<i64: 256, 128>}]} {
    %c0 = arith.constant 0 : index
    %c0_0 = arith.constant 0 : index
    %0 = vector.load %arg1[%c0, %c0_0] : memref<256x512xbf16, #tpu.memory_space<vmem>>, vector<256x512xbf16>
    %c0_1 = arith.constant 0 : index
    %c0_2 = arith.constant 0 : index
    %1 = vector.load %arg2[%c0_1, %c0_2] : memref<512x128xbf16, #tpu.memory_space<vmem>>, vector<512x128xbf16>
    %cst = arith.constant dense<0.000000e+00> : vector<256x128xf32>
    %2 = tpu.matmul %0, %1, %cst {dimension_numbers = #tpu.dot_dimension_numbers<[1], [0], [0], [1], [0, 0, 1, 1], [], []>} : vector<256x512xbf16>, vector<512x128xbf16>, vector<256x128xf32> -> vector<256x128xf32>
    %c0_3 = arith.constant 0 : index
    %c0_4 = arith.constant 0 : index
    %3 = vector.load %arg3[%c0_3, %c0_4] : memref<1x128xf32, #tpu.memory_space<vmem>>, vector<1x128xf32>
    %4 = vector.broadcast %3 : vector<1x128xf32> to vector<256x128xf32>
    %5 = arith.addf %2, %4 : vector<256x128xf32>
    %cst_5 = arith.constant 0.000000e+00 : f32
    %6 = vector.broadcast %cst_5 : f32 to vector<256x128xf32>
    %7 = arith.maximumf %5, %6 : vector<256x128xf32>
    %8 = arith.truncf %7 : vector<256x128xf32> to vector<256x128xbf16>
    %c0_6 = arith.constant 0 : index
    %c0_7 = arith.constant 0 : index
    %9 = vector.load %arg4[%c0_6, %c0_7] : memref<256x128xbf16, #tpu.memory_space<vmem>>, vector<256x128xbf16>
    tpu.vector_store %arg4[%c0_6, %c0_7], %8 {strides = array<i32>} : memref<256x128xbf16, #tpu.memory_space<vmem>>, vector<256x128xbf16>,
    return
  }
  func.func @transform_0(%arg0: i32) -> (i32, i32) {
    %c0_i32 = arith.constant 0 : i32
    %c0_i32_0 = arith.constant 0 : i32
    return %arg0, %c0_i32 : i32, i32
  }
  func.func @transform_1(%arg0: i32) -> (i32, i32) {
    %c0_i32 = arith.constant 0 : i32
    %c0_i32_0 = arith.constant 0 : i32
    %c0_i32_1 = arith.constant 0 : i32
    return %c0_i32, %c0_i32_0 : i32, i32
  }
  func.func @transform_2(%arg0: i32) -> (i32, i32) {
    %c0_i32 = arith.constant 0 : i32
    %c0_i32_0 = arith.constant 0 : i32
    %c0_i32_1 = arith.constant 0 : i32
    return %c0_i32, %c0_i32_0 : i32, i32
  }
  func.func @transform_3(%arg0: i32) -> (i32, i32) {
    %c0_i32 = arith.constant 0 : i32
    %c0_i32_0 = arith.constant 0 : i32
    return %arg0, %c0_i32 : i32, i32
  }
}

module attributes {stable_mosaic.version = 11 : i64} {
  func.func @_fused_matmul_kernel(%arg0: i32, %arg1: memref<256x512xbf16, #tpu.memory_space<vmem>>, %arg2: memref<512x128xbf16, #tpu.memory_space<vmem>>, %arg3: memref<1x128xf32, #tpu.memory_space<vmem>>, %arg4: memref<256x128xbf16, #tpu.memory_space<vmem>>) attributes {dimension_semantics = [#tpu.dimension_semantics<parallel>], iteration_bounds = array<i64: 2>, scalar_prefetch = 0 : i64, scratch_operands = 0 : i64, tpu.core_type = #tpu.core_type<tc>, window_params = [{transform_indices = @transform_0, window_bounds = array<i64: 256, 512>}, {pipeline_mode = #tpu.pipeline_mode<synchronous>, transform_indices = @transform_1, window_bounds = array<i64: 512, 128>}, {pipeline_mode = #tpu.pipeline_mode<synchronous>, transform_indices = @transform_2, window_bounds = array<i64: 1, 128>}, {transform_indices = @transform_3, window_bounds = array<i64: 256, 128>}]} {
    %c0 = arith.constant 0 : index
    %c0_0 = arith.constant 0 : index
    %0 = vector.load %arg1[%c0, %c0_0] : memref<256x512xbf16, #tpu.memory_space<vmem>>, vector<256x512xbf16>
    %c0_1 = arith.constant 0 : index
    %c0_2 = arith.constant 0 : index
    %1 = vector.load %arg2[%c0_1, %c0_2] : memref<512x128xbf16, #tpu.memory_space<vmem>>, vector<512x128xbf16>
    %cst = arith.constant dense<0.000000e+00> : vector<256x128xf32>
    %2 = tpu.matmul %0, %1, %cst {dimension_numbers = #tpu.dot_dimension_numbers<[1], [0], [0], [1], [0, 0, 1, 1], [], []>} : vector<256x512xbf16>, vector<512x128xbf16>, vector<256x128xf32> -> vector<256x128xf32>
    %c0_3 = arith.constant 0 : index
    %c0_4 = arith.constant 0 : index
    %3 = vector.load %arg3[%c0_3, %c0_4] : memref<1x128xf32, #tpu.memory_space<vmem>>, vector<1x128xf32>
    %4 = vector.broadcast %3 : vector<1x128xf32> to vector<256x128xf32>
    %5 = arith.addf %2, %4 : vector<256x128xf32>
    %6 = arith.truncf %5 : vector<256x128xf32> to vector<256x128xbf16>
    %c0_5 = arith.constant 0 : index
    %c0_6 = arith.constant 0 : index
    %7 = vector.load %arg4[%c0_5, %c0_6] : memref<256x128xbf16, #tpu.memory_space<vmem>>, vector<256x128xbf16>
    tpu.vector_store %arg4[%c0_5, %c0_6], %6 {strides = array<i32>} : memref<256x128xbf16, #tpu.memory_space<vmem>>, vector<256x128xbf16>,
    return
  }
  func.func @transform_0(%arg0: i32) -> (i32, i32) {
    %c0_i32 = arith.constant 0 : i32
    %c0_i32_0 = arith.constant 0 : i32
    return %arg0, %c0_i32 : i32, i32
  }
  func.func @transform_1(%arg0: i32) -> (i32, i32) {
    %c0_i32 = arith.constant 0 : i32
    %c0_i32_0 = arith.constant 0 : i32
    %c0_i32_1 = arith.constant 0 : i32
    return %c0_i32, %c0_i32_0 : i32, i32
  }
  func.func @transform_2(%arg0: i32) -> (i32, i32) {
    %c0_i32 = arith.constant 0 : i32
    %c0_i32_0 = arith.constant 0 : i32
    %c0_i32_1 = arith.constant 0 : i32
    return %c0_i32, %c0_i32_0 : i32, i32
  }
  func.func @transform_3(%arg0: i32) -> (i32, i32) {
    %c0_i32 = arith.constant 0 : i32
    %c0_i32_0 = arith.constant 0 : i32
    return %arg0, %c0_i32 : i32, i32
  }
}

module attributes {stable_mosaic.version = 11 : i64} {
  func.func @_fused_matmul_kernel(%arg0: i32, %arg1: memref<64x512xbf16, #tpu.memory_space<vmem>>, %arg2: memref<512x128xbf16, #tpu.memory_space<vmem>>, %arg3: memref<1x128xf32, #tpu.memory_space<vmem>>, %arg4: memref<64x128xbf16, #tpu.memory_space<vmem>>) attributes {dimension_semantics = [#tpu.dimension_semantics<parallel>], iteration_bounds = array<i64: 1>, scalar_prefetch = 0 : i64, scratch_operands = 0 : i64, tpu.core_type = #tpu.core_type<tc>, window_params = [{transform_indices = @transform_0, window_bounds = array<i64: 64, 512>}, {pipeline_mode = #tpu.pipeline_mode<synchronous>, transform_indices = @transform_1, window_bounds = array<i64: 512, 128>}, {pipeline_mode = #tpu.pipeline_mode<synchronous>, transform_indices = @transform_2, window_bounds = array<i64: 1, 128>}, {transform_indices = @transform_3, window_bounds = array<i64: 64, 128>}]} {
    %c0 = arith.constant 0 : index
    %c0_0 = arith.constant 0 : index
    %0 = vector.load %arg1[%c0, %c0_0] : memref<64x512xbf16, #tpu.memory_space<vmem>>, vector<64x512xbf16>
    %c0_1 = arith.constant 0 : index
    %c0_2 = arith.constant 0 : index
    %1 = vector.load %arg2[%c0_1, %c0_2] : memref<512x128xbf16, #tpu.memory_space<vmem>>, vector<512x128xbf16>
    %cst = arith.constant dense<0.000000e+00> : vector<64x128xf32>
    %2 = tpu.matmul %0, %1, %cst {dimension_numbers = #tpu.dot_dimension_numbers<[1], [0], [0], [1], [0, 0, 1, 1], [], []>} : vector<64x512xbf16>, vector<512x128xbf16>, vector<64x128xf32> -> vector<64x128xf32>
    %c0_3 = arith.constant 0 : index
    %c0_4 = arith.constant 0 : index
    %3 = vector.load %arg3[%c0_3, %c0_4] : memref<1x128xf32, #tpu.memory_space<vmem>>, vector<1x128xf32>
    %4 = vector.broadcast %3 : vector<1x128xf32> to vector<64x128xf32>
    %5 = arith.addf %2, %4 : vector<64x128xf32>
    %cst_5 = arith.constant 0.000000e+00 : f32
    %6 = vector.broadcast %cst_5 : f32 to vector<64x128xf32>
    %7 = arith.maximumf %5, %6 : vector<64x128xf32>
    %8 = arith.truncf %7 : vector<64x128xf32> to vector<64x128xbf16>
    %c0_6 = arith.constant 0 : index
    %c0_7 = arith.constant 0 : index
    %9 = vector.load %arg4[%c0_6, %c0_7] : memref<64x128xbf16, #tpu.memory_space<vmem>>, vector<64x128xbf16>
    tpu.vector_store %arg4[%c0_6, %c0_7], %8 {strides = array<i32>} : memref<64x128xbf16, #tpu.memory_space<vmem>>, vector<64x128xbf16>,
    return
  }
  func.func @transform_0(%arg0: i32) -> (i32, i32) {
    %c0_i32 = arith.constant 0 : i32
    %c0_i32_0 = arith.constant 0 : i32
    return %arg0, %c0_i32 : i32, i32
  }
  func.func @transform_1(%arg0: i32) -> (i32, i32) {
    %c0_i32 = arith.constant 0 : i32
    %c0_i32_0 = arith.constant 0 : i32
    %c0_i32_1 = arith.constant 0 : i32
    return %c0_i32, %c0_i32_0 : i32, i32
  }
  func.func @transform_2(%arg0: i32) -> (i32, i32) {
    %c0_i32 = arith.constant 0 : i32
    %c0_i32_0 = arith.constant 0 : i32
    %c0_i32_1 = arith.constant 0 : i32
    return %c0_i32, %c0_i32_0 : i32, i32
  }
  func.func @transform_3(%arg0: i32) -> (i32, i32) {
    %c0_i32 = arith.constant 0 : i32
    %c0_i32_0 = arith.constant 0 : i32
    return %arg0, %c0_i32 : i32, i32
  }
}

module attributes {stable_mosaic.version = 11 : i64} {
  func.func @_fused_matmul_kernel(%arg0: i32, %arg1: memref<64x896xbf16, #tpu.memory_space<vmem>>, %arg2: memref<896x128xbf16, #tpu.memory_space<vmem>>, %arg3: memref<1x128xf32, #tpu.memory_space<vmem>>, %arg4: memref<64x128xbf16, #tpu.memory_space<vmem>>) attributes {dimension_semantics = [#tpu.dimension_semantics<parallel>], iteration_bounds = array<i64: 1>, scalar_prefetch = 0 : i64, scratch_operands = 0 : i64, tpu.core_type = #tpu.core_type<tc>, window_params = [{transform_indices = @transform_0, window_bounds = array<i64: 64, 896>}, {pipeline_mode = #tpu.pipeline_mode<synchronous>, transform_indices = @transform_1, window_bounds = array<i64: 896, 128>}, {pipeline_mode = #tpu.pipeline_mode<synchronous>, transform_indices = @transform_2, window_bounds = array<i64: 1, 128>}, {transform_indices = @transform_3, window_bounds = array<i64: 64, 128>}]} {
    %c0 = arith.constant 0 : index
    %c0_0 = arith.constant 0 : index
    %0 = vector.load %arg1[%c0, %c0_0] : memref<64x896xbf16, #tpu.memory_space<vmem>>, vector<64x896xbf16>
    %c0_1 = arith.constant 0 : index
    %c0_2 = arith.constant 0 : index
    %1 = vector.load %arg2[%c0_1, %c0_2] : memref<896x128xbf16, #tpu.memory_space<vmem>>, vector<896x128xbf16>
    %cst = arith.constant dense<0.000000e+00> : vector<64x128xf32>
    %2 = tpu.matmul %0, %1, %cst {dimension_numbers = #tpu.dot_dimension_numbers<[1], [0], [0], [1], [0, 0, 1, 1], [], []>} : vector<64x896xbf16>, vector<896x128xbf16>, vector<64x128xf32> -> vector<64x128xf32>
    %c0_3 = arith.constant 0 : index
    %c0_4 = arith.constant 0 : index
    %3 = vector.load %arg3[%c0_3, %c0_4] : memref<1x128xf32, #tpu.memory_space<vmem>>, vector<1x128xf32>
    %4 = vector.broadcast %3 : vector<1x128xf32> to vector<64x128xf32>
    %5 = arith.addf %2, %4 : vector<64x128xf32>
    %cst_5 = arith.constant 0.000000e+00 : f32
    %6 = vector.broadcast %cst_5 : f32 to vector<64x128xf32>
    %7 = arith.maximumf %5, %6 : vector<64x128xf32>
    %8 = arith.truncf %7 : vector<64x128xf32> to vector<64x128xbf16>
    %c0_6 = arith.constant 0 : index
    %c0_7 = arith.constant 0 : index
    %9 = vector.load %arg4[%c0_6, %c0_7] : memref<64x128xbf16, #tpu.memory_space<vmem>>, vector<64x128xbf16>
    tpu.vector_store %arg4[%c0_6, %c0_7], %8 {strides = array<i32>} : memref<64x128xbf16, #tpu.memory_space<vmem>>, vector<64x128xbf16>,
    return
  }
  func.func @transform_0(%arg0: i32) -> (i32, i32) {
    %c0_i32 = arith.constant 0 : i32
    %c0_i32_0 = arith.constant 0 : i32
    return %arg0, %c0_i32 : i32, i32
  }
  func.func @transform_1(%arg0: i32) -> (i32, i32) {
    %c0_i32 = arith.constant 0 : i32
    %c0_i32_0 = arith.constant 0 : i32
    %c0_i32_1 = arith.constant 0 : i32
    return %c0_i32, %c0_i32_0 : i32, i32
  }
  func.func @transform_2(%arg0: i32) -> (i32, i32) {
    %c0_i32 = arith.constant 0 : i32
    %c0_i32_0 = arith.constant 0 : i32
    %c0_i32_1 = arith.constant 0 : i32
    return %c0_i32, %c0_i32_0 : i32, i32
  }
  func.func @transform_3(%arg0: i32) -> (i32, i32) {
    %c0_i32 = arith.constant 0 : i32
    %c0_i32_0 = arith.constant 0 : i32
    return %arg0, %c0_i32 : i32, i32
  }
}

module attributes {stable_mosaic.version = 11 : i64} {
  func.func @_fused_matmul_kernel(%arg0: i32, %arg1: memref<64x896xbf16, #tpu.memory_space<vmem>>, %arg2: memref<896x128xbf16, #tpu.memory_space<vmem>>, %arg3: memref<1x128xf32, #tpu.memory_space<vmem>>, %arg4: memref<64x128xbf16, #tpu.memory_space<vmem>>) attributes {dimension_semantics = [#tpu.dimension_semantics<parallel>], iteration_bounds = array<i64: 1>, scalar_prefetch = 0 : i64, scratch_operands = 0 : i64, tpu.core_type = #tpu.core_type<tc>, window_params = [{transform_indices = @transform_0, window_bounds = array<i64: 64, 896>}, {pipeline_mode = #tpu.pipeline_mode<synchronous>, transform_indices = @transform_1, window_bounds = array<i64: 896, 128>}, {pipeline_mode = #tpu.pipeline_mode<synchronous>, transform_indices = @transform_2, window_bounds = array<i64: 1, 128>}, {transform_indices = @transform_3, window_bounds = array<i64: 64, 128>}]} {
    %c0 = arith.constant 0 : index
    %c0_0 = arith.constant 0 : index
    %0 = vector.load %arg1[%c0, %c0_0] : memref<64x896xbf16, #tpu.memory_space<vmem>>, vector<64x896xbf16>
    %c0_1 = arith.constant 0 : index
    %c0_2 = arith.constant 0 : index
    %1 = vector.load %arg2[%c0_1, %c0_2] : memref<896x128xbf16, #tpu.memory_space<vmem>>, vector<896x128xbf16>
    %cst = arith.constant dense<0.000000e+00> : vector<64x128xf32>
    %2 = tpu.matmul %0, %1, %cst {dimension_numbers = #tpu.dot_dimension_numbers<[1], [0], [0], [1], [0, 0, 1, 1], [], []>} : vector<64x896xbf16>, vector<896x128xbf16>, vector<64x128xf32> -> vector<64x128xf32>
    %c0_3 = arith.constant 0 : index
    %c0_4 = arith.constant 0 : index
    %3 = vector.load %arg3[%c0_3, %c0_4] : memref<1x128xf32, #tpu.memory_space<vmem>>, vector<1x128xf32>
    %4 = vector.broadcast %3 : vector<1x128xf32> to vector<64x128xf32>
    %5 = arith.addf %2, %4 : vector<64x128xf32>
    %6 = arith.truncf %5 : vector<64x128xf32> to vector<64x128xbf16>
    %c0_5 = arith.constant 0 : index
    %c0_6 = arith.constant 0 : index
    %7 = vector.load %arg4[%c0_5, %c0_6] : memref<64x128xbf16, #tpu.memory_space<vmem>>, vector<64x128xbf16>
    tpu.vector_store %arg4[%c0_5, %c0_6], %6 {strides = array<i32>} : memref<64x128xbf16, #tpu.memory_space<vmem>>, vector<64x128xbf16>,
    return
  }
  func.func @transform_0(%arg0: i32) -> (i32, i32) {
    %c0_i32 = arith.constant 0 : i32
    %c0_i32_0 = arith.constant 0 : i32
    return %arg0, %c0_i32 : i32, i32
  }
  func.func @transform_1(%arg0: i32) -> (i32, i32) {
    %c0_i32 = arith.constant 0 : i32
    %c0_i32_0 = arith.constant 0 : i32
    %c0_i32_1 = arith.constant 0 : i32
    return %c0_i32, %c0_i32_0 : i32, i32
  }
  func.func @transform_2(%arg0: i32) -> (i32, i32) {
    %c0_i32 = arith.constant 0 : i32
    %c0_i32_0 = arith.constant 0 : i32
    %c0_i32_1 = arith.constant 0 : i32
    return %c0_i32, %c0_i32_0 : i32, i32
  }
  func.func @transform_3(%arg0: i32) -> (i32, i32) {
    %c0_i32 = arith.constant 0 : i32
    %c0_i32_0 = arith.constant 0 : i32
    return %arg0, %c0_i32 : i32, i32
  }
}

module attributes {stable_mosaic.version = 11 : i64} {
  func.func @_fused_matmul_kernel(%arg0: i32, %arg1: memref<64x1792xbf16, #tpu.memory_space<vmem>>, %arg2: memref<1792x128xbf16, #tpu.memory_space<vmem>>, %arg3: memref<1x128xf32, #tpu.memory_space<vmem>>, %arg4: memref<64x128xbf16, #tpu.memory_space<vmem>>) attributes {dimension_semantics = [#tpu.dimension_semantics<parallel>], iteration_bounds = array<i64: 1>, scalar_prefetch = 0 : i64, scratch_operands = 0 : i64, tpu.core_type = #tpu.core_type<tc>, window_params = [{transform_indices = @transform_0, window_bounds = array<i64: 64, 1792>}, {pipeline_mode = #tpu.pipeline_mode<synchronous>, transform_indices = @transform_1, window_bounds = array<i64: 1792, 128>}, {pipeline_mode = #tpu.pipeline_mode<synchronous>, transform_indices = @transform_2, window_bounds = array<i64: 1, 128>}, {transform_indices = @transform_3, window_bounds = array<i64: 64, 128>}]} {
    %c0 = arith.constant 0 : index
    %c0_0 = arith.constant 0 : index
    %0 = vector.load %arg1[%c0, %c0_0] : memref<64x1792xbf16, #tpu.memory_space<vmem>>, vector<64x1792xbf16>
    %c0_1 = arith.constant 0 : index
    %c0_2 = arith.constant 0 : index
    %1 = vector.load %arg2[%c0_1, %c0_2] : memref<1792x128xbf16, #tpu.memory_space<vmem>>, vector<1792x128xbf16>
    %cst = arith.constant dense<0.000000e+00> : vector<64x128xf32>
    %2 = tpu.matmul %0, %1, %cst {dimension_numbers = #tpu.dot_dimension_numbers<[1], [0], [0], [1], [0, 0, 1, 1], [], []>} : vector<64x1792xbf16>, vector<1792x128xbf16>, vector<64x128xf32> -> vector<64x128xf32>
    %c0_3 = arith.constant 0 : index
    %c0_4 = arith.constant 0 : index
    %3 = vector.load %arg3[%c0_3, %c0_4] : memref<1x128xf32, #tpu.memory_space<vmem>>, vector<1x128xf32>
    %4 = vector.broadcast %3 : vector<1x128xf32> to vector<64x128xf32>
    %5 = arith.addf %2, %4 : vector<64x128xf32>
    %cst_5 = arith.constant 0.000000e+00 : f32
    %6 = vector.broadcast %cst_5 : f32 to vector<64x128xf32>
    %7 = arith.maximumf %5, %6 : vector<64x128xf32>
    %8 = arith.truncf %7 : vector<64x128xf32> to vector<64x128xbf16>
    %c0_6 = arith.constant 0 : index
    %c0_7 = arith.constant 0 : index
    %9 = vector.load %arg4[%c0_6, %c0_7] : memref<64x128xbf16, #tpu.memory_space<vmem>>, vector<64x128xbf16>
    tpu.vector_store %arg4[%c0_6, %c0_7], %8 {strides = array<i32>} : memref<64x128xbf16, #tpu.memory_space<vmem>>, vector<64x128xbf16>,
    return
  }
  func.func @transform_0(%arg0: i32) -> (i32, i32) {
    %c0_i32 = arith.constant 0 : i32
    %c0_i32_0 = arith.constant 0 : i32
    return %arg0, %c0_i32 : i32, i32
  }
  func.func @transform_1(%arg0: i32) -> (i32, i32) {
    %c0_i32 = arith.constant 0 : i32
    %c0_i32_0 = arith.constant 0 : i32
    %c0_i32_1 = arith.constant 0 : i32
    return %c0_i32, %c0_i32_0 : i32, i32
  }
  func.func @transform_2(%arg0: i32) -> (i32, i32) {
    %c0_i32 = arith.constant 0 : i32
    %c0_i32_0 = arith.constant 0 : i32
    %c0_i32_1 = arith.constant 0 : i32
    return %c0_i32, %c0_i32_0 : i32, i32
  }
  func.func @transform_3(%arg0: i32) -> (i32, i32) {
    %c0_i32 = arith.constant 0 : i32
    %c0_i32_0 = arith.constant 0 : i32
    return %arg0, %c0_i32 : i32, i32
  }
}

module attributes {stable_mosaic.version = 11 : i64} {
  func.func @_fused_matmul_kernel(%arg0: i32, %arg1: memref<64x128xbf16, #tpu.memory_space<vmem>>, %arg2: memref<128x128xbf16, #tpu.memory_space<vmem>>, %arg3: memref<1x128xf32, #tpu.memory_space<vmem>>, %arg4: memref<64x128xbf16, #tpu.memory_space<vmem>>) attributes {dimension_semantics = [#tpu.dimension_semantics<parallel>], iteration_bounds = array<i64: 1>, scalar_prefetch = 0 : i64, scratch_operands = 0 : i64, tpu.core_type = #tpu.core_type<tc>, window_params = [{transform_indices = @transform_0, window_bounds = array<i64: 64, 128>}, {pipeline_mode = #tpu.pipeline_mode<synchronous>, transform_indices = @transform_1, window_bounds = array<i64: 128, 128>}, {pipeline_mode = #tpu.pipeline_mode<synchronous>, transform_indices = @transform_2, window_bounds = array<i64: 1, 128>}, {transform_indices = @transform_3, window_bounds = array<i64: 64, 128>}]} {
    %c0 = arith.constant 0 : index
    %c0_0 = arith.constant 0 : index
    %0 = vector.load %arg1[%c0, %c0_0] : memref<64x128xbf16, #tpu.memory_space<vmem>>, vector<64x128xbf16>
    %c0_1 = arith.constant 0 : index
    %c0_2 = arith.constant 0 : index
    %1 = vector.load %arg2[%c0_1, %c0_2] : memref<128x128xbf16, #tpu.memory_space<vmem>>, vector<128x128xbf16>
    %cst = arith.constant dense<0.000000e+00> : vector<64x128xf32>
    %2 = tpu.matmul %0, %1, %cst {dimension_numbers = #tpu.dot_dimension_numbers<[1], [0], [0], [1], [0, 0, 1, 1], [], []>} : vector<64x128xbf16>, vector<128x128xbf16>, vector<64x128xf32> -> vector<64x128xf32>
    %c0_3 = arith.constant 0 : index
    %c0_4 = arith.constant 0 : index
    %3 = vector.load %arg3[%c0_3, %c0_4] : memref<1x128xf32, #tpu.memory_space<vmem>>, vector<1x128xf32>
    %4 = vector.broadcast %3 : vector<1x128xf32> to vector<64x128xf32>
    %5 = arith.addf %2, %4 : vector<64x128xf32>
    %6 = arith.truncf %5 : vector<64x128xf32> to vector<64x128xbf16>
    %c0_5 = arith.constant 0 : index
    %c0_6 = arith.constant 0 : index
    %7 = vector.load %arg4[%c0_5, %c0_6] : memref<64x128xbf16, #tpu.memory_space<vmem>>, vector<64x128xbf16>
    tpu.vector_store %arg4[%c0_5, %c0_6], %6 {strides = array<i32>} : memref<64x128xbf16, #tpu.memory_space<vmem>>, vector<64x128xbf16>,
    return
  }
  func.func @transform_0(%arg0: i32) -> (i32, i32) {
    %c0_i32 = arith.constant 0 : i32
    %c0_i32_0 = arith.constant 0 : i32
    return %arg0, %c0_i32 : i32, i32
  }
  func.func @transform_1(%arg0: i32) -> (i32, i32) {
    %c0_i32 = arith.constant 0 : i32
    %c0_i32_0 = arith.constant 0 : i32
    %c0_i32_1 = arith.constant 0 : i32
    return %c0_i32, %c0_i32_0 : i32, i32
  }
  func.func @transform_2(%arg0: i32) -> (i32, i32) {
    %c0_i32 = arith.constant 0 : i32
    %c0_i32_0 = arith.constant 0 : i32
    %c0_i32_1 = arith.constant 0 : i32
    return %c0_i32, %c0_i32_0 : i32, i32
  }
  func.func @transform_3(%arg0: i32) -> (i32, i32) {
    %c0_i32 = arith.constant 0 : i32
    %c0_i32_0 = arith.constant 0 : i32
    return %arg0, %c0_i32 : i32, i32
  }
}

module attributes {stable_mosaic.version = 11 : i64} {
  func.func @_fused_matmul_kernel(%arg0: i32, %arg1: memref<64x256xbf16, #tpu.memory_space<vmem>>, %arg2: memref<256x128xbf16, #tpu.memory_space<vmem>>, %arg3: memref<1x128xf32, #tpu.memory_space<vmem>>, %arg4: memref<64x128xbf16, #tpu.memory_space<vmem>>) attributes {dimension_semantics = [#tpu.dimension_semantics<parallel>], iteration_bounds = array<i64: 1>, scalar_prefetch = 0 : i64, scratch_operands = 0 : i64, tpu.core_type = #tpu.core_type<tc>, window_params = [{transform_indices = @transform_0, window_bounds = array<i64: 64, 256>}, {pipeline_mode = #tpu.pipeline_mode<synchronous>, transform_indices = @transform_1, window_bounds = array<i64: 256, 128>}, {pipeline_mode = #tpu.pipeline_mode<synchronous>, transform_indices = @transform_2, window_bounds = array<i64: 1, 128>}, {transform_indices = @transform_3, window_bounds = array<i64: 64, 128>}]} {
    %c0 = arith.constant 0 : index
    %c0_0 = arith.constant 0 : index
    %0 = vector.load %arg1[%c0, %c0_0] : memref<64x256xbf16, #tpu.memory_space<vmem>>, vector<64x256xbf16>
    %c0_1 = arith.constant 0 : index
    %c0_2 = arith.constant 0 : index
    %1 = vector.load %arg2[%c0_1, %c0_2] : memref<256x128xbf16, #tpu.memory_space<vmem>>, vector<256x128xbf16>
    %cst = arith.constant dense<0.000000e+00> : vector<64x128xf32>
    %2 = tpu.matmul %0, %1, %cst {dimension_numbers = #tpu.dot_dimension_numbers<[1], [0], [0], [1], [0, 0, 1, 1], [], []>} : vector<64x256xbf16>, vector<256x128xbf16>, vector<64x128xf32> -> vector<64x128xf32>
    %c0_3 = arith.constant 0 : index
    %c0_4 = arith.constant 0 : index
    %3 = vector.load %arg3[%c0_3, %c0_4] : memref<1x128xf32, #tpu.memory_space<vmem>>, vector<1x128xf32>
    %4 = vector.broadcast %3 : vector<1x128xf32> to vector<64x128xf32>
    %5 = arith.addf %2, %4 : vector<64x128xf32>
    %cst_5 = arith.constant 0.000000e+00 : f32
    %6 = vector.broadcast %cst_5 : f32 to vector<64x128xf32>
    %7 = arith.maximumf %5, %6 : vector<64x128xf32>
    %8 = arith.truncf %7 : vector<64x128xf32> to vector<64x128xbf16>
    %c0_6 = arith.constant 0 : index
    %c0_7 = arith.constant 0 : index
    %9 = vector.load %arg4[%c0_6, %c0_7] : memref<64x128xbf16, #tpu.memory_space<vmem>>, vector<64x128xbf16>
    tpu.vector_store %arg4[%c0_6, %c0_7], %8 {strides = array<i32>} : memref<64x128xbf16, #tpu.memory_space<vmem>>, vector<64x128xbf16>,
    return
  }
  func.func @transform_0(%arg0: i32) -> (i32, i32) {
    %c0_i32 = arith.constant 0 : i32
    %c0_i32_0 = arith.constant 0 : i32
    return %arg0, %c0_i32 : i32, i32
  }
  func.func @transform_1(%arg0: i32) -> (i32, i32) {
    %c0_i32 = arith.constant 0 : i32
    %c0_i32_0 = arith.constant 0 : i32
    %c0_i32_1 = arith.constant 0 : i32
    return %c0_i32, %c0_i32_0 : i32, i32
  }
  func.func @transform_2(%arg0: i32) -> (i32, i32) {
    %c0_i32 = arith.constant 0 : i32
    %c0_i32_0 = arith.constant 0 : i32
    %c0_i32_1 = arith.constant 0 : i32
    return %c0_i32, %c0_i32_0 : i32, i32
  }
  func.func @transform_3(%arg0: i32) -> (i32, i32) {
    %c0_i32 = arith.constant 0 : i32
    %c0_i32_0 = arith.constant 0 : i32
    return %arg0, %c0_i32 : i32, i32
  }
}

module attributes {stable_mosaic.version = 11 : i64} {
  func.func @_fused_matmul_kernel(%arg0: i32, %arg1: memref<256x896xbf16, #tpu.memory_space<vmem>>, %arg2: memref<896x128xbf16, #tpu.memory_space<vmem>>, %arg3: memref<1x128xf32, #tpu.memory_space<vmem>>, %arg4: memref<256x128xbf16, #tpu.memory_space<vmem>>) attributes {dimension_semantics = [#tpu.dimension_semantics<parallel>], iteration_bounds = array<i64: 2>, scalar_prefetch = 0 : i64, scratch_operands = 0 : i64, tpu.core_type = #tpu.core_type<tc>, window_params = [{transform_indices = @transform_0, window_bounds = array<i64: 256, 896>}, {pipeline_mode = #tpu.pipeline_mode<synchronous>, transform_indices = @transform_1, window_bounds = array<i64: 896, 128>}, {pipeline_mode = #tpu.pipeline_mode<synchronous>, transform_indices = @transform_2, window_bounds = array<i64: 1, 128>}, {transform_indices = @transform_3, window_bounds = array<i64: 256, 128>}]} {
    %c0 = arith.constant 0 : index
    %c0_0 = arith.constant 0 : index
    %0 = vector.load %arg1[%c0, %c0_0] : memref<256x896xbf16, #tpu.memory_space<vmem>>, vector<256x896xbf16>
    %c0_1 = arith.constant 0 : index
    %c0_2 = arith.constant 0 : index
    %1 = vector.load %arg2[%c0_1, %c0_2] : memref<896x128xbf16, #tpu.memory_space<vmem>>, vector<896x128xbf16>
    %cst = arith.constant dense<0.000000e+00> : vector<256x128xf32>
    %2 = tpu.matmul %0, %1, %cst {dimension_numbers = #tpu.dot_dimension_numbers<[1], [0], [0], [1], [0, 0, 1, 1], [], []>} : vector<256x896xbf16>, vector<896x128xbf16>, vector<256x128xf32> -> vector<256x128xf32>
    %c0_3 = arith.constant 0 : index
    %c0_4 = arith.constant 0 : index
    %3 = vector.load %arg3[%c0_3, %c0_4] : memref<1x128xf32, #tpu.memory_space<vmem>>, vector<1x128xf32>
    %4 = vector.broadcast %3 : vector<1x128xf32> to vector<256x128xf32>
    %5 = arith.addf %2, %4 : vector<256x128xf32>
    %cst_5 = arith.constant 0.000000e+00 : f32
    %6 = vector.broadcast %cst_5 : f32 to vector<256x128xf32>
    %7 = arith.maximumf %5, %6 : vector<256x128xf32>
    %8 = arith.truncf %7 : vector<256x128xf32> to vector<256x128xbf16>
    %c0_6 = arith.constant 0 : index
    %c0_7 = arith.constant 0 : index
    %9 = vector.load %arg4[%c0_6, %c0_7] : memref<256x128xbf16, #tpu.memory_space<vmem>>, vector<256x128xbf16>
    tpu.vector_store %arg4[%c0_6, %c0_7], %8 {strides = array<i32>} : memref<256x128xbf16, #tpu.memory_space<vmem>>, vector<256x128xbf16>,
    return
  }
  func.func @transform_0(%arg0: i32) -> (i32, i32) {
    %c0_i32 = arith.constant 0 : i32
    %c0_i32_0 = arith.constant 0 : i32
    return %arg0, %c0_i32 : i32, i32
  }
  func.func @transform_1(%arg0: i32) -> (i32, i32) {
    %c0_i32 = arith.constant 0 : i32
    %c0_i32_0 = arith.constant 0 : i32
    %c0_i32_1 = arith.constant 0 : i32
    return %c0_i32, %c0_i32_0 : i32, i32
  }
  func.func @transform_2(%arg0: i32) -> (i32, i32) {
    %c0_i32 = arith.constant 0 : i32
    %c0_i32_0 = arith.constant 0 : i32
    %c0_i32_1 = arith.constant 0 : i32
    return %c0_i32, %c0_i32_0 : i32, i32
  }
  func.func @transform_3(%arg0: i32) -> (i32, i32) {
    %c0_i32 = arith.constant 0 : i32
    %c0_i32_0 = arith.constant 0 : i32
    return %arg0, %c0_i32 : i32, i32
  }
}

module attributes {stable_mosaic.version = 11 : i64} {
  func.func @_fused_matmul_kernel(%arg0: i32, %arg1: memref<256x128xbf16, #tpu.memory_space<vmem>>, %arg2: memref<128x128xbf16, #tpu.memory_space<vmem>>, %arg3: memref<1x128xf32, #tpu.memory_space<vmem>>, %arg4: memref<256x128xbf16, #tpu.memory_space<vmem>>) attributes {dimension_semantics = [#tpu.dimension_semantics<parallel>], iteration_bounds = array<i64: 2>, scalar_prefetch = 0 : i64, scratch_operands = 0 : i64, tpu.core_type = #tpu.core_type<tc>, window_params = [{transform_indices = @transform_0, window_bounds = array<i64: 256, 128>}, {pipeline_mode = #tpu.pipeline_mode<synchronous>, transform_indices = @transform_1, window_bounds = array<i64: 128, 128>}, {pipeline_mode = #tpu.pipeline_mode<synchronous>, transform_indices = @transform_2, window_bounds = array<i64: 1, 128>}, {transform_indices = @transform_3, window_bounds = array<i64: 256, 128>}]} {
    %c0 = arith.constant 0 : index
    %c0_0 = arith.constant 0 : index
    %0 = vector.load %arg1[%c0, %c0_0] : memref<256x128xbf16, #tpu.memory_space<vmem>>, vector<256x128xbf16>
    %c0_1 = arith.constant 0 : index
    %c0_2 = arith.constant 0 : index
    %1 = vector.load %arg2[%c0_1, %c0_2] : memref<128x128xbf16, #tpu.memory_space<vmem>>, vector<128x128xbf16>
    %cst = arith.constant dense<0.000000e+00> : vector<256x128xf32>
    %2 = tpu.matmul %0, %1, %cst {dimension_numbers = #tpu.dot_dimension_numbers<[1], [0], [0], [1], [0, 0, 1, 1], [], []>} : vector<256x128xbf16>, vector<128x128xbf16>, vector<256x128xf32> -> vector<256x128xf32>
    %c0_3 = arith.constant 0 : index
    %c0_4 = arith.constant 0 : index
    %3 = vector.load %arg3[%c0_3, %c0_4] : memref<1x128xf32, #tpu.memory_space<vmem>>, vector<1x128xf32>
    %4 = vector.broadcast %3 : vector<1x128xf32> to vector<256x128xf32>
    %5 = arith.addf %2, %4 : vector<256x128xf32>
    %6 = arith.truncf %5 : vector<256x128xf32> to vector<256x128xbf16>
    %c0_5 = arith.constant 0 : index
    %c0_6 = arith.constant 0 : index
    %7 = vector.load %arg4[%c0_5, %c0_6] : memref<256x128xbf16, #tpu.memory_space<vmem>>, vector<256x128xbf16>
    tpu.vector_store %arg4[%c0_5, %c0_6], %6 {strides = array<i32>} : memref<256x128xbf16, #tpu.memory_space<vmem>>, vector<256x128xbf16>,
    return
  }
  func.func @transform_0(%arg0: i32) -> (i32, i32) {
    %c0_i32 = arith.constant 0 : i32
    %c0_i32_0 = arith.constant 0 : i32
    return %arg0, %c0_i32 : i32, i32
  }
  func.func @transform_1(%arg0: i32) -> (i32, i32) {
    %c0_i32 = arith.constant 0 : i32
    %c0_i32_0 = arith.constant 0 : i32
    %c0_i32_1 = arith.constant 0 : i32
    return %c0_i32, %c0_i32_0 : i32, i32
  }
  func.func @transform_2(%arg0: i32) -> (i32, i32) {
    %c0_i32 = arith.constant 0 : i32
    %c0_i32_0 = arith.constant 0 : i32
    %c0_i32_1 = arith.constant 0 : i32
    return %c0_i32, %c0_i32_0 : i32, i32
  }
  func.func @transform_3(%arg0: i32) -> (i32, i32) {
    %c0_i32 = arith.constant 0 : i32
    %c0_i32_0 = arith.constant 0 : i32
    return %arg0, %c0_i32 : i32, i32
  }
}

module attributes {stable_mosaic.version = 11 : i64} {
  func.func @_fused_matmul_kernel(%arg0: i32, %arg1: memref<256x128xbf16, #tpu.memory_space<vmem>>, %arg2: memref<128x128xbf16, #tpu.memory_space<vmem>>, %arg3: memref<1x128xf32, #tpu.memory_space<vmem>>, %arg4: memref<256x128xbf16, #tpu.memory_space<vmem>>) attributes {dimension_semantics = [#tpu.dimension_semantics<parallel>], iteration_bounds = array<i64: 2>, scalar_prefetch = 0 : i64, scratch_operands = 0 : i64, tpu.core_type = #tpu.core_type<tc>, window_params = [{transform_indices = @transform_0, window_bounds = array<i64: 256, 128>}, {pipeline_mode = #tpu.pipeline_mode<synchronous>, transform_indices = @transform_1, window_bounds = array<i64: 128, 128>}, {pipeline_mode = #tpu.pipeline_mode<synchronous>, transform_indices = @transform_2, window_bounds = array<i64: 1, 128>}, {transform_indices = @transform_3, window_bounds = array<i64: 256, 128>}]} {
    %c0 = arith.constant 0 : index
    %c0_0 = arith.constant 0 : index
    %0 = vector.load %arg1[%c0, %c0_0] : memref<256x128xbf16, #tpu.memory_space<vmem>>, vector<256x128xbf16>
    %c0_1 = arith.constant 0 : index
    %c0_2 = arith.constant 0 : index
    %1 = vector.load %arg2[%c0_1, %c0_2] : memref<128x128xbf16, #tpu.memory_space<vmem>>, vector<128x128xbf16>
    %cst = arith.constant dense<0.000000e+00> : vector<256x128xf32>
    %2 = tpu.matmul %0, %1, %cst {dimension_numbers = #tpu.dot_dimension_numbers<[1], [0], [0], [1], [0, 0, 1, 1], [], []>} : vector<256x128xbf16>, vector<128x128xbf16>, vector<256x128xf32> -> vector<256x128xf32>
    %c0_3 = arith.constant 0 : index
    %c0_4 = arith.constant 0 : index
    %3 = vector.load %arg3[%c0_3, %c0_4] : memref<1x128xf32, #tpu.memory_space<vmem>>, vector<1x128xf32>
    %4 = vector.broadcast %3 : vector<1x128xf32> to vector<256x128xf32>
    %5 = arith.addf %2, %4 : vector<256x128xf32>
    %cst_5 = arith.constant 0.000000e+00 : f32
    %6 = vector.broadcast %cst_5 : f32 to vector<256x128xf32>
    %7 = arith.maximumf %5, %6 : vector<256x128xf32>
    %8 = arith.truncf %7 : vector<256x128xf32> to vector<256x128xbf16>
    %c0_6 = arith.constant 0 : index
    %c0_7 = arith.constant 0 : index
    %9 = vector.load %arg4[%c0_6, %c0_7] : memref<256x128xbf16, #tpu.memory_space<vmem>>, vector<256x128xbf16>
    tpu.vector_store %arg4[%c0_6, %c0_7], %8 {strides = array<i32>} : memref<256x128xbf16, #tpu.memory_space<vmem>>, vector<256x128xbf16>,
    return
  }
  func.func @transform_0(%arg0: i32) -> (i32, i32) {
    %c0_i32 = arith.constant 0 : i32
    %c0_i32_0 = arith.constant 0 : i32
    return %arg0, %c0_i32 : i32, i32
  }
  func.func @transform_1(%arg0: i32) -> (i32, i32) {
    %c0_i32 = arith.constant 0 : i32
    %c0_i32_0 = arith.constant 0 : i32
    %c0_i32_1 = arith.constant 0 : i32
    return %c0_i32, %c0_i32_0 : i32, i32
  }
  func.func @transform_2(%arg0: i32) -> (i32, i32) {
    %c0_i32 = arith.constant 0 : i32
    %c0_i32_0 = arith.constant 0 : i32
    %c0_i32_1 = arith.constant 0 : i32
    return %c0_i32, %c0_i32_0 : i32, i32
  }
  func.func @transform_3(%arg0: i32) -> (i32, i32) {
    %c0_i32 = arith.constant 0 : i32
    %c0_i32_0 = arith.constant 0 : i32
    return %arg0, %c0_i32 : i32, i32
  }
}

module attributes {stable_mosaic.version = 11 : i64} {
  func.func @_fused_matmul_kernel(%arg0: i32, %arg1: memref<512x128xbf16, #tpu.memory_space<vmem>>, %arg2: memref<128x128xbf16, #tpu.memory_space<vmem>>, %arg3: memref<1x128xf32, #tpu.memory_space<vmem>>, %arg4: memref<512x128xbf16, #tpu.memory_space<vmem>>) attributes {dimension_semantics = [#tpu.dimension_semantics<parallel>], iteration_bounds = array<i64: 8>, scalar_prefetch = 0 : i64, scratch_operands = 0 : i64, tpu.core_type = #tpu.core_type<tc>, window_params = [{transform_indices = @transform_0, window_bounds = array<i64: 512, 128>}, {pipeline_mode = #tpu.pipeline_mode<synchronous>, transform_indices = @transform_1, window_bounds = array<i64: 128, 128>}, {pipeline_mode = #tpu.pipeline_mode<synchronous>, transform_indices = @transform_2, window_bounds = array<i64: 1, 128>}, {transform_indices = @transform_3, window_bounds = array<i64: 512, 128>}]} {
    %c0 = arith.constant 0 : index
    %c0_0 = arith.constant 0 : index
    %0 = vector.load %arg1[%c0, %c0_0] : memref<512x128xbf16, #tpu.memory_space<vmem>>, vector<512x128xbf16>
    %c0_1 = arith.constant 0 : index
    %c0_2 = arith.constant 0 : index
    %1 = vector.load %arg2[%c0_1, %c0_2] : memref<128x128xbf16, #tpu.memory_space<vmem>>, vector<128x128xbf16>
    %cst = arith.constant dense<0.000000e+00> : vector<512x128xf32>
    %2 = tpu.matmul %0, %1, %cst {dimension_numbers = #tpu.dot_dimension_numbers<[1], [0], [0], [1], [0, 0, 1, 1], [], []>} : vector<512x128xbf16>, vector<128x128xbf16>, vector<512x128xf32> -> vector<512x128xf32>
    %c0_3 = arith.constant 0 : index
    %c0_4 = arith.constant 0 : index
    %3 = vector.load %arg3[%c0_3, %c0_4] : memref<1x128xf32, #tpu.memory_space<vmem>>, vector<1x128xf32>
    %4 = vector.broadcast %3 : vector<1x128xf32> to vector<512x128xf32>
    %5 = arith.addf %2, %4 : vector<512x128xf32>
    %6 = arith.truncf %5 : vector<512x128xf32> to vector<512x128xbf16>
    %c0_5 = arith.constant 0 : index
    %c0_6 = arith.constant 0 : index
    %7 = vector.load %arg4[%c0_5, %c0_6] : memref<512x128xbf16, #tpu.memory_space<vmem>>, vector<512x128xbf16>
    tpu.vector_store %arg4[%c0_5, %c0_6], %6 {strides = array<i32>} : memref<512x128xbf16, #tpu.memory_space<vmem>>, vector<512x128xbf16>,
    return
  }
  func.func @transform_0(%arg0: i32) -> (i32, i32) {
    %c0_i32 = arith.constant 0 : i32
    %c0_i32_0 = arith.constant 0 : i32
    return %arg0, %c0_i32 : i32, i32
  }
  func.func @transform_1(%arg0: i32) -> (i32, i32) {
    %c0_i32 = arith.constant 0 : i32
    %c0_i32_0 = arith.constant 0 : i32
    %c0_i32_1 = arith.constant 0 : i32
    return %c0_i32, %c0_i32_0 : i32, i32
  }
  func.func @transform_2(%arg0: i32) -> (i32, i32) {
    %c0_i32 = arith.constant 0 : i32
    %c0_i32_0 = arith.constant 0 : i32
    %c0_i32_1 = arith.constant 0 : i32
    return %c0_i32, %c0_i32_0 : i32, i32
  }
  func.func @transform_3(%arg0: i32) -> (i32, i32) {
    %c0_i32 = arith.constant 0 : i32
    %c0_i32_0 = arith.constant 0 : i32
    return %arg0, %c0_i32 : i32, i32
  }
}

module attributes {stable_mosaic.version = 11 : i64} {
  func.func @_l2norm_kernel(%arg0: i32, %arg1: memref<128x128xf32, #tpu.memory_space<vmem>>, %arg2: memref<128x128xf32, #tpu.memory_space<vmem>>) attributes {dimension_semantics = [#tpu.dimension_semantics<parallel>], iteration_bounds = array<i64: 2>, scalar_prefetch = 0 : i64, scratch_operands = 0 : i64, tpu.core_type = #tpu.core_type<tc>, window_params = [{transform_indices = @transform_0, window_bounds = array<i64: 128, 128>}, {transform_indices = @transform_1, window_bounds = array<i64: 128, 128>}]} {
    %c0 = arith.constant 0 : index
    %c0_0 = arith.constant 0 : index
    %0 = vector.load %arg1[%c0, %c0_0] : memref<128x128xf32, #tpu.memory_space<vmem>>, vector<128x128xf32>
    %1 = arith.mulf %0, %0 : vector<128x128xf32>
    %cst = arith.constant dense<0.000000e+00> : vector<128xf32>
    %2 = vector.multi_reduction <add>, %1, %cst [1] : vector<128x128xf32> to vector<128xf32>
    %3 = vector.shape_cast %2 : vector<128xf32> to vector<128x1xf32>
    %cst_1 = arith.constant 9.99999996E-13 : f32
    %4 = vector.broadcast %cst_1 : f32 to vector<128x1xf32>
    %5 = arith.addf %3, %4 : vector<128x1xf32>
    %6 = math.rsqrt %5 : vector<128x1xf32>
    %7 = vector.broadcast %6 : vector<128x1xf32> to vector<128x128xf32>
    %8 = arith.mulf %0, %7 : vector<128x128xf32>
    %c0_2 = arith.constant 0 : index
    %c0_3 = arith.constant 0 : index
    %9 = vector.load %arg2[%c0_2, %c0_3] : memref<128x128xf32, #tpu.memory_space<vmem>>, vector<128x128xf32>
    tpu.vector_store %arg2[%c0_2, %c0_3], %8 {strides = array<i32>} : memref<128x128xf32, #tpu.memory_space<vmem>>, vector<128x128xf32>,
    return
  }
  func.func @transform_0(%arg0: i32) -> (i32, i32) {
    %c0_i32 = arith.constant 0 : i32
    %c0_i32_0 = arith.constant 0 : i32
    return %arg0, %c0_i32 : i32, i32
  }
  func.func @transform_1(%arg0: i32) -> (i32, i32) {
    %c0_i32 = arith.constant 0 : i32
    %c0_i32_0 = arith.constant 0 : i32
    return %arg0, %c0_i32 : i32, i32
  }
}

</mosaic_0001>

<bundles_post_ra>
// kernel: minkunet_forward.21
= control target key start
LH: loop header
LB: loop body
LE: loop exit
PB: predicated region body
PF: predicated region fallthrough
CT: control target
= control target key end

     0   :  { %s3111_s12 = smov 0   ;;  %s3493_s0 = inlined_call_operand.vmem [shape: bf16[4096,512], index: 0, kind: input, shape index: {}]   ;;  %s3494_s1 = inlined_call_operand.vmem [shape: bf16[512,128], index: 1, kind: input, shape index: {}]   ;;  %s3495_s2 = inlined_call_operand.vmem [shape: f32[1,128], index: 2, kind: input, shape index: {}]   ;;  %s3496_s3 = inlined_call_operand.vmem [shape: bf16[4096,128], index: 3, kind: output, shape index: {}]  }
   0x1 LB: > { %s2227_s13 = sadd.s32 4294967295, %s3088_s12   ;;  %p2231_p0 = scmp.ge.s32.totalorder %s3088_s12, 1  ;;  %s3088_s12 = sphi %s3111_s12, %s13_s12  }
   0x2   : > { %p139_p1 = scmp.lt.s32.totalorder %s3088_s12, 9 }
   0x4   : > { %p140_p2 = pnand %p2231_p0, %p139_p1 }
   0x5   : > { %v2857_v0 = vld [vmem:[%s3494_s1] sm:$0xff] (!%p140_p2)   ;;  %v3090_v1 = vmov (!%p140_p2), 0   ;;  %v2859_v3 = vld [vmem:[%s3494_s1 + $0x8] sm:$0xff] (!%p140_p2)   ;;  %v2861_v5 = vld [vmem:[%s3494_s1 + $0x10] sm:$0xff] (!%p140_p2)   ;;  %s2232_s7 = sshll.u32 (!%p140_p2), %s2227_s13, 6 }
   0x6   : > { %143 = sbr.rel (%p140_p2) target bundleno = 541 (0x21d), region = 32  ;;  %1209 = vmatprep.subr.bf16.mxu1 (!%p140_p2), %v3090_v1  ;;  %1498 = vmatprep.subr.bf16.mxu0 (!%p140_p2), %v3090_v1  ;;  %v2858_v2 = vld [vmem:[%s3494_s1 + $0x80] sm:$0xff] (!%p140_p2)   ;;  %v2860_v4 = vld [vmem:[%s3494_s1 + $0x88] sm:$0xff] (!%p140_p2)   ;;  %v2862_v6 = vld [vmem:[%s3494_s1 + $0x90] sm:$0xff] (!%p140_p2)   ;;  %p165_p3 = scmp.lt.s32.totalorder (!%p140_p2), %s2232_s7, 511 }
   0x7   : > { %1210 = vmatpush1.bf16.msra.mxu1 (!%p140_p2), %v2857_v0  ;;  %1499 = vmatpush1.bf16.msra.mxu0 (!%p140_p2), %v2858_v2  ;;  %v2863_v7 = vld [vmem:[%s3494_s1 + $0x18] sm:$0xff] (!%p140_p2)   ;;  %v2865_v9 = vld [vmem:[%s3494_s1 + $0x20] sm:$0xff] (!%p140_p2)   ;;  %v2867_v11 = vld [vmem:[%s3494_s1 + $0x28] sm:$0xff] (!%p140_p2)  }
   0x8   : > { %1211 = vmatprep.subr.bf16.mxu1 (!%p140_p2), %v3090_v1  ;;  %1500 = vmatprep.subr.bf16.mxu0 (!%p140_p2), %v3090_v1  ;;  %v2864_v8 = vld [vmem:[%s3494_s1 + $0x98] sm:$0xff] (!%p140_p2)   ;;  %v2866_v10 = vld [vmem:[%s3494_s1 + $0xa0] sm:$0xff] (!%p140_p2)   ;;  %v2868_v12 = vld [vmem:[%s3494_s1 + $0xa8] sm:$0xff] (!%p140_p2)  }
   0x9   : > { %v2869_v13 = vld [vmem:[%s3494_s1 + $0x30] sm:$0xff] (!%p140_p2)   ;;  %v2871_v15 = vld [vmem:[%s3494_s1 + $0x38] sm:$0xff] (!%p140_p2)   ;;  %v2873_v17 = vld [vmem:[%s3494_s1 + $0x40] sm:$0xff] (!%p140_p2)  }
   0xa   : > { %v2870_v14 = vld [vmem:[%s3494_s1 + $0xb0] sm:$0xff] (!%p140_p2)   ;;  %v2872_v16 = vld [vmem:[%s3494_s1 + $0xb8] sm:$0xff] (!%p140_p2)   ;;  %v2874_v18 = vld [vmem:[%s3494_s1 + $0xc0] sm:$0xff] (!%p140_p2)  }
   0xb   : > { %1212 = vmatpush1.bf16.msra.mxu1 (!%p140_p2), %v2859_v3  ;;  %1501 = vmatpush1.bf16.msra.mxu0 (!%p140_p2), %v2860_v4  ;;  %v2875_v20 = vld [vmem:[%s3494_s1 + $0x48] sm:$0xff] (!%p140_p2)   ;;  %v2877_v23 = vld [vmem:[%s3494_s1 + $0x50] sm:$0xff] (!%p140_p2)   ;;  %v2879_v25 = vld [vmem:[%s3494_s1 + $0x58] sm:$0xff] (!%p140_p2)  }
   0xc   : > { %1213 = vmatprep.subr.bf16.mxu1 (!%p140_p2), %v3090_v1  ;;  %1502 = vmatprep.subr.bf16.mxu0 (!%p140_p2), %v3090_v1  ;;  %v2876_v22 = vld [vmem:[%s3494_s1 + $0xc8] sm:$0xff] (!%p140_p2)   ;;  %v2878_v24 = vld [vmem:[%s3494_s1 + $0xd0] sm:$0xff] (!%p140_p2)   ;;  %v2880_v26 = vld [vmem:[%s3494_s1 + $0xd8] sm:$0xff] (!%p140_p2)  }
   0xd   : > { %s3498_s7 = smov (!%p165_p3, %s2232_s7), 511  ;;  %v2881_v27 = vld [vmem:[%s3494_s1 + $0x60] sm:$0xff]   ;;  %v2883_v29 = vld [vmem:[%s3494_s1 + $0x68] sm:$0xff]   ;;  %v2885_v31 = vld [vmem:[%s3494_s1 + $0x70] sm:$0xff]  }
   0xe   : > { %s2464_s21 = sshll.u32 %s3498_s7, 4  ;;  %v2882_v28 = vld [vmem:[%s3494_s1 + $0xe0] sm:$0xff]   ;;  %v2884_v30 = vld [vmem:[%s3494_s1 + $0xe8] sm:$0xff]   ;;  %v2886_v32 = vld [vmem:[%s3494_s1 + $0xf0] sm:$0xff]   ;;  %s2236_s9 = sshll.u32 %s3498_s7, 2 }
   0xf   : > { %1214 = vmatpush1.bf16.msra.mxu1 %v2861_v5  ;;  %1503 = vmatpush1.bf16.msra.mxu0 %v2862_v6  ;;  %s3194_s26 = scalar_lea.vmem %s3493_s0, %s2464_s21  ;;  %v2887_v33 = vld [vmem:[%s3494_s1 + $0x78] sm:$0xff]   ;;  %s3382_s14 = scalar_lea.vmem %s3496_s3, %s2236_s9 }
  0x10   : > { %1215 = vmatprep.subr.bf16.mxu1 %v3090_v1  ;;  %1504 = vmatprep.subr.bf16.mxu0 %v3090_v1  ;;  %v2891_v19 = vld [vmem:[%s3194_s26 + $0x4] ss:$16 sps:$4 sm:$0xff]   ;;  %v2894_v21 = vld [vmem:[%s3194_s26 + $0xc] ss:$16 sps:$4 sm:$0xff]   ;;  %v2889_v35 = vld [vmem:[%s3194_s26] ss:$16 sps:$4 sm:$0xff]  }
  0x11   : > { %1241 = vmatprep.mubr.bf16.mxu1 %v2891_v19  ;;  %1530 = vmatprep.mubr.bf16.mxu0 %v2894_v21  ;;  %v2888_v34 = vld [vmem:[%s3494_s1 + $0xf8] sm:$0xff]   ;;  %v2895_v37 = vld [vmem:[%s3194_s26 + $0x24] ss:$16 sps:$4 sm:$0xff]   ;;  %v2899_v39 = vld [vmem:[%s3194_s26 + $0x20] ss:$16 sps:$4 sm:$0xff]  }
  0x12   : > { %v2892_v36 = vld [vmem:[%s3194_s26 + $0x8] ss:$16 sps:$4 sm:$0xff]   ;;  %v2897_v38 = vld [vmem:[%s3194_s26 + $0x2c] ss:$16 sps:$4 sm:$0xff]   ;;  %v2901_v41 = vld [vmem:[%s3194_s26 + $0x44] ss:$16 sps:$4 sm:$0xff]  }
  0x13   : > { %1216 = vmatpush1.bf16.msra.mxu1 %v2863_v7  ;;  %1505 = vmatpush1.bf16.msra.mxu0 %v2864_v8  ;;  %v2900_v40 = vld [vmem:[%s3194_s26 + $0x28] ss:$16 sps:$4 sm:$0xff]   ;;  %v2903_v42 = vld [vmem:[%s3194_s26 + $0x4c] ss:$16 sps:$4 sm:$0xff]   ;;  %v2905_v43 = vld [vmem:[%s3194_s26 + $0x40] ss:$16 sps:$4 sm:$0xff]  }
  0x14   : > { %1217 = vmatprep.subr.bf16.mxu1 %v3090_v1  ;;  %1506 = vmatprep.subr.bf16.mxu0 %v3090_v1  ;;  %v2906_v44 = vld [vmem:[%s3194_s26 + $0x48] ss:$16 sps:$4 sm:$0xff]   ;;  %v2907_v45 = vld [vmem:[%s3194_s26 + $0x64] ss:$16 sps:$4 sm:$0xff]   ;;  %v2909_v46 = vld [vmem:[%s3194_s26 + $0x6c] ss:$16 sps:$4 sm:$0xff]  }
  0x15   : > { %v2911_v47 = vld [vmem:[%s3194_s26 + $0x60] ss:$16 sps:$4 sm:$0xff]   ;;  %v2912_v48 = vld [vmem:[%s3194_s26 + $0x68] ss:$16 sps:$4 sm:$0xff]   ;;  %v2913_v49 = vld [vmem:[%s3194_s26 + $0x84] ss:$16 sps:$4 sm:$0xff]  }
  0x16   : > { %v2915_v50 = vld [vmem:[%s3194_s26 + $0x8c] ss:$16 sps:$4 sm:$0xff]   ;;  %v2917_v51 = vld [vmem:[%s3194_s26 + $0x80] ss:$16 sps:$4 sm:$0xff]   ;;  %v2918_v52 = vld [vmem:[%s3194_s26 + $0x88] ss:$16 sps:$4 sm:$0xff]  }
  0x17   : > { %1218 = vmatpush1.bf16.msra.mxu1 %v2865_v9  ;;  %1507 = vmatpush1.bf16.msra.mxu0 %v2866_v10  ;;  %v2919_v53 = vld [vmem:[%s3194_s26 + $0xa4] ss:$16 sps:$4 sm:$0xff]   ;;  %v2921_v54 = vld [vmem:[%s3194_s26 + $0xac] ss:$16 sps:$4 sm:$0xff]   ;;  %v2923_v55 = vld [vmem:[%s3194_s26 + $0xa0] ss:$16 sps:$4 sm:$0xff]  }
  0x18   : > { %1219 = vmatprep.subr.bf16.mxu1 %v3090_v1  ;;  %1508 = vmatprep.subr.bf16.mxu0 %v3090_v1  ;;  %v2924_v56 = vld [vmem:[%s3194_s26 + $0xa8] ss:$16 sps:$4 sm:$0xff]   ;;  %v2925_v57 = vld [vmem:[%s3194_s26 + $0xc4] ss:$16 sps:$4 sm:$0xff]   ;;  %v2927_v58 = vld [vmem:[%s3194_s26 + $0xcc] ss:$16 sps:$4 sm:$0xff]  }
  0x19   : > { %v2929_v59 = vld [vmem:[%s3194_s26 + $0xc0] ss:$16 sps:$4 sm:$0xff]   ;;  %v2930_v60 = vld [vmem:[%s3194_s26 + $0xc8] ss:$16 sps:$4 sm:$0xff]   ;;  %v2931_v61 = vld [vmem:[%s3194_s26 + $0xe4] ss:$16 sps:$4 sm:$0xff]  }
  0x1a   : > { %v2933_v62 = vld [vmem:[%s3194_s26 + $0xec] ss:$16 sps:$4 sm:$0xff]   ;;  %v2935_v63 = vld [vmem:[%s3194_s26 + $0xe0] ss:$16 sps:$4 sm:$0xff]   ;;  %v2936_v0 = vld [vmem:[%s3194_s26 + $0xe8] ss:$16 sps:$4 sm:$0xff]  }
  0x1b   : > { %1220 = vmatpush1.bf16.msra.mxu1 %v2867_v11  ;;  %1509 = vmatpush1.bf16.msra.mxu0 %v2868_v12  ;;  %v2939_v2 = vld [vmem:[%s3194_s26 + $0x10c] ss:$16 sps:$4 sm:$0xff]   ;;  %v2941_v3 = vld [vmem:[%s3194_s26 + $0x100] ss:$16 sps:$4 sm:$0xff]   ;;  %v2942_v4 = vld [vmem:[%s3194_s26 + $0x108] ss:$16 sps:$4 sm:$0xff]  }
  0x1c   : > { %1221 = vmatprep.subr.bf16.mxu1 %v3090_v1  ;;  %1510 = vmatprep.subr.bf16.mxu0 %v3090_v1  ;;  %v2943_v5 = vld [vmem:[%s3194_s26 + $0x124] ss:$16 sps:$4 sm:$0xff]   ;;  %v2945_v6 = vld [vmem:[%s3194_s26 + $0x12c] ss:$16 sps:$4 sm:$0xff]   ;;  %v2947_v7 = vld [vmem:[%s3194_s26 + $0x120] ss:$16 sps:$4 sm:$0xff]  }
  0x1d   : > { %v2948_v8 = vld [vmem:[%s3194_s26 + $0x128] ss:$16 sps:$4 sm:$0xff]   ;;  %v2949_v9 = vld [vmem:[%s3194_s26 + $0x144] ss:$16 sps:$4 sm:$0xff]   ;;  %v2951_v10 = vld [vmem:[%s3194_s26 + $0x14c] ss:$16 sps:$4 sm:$0xff]  }
  0x1e   : > { %v2953_v11 = vld [vmem:[%s3194_s26 + $0x140] ss:$16 sps:$4 sm:$0xff]   ;;  %v2954_v12 = vld [vmem:[%s3194_s26 + $0x148] ss:$16 sps:$4 sm:$0xff]   ;;  %v2967_v21 = vld [vmem:[%s3194_s26 + $0x1a4] ss:$16 sps:$4 sm:$0xff]  }
  0x1f   : > { %1222 = vmatpush1.bf16.msra.mxu1 %v2869_v13  ;;  %1511 = vmatpush1.bf16.msra.mxu0 %v2870_v14  ;;  %v2955_v13 = vld [vmem:[%s3194_s26 + $0x164] ss:$16 sps:$4 sm:$0xff]   ;;  %v2957_v14 = vld [vmem:[%s3194_s26 + $0x16c] ss:$16 sps:$4 sm:$0xff]   ;;  %v2965_v19 = vld [vmem:[%s3194_s26 + $0x180] ss:$16 sps:$4 sm:$0xff]  }
  0x20   : > { %1223 = vmatprep.subr.bf16.mxu1 %v3090_v1  ;;  %1512 = vmatprep.subr.bf16.mxu0 %v3090_v1 }
  0x23   : > { %1224 = vmatpush1.bf16.msra.mxu1 %v2871_v15  ;;  %1513 = vmatpush1.bf16.msra.mxu0 %v2872_v16  ;;  %v2959_v15 = vld [vmem:[%s3194_s26 + $0x160] ss:$16 sps:$4 sm:$0xff]   ;;  %v2960_v16 = vld [vmem:[%s3194_s26 + $0x168] ss:$16 sps:$4 sm:$0xff]  }
  0x24   : > { %1225 = vmatprep.subr.bf16.mxu1 %v3090_v1  ;;  %1514 = vmatprep.subr.bf16.mxu0 %v3090_v1 }
  0x27   : > { %1226 = vmatpush1.bf16.msra.mxu1 %v2873_v17  ;;  %1515 = vmatpush1.bf16.msra.mxu0 %v2874_v18  ;;  %v2961_v17 = vld [vmem:[%s3194_s26 + $0x184] ss:$16 sps:$4 sm:$0xff]   ;;  %v2963_v18 = vld [vmem:[%s3194_s26 + $0x18c] ss:$16 sps:$4 sm:$0xff]  }
  0x28   : > { %1227 = vmatprep.subr.bf16.mxu1 %v3090_v1  ;;  %1516 = vmatprep.subr.bf16.mxu0 %v3090_v1 }
  0x2b   : > { %1228 = vmatpush1.bf16.msra.mxu1 %v2875_v20  ;;  %1517 = vmatpush1.bf16.msra.mxu0 %v2876_v22  ;;  %v2966_v20 = vld [vmem:[%s3194_s26 + $0x188] ss:$16 sps:$4 sm:$0xff]   ;;  %v2969_v22 = vld [vmem:[%s3194_s26 + $0x1ac] ss:$16 sps:$4 sm:$0xff]  }
  0x2c   : > { %1229 = vmatprep.subr.bf16.mxu1 %v3090_v1  ;;  %1518 = vmatprep.subr.bf16.mxu0 %v3090_v1 }
  0x2f   : > { %1230 = vmatpush1.bf16.msra.mxu1 %v2877_v23  ;;  %1519 = vmatpush1.bf16.msra.mxu0 %v2878_v24  ;;  %v2971_v23 = vld [vmem:[%s3194_s26 + $0x1a0] ss:$16 sps:$4 sm:$0xff]   ;;  %v2972_v24 = vld [vmem:[%s3194_s26 + $0x1a8] ss:$16 sps:$4 sm:$0xff]  }
  0x30   : > { %1231 = vmatprep.subr.bf16.mxu1 %v3090_v1  ;;  %1520 = vmatprep.subr.bf16.mxu0 %v3090_v1 }
  0x33   : > { %1232 = vmatpush1.bf16.msra.mxu1 %v2879_v25  ;;  %1521 = vmatpush1.bf16.msra.mxu0 %v2880_v26  ;;  %v2973_v25 = vld [vmem:[%s3194_s26 + $0x1c4] ss:$16 sps:$4 sm:$0xff]   ;;  %v2975_v26 = vld [vmem:[%s3194_s26 + $0x1cc] ss:$16 sps:$4 sm:$0xff]  }
  0x34   : > { %1233 = vmatprep.subr.bf16.mxu1 %v3090_v1  ;;  %1522 = vmatprep.subr.bf16.mxu0 %v3090_v1 }
  0x37   : > { %1234 = vmatpush1.bf16.msra.mxu1 %v2881_v27  ;;  %1523 = vmatpush1.bf16.msra.mxu0 %v2882_v28  ;;  %v2977_v27 = vld [vmem:[%s3194_s26 + $0x1c0] ss:$16 sps:$4 sm:$0xff]   ;;  %v2978_v28 = vld [vmem:[%s3194_s26 + $0x1c8] ss:$16 sps:$4 sm:$0xff]  }
  0x38   : > { %1235 = vmatprep.subr.bf16.mxu1 %v3090_v1  ;;  %1524 = vmatprep.subr.bf16.mxu0 %v3090_v1 }
  0x3b   : > { %1236 = vmatpush1.bf16.msra.mxu1 %v2883_v29  ;;  %1525 = vmatpush1.bf16.msra.mxu0 %v2884_v30  ;;  %v2979_v29 = vld [vmem:[%s3194_s26 + $0x1e4] ss:$16 sps:$4 sm:$0xff]   ;;  %v2981_v30 = vld [vmem:[%s3194_s26 + $0x1ec] ss:$16 sps:$4 sm:$0xff]  }
  0x3c   : > { %1237 = vmatprep.subr.bf16.mxu1 %v3090_v1  ;;  %1526 = vmatprep.subr.bf16.mxu0 %v3090_v1 }
  0x3f   : > { %1238 = vmatpush1.bf16.msra.mxu1 %v2885_v31  ;;  %1527 = vmatpush1.bf16.msra.mxu0 %v2886_v32  ;;  %v2983_v31 = vld [vmem:[%s3194_s26 + $0x1e0] ss:$16 sps:$4 sm:$0xff]   ;;  %v2984_v32 = vld [vmem:[%s3194_s26 + $0x1e8] ss:$16 sps:$4 sm:$0xff]  }
  0x40   : > { %1239 = vmatprep.subr.bf16.mxu1 %v3090_v1  ;;  %1528 = vmatprep.subr.bf16.mxu0 %v3090_v1  ;;  %v2937_v1 = vld [vmem:[%s3194_s26 + $0x104] ss:$16 sps:$4 sm:$0xff]  }
  0x43   : > { %1240 = vmatpush1.bf16.msra.mxu1 %v2887_v33  ;;  %1529 = vmatpush1.bf16.msra.mxu0 %v2888_v34  ;;  %v2985_v33 = vld [vmem:[%s3194_s26 + $0x204] ss:$16 sps:$4 sm:$0xff]   ;;  %v2987_v34 = vld [vmem:[%s3194_s26 + $0x20c] ss:$16 sps:$4 sm:$0xff]  }
  0x46   : > { %1242 = vmatmul.mubr.bf16.vlgmr.msra.gmra.mrb[0].mxu1 %v2889_v35  ;;  %1531 = vmatmul.mubr.bf16.vlgmr.msra.gmra.mrb[0].mxu0 %v2892_v36  ;;  %v2989_v35 = vld [vmem:[%s3194_s26 + $0x200] ss:$16 sps:$4 sm:$0xff]   ;;  %v2990_v36 = vld [vmem:[%s3194_s26 + $0x208] ss:$16 sps:$4 sm:$0xff]  }
  0x47   : > { %1249 = vmatprep.mubr.bf16.mxu1 %v2895_v37  ;;  %1538 = vmatprep.mubr.bf16.mxu0 %v2897_v38  ;;  %v2991_v37 = vld [vmem:[%s3194_s26 + $0x224] ss:$16 sps:$4 sm:$0xff]   ;;  %v2993_v38 = vld [vmem:[%s3194_s26 + $0x22c] ss:$16 sps:$4 sm:$0xff]  }
  0x4e   : > { %1250 = vmatmul.mubr.bf16.gmra.mrb[4].mxu1 %v2899_v39  ;;  %1539 = vmatmul.mubr.bf16.gmra.mrb[4].mxu0 %v2900_v40  ;;  %v2995_v39 = vld [vmem:[%s3194_s26 + $0x220] ss:$16 sps:$4 sm:$0xff]   ;;  %v2996_v40 = vld [vmem:[%s3194_s26 + $0x228] ss:$16 sps:$4 sm:$0xff]  }
  0x4f   : > { %1257 = vmatprep.mubr.bf16.mxu1 %v2901_v41  ;;  %1546 = vmatprep.mubr.bf16.mxu0 %v2903_v42  ;;  %v2997_v41 = vld [vmem:[%s3194_s26 + $0x244] ss:$16 sps:$4 sm:$0xff]   ;;  %v2999_v42 = vld [vmem:[%s3194_s26 + $0x24c] ss:$16 sps:$4 sm:$0xff]  }
  0x56   : > { %1258 = vmatmul.mubr.bf16.gmra.mrb[8].mxu1 %v2905_v43  ;;  %1547 = vmatmul.mubr.bf16.gmra.mrb[8].mxu0 %v2906_v44  ;;  %v3001_v43 = vld [vmem:[%s3194_s26 + $0x240] ss:$16 sps:$4 sm:$0xff]   ;;  %v3002_v44 = vld [vmem:[%s3194_s26 + $0x248] ss:$16 sps:$4 sm:$0xff]  }
  0x57   : > { %1265 = vmatprep.mubr.bf16.mxu1 %v2907_v45  ;;  %1554 = vmatprep.mubr.bf16.mxu0 %v2909_v46  ;;  %v3003_v45 = vld [vmem:[%s3194_s26 + $0x264] ss:$16 sps:$4 sm:$0xff]   ;;  %v3005_v46 = vld [vmem:[%s3194_s26 + $0x26c] ss:$16 sps:$4 sm:$0xff]  }
  0x5e   : > { %1266 = vmatmul.mubr.bf16.gmra.mrb[12].mxu1 %v2911_v47  ;;  %1555 = vmatmul.mubr.bf16.gmra.mrb[12].mxu0 %v2912_v48  ;;  %v3007_v47 = vld [vmem:[%s3194_s26 + $0x260] ss:$16 sps:$4 sm:$0xff]   ;;  %v3008_v48 = vld [vmem:[%s3194_s26 + $0x268] ss:$16 sps:$4 sm:$0xff]  }
  0x5f   : > { %1273 = vmatprep.mubr.bf16.mxu1 %v2913_v49  ;;  %1562 = vmatprep.mubr.bf16.mxu0 %v2915_v50  ;;  %v3009_v49 = vld [vmem:[%s3194_s26 + $0x284] ss:$16 sps:$4 sm:$0xff]   ;;  %v3011_v50 = vld [vmem:[%s3194_s26 + $0x28c] ss:$16 sps:$4 sm:$0xff]  }
  0x66   : > { %1274 = vmatmul.mubr.bf16.gmra.mrb[16].mxu1 %v2917_v51  ;;  %1563 = vmatmul.mubr.bf16.gmra.mrb[16].mxu0 %v2918_v52  ;;  %v3013_v51 = vld [vmem:[%s3194_s26 + $0x280] ss:$16 sps:$4 sm:$0xff]   ;;  %v3014_v52 = vld [vmem:[%s3194_s26 + $0x288] ss:$16 sps:$4 sm:$0xff]  }
  0x67   : > { %1281 = vmatprep.mubr.bf16.mxu1 %v2919_v53  ;;  %1570 = vmatprep.mubr.bf16.mxu0 %v2921_v54  ;;  %v3015_v53 = vld [vmem:[%s3194_s26 + $0x2a4] ss:$16 sps:$4 sm:$0xff]   ;;  %v3017_v54 = vld [vmem:[%s3194_s26 + $0x2ac] ss:$16 sps:$4 sm:$0xff]  }
  0x6e   : > { %1282 = vmatmul.mubr.bf16.gmra.mrb[20].mxu1 %v2923_v55  ;;  %1571 = vmatmul.mubr.bf16.gmra.mrb[20].mxu0 %v2924_v56  ;;  %v3019_v55 = vld [vmem:[%s3194_s26 + $0x2a0] ss:$16 sps:$4 sm:$0xff]   ;;  %v3020_v56 = vld [vmem:[%s3194_s26 + $0x2a8] ss:$16 sps:$4 sm:$0xff]  }
  0x6f   : > { %1289 = vmatprep.mubr.bf16.mxu1 %v2925_v57  ;;  %1578 = vmatprep.mubr.bf16.mxu0 %v2927_v58  ;;  %v3021_v57 = vld [vmem:[%s3194_s26 + $0x2c4] ss:$16 sps:$4 sm:$0xff]   ;;  %v3023_v58 = vld [vmem:[%s3194_s26 + $0x2cc] ss:$16 sps:$4 sm:$0xff]  }
  0x76   : > { %1290 = vmatmul.mubr.bf16.gmra.mrb[24].mxu1 %v2929_v59  ;;  %1579 = vmatmul.mubr.bf16.gmra.mrb[24].mxu0 %v2930_v60  ;;  %v3025_v59 = vld [vmem:[%s3194_s26 + $0x2c0] ss:$16 sps:$4 sm:$0xff]   ;;  %v3026_v60 = vld [vmem:[%s3194_s26 + $0x2c8] ss:$16 sps:$4 sm:$0xff]  }
  0x77   : > { %1297 = vmatprep.mubr.bf16.mxu1 %v2931_v61  ;;  %1586 = vmatprep.mubr.bf16.mxu0 %v2933_v62  ;;  %v3027_v61 = vld [vmem:[%s3194_s26 + $0x2e4] ss:$16 sps:$4 sm:$0xff]   ;;  %v3029_v62 = vld [vmem:[%s3194_s26 + $0x2ec] ss:$16 sps:$4 sm:$0xff]  }
  0x7e   : > { %1298 = vmatmul.mubr.bf16.gmra.mrb[28].mxu1 %v2935_v63  ;;  %1587 = vmatmul.mubr.bf16.gmra.mrb[28].mxu0 %v2936_v0  ;;  %v3031_v63 = vld [vmem:[%s3194_s26 + $0x2e0] ss:$16 sps:$4 sm:$0xff]   ;;  %v3032_v0 = vld [vmem:[%s3194_s26 + $0x2e8] ss:$16 sps:$4 sm:$0xff]  }
  0x7f   : > { %1305 = vmatprep.mubr.bf16.mxu1 %v2937_v1  ;;  %1594 = vmatprep.mubr.bf16.mxu0 %v2939_v2  ;;  %v3033_v1 = vld [vmem:[%s3194_s26 + $0x304] ss:$16 sps:$4 sm:$0xff]   ;;  %v3035_v2 = vld [vmem:[%s3194_s26 + $0x30c] ss:$16 sps:$4 sm:$0xff]  }
  0x86   : > { %1306 = vmatmul.mubr.bf16.gmra.mrb[32].mxu1 %v2941_v3  ;;  %1595 = vmatmul.mubr.bf16.gmra.mrb[32].mxu0 %v2942_v4  ;;  %v3037_v3 = vld [vmem:[%s3194_s26 + $0x300] ss:$16 sps:$4 sm:$0xff]   ;;  %v3038_v4 = vld [vmem:[%s3194_s26 + $0x308] ss:$16 sps:$4 sm:$0xff]  }
  0x87   : > { %1313 = vmatprep.mubr.bf16.mxu1 %v2943_v5  ;;  %1602 = vmatprep.mubr.bf16.mxu0 %v2945_v6  ;;  %v3039_v5 = vld [vmem:[%s3194_s26 + $0x324] ss:$16 sps:$4 sm:$0xff]   ;;  %v3041_v6 = vld [vmem:[%s3194_s26 + $0x32c] ss:$16 sps:$4 sm:$0xff]  }
  0x8e   : > { %1314 = vmatmul.mubr.bf16.gmra.mrb[36].mxu1 %v2947_v7  ;;  %1603 = vmatmul.mubr.bf16.gmra.mrb[36].mxu0 %v2948_v8  ;;  %v3043_v7 = vld [vmem:[%s3194_s26 + $0x320] ss:$16 sps:$4 sm:$0xff]   ;;  %v3044_v8 = vld [vmem:[%s3194_s26 + $0x328] ss:$16 sps:$4 sm:$0xff]  }
  0x8f   : > { %1321 = vmatprep.mubr.bf16.mxu1 %v2949_v9  ;;  %1610 = vmatprep.mubr.bf16.mxu0 %v2951_v10  ;;  %v3045_v9 = vld [vmem:[%s3194_s26 + $0x344] ss:$16 sps:$4 sm:$0xff]   ;;  %v3047_v10 = vld [vmem:[%s3194_s26 + $0x34c] ss:$16 sps:$4 sm:$0xff]  }
  0x96   : > { %1322 = vmatmul.mubr.bf16.gmra.mrb[40].mxu1 %v2953_v11  ;;  %1611 = vmatmul.mubr.bf16.gmra.mrb[40].mxu0 %v2954_v12  ;;  %v3049_v11 = vld [vmem:[%s3194_s26 + $0x340] ss:$16 sps:$4 sm:$0xff]   ;;  %v3050_v12 = vld [vmem:[%s3194_s26 + $0x348] ss:$16 sps:$4 sm:$0xff]  }
  0x97   : > { %1329 = vmatprep.mubr.bf16.mxu1 %v2955_v13  ;;  %1618 = vmatprep.mubr.bf16.mxu0 %v2957_v14  ;;  %v3051_v13 = vld [vmem:[%s3194_s26 + $0x364] ss:$16 sps:$4 sm:$0xff]   ;;  %v3053_v14 = vld [vmem:[%s3194_s26 + $0x36c] ss:$16 sps:$4 sm:$0xff]  }
  0x9e   : > { %1330 = vmatmul.mubr.bf16.gmra.mrb[44].mxu1 %v2959_v15  ;;  %1619 = vmatmul.mubr.bf16.gmra.mrb[44].mxu0 %v2960_v16  ;;  %v3370_v15 = vld [vmem:[%s3495_s2] ss:$0 sm:$0xff] }
  0x9f   : > { %1337 = vmatprep.mubr.bf16.mxu1 %v2961_v17  ;;  %1626 = vmatprep.mubr.bf16.mxu0 %v2963_v18 }
  0xa6   : > { %1338 = vmatmul.mubr.bf16.gmra.mrb[48].mxu1 %v2965_v19  ;;  %1627 = vmatmul.mubr.bf16.gmra.mrb[48].mxu0 %v2966_v20  ;;  %v3055_v20 = vld [vmem:[%s3194_s26 + $0x360] ss:$16 sps:$4 sm:$0xff]  }
  0xa7   : > { %1345 = vmatprep.mubr.bf16.mxu1 %v2967_v21  ;;  %1634 = vmatprep.mubr.bf16.mxu0 %v2969_v22 }
  0xae   : > { %1346 = vmatmul.mubr.bf16.gmra.mrb[52].mxu1 %v2971_v23  ;;  %1635 = vmatmul.mubr.bf16.gmra.mrb[52].mxu0 %v2972_v24  ;;  %v3056_v23 = vld [vmem:[%s3194_s26 + $0x368] ss:$16 sps:$4 sm:$0xff]   ;;  %v3057_v24 = vld [vmem:[%s3194_s26 + $0x384] ss:$16 sps:$4 sm:$0xff]  }
  0xaf   : > { %1353 = vmatprep.mubr.bf16.mxu1 %v2973_v25  ;;  %1642 = vmatprep.mubr.bf16.mxu0 %v2975_v26 }
  0xb6   : > { %1354 = vmatmul.mubr.bf16.gmra.mrb[56].mxu1 %v2977_v27  ;;  %1643 = vmatmul.mubr.bf16.gmra.mrb[56].mxu0 %v2978_v28 }
  0xb7   : > { %1361 = vmatprep.mubr.bf16.mxu1 %v2979_v29  ;;  %1650 = vmatprep.mubr.bf16.mxu0 %v2981_v30  ;;  %v3059_v29 = vld [vmem:[%s3194_s26 + $0x38c] ss:$16 sps:$4 sm:$0xff]  }
  0xbe   : > { %1362 = vmatmul.mubr.bf16.gmra.mrb[60].mxu1 %v2983_v31  ;;  %1651 = vmatmul.mubr.bf16.gmra.mrb[60].mxu0 %v2984_v32 }
  0xbf   : > { %1369 = vmatprep.mubr.bf16.mxu1 %v2985_v33  ;;  %1658 = vmatprep.mubr.bf16.mxu0 %v2987_v34 }
  0xc6   : > { %1370 = vmatmul.mubr.bf16.gmra.mrb[64].mxu1 %v2989_v35  ;;  %1659 = vmatmul.mubr.bf16.gmra.mrb[64].mxu0 %v2990_v36 }
  0xc7   : > { %1377 = vmatprep.mubr.bf16.mxu1 %v2991_v37  ;;  %1666 = vmatprep.mubr.bf16.mxu0 %v2993_v38 }
  0xce   : > { %1378 = vmatmul.mubr.bf16.gmra.mrb[68].mxu1 %v2995_v39  ;;  %1667 = vmatmul.mubr.bf16.gmra.mrb[68].mxu0 %v2996_v40  ;;  %v3061_v39 = vld [vmem:[%s3194_s26 + $0x380] ss:$16 sps:$4 sm:$0xff]  }
  0xcf   : > { %1385 = vmatprep.mubr.bf16.mxu1 %v2997_v41  ;;  %1674 = vmatprep.mubr.bf16.mxu0 %v2999_v42  ;;  %v3062_v42 = vld [vmem:[%s3194_s26 + $0x388] ss:$16 sps:$4 sm:$0xff]  }
  0xd6   : > { %1386 = vmatmul.mubr.bf16.gmra.mrb[72].mxu1 %v3001_v43  ;;  %1675 = vmatmul.mubr.bf16.gmra.mrb[72].mxu0 %v3002_v44  ;;  %v3063_v43 = vld [vmem:[%s3194_s26 + $0x3a4] ss:$16 sps:$4 sm:$0xff]  }
  0xd7   : > { %1393 = vmatprep.mubr.bf16.mxu1 %v3003_v45  ;;  %1682 = vmatprep.mubr.bf16.mxu0 %v3005_v46 }
  0xde   : > { %1394 = vmatmul.mubr.bf16.gmra.mrb[76].mxu1 %v3007_v47  ;;  %1683 = vmatmul.mubr.bf16.gmra.mrb[76].mxu0 %v3008_v48  ;;  %v3065_v48 = vld [vmem:[%s3194_s26 + $0x3ac] ss:$16 sps:$4 sm:$0xff]  }
  0xdf   : > { %1401 = vmatprep.mubr.bf16.mxu1 %v3009_v49  ;;  %1690 = vmatprep.mubr.bf16.mxu0 %v3011_v50 }
  0xe6   : > { %1402 = vmatmul.mubr.bf16.gmra.mrb[80].mxu1 %v3013_v51  ;;  %1691 = vmatmul.mubr.bf16.gmra.mrb[80].mxu0 %v3014_v52 }
  0xe7   : > { %1409 = vmatprep.mubr.bf16.mxu1 %v3015_v53  ;;  %1698 = vmatprep.mubr.bf16.mxu0 %v3017_v54 }
  0xee   : > { %1410 = vmatmul.mubr.bf16.gmra.mrb[84].mxu1 %v3019_v55  ;;  %1699 = vmatmul.mubr.bf16.gmra.mrb[84].mxu0 %v3020_v56 }
  0xef   : > { %1417 = vmatprep.mubr.bf16.mxu1 %v3021_v57  ;;  %1706 = vmatprep.mubr.bf16.mxu0 %v3023_v58  ;;  %v3067_v58 = vld [vmem:[%s3194_s26 + $0x3a0] ss:$16 sps:$4 sm:$0xff]  }
  0xf6   : > { %1418 = vmatmul.mubr.bf16.gmra.mrb[88].mxu1 %v3025_v59  ;;  %1707 = vmatmul.mubr.bf16.gmra.mrb[88].mxu0 %v3026_v60 }
  0xf7   : > { %1425 = vmatprep.mubr.bf16.mxu1 %v3027_v61  ;;  %1714 = vmatprep.mubr.bf16.mxu0 %v3029_v62  ;;  %v3068_v61 = vld [vmem:[%s3194_s26 + $0x3a8] ss:$16 sps:$4 sm:$0xff]   ;;  %v3069_v62 = vld [vmem:[%s3194_s26 + $0x3c4] ss:$16 sps:$4 sm:$0xff]  }
  0xfe   : > { %1426 = vmatmul.mubr.bf16.gmra.mrb[92].mxu1 %v3031_v63  ;;  %1715 = vmatmul.mubr.bf16.gmra.mrb[92].mxu0 %v3032_v0 }
  0xff   : > { %1433 = vmatprep.mubr.bf16.mxu1 %v3033_v1  ;;  %1722 = vmatprep.mubr.bf16.mxu0 %v3035_v2 }
 0x106   : > { %1434 = vmatmul.mubr.bf16.gmra.mrb[96].mxu1 %v3037_v3  ;;  %1723 = vmatmul.mubr.bf16.gmra.mrb[96].mxu0 %v3038_v4  ;;  %v3071_v3 = vld [vmem:[%s3194_s26 + $0x3cc] ss:$16 sps:$4 sm:$0xff]  }
 0x107   : > { %1441 = vmatprep.mubr.bf16.mxu1 %v3039_v5  ;;  %1730 = vmatprep.mubr.bf16.mxu0 %v3041_v6 }
 0x10e   : > { %1442 = vmatmul.mubr.bf16.gmra.mrb[100].mxu1 %v3043_v7  ;;  %1731 = vmatmul.mubr.bf16.gmra.mrb[100].mxu0 %v3044_v8 }
 0x10f   : > { %1449 = vmatprep.mubr.bf16.mxu1 %v3045_v9  ;;  %1738 = vmatprep.mubr.bf16.mxu0 %v3047_v10 }
 0x116   : > { %1450 = vmatmul.mubr.bf16.gmra.mrb[104].mxu1 %v3049_v11  ;;  %1739 = vmatmul.mubr.bf16.gmra.mrb[104].mxu0 %v3050_v12 }
 0x117   : > { %1457 = vmatprep.mubr.bf16.mxu1 %v3051_v13  ;;  %1746 = vmatprep.mubr.bf16.mxu0 %v3053_v14  ;;  %v3073_v13 = vld [vmem:[%s3194_s26 + $0x3c0] ss:$16 sps:$4 sm:$0xff]  }
 0x119   : > { %v1243_v16 = vpop.f32.mrb[0].mxu1  ;;  %v1532_v18 = vpop.f32.mrb[0].mxu0 }
 0x11a   : > { %v1244_v17 = vadd.f32 %v3370_v15, %v1243_v16  ;;  %v1245_v19 = vpop.f32.mrb[1].mxu1  ;;  %v1534_v21 = vpop.f32.mrb[1].mxu0 }
 0x11b   : > { %v1246_v22 = vpop.f32.mrb[2].mxu1  ;;  %v1535_v27 = vpop.f32.mrb[2].mxu0 }
 0x11c   : > { %v1533_v25 = vadd.f32 %v1532_v18, %v1244_v17  ;;  %v1247_v26 = vadd.f32 %v3370_v15, %v1246_v22  ;;  %v1248_v28 = vpop.f32.mrb[3].mxu1  ;;  %v1537_v30 = vpop.f32.mrb[3].mxu0  ;;  %v3074_v17 = vld [vmem:[%s3194_s26 + $0x3c8] ss:$16 sps:$4 sm:$0xff]   ;;  %v3075_v18 = vld [vmem:[%s3194_s26 + $0x3e4] ss:$16 sps:$4 sm:$0xff]  }
 0x11e   : > { %v1536_v31 = vadd.f32 %v1535_v27, %v1247_v26  ;;  %1458 = vmatmul.mubr.bf16.gmra.mrb[108].mxu1 %v3055_v20  ;;  %1747 = vmatmul.mubr.bf16.gmra.mrb[108].mxu0 %v3056_v23  ;;  %v1787_v32 = vmax.f32 %v1533_v25, 0.0  ;;  %v3077_v23 = vld [vmem:[%s3194_s26 + $0x3ec] ss:$16 sps:$4 sm:$0xff]  }
 0x11f   : > { %1465 = vmatprep.mubr.bf16.mxu1 %v3057_v24  ;;  %1754 = vmatprep.mubr.bf16.mxu0 %v3059_v29 }
 0x120   : > { %v1788_v33 = vmax.f32 %v1536_v31, 0.0 }
 0x121   : > { %v1251_v34 = vpop.f32.mrb[4].mxu1  ;;  %v1540_v37 = vpop.f32.mrb[4].mxu0 }
 0x122   : > { %v2532_v35 = vpack.c.bf16 %v1788_v33, %v1787_v32  ;;  %v1252_v36 = vadd.f32 %v3370_v15, %v1251_v34  ;;  %v1253_v38 = vpop.f32.mrb[5].mxu1  ;;  %v1542_v40 = vpop.f32.mrb[5].mxu0  ;;  %v3079_v33 = vld [vmem:[%s3194_s26 + $0x3e0] ss:$16 sps:$4 sm:$0xff]  }
 0x123   : > { %v1254_v41 = vpop.f32.mrb[6].mxu1  ;;  %v1543_v46 = vpop.f32.mrb[6].mxu0 }
 0x124   : > { %2533 = vst [vmem:[%s3382_s14] sm:$0xff] %v2532_v35   ;;  %v1541_v44 = vadd.f32 %v1540_v37, %v1252_v36  ;;  %v1255_v45 = vadd.f32 %v3370_v15, %v1254_v41  ;;  %v1256_v47 = vpop.f32.mrb[7].mxu1  ;;  %v1545_v49 = vpop.f32.mrb[7].mxu0  ;;  %v3080_v36 = vld [vmem:[%s3194_s26 + $0x3e8] ss:$16 sps:$4 sm:$0xff]  }
 0x126   : > { %v1544_v50 = vadd.f32 %v1543_v46, %v1255_v45  ;;  %1466 = vmatmul.mubr.bf16.gmra.mrb[112].mxu1 %v3061_v39  ;;  %1755 = vmatmul.mubr.bf16.gmra.mrb[112].mxu0 %v3062_v42  ;;  %v1789_v51 = vmax.f32 %v1541_v44, 0.0 }
 0x127   : > { %1473 = vmatprep.mubr.bf16.mxu1 %v3063_v43  ;;  %1762 = vmatprep.mubr.bf16.mxu0 %v3065_v48 }
 0x128   : > { %v1790_v52 = vmax.f32 %v1544_v50, 0.0 }
 0x129   : > { %v1259_v53 = vpop.f32.mrb[8].mxu1  ;;  %v1548_v56 = vpop.f32.mrb[8].mxu0 }
 0x12a   : > { %v2537_v54 = vpack.c.bf16 %v1790_v52, %v1789_v51  ;;  %v1260_v55 = vadd.f32 %v3370_v15, %v1259_v53  ;;  %v1261_v57 = vpop.f32.mrb[9].mxu1  ;;  %v1550_v59 = vpop.f32.mrb[9].mxu0 }
 0x12b   : > { %v1262_v60 = vpop.f32.mrb[10].mxu1  ;;  %v1551_v1 = vpop.f32.mrb[10].mxu0 }
 0x12c   : > { %2689 = vst [vmem:[%s3382_s14 + $0x8] sm:$0xff] %v2537_v54   ;;  %v1549_v63 = vadd.f32 %v1548_v56, %v1260_v55  ;;  %v1263_v0 = vadd.f32 %v3370_v15, %v1262_v60  ;;  %v1264_v2 = vpop.f32.mrb[11].mxu1  ;;  %v1553_v4 = vpop.f32.mrb[11].mxu0 }
 0x12e   : > { %v1552_v5 = vadd.f32 %v1551_v1, %v1263_v0  ;;  %1474 = vmatmul.mubr.bf16.gmra.mrb[116].mxu1 %v3067_v58  ;;  %1763 = vmatmul.mubr.bf16.gmra.mrb[116].mxu0 %v3068_v61  ;;  %v1791_v6 = vmax.f32 %v1549_v63, 0.0 }
 0x12f   : > { %1481 = vmatprep.mubr.bf16.mxu1 %v3069_v62  ;;  %1770 = vmatprep.mubr.bf16.mxu0 %v3071_v3 }
 0x130   : > { %v1792_v7 = vmax.f32 %v1552_v5, 0.0 }
 0x131   : > { %v1267_v8 = vpop.f32.mrb[12].mxu1  ;;  %v1556_v11 = vpop.f32.mrb[12].mxu0 }
 0x132   : > { %v2542_v9 = vpack.c.bf16 %v1792_v7, %v1791_v6  ;;  %v1268_v10 = vadd.f32 %v3370_v15, %v1267_v8  ;;  %v1269_v12 = vpop.f32.mrb[13].mxu1  ;;  %v1558_v14 = vpop.f32.mrb[13].mxu0 }
 0x133   : > { %v1270_v16 = vpop.f32.mrb[14].mxu1  ;;  %v1559_v21 = vpop.f32.mrb[14].mxu0 }
 0x134   : > { %2690 = vst [vmem:[%s3382_s14 + $0x10] sm:$0xff] %v2542_v9   ;;  %v1557_v19 = vadd.f32 %v1556_v11, %v1268_v10  ;;  %v1271_v20 = vadd.f32 %v3370_v15, %v1270_v16  ;;  %v1272_v22 = vpop.f32.mrb[15].mxu1  ;;  %v1561_v24 = vpop.f32.mrb[15].mxu0 }
 0x136   : > { %v1560_v25 = vadd.f32 %v1559_v21, %v1271_v20  ;;  %1482 = vmatmul.mubr.bf16.gmra.mrb[120].mxu1 %v3073_v13  ;;  %1771 = vmatmul.mubr.bf16.gmra.mrb[120].mxu0 %v3074_v17  ;;  %v1793_v26 = vmax.f32 %v1557_v19, 0.0 }
 0x137   : > { %1489 = vmatprep.mubr.bf16.mxu1 %v3075_v18  ;;  %1778 = vmatprep.mubr.bf16.mxu0 %v3077_v23 }
 0x138   : > { %v1794_v27 = vmax.f32 %v1560_v25, 0.0 }
 0x139   : > { %v1275_v28 = vpop.f32.mrb[16].mxu1  ;;  %v1564_v31 = vpop.f32.mrb[16].mxu0 }
 0x13a   : > { %v2547_v29 = vpack.c.bf16 %v1794_v27, %v1793_v26  ;;  %v1276_v30 = vadd.f32 %v3370_v15, %v1275_v28  ;;  %v1277_v32 = vpop.f32.mrb[17].mxu1  ;;  %v1566_v34 = vpop.f32.mrb[17].mxu0 }
 0x13b   : > { %v1278_v35 = vpop.f32.mrb[18].mxu1  ;;  %v1567_v39 = vpop.f32.mrb[18].mxu0 }
 0x13c   : > { %2691 = vst [vmem:[%s3382_s14 + $0x18] sm:$0xff] %v2547_v29   ;;  %v1565_v37 = vadd.f32 %v1564_v31, %v1276_v30  ;;  %v1279_v38 = vadd.f32 %v3370_v15, %v1278_v35  ;;  %v1280_v40 = vpop.f32.mrb[19].mxu1  ;;  %v1569_v41 = vpop.f32.mrb[19].mxu0 }
 0x13e   : > { %v1568_v42 = vadd.f32 %v1567_v39, %v1279_v38  ;;  %1490 = vmatmul.mubr.bf16.gmra.mrb[124].mxu1 %v3079_v33  ;;  %1779 = vmatmul.mubr.bf16.gmra.mrb[124].mxu0 %v3080_v36  ;;  %v1795_v43 = vmax.f32 %v1565_v37, 0.0 }
 0x140   : > { %v1796_v44 = vmax.f32 %v1568_v42, 0.0 }
 0x141   : > { %v1283_v45 = vpop.f32.mrb[20].mxu1  ;;  %v1572_v48 = vpop.f32.mrb[20].mxu0 }
 0x142   : > { %v2552_v46 = vpack.c.bf16 %v1796_v44, %v1795_v43  ;;  %v1284_v47 = vadd.f32 %v3370_v15, %v1283_v45  ;;  %v1285_v49 = vpop.f32.mrb[21].mxu1  ;;  %v1574_v50 = vpop.f32.mrb[21].mxu0 }
 0x143   : > { %v1286_v51 = vpop.f32.mrb[22].mxu1  ;;  %v1575_v54 = vpop.f32.mrb[22].mxu0 }
 0x144   : > { %2692 = vst [vmem:[%s3382_s14 + $0x20] sm:$0xff] %v2552_v46   ;;  %v1573_v52 = vadd.f32 %v1572_v48, %v1284_v47  ;;  %v1287_v53 = vadd.f32 %v3370_v15, %v1286_v51  ;;  %v1288_v55 = vpop.f32.mrb[23].mxu1  ;;  %v1577_v56 = vpop.f32.mrb[23].mxu0 }
 0x146   : > { %v1576_v57 = vadd.f32 %v1575_v54, %v1287_v53  ;;  %v1797_v58 = vmax.f32 %v1573_v52, 0.0 }
 0x148   : > { %v1798_v59 = vmax.f32 %v1576_v57, 0.0 }
 0x149   : > { %v1291_v60 = vpop.f32.mrb[24].mxu1  ;;  %v1580_v63 = vpop.f32.mrb[24].mxu0 }
 0x14a   : > { %v2557_v61 = vpack.c.bf16 %v1798_v59, %v1797_v58  ;;  %v1292_v62 = vadd.f32 %v3370_v15, %v1291_v60  ;;  %v1293_v0 = vpop.f32.mrb[25].mxu1  ;;  %v1582_v1 = vpop.f32.mrb[25].mxu0 }
 0x14b   : > { %v1294_v2 = vpop.f32.mrb[26].mxu1  ;;  %v1583_v5 = vpop.f32.mrb[26].mxu0 }
 0x14c   : > { %2693 = vst [vmem:[%s3382_s14 + $0x28] sm:$0xff] %v2557_v61   ;;  %v1581_v3 = vadd.f32 %v1580_v63, %v1292_v62  ;;  %v1295_v4 = vadd.f32 %v3370_v15, %v1294_v2  ;;  %v1296_v6 = vpop.f32.mrb[27].mxu1  ;;  %v1585_v7 = vpop.f32.mrb[27].mxu0 }
 0x14e   : > { %v1584_v8 = vadd.f32 %v1583_v5, %v1295_v4  ;;  %v1799_v9 = vmax.f32 %v1581_v3, 0.0 }
 0x150   : > { %v1800_v10 = vmax.f32 %v1584_v8, 0.0 }
 0x151   : > { %v1299_v11 = vpop.f32.mrb[28].mxu1  ;;  %v1588_v14 = vpop.f32.mrb[28].mxu0 }
 0x152   : > { %v2562_v12 = vpack.c.bf16 %v1800_v10, %v1799_v9  ;;  %v1300_v13 = vadd.f32 %v3370_v15, %v1299_v11  ;;  %v1301_v16 = vpop.f32.mrb[29].mxu1  ;;  %v1590_v17 = vpop.f32.mrb[29].mxu0 }
 0x153   : > { %v1302_v18 = vpop.f32.mrb[30].mxu1  ;;  %v1591_v21 = vpop.f32.mrb[30].mxu0 }
 0x154   : > { %2694 = vst [vmem:[%s3382_s14 + $0x30] sm:$0xff] %v2562_v12   ;;  %v1589_v19 = vadd.f32 %v1588_v14, %v1300_v13  ;;  %v1303_v20 = vadd.f32 %v3370_v15, %v1302_v18  ;;  %v1304_v22 = vpop.f32.mrb[31].mxu1  ;;  %v1593_v23 = vpop.f32.mrb[31].mxu0 }
 0x156   : > { %v1592_v24 = vadd.f32 %v1591_v21, %v1303_v20  ;;  %v1801_v25 = vmax.f32 %v1589_v19, 0.0 }
 0x158   : > { %v1802_v26 = vmax.f32 %v1592_v24, 0.0 }
 0x159   : > { %v1307_v27 = vpop.f32.mrb[32].mxu1  ;;  %v1596_v30 = vpop.f32.mrb[32].mxu0 }
 0x15a   : > { %v2567_v28 = vpack.c.bf16 %v1802_v26, %v1801_v25  ;;  %v1308_v29 = vadd.f32 %v3370_v15, %v1307_v27  ;;  %v1309_v31 = vpop.f32.mrb[33].mxu1  ;;  %v1598_v32 = vpop.f32.mrb[33].mxu0 }
 0x15b   : > { %v1310_v33 = vpop.f32.mrb[34].mxu1  ;;  %v1599_v36 = vpop.f32.mrb[34].mxu0 }
 0x15c   : > { %2695 = vst [vmem:[%s3382_s14 + $0x38] sm:$0xff] %v2567_v28   ;;  %v1597_v34 = vadd.f32 %v1596_v30, %v1308_v29  ;;  %v1311_v35 = vadd.f32 %v3370_v15, %v1310_v33  ;;  %v1312_v37 = vpop.f32.mrb[35].mxu1  ;;  %v1601_v38 = vpop.f32.mrb[35].mxu0 }
 0x15e   : > { %v1600_v39 = vadd.f32 %v1599_v36, %v1311_v35  ;;  %v1803_v40 = vmax.f32 %v1597_v34, 0.0 }
 0x160   : > { %v1804_v41 = vmax.f32 %v1600_v39, 0.0 }
 0x161   : > { %v1315_v42 = vpop.f32.mrb[36].mxu1  ;;  %v1604_v45 = vpop.f32.mrb[36].mxu0 }
 0x162   : > { %v2572_v43 = vpack.c.bf16 %v1804_v41, %v1803_v40  ;;  %v1316_v44 = vadd.f32 %v3370_v15, %v1315_v42  ;;  %v1317_v46 = vpop.f32.mrb[37].mxu1  ;;  %v1606_v47 = vpop.f32.mrb[37].mxu0 }
 0x163   : > { %v1318_v48 = vpop.f32.mrb[38].mxu1  ;;  %v1607_v51 = vpop.f32.mrb[38].mxu0 }
 0x164   : > { %2696 = vst [vmem:[%s3382_s14 + $0x40] sm:$0xff] %v2572_v43   ;;  %v1605_v49 = vadd.f32 %v1604_v45, %v1316_v44  ;;  %v1319_v50 = vadd.f32 %v3370_v15, %v1318_v48  ;;  %v1320_v52 = vpop.f32.mrb[39].mxu1  ;;  %v1609_v53 = vpop.f32.mrb[39].mxu0 }
 0x166   : > { %v1608_v54 = vadd.f32 %v1607_v51, %v1319_v50  ;;  %v1805_v55 = vmax.f32 %v1605_v49, 0.0 }
 0x168   : > { %v1806_v56 = vmax.f32 %v1608_v54, 0.0 }
 0x169   : > { %v1323_v57 = vpop.f32.mrb[40].mxu1  ;;  %v1612_v60 = vpop.f32.mrb[40].mxu0 }
 0x16a   : > { %v2577_v58 = vpack.c.bf16 %v1806_v56, %v1805_v55  ;;  %v1324_v59 = vadd.f32 %v3370_v15, %v1323_v57  ;;  %v1325_v61 = vpop.f32.mrb[41].mxu1  ;;  %v1614_v62 = vpop.f32.mrb[41].mxu0 }
 0x16b   : > { %v1326_v63 = vpop.f32.mrb[42].mxu1  ;;  %v1615_v2 = vpop.f32.mrb[42].mxu0 }
 0x16c   : > { %2697 = vst [vmem:[%s3382_s14 + $0x48] sm:$0xff] %v2577_v58   ;;  %v1613_v0 = vadd.f32 %v1612_v60, %v1324_v59  ;;  %v1327_v1 = vadd.f32 %v3370_v15, %v1326_v63  ;;  %v1328_v3 = vpop.f32.mrb[43].mxu1  ;;  %v1617_v4 = vpop.f32.mrb[43].mxu0 }
 0x16e   : > { %v1616_v5 = vadd.f32 %v1615_v2, %v1327_v1  ;;  %v1807_v6 = vmax.f32 %v1613_v0, 0.0 }
 0x170   : > { %v1808_v7 = vmax.f32 %v1616_v5, 0.0 }
 0x171   : > { %v1331_v8 = vpop.f32.mrb[44].mxu1  ;;  %v1620_v11 = vpop.f32.mrb[44].mxu0 }
 0x172   : > { %v2582_v9 = vpack.c.bf16 %v1808_v7, %v1807_v6  ;;  %v1332_v10 = vadd.f32 %v3370_v15, %v1331_v8  ;;  %v1333_v12 = vpop.f32.mrb[45].mxu1  ;;  %v1622_v13 = vpop.f32.mrb[45].mxu0 }
 0x173   : > { %v1334_v14 = vpop.f32.mrb[46].mxu1  ;;  %v1623_v18 = vpop.f32.mrb[46].mxu0 }
 0x174   : > { %2698 = vst [vmem:[%s3382_s14 + $0x50] sm:$0xff] %v2582_v9   ;;  %v1621_v16 = vadd.f32 %v1620_v11, %v1332_v10  ;;  %v1335_v17 = vadd.f32 %v3370_v15, %v1334_v14  ;;  %v1336_v19 = vpop.f32.mrb[47].mxu1  ;;  %v1625_v20 = vpop.f32.mrb[47].mxu0 }
 0x176   : > { %v1624_v21 = vadd.f32 %v1623_v18, %v1335_v17  ;;  %v1809_v22 = vmax.f32 %v1621_v16, 0.0 }
 0x178   : > { %v1810_v23 = vmax.f32 %v1624_v21, 0.0 }
 0x179   : > { %v1339_v24 = vpop.f32.mrb[48].mxu1  ;;  %v1628_v27 = vpop.f32.mrb[48].mxu0 }
 0x17a   : > { %v2587_v25 = vpack.c.bf16 %v1810_v23, %v1809_v22  ;;  %v1340_v26 = vadd.f32 %v3370_v15, %v1339_v24  ;;  %v1341_v28 = vpop.f32.mrb[49].mxu1  ;;  %v1630_v29 = vpop.f32.mrb[49].mxu0 }
 0x17b   : > { %v1342_v30 = vpop.f32.mrb[50].mxu1  ;;  %v1631_v33 = vpop.f32.mrb[50].mxu0 }
 0x17c   : > { %2699 = vst [vmem:[%s3382_s14 + $0x58] sm:$0xff] %v2587_v25   ;;  %v1629_v31 = vadd.f32 %v1628_v27, %v1340_v26  ;;  %v1343_v32 = vadd.f32 %v3370_v15, %v1342_v30  ;;  %v1344_v34 = vpop.f32.mrb[51].mxu1  ;;  %v1633_v35 = vpop.f32.mrb[51].mxu0 }
 0x17e   : > { %v1632_v36 = vadd.f32 %v1631_v33, %v1343_v32  ;;  %v1811_v37 = vmax.f32 %v1629_v31, 0.0 }
 0x180   : > { %v1812_v38 = vmax.f32 %v1632_v36, 0.0 }
 0x181   : > { %v1347_v39 = vpop.f32.mrb[52].mxu1  ;;  %v1636_v42 = vpop.f32.mrb[52].mxu0 }
 0x182   : > { %v2592_v40 = vpack.c.bf16 %v1812_v38, %v1811_v37  ;;  %v1348_v41 = vadd.f32 %v3370_v15, %v1347_v39  ;;  %v1349_v43 = vpop.f32.mrb[53].mxu1  ;;  %v1638_v44 = vpop.f32.mrb[53].mxu0 }
 0x183   : > { %v1350_v45 = vpop.f32.mrb[54].mxu1  ;;  %v1639_v48 = vpop.f32.mrb[54].mxu0 }
 0x184   : > { %2700 = vst [vmem:[%s3382_s14 + $0x60] sm:$0xff] %v2592_v40   ;;  %v1637_v46 = vadd.f32 %v1636_v42, %v1348_v41  ;;  %v1351_v47 = vadd.f32 %v3370_v15, %v1350_v45  ;;  %v1352_v49 = vpop.f32.mrb[55].mxu1  ;;  %v1641_v50 = vpop.f32.mrb[55].mxu0 }
 0x186   : > { %v1640_v51 = vadd.f32 %v1639_v48, %v1351_v47  ;;  %v1813_v52 = vmax.f32 %v1637_v46, 0.0 }
 0x188   : > { %v1814_v53 = vmax.f32 %v1640_v51, 0.0 }
 0x189   : > { %v1355_v54 = vpop.f32.mrb[56].mxu1  ;;  %v1644_v57 = vpop.f32.mrb[56].mxu0 }
 0x18a   : > { %v2597_v55 = vpack.c.bf16 %v1814_v53, %v1813_v52  ;;  %v1356_v56 = vadd.f32 %v3370_v15, %v1355_v54  ;;  %v1357_v58 = vpop.f32.mrb[57].mxu1  ;;  %v1646_v59 = vpop.f32.mrb[57].mxu0 }
 0x18b   : > { %v1358_v60 = vpop.f32.mrb[58].mxu1  ;;  %v1647_v63 = vpop.f32.mrb[58].mxu0 }
 0x18c   : > { %2701 = vst [vmem:[%s3382_s14 + $0x68] sm:$0xff] %v2597_v55   ;;  %v1645_v61 = vadd.f32 %v1644_v57, %v1356_v56  ;;  %v1359_v62 = vadd.f32 %v3370_v15, %v1358_v60  ;;  %v1360_v0 = vpop.f32.mrb[59].mxu1  ;;  %v1649_v1 = vpop.f32.mrb[59].mxu0 }
 0x18e   : > { %v1648_v2 = vadd.f32 %v1647_v63, %v1359_v62  ;;  %v1815_v3 = vmax.f32 %v1645_v61, 0.0 }
 0x190   : > { %v1816_v4 = vmax.f32 %v1648_v2, 0.0 }
 0x191   : > { %v1363_v5 = vpop.f32.mrb[60].mxu1  ;;  %v1652_v8 = vpop.f32.mrb[60].mxu0 }
 0x192   : > { %v2602_v6 = vpack.c.bf16 %v1816_v4, %v1815_v3  ;;  %v1364_v7 = vadd.f32 %v3370_v15, %v1363_v5  ;;  %v1365_v9 = vpop.f32.mrb[61].mxu1  ;;  %v1654_v10 = vpop.f32.mrb[61].mxu0 }
 0x193   : > { %v1366_v11 = vpop.f32.mrb[62].mxu1  ;;  %v1655_v14 = vpop.f32.mrb[62].mxu0 }
 0x194   : > { %2702 = vst [vmem:[%s3382_s14 + $0x70] sm:$0xff] %v2602_v6   ;;  %v1653_v12 = vadd.f32 %v1652_v8, %v1364_v7  ;;  %v1367_v13 = vadd.f32 %v3370_v15, %v1366_v11  ;;  %v1368_v16 = vpop.f32.mrb[63].mxu1  ;;  %v1657_v17 = vpop.f32.mrb[63].mxu0 }
 0x196   : > { %v1656_v18 = vadd.f32 %v1655_v14, %v1367_v13  ;;  %v1817_v19 = vmax.f32 %v1653_v12, 0.0 }
 0x198   : > { %v1818_v20 = vmax.f32 %v1656_v18, 0.0 }
 0x199   : > { %v1371_v21 = vpop.f32.mrb[64].mxu1  ;;  %v1660_v24 = vpop.f32.mrb[64].mxu0 }
 0x19a   : > { %v2607_v22 = vpack.c.bf16 %v1818_v20, %v1817_v19  ;;  %v1372_v23 = vadd.f32 %v3370_v15, %v1371_v21  ;;  %v1373_v25 = vpop.f32.mrb[65].mxu1  ;;  %v1662_v26 = vpop.f32.mrb[65].mxu0 }
 0x19b   : > { %v1374_v27 = vpop.f32.mrb[66].mxu1  ;;  %v1663_v30 = vpop.f32.mrb[66].mxu0 }
 0x19c   : > { %2703 = vst [vmem:[%s3382_s14 + $0x78] sm:$0xff] %v2607_v22   ;;  %v1661_v28 = vadd.f32 %v1660_v24, %v1372_v23  ;;  %v1375_v29 = vadd.f32 %v3370_v15, %v1374_v27  ;;  %v1376_v31 = vpop.f32.mrb[67].mxu1  ;;  %v1665_v32 = vpop.f32.mrb[67].mxu0 }
 0x19e   : > { %v1664_v33 = vadd.f32 %v1663_v30, %v1375_v29  ;;  %v1819_v34 = vmax.f32 %v1661_v28, 0.0 }
 0x1a0   : > { %v1820_v35 = vmax.f32 %v1664_v33, 0.0 }
 0x1a1   : > { %v1379_v36 = vpop.f32.mrb[68].mxu1  ;;  %v1668_v39 = vpop.f32.mrb[68].mxu0 }
 0x1a2   : > { %v2612_v37 = vpack.c.bf16 %v1820_v35, %v1819_v34  ;;  %v1380_v38 = vadd.f32 %v3370_v15, %v1379_v36  ;;  %v1381_v40 = vpop.f32.mrb[69].mxu1  ;;  %v1670_v41 = vpop.f32.mrb[69].mxu0 }
 0x1a3   : > { %v1382_v42 = vpop.f32.mrb[70].mxu1  ;;  %v1671_v45 = vpop.f32.mrb[70].mxu0 }
 0x1a4   : > { %2704 = vst [vmem:[%s3382_s14 + $0x80] sm:$0xff] %v2612_v37   ;;  %v1669_v43 = vadd.f32 %v1668_v39, %v1380_v38  ;;  %v1383_v44 = vadd.f32 %v3370_v15, %v1382_v42  ;;  %v1384_v46 = vpop.f32.mrb[71].mxu1  ;;  %v1673_v47 = vpop.f32.mrb[71].mxu0 }
 0x1a6   : > { %v1672_v48 = vadd.f32 %v1671_v45, %v1383_v44  ;;  %v1821_v49 = vmax.f32 %v1669_v43, 0.0 }
 0x1a8   : > { %v1822_v50 = vmax.f32 %v1672_v48, 0.0 }
 0x1a9   : > { %v1387_v51 = vpop.f32.mrb[72].mxu1  ;;  %v1676_v54 = vpop.f32.mrb[72].mxu0 }
 0x1aa   : > { %v2617_v52 = vpack.c.bf16 %v1822_v50, %v1821_v49  ;;  %v1388_v53 = vadd.f32 %v3370_v15, %v1387_v51  ;;  %v1389_v55 = vpop.f32.mrb[73].mxu1  ;;  %v1678_v56 = vpop.f32.mrb[73].mxu0 }
 0x1ab   : > { %v1390_v57 = vpop.f32.mrb[74].mxu1  ;;  %v1679_v60 = vpop.f32.mrb[74].mxu0 }
 0x1ac   : > { %2705 = vst [vmem:[%s3382_s14 + $0x88] sm:$0xff] %v2617_v52   ;;  %v1677_v58 = vadd.f32 %v1676_v54, %v1388_v53  ;;  %v1391_v59 = vadd.f32 %v3370_v15, %v1390_v57  ;;  %v1392_v61 = vpop.f32.mrb[75].mxu1  ;;  %v1681_v62 = vpop.f32.mrb[75].mxu0 }
 0x1ae   : > { %v1680_v63 = vadd.f32 %v1679_v60, %v1391_v59  ;;  %v1823_v0 = vmax.f32 %v1677_v58, 0.0 }
 0x1b0   : > { %v1824_v1 = vmax.f32 %v1680_v63, 0.0 }
 0x1b1   : > { %v1395_v2 = vpop.f32.mrb[76].mxu1  ;;  %v1684_v5 = vpop.f32.mrb[76].mxu0 }
 0x1b2   : > { %v2622_v3 = vpack.c.bf16 %v1824_v1, %v1823_v0  ;;  %v1396_v4 = vadd.f32 %v3370_v15, %v1395_v2  ;;  %v1397_v6 = vpop.f32.mrb[77].mxu1  ;;  %v1686_v7 = vpop.f32.mrb[77].mxu0 }
 0x1b3   : > { %v1398_v8 = vpop.f32.mrb[78].mxu1  ;;  %v1687_v11 = vpop.f32.mrb[78].mxu0 }
 0x1b4   : > { %2706 = vst [vmem:[%s3382_s14 + $0x90] sm:$0xff] %v2622_v3   ;;  %v1685_v9 = vadd.f32 %v1684_v5, %v1396_v4  ;;  %v1399_v10 = vadd.f32 %v3370_v15, %v1398_v8  ;;  %v1400_v12 = vpop.f32.mrb[79].mxu1  ;;  %v1689_v13 = vpop.f32.mrb[79].mxu0 }
 0x1b6   : > { %v1688_v14 = vadd.f32 %v1687_v11, %v1399_v10  ;;  %v1825_v16 = vmax.f32 %v1685_v9, 0.0 }
 0x1b8   : > { %v1826_v17 = vmax.f32 %v1688_v14, 0.0 }
 0x1b9   : > { %v1403_v18 = vpop.f32.mrb[80].mxu1  ;;  %v1692_v21 = vpop.f32.mrb[80].mxu0 }
 0x1ba   : > { %v2627_v19 = vpack.c.bf16 %v1826_v17, %v1825_v16  ;;  %v1404_v20 = vadd.f32 %v3370_v15, %v1403_v18  ;;  %v1405_v22 = vpop.f32.mrb[81].mxu1  ;;  %v1694_v23 = vpop.f32.mrb[81].mxu0 }
 0x1bb   : > { %v1406_v24 = vpop.f32.mrb[82].mxu1  ;;  %v1695_v27 = vpop.f32.mrb[82].mxu0 }
 0x1bc   : > { %2707 = vst [vmem:[%s3382_s14 + $0x98] sm:$0xff] %v2627_v19   ;;  %v1693_v25 = vadd.f32 %v1692_v21, %v1404_v20  ;;  %v1407_v26 = vadd.f32 %v3370_v15, %v1406_v24  ;;  %v1408_v28 = vpop.f32.mrb[83].mxu1  ;;  %v1697_v29 = vpop.f32.mrb[83].mxu0 }
 0x1be   : > { %v1696_v30 = vadd.f32 %v1695_v27, %v1407_v26  ;;  %v1827_v31 = vmax.f32 %v1693_v25, 0.0 }
 0x1c0   : > { %v1828_v32 = vmax.f32 %v1696_v30, 0.0 }
 0x1c1   : > { %v1411_v33 = vpop.f32.mrb[84].mxu1  ;;  %v1700_v36 = vpop.f32.mrb[84].mxu0 }
 0x1c2   : > { %v2632_v34 = vpack.c.bf16 %v1828_v32, %v1827_v31  ;;  %v1412_v35 = vadd.f32 %v3370_v15, %v1411_v33  ;;  %v1413_v37 = vpop.f32.mrb[85].mxu1  ;;  %v1702_v38 = vpop.f32.mrb[85].mxu0 }
 0x1c3   : > { %v1414_v39 = vpop.f32.mrb[86].mxu1  ;;  %v1703_v42 = vpop.f32.mrb[86].mxu0 }
 0x1c4   : > { %2708 = vst [vmem:[%s3382_s14 + $0xa0] sm:$0xff] %v2632_v34   ;;  %v1701_v40 = vadd.f32 %v1700_v36, %v1412_v35  ;;  %v1415_v41 = vadd.f32 %v3370_v15, %v1414_v39  ;;  %v1416_v43 = vpop.f32.mrb[87].mxu1  ;;  %v1705_v44 = vpop.f32.mrb[87].mxu0 }
 0x1c6   : > { %v1704_v45 = vadd.f32 %v1703_v42, %v1415_v41  ;;  %v1829_v46 = vmax.f32 %v1701_v40, 0.0 }
 0x1c8   : > { %v1830_v47 = vmax.f32 %v1704_v45, 0.0 }
 0x1c9   : > { %v1419_v48 = vpop.f32.mrb[88].mxu1  ;;  %v1708_v51 = vpop.f32.mrb[88].mxu0 }
 0x1ca   : > { %v2637_v49 = vpack.c.bf16 %v1830_v47, %v1829_v46  ;;  %v1420_v50 = vadd.f32 %v3370_v15, %v1419_v48  ;;  %v1421_v52 = vpop.f32.mrb[89].mxu1  ;;  %v1710_v53 = vpop.f32.mrb[89].mxu0 }
 0x1cb   : > { %v1422_v54 = vpop.f32.mrb[90].mxu1  ;;  %v1711_v57 = vpop.f32.mrb[90].mxu0 }
 0x1cc   : > { %2709 = vst [vmem:[%s3382_s14 + $0xa8] sm:$0xff] %v2637_v49   ;;  %v1709_v55 = vadd.f32 %v1708_v51, %v1420_v50  ;;  %v1423_v56 = vadd.f32 %v3370_v15, %v1422_v54  ;;  %v1424_v58 = vpop.f32.mrb[91].mxu1  ;;  %v1713_v59 = vpop.f32.mrb[91].mxu0 }
 0x1ce   : > { %v1712_v60 = vadd.f32 %v1711_v57, %v1423_v56  ;;  %v1831_v61 = vmax.f32 %v1709_v55, 0.0 }
 0x1d0   : > { %v1832_v62 = vmax.f32 %v1712_v60, 0.0 }
 0x1d1   : > { %v1427_v63 = vpop.f32.mrb[92].mxu1  ;;  %v1716_v2 = vpop.f32.mrb[92].mxu0 }
 0x1d2   : > { %v2642_v0 = vpack.c.bf16 %v1832_v62, %v1831_v61  ;;  %v1428_v1 = vadd.f32 %v3370_v15, %v1427_v63  ;;  %v1429_v3 = vpop.f32.mrb[93].mxu1  ;;  %v1718_v4 = vpop.f32.mrb[93].mxu0 }
 0x1d3   : > { %v1430_v5 = vpop.f32.mrb[94].mxu1  ;;  %v1719_v8 = vpop.f32.mrb[94].mxu0 }
 0x1d4   : > { %2710 = vst [vmem:[%s3382_s14 + $0xb0] sm:$0xff] %v2642_v0   ;;  %v1717_v6 = vadd.f32 %v1716_v2, %v1428_v1  ;;  %v1431_v7 = vadd.f32 %v3370_v15, %v1430_v5  ;;  %v1432_v9 = vpop.f32.mrb[95].mxu1  ;;  %v1721_v10 = vpop.f32.mrb[95].mxu0 }
 0x1d6   : > { %v1720_v11 = vadd.f32 %v1719_v8, %v1431_v7  ;;  %v1833_v12 = vmax.f32 %v1717_v6, 0.0 }
 0x1d8   : > { %v1834_v13 = vmax.f32 %v1720_v11, 0.0 }
 0x1d9   : > { %v1435_v14 = vpop.f32.mrb[96].mxu1  ;;  %v1724_v18 = vpop.f32.mrb[96].mxu0 }
 0x1da   : > { %v2647_v16 = vpack.c.bf16 %v1834_v13, %v1833_v12  ;;  %v1436_v17 = vadd.f32 %v3370_v15, %v1435_v14  ;;  %v1437_v19 = vpop.f32.mrb[97].mxu1  ;;  %v1726_v20 = vpop.f32.mrb[97].mxu0 }
 0x1db   : > { %v1438_v21 = vpop.f32.mrb[98].mxu1  ;;  %v1727_v24 = vpop.f32.mrb[98].mxu0 }
 0x1dc   : > { %2711 = vst [vmem:[%s3382_s14 + $0xb8] sm:$0xff] %v2647_v16   ;;  %v1725_v22 = vadd.f32 %v1724_v18, %v1436_v17  ;;  %v1439_v23 = vadd.f32 %v3370_v15, %v1438_v21  ;;  %v1440_v25 = vpop.f32.mrb[99].mxu1  ;;  %v1729_v26 = vpop.f32.mrb[99].mxu0 }
 0x1de   : > { %v1728_v27 = vadd.f32 %v1727_v24, %v1439_v23  ;;  %v1835_v28 = vmax.f32 %v1725_v22, 0.0 }
 0x1e0   : > { %v1836_v29 = vmax.f32 %v1728_v27, 0.0 }
 0x1e1   : > { %v1443_v30 = vpop.f32.mrb[100].mxu1  ;;  %v1732_v33 = vpop.f32.mrb[100].mxu0 }
 0x1e2   : > { %v2652_v31 = vpack.c.bf16 %v1836_v29, %v1835_v28  ;;  %v1444_v32 = vadd.f32 %v3370_v15, %v1443_v30  ;;  %v1445_v34 = vpop.f32.mrb[101].mxu1  ;;  %v1734_v35 = vpop.f32.mrb[101].mxu0 }
 0x1e3   : > { %v1446_v36 = vpop.f32.mrb[102].mxu1  ;;  %v1735_v39 = vpop.f32.mrb[102].mxu0  ;;  %v3081_v35 = vld [vmem:[%s3495_s2] ss:$0 sm:$0xff] }
 0x1e4   : > { %2712 = vst [vmem:[%s3382_s14 + $0xc0] sm:$0xff] %v2652_v31   ;;  %v1733_v37 = vadd.f32 %v1732_v33, %v1444_v32  ;;  %v1447_v38 = vadd.f32 %v3370_v15, %v1446_v36  ;;  %v1448_v40 = vpop.f32.mrb[103].mxu1  ;;  %v1737_v41 = vpop.f32.mrb[103].mxu0 }
 0x1e6   : > { %v1736_v42 = vadd.f32 %v1735_v39, %v1447_v38  ;;  %v1837_v43 = vmax.f32 %v1733_v37, 0.0 }
 0x1e8   : > { %v1838_v44 = vmax.f32 %v1736_v42, 0.0 }
 0x1e9   : > { %v1451_v45 = vpop.f32.mrb[104].mxu1  ;;  %v1740_v48 = vpop.f32.mrb[104].mxu0 }
 0x1ea   : > { %v2657_v46 = vpack.c.bf16 %v1838_v44, %v1837_v43  ;;  %v1452_v47 = vadd.f32 %v3370_v15, %v1451_v45  ;;  %v1453_v49 = vpop.f32.mrb[105].mxu1  ;;  %v1742_v50 = vpop.f32.mrb[105].mxu0 }
 0x1eb   : > { %v1454_v51 = vpop.f32.mrb[106].mxu1  ;;  %v1743_v54 = vpop.f32.mrb[106].mxu0 }
 0x1ec   : > { %2713 = vst [vmem:[%s3382_s14 + $0xc8] sm:$0xff] %v2657_v46   ;;  %v1741_v52 = vadd.f32 %v1740_v48, %v1452_v47  ;;  %v1455_v53 = vadd.f32 %v3370_v15, %v1454_v51  ;;  %v1456_v55 = vpop.f32.mrb[107].mxu1  ;;  %v1745_v56 = vpop.f32.mrb[107].mxu0 }
 0x1ee   : > { %v1744_v57 = vadd.f32 %v1743_v54, %v1455_v53  ;;  %v1839_v58 = vmax.f32 %v1741_v52, 0.0 }
 0x1f0   : > { %v1840_v59 = vmax.f32 %v1744_v57, 0.0 }
 0x1f1   : > { %v1459_v60 = vpop.f32.mrb[108].mxu1  ;;  %v1748_v63 = vpop.f32.mrb[108].mxu0 }
 0x1f2   : > { %v2662_v61 = vpack.c.bf16 %v1840_v59, %v1839_v58  ;;  %v1460_v62 = vadd.f32 %v3370_v15, %v1459_v60  ;;  %v1461_v0 = vpop.f32.mrb[109].mxu1  ;;  %v1750_v1 = vpop.f32.mrb[109].mxu0 }
 0x1f3   : > { %v1462_v2 = vpop.f32.mrb[110].mxu1  ;;  %v1751_v5 = vpop.f32.mrb[110].mxu0 }
 0x1f4   : > { %2714 = vst [vmem:[%s3382_s14 + $0xd0] sm:$0xff] %v2662_v61   ;;  %v1749_v3 = vadd.f32 %v1748_v63, %v1460_v62  ;;  %v1463_v4 = vadd.f32 %v3370_v15, %v1462_v2  ;;  %v1464_v6 = vpop.f32.mrb[111].mxu1  ;;  %v1753_v7 = vpop.f32.mrb[111].mxu0 }
 0x1f6   : > { %v1752_v8 = vadd.f32 %v1751_v5, %v1463_v4  ;;  %v1841_v9 = vmax.f32 %v1749_v3, 0.0 }
 0x1f8   : > { %v1842_v10 = vmax.f32 %v1752_v8, 0.0 }
 0x1f9   : > { %v1467_v11 = vpop.f32.mrb[112].mxu1  ;;  %v1756_v14 = vpop.f32.mrb[112].mxu0 }
 0x1fa   : > { %v2667_v12 = vpack.c.bf16 %v1842_v10, %v1841_v9  ;;  %v1468_v13 = vadd.f32 %v3370_v15, %v1467_v11  ;;  %v1469_v16 = vpop.f32.mrb[113].mxu1  ;;  %v1758_v17 = vpop.f32.mrb[113].mxu0 }
 0x1fb   : > { %v1470_v18 = vpop.f32.mrb[114].mxu1  ;;  %v1759_v21 = vpop.f32.mrb[114].mxu0 }
 0x1fc   : > { %2715 = vst [vmem:[%s3382_s14 + $0xd8] sm:$0xff] %v2667_v12   ;;  %v1757_v19 = vadd.f32 %v1756_v14, %v1468_v13  ;;  %v1471_v20 = vadd.f32 %v3370_v15, %v1470_v18  ;;  %v1472_v22 = vpop.f32.mrb[115].mxu1  ;;  %v1761_v23 = vpop.f32.mrb[115].mxu0 }
 0x1fe   : > { %v1760_v24 = vadd.f32 %v1759_v21, %v1471_v20  ;;  %v1843_v25 = vmax.f32 %v1757_v19, 0.0 }
 0x200   : > { %v1844_v26 = vmax.f32 %v1760_v24, 0.0 }
 0x201   : > { %v1475_v27 = vpop.f32.mrb[116].mxu1  ;;  %v1764_v30 = vpop.f32.mrb[116].mxu0 }
 0x202   : > { %v2672_v28 = vpack.c.bf16 %v1844_v26, %v1843_v25  ;;  %v1476_v29 = vadd.f32 %v3370_v15, %v1475_v27  ;;  %v1477_v31 = vpop.f32.mrb[117].mxu1  ;;  %v1766_v32 = vpop.f32.mrb[117].mxu0 }
 0x203   : > { %v1478_v33 = vpop.f32.mrb[118].mxu1  ;;  %v1767_v37 = vpop.f32.mrb[118].mxu0 }
 0x204   : > { %2716 = vst [vmem:[%s3382_s14 + $0xe0] sm:$0xff] %v2672_v28   ;;  %v1765_v34 = vadd.f32 %v1764_v30, %v1476_v29  ;;  %v1479_v36 = vadd.f32 %v3081_v35, %v1478_v33  ;;  %v1480_v38 = vpop.f32.mrb[119].mxu1  ;;  %v1769_v39 = vpop.f32.mrb[119].mxu0 }
 0x206   : > { %v1768_v40 = vadd.f32 %v1767_v37, %v1479_v36  ;;  %v1845_v41 = vmax.f32 %v1765_v34, 0.0 }
 0x208   : > { %v1846_v42 = vmax.f32 %v1768_v40, 0.0 }
 0x209   : > { %v1483_v43 = vpop.f32.mrb[120].mxu1  ;;  %v1772_v45 = vpop.f32.mrb[120].mxu0 }
 0x20a   : > { %v2677_v15 = vpack.c.bf16 %v1846_v42, %v1845_v41  ;;  %v1484_v44 = vadd.f32 %v3081_v35, %v1483_v43  ;;  %v1485_v46 = vpop.f32.mrb[121].mxu1  ;;  %v1774_v47 = vpop.f32.mrb[121].mxu0 }
 0x20b   : > { %v1486_v48 = vpop.f32.mrb[122].mxu1  ;;  %v1775_v51 = vpop.f32.mrb[122].mxu0 }
 0x20c   : > { %2717 = vst [vmem:[%s3382_s14 + $0xe8] sm:$0xff] %v2677_v15   ;;  %v1773_v49 = vadd.f32 %v1772_v45, %v1484_v44  ;;  %v1487_v50 = vadd.f32 %v3081_v35, %v1486_v48  ;;  %v1488_v52 = vpop.f32.mrb[123].mxu1  ;;  %v1777_v53 = vpop.f32.mrb[123].mxu0 }
 0x20e   : > { %v1776_v54 = vadd.f32 %v1775_v51, %v1487_v50  ;;  %v1847_v55 = vmax.f32 %v1773_v49, 0.0 }
 0x210   : > { %v1848_v56 = vmax.f32 %v1776_v54, 0.0 }
 0x211   : > { %v1491_v57 = vpop.f32.mrb[124].mxu1  ;;  %v1780_v60 = vpop.f32.mrb[124].mxu0 }
 0x212   : > { %v2682_v58 = vpack.c.bf16 %v1848_v56, %v1847_v55  ;;  %v1492_v59 = vadd.f32 %v3081_v35, %v1491_v57  ;;  %v1493_v61 = vpop.f32.mrb[125].mxu1  ;;  %v1782_v62 = vpop.f32.mrb[125].mxu0 }
 0x213   : > { %v1494_v63 = vpop.f32.mrb[126].mxu1  ;;  %v1783_v2 = vpop.f32.mrb[126].mxu0 }
 0x214   : > { %2718 = vst [vmem:[%s3382_s14 + $0xf0] sm:$0xff] %v2682_v58   ;;  %v1781_v0 = vadd.f32 %v1780_v60, %v1492_v59  ;;  %v1495_v1 = vadd.f32 %v3081_v35, %v1494_v63  ;;  %v1496_v3 = vpop.f32.mrb[127].mxu1  ;;  %v1785_v4 = vpop.f32.mrb[127].mxu0 }
 0x216   : > { %v1784_v5 = vadd.f32 %v1783_v2, %v1495_v1  ;;  %v1849_v6 = vmax.f32 %v1781_v0, 0.0 }
 0x218   : > { %v1850_v7 = vmax.f32 %v1784_v5, 0.0 }
 0x21a   : > { %v2687_v8 = vpack.c.bf16 %v1850_v7, %v1849_v6 }
 0x21c   : > { %2719 = vst [vmem:[%s3382_s14 + $0xf8] sm:$0xff] %v2687_v8  }
 0x21d PF: > { %s13_s12 = sadd.s32 1, %s3088_s12  }
 0x21e   : > { %p10_p4 = scmp.ge.s32.totalorder %s13_s12, 10  }
 0x220   :  { %12 = sbr.rel (!%p10_p4) target bundleno = 1 (0x1), region = 62 }

// kernel: minkunet_forward.22
= control target key start
LH: loop header
LB: loop body
LE: loop exit
PB: predicated region body
PF: predicated region fallthrough
CT: control target
= control target key end

     0   :  { %s2021_s12 = smov 0   ;;  %s2291_s0 = inlined_call_operand.vmem [shape: bf16[4096,256], index: 0, kind: input, shape index: {}]   ;;  %s2292_s1 = inlined_call_operand.vmem [shape: bf16[256,128], index: 1, kind: input, shape index: {}]   ;;  %s2293_s2 = inlined_call_operand.vmem [shape: f32[1,128], index: 2, kind: input, shape index: {}]   ;;  %s2294_s3 = inlined_call_operand.vmem [shape: bf16[4096,128], index: 3, kind: output, shape index: {}]  }
   0x1 LB: > { %s1426_s13 = sadd.s32 4294967295, %s1998_s12   ;;  %p1430_p0 = scmp.ge.s32.totalorder %s1998_s12, 1  ;;  %s1998_s12 = sphi %s2021_s12, %s13_s12  }
   0x2   : > { %p139_p1 = scmp.lt.s32.totalorder %s1998_s12, 9 }
   0x4   : > { %p140_p2 = pnand %p1430_p0, %p139_p1 }
   0x5   : > { %v1880_v0 = vld [vmem:[%s2292_s1] sm:$0xff] (!%p140_p2)   ;;  %v2000_v1 = vmov (!%p140_p2), 0   ;;  %s1431_s16 = sshll.u32 (!%p140_p2), %s1426_s13, 6  ;;  %v1881_v2 = vld [vmem:[%s2292_s1 + $0x8] sm:$0xff] (!%p140_p2)   ;;  %v1882_v3 = vld [vmem:[%s2292_s1 + $0x10] sm:$0xff] (!%p140_p2)  }
   0x6   : > { %143 = sbr.rel (%p140_p2) target bundleno = 411 (0x19b), region = 32  ;;  %697 = vmatprep.subr.bf16.mxu0 (!%p140_p2), %v2000_v1  ;;  %1839 = vmatprep.subr.bf16.mxu1 (!%p140_p2), %v2000_v1  ;;  %p165_p3 = scmp.lt.s32.totalorder (!%p140_p2), %s1431_s16, 511  ;;  %v1883_v4 = vld [vmem:[%s2292_s1 + $0x18] sm:$0xff] (!%p140_p2)   ;;  %v1884_v5 = vld [vmem:[%s2292_s1 + $0x20] sm:$0xff] (!%p140_p2)   ;;  %v1885_v7 = vld [vmem:[%s2292_s1 + $0x28] sm:$0xff] (!%p140_p2)  }
   0x7   : > { %698 = vmatpush1.bf16.msra.mxu0 (!%p140_p2), %v1880_v0  ;;  %1855 = vmatpush1.bf16.msra.mxu1 (!%p140_p2), %v1880_v0  ;;  %v1886_v9 = vld [vmem:[%s2292_s1 + $0x30] sm:$0xff] (!%p140_p2)   ;;  %v1887_v10 = vld [vmem:[%s2292_s1 + $0x38] sm:$0xff] (!%p140_p2)   ;;  %v1888_v11 = vld [vmem:[%s2292_s1 + $0x40] sm:$0xff] (!%p140_p2)  }
   0x8   : > { %699 = vmatprep.subr.bf16.mxu0 (!%p140_p2), %v2000_v1  ;;  %1840 = vmatprep.subr.bf16.mxu1 (!%p140_p2), %v2000_v1  ;;  %v1889_v12 = vld [vmem:[%s2292_s1 + $0x48] sm:$0xff] (!%p140_p2)   ;;  %v1890_v13 = vld [vmem:[%s2292_s1 + $0x50] sm:$0xff] (!%p140_p2)   ;;  %v1891_v14 = vld [vmem:[%s2292_s1 + $0x58] sm:$0xff] (!%p140_p2)  }
   0x9   : > { %v1892_v15 = vld [vmem:[%s2292_s1 + $0x60] sm:$0xff] (!%p140_p2)   ;;  %v1893_v16 = vld [vmem:[%s2292_s1 + $0x68] sm:$0xff] (!%p140_p2)   ;;  %v1894_v17 = vld [vmem:[%s2292_s1 + $0x70] sm:$0xff] (!%p140_p2)  }
   0xa   : > { %v1895_v18 = vld [vmem:[%s2292_s1 + $0x78] sm:$0xff] (!%p140_p2)  }
   0xb   : > { %700 = vmatpush1.bf16.msra.mxu0 (!%p140_p2), %v1881_v2  ;;  %1856 = vmatpush1.bf16.msra.mxu1 (!%p140_p2), %v1881_v2 }
   0xc   : > { %701 = vmatprep.subr.bf16.mxu0 (!%p140_p2), %v2000_v1  ;;  %1841 = vmatprep.subr.bf16.mxu1 (!%p140_p2), %v2000_v1 }
   0xd   : > { %s2296_s16 = smov (!%p165_p3, %s1431_s16), 511 }
   0xe   : > { %s1583_s23 = sshll.u32 %s2296_s16, 3  ;;  %s1435_s29 = sshll.u32 %s2296_s16, 2 }
   0xf   : > { %702 = vmatpush1.bf16.msra.mxu0 %v1882_v3  ;;  %1857 = vmatpush1.bf16.msra.mxu1 %v1882_v3  ;;  %s2058_s28 = scalar_lea.vmem %s2291_s0, %s1583_s23  ;;  %s2194_s4 = scalar_lea.vmem %s2294_s3, %s1435_s29 }
  0x10   : > { %703 = vmatprep.subr.bf16.mxu0 %v2000_v1  ;;  %1842 = vmatprep.subr.bf16.mxu1 %v2000_v1  ;;  %v1898_v6 = vld [vmem:[%s2058_s28 + $0x4] ss:$8 sps:$4 sm:$0xff]   ;;  %v1896_v19 = vld [vmem:[%s2058_s28] ss:$8 sps:$4 sm:$0xff]   ;;  %v1902_v21 = vld [vmem:[%s2058_s28 + $0x14] ss:$8 sps:$4 sm:$0xff]  }
  0x11   : > { %v1901_v8 = vld [vmem:[%s2058_s28 + $0x104] ss:$8 sps:$4 sm:$0xff]   ;;  %729 = vmatprep.mubr.bf16.mxu0 %v1898_v6  ;;  %v1899_v20 = vld [vmem:[%s2058_s28 + $0x100] ss:$8 sps:$4 sm:$0xff]   ;;  %v1904_v22 = vld [vmem:[%s2058_s28 + $0x114] ss:$8 sps:$4 sm:$0xff]  }
  0x12   : > { %857 = vmatprep.mubr.bf16.mxu1 %v1901_v8  ;;  %v1906_v23 = vld [vmem:[%s2058_s28 + $0x10] ss:$8 sps:$4 sm:$0xff]   ;;  %v1908_v25 = vld [vmem:[%s2058_s28 + $0x24] ss:$8 sps:$4 sm:$0xff]   ;;  %v1912_v27 = vld [vmem:[%s2058_s28 + $0x20] ss:$8 sps:$4 sm:$0xff]  }
  0x13   : > { %704 = vmatpush1.bf16.msra.mxu0 %v1883_v4  ;;  %1858 = vmatpush1.bf16.msra.mxu1 %v1883_v4  ;;  %v1907_v24 = vld [vmem:[%s2058_s28 + $0x110] ss:$8 sps:$4 sm:$0xff]   ;;  %v1910_v26 = vld [vmem:[%s2058_s28 + $0x124] ss:$8 sps:$4 sm:$0xff]   ;;  %v1913_v28 = vld [vmem:[%s2058_s28 + $0x120] ss:$8 sps:$4 sm:$0xff]  }
  0x14   : > { %705 = vmatprep.subr.bf16.mxu0 %v2000_v1  ;;  %1843 = vmatprep.subr.bf16.mxu1 %v2000_v1  ;;  %v1914_v29 = vld [vmem:[%s2058_s28 + $0x34] ss:$8 sps:$4 sm:$0xff]   ;;  %v1918_v31 = vld [vmem:[%s2058_s28 + $0x30] ss:$8 sps:$4 sm:$0xff]   ;;  %v1920_v33 = vld [vmem:[%s2058_s28 + $0x44] ss:$8 sps:$4 sm:$0xff]  }
  0x15   : > { %v1916_v30 = vld [vmem:[%s2058_s28 + $0x134] ss:$8 sps:$4 sm:$0xff]   ;;  %v1919_v32 = vld [vmem:[%s2058_s28 + $0x130] ss:$8 sps:$4 sm:$0xff]   ;;  %v1922_v34 = vld [vmem:[%s2058_s28 + $0x144] ss:$8 sps:$4 sm:$0xff]  }
  0x16   : > { %v1924_v35 = vld [vmem:[%s2058_s28 + $0x40] ss:$8 sps:$4 sm:$0xff]   ;;  %v1926_v37 = vld [vmem:[%s2058_s28 + $0x54] ss:$8 sps:$4 sm:$0xff]   ;;  %v1930_v39 = vld [vmem:[%s2058_s28 + $0x50] ss:$8 sps:$4 sm:$0xff]  }
  0x17   : > { %706 = vmatpush1.bf16.msra.mxu0 %v1884_v5  ;;  %1859 = vmatpush1.bf16.msra.mxu1 %v1884_v5  ;;  %v1925_v36 = vld [vmem:[%s2058_s28 + $0x140] ss:$8 sps:$4 sm:$0xff]   ;;  %v1928_v38 = vld [vmem:[%s2058_s28 + $0x154] ss:$8 sps:$4 sm:$0xff]   ;;  %v1931_v40 = vld [vmem:[%s2058_s28 + $0x150] ss:$8 sps:$4 sm:$0xff]  }
  0x18   : > { %707 = vmatprep.subr.bf16.mxu0 %v2000_v1  ;;  %1844 = vmatprep.subr.bf16.mxu1 %v2000_v1  ;;  %v1932_v41 = vld [vmem:[%s2058_s28 + $0x64] ss:$8 sps:$4 sm:$0xff]   ;;  %v1936_v43 = vld [vmem:[%s2058_s28 + $0x60] ss:$8 sps:$4 sm:$0xff]   ;;  %v1938_v45 = vld [vmem:[%s2058_s28 + $0x74] ss:$8 sps:$4 sm:$0xff]  }
  0x19   : > { %v1934_v42 = vld [vmem:[%s2058_s28 + $0x164] ss:$8 sps:$4 sm:$0xff]   ;;  %v1937_v44 = vld [vmem:[%s2058_s28 + $0x160] ss:$8 sps:$4 sm:$0xff]   ;;  %v1940_v46 = vld [vmem:[%s2058_s28 + $0x174] ss:$8 sps:$4 sm:$0xff]  }
  0x1a   : > { %v1942_v47 = vld [vmem:[%s2058_s28 + $0x70] ss:$8 sps:$4 sm:$0xff]   ;;  %v1944_v49 = vld [vmem:[%s2058_s28 + $0x84] ss:$8 sps:$4 sm:$0xff]   ;;  %v1948_v51 = vld [vmem:[%s2058_s28 + $0x80] ss:$8 sps:$4 sm:$0xff]  }
  0x1b   : > { %708 = vmatpush1.bf16.msra.mxu0 %v1885_v7  ;;  %1860 = vmatpush1.bf16.msra.mxu1 %v1885_v7  ;;  %v1943_v48 = vld [vmem:[%s2058_s28 + $0x170] ss:$8 sps:$4 sm:$0xff]   ;;  %v1946_v50 = vld [vmem:[%s2058_s28 + $0x184] ss:$8 sps:$4 sm:$0xff]   ;;  %v1949_v52 = vld [vmem:[%s2058_s28 + $0x180] ss:$8 sps:$4 sm:$0xff]  }
  0x1c   : > { %709 = vmatprep.subr.bf16.mxu0 %v2000_v1  ;;  %1845 = vmatprep.subr.bf16.mxu1 %v2000_v1  ;;  %v1950_v53 = vld [vmem:[%s2058_s28 + $0x94] ss:$8 sps:$4 sm:$0xff]   ;;  %v1954_v55 = vld [vmem:[%s2058_s28 + $0x90] ss:$8 sps:$4 sm:$0xff]   ;;  %v1956_v57 = vld [vmem:[%s2058_s28 + $0xa4] ss:$8 sps:$4 sm:$0xff]  }
  0x1d   : > { %v1952_v54 = vld [vmem:[%s2058_s28 + $0x194] ss:$8 sps:$4 sm:$0xff]   ;;  %v1955_v56 = vld [vmem:[%s2058_s28 + $0x190] ss:$8 sps:$4 sm:$0xff]   ;;  %v1958_v58 = vld [vmem:[%s2058_s28 + $0x1a4] ss:$8 sps:$4 sm:$0xff]  }
  0x1e   : > { %v1960_v59 = vld [vmem:[%s2058_s28 + $0xa0] ss:$8 sps:$4 sm:$0xff]   ;;  %v1962_v61 = vld [vmem:[%s2058_s28 + $0xb4] ss:$8 sps:$4 sm:$0xff]   ;;  %v1966_v63 = vld [vmem:[%s2058_s28 + $0xb0] ss:$8 sps:$4 sm:$0xff]  }
  0x1f   : > { %710 = vmatpush1.bf16.msra.mxu0 %v1886_v9  ;;  %1861 = vmatpush1.bf16.msra.mxu1 %v1886_v9  ;;  %v1961_v60 = vld [vmem:[%s2058_s28 + $0x1a0] ss:$8 sps:$4 sm:$0xff]   ;;  %v1964_v62 = vld [vmem:[%s2058_s28 + $0x1b4] ss:$8 sps:$4 sm:$0xff]   ;;  %v1967_v0 = vld [vmem:[%s2058_s28 + $0x1b0] ss:$8 sps:$4 sm:$0xff]  }
  0x20   : > { %711 = vmatprep.subr.bf16.mxu0 %v2000_v1  ;;  %1846 = vmatprep.subr.bf16.mxu1 %v2000_v1  ;;  %v1970_v2 = vld [vmem:[%s2058_s28 + $0x1c4] ss:$8 sps:$4 sm:$0xff]   ;;  %v1972_v3 = vld [vmem:[%s2058_s28 + $0xc0] ss:$8 sps:$4 sm:$0xff]   ;;  %v1974_v5 = vld [vmem:[%s2058_s28 + $0xd4] ss:$8 sps:$4 sm:$0xff]  }
  0x21   : > { %v1973_v4 = vld [vmem:[%s2058_s28 + $0x1c0] ss:$8 sps:$4 sm:$0xff]   ;;  %v1976_v6 = vld [vmem:[%s2058_s28 + $0x1d4] ss:$8 sps:$4 sm:$0xff]   ;;  %v1978_v7 = vld [vmem:[%s2058_s28 + $0xd0] ss:$8 sps:$4 sm:$0xff]  }
  0x22   : > { %v1979_v8 = vld [vmem:[%s2058_s28 + $0x1d0] ss:$8 sps:$4 sm:$0xff]   ;;  %v1980_v9 = vld [vmem:[%s2058_s28 + $0xe4] ss:$8 sps:$4 sm:$0xff]  }
  0x23   : > { %712 = vmatpush1.bf16.msra.mxu0 %v1887_v10  ;;  %1862 = vmatpush1.bf16.msra.mxu1 %v1887_v10  ;;  %v1982_v10 = vld [vmem:[%s2058_s28 + $0x1e4] ss:$8 sps:$4 sm:$0xff]  }
  0x24   : > { %713 = vmatprep.subr.bf16.mxu0 %v2000_v1  ;;  %1847 = vmatprep.subr.bf16.mxu1 %v2000_v1 }
  0x27   : > { %714 = vmatpush1.bf16.msra.mxu0 %v1888_v11  ;;  %1863 = vmatpush1.bf16.msra.mxu1 %v1888_v11  ;;  %v1984_v11 = vld [vmem:[%s2058_s28 + $0xe0] ss:$8 sps:$4 sm:$0xff]  }
  0x28   : > { %715 = vmatprep.subr.bf16.mxu0 %v2000_v1  ;;  %1848 = vmatprep.subr.bf16.mxu1 %v2000_v1 }
  0x2b   : > { %716 = vmatpush1.bf16.msra.mxu0 %v1889_v12  ;;  %1864 = vmatpush1.bf16.msra.mxu1 %v1889_v12  ;;  %v1985_v12 = vld [vmem:[%s2058_s28 + $0x1e0] ss:$8 sps:$4 sm:$0xff]  }
  0x2c   : > { %717 = vmatprep.subr.bf16.mxu0 %v2000_v1  ;;  %1849 = vmatprep.subr.bf16.mxu1 %v2000_v1 }
  0x2f   : > { %718 = vmatpush1.bf16.msra.mxu0 %v1890_v13  ;;  %1865 = vmatpush1.bf16.msra.mxu1 %v1890_v13  ;;  %v1986_v13 = vld [vmem:[%s2058_s28 + $0xf4] ss:$8 sps:$4 sm:$0xff]  }
  0x30   : > { %719 = vmatprep.subr.bf16.mxu0 %v2000_v1  ;;  %1850 = vmatprep.subr.bf16.mxu1 %v2000_v1 }
  0x33   : > { %720 = vmatpush1.bf16.msra.mxu0 %v1891_v14  ;;  %1866 = vmatpush1.bf16.msra.mxu1 %v1891_v14  ;;  %v1988_v14 = vld [vmem:[%s2058_s28 + $0x1f4] ss:$8 sps:$4 sm:$0xff]  }
  0x34   : > { %721 = vmatprep.subr.bf16.mxu0 %v2000_v1  ;;  %1851 = vmatprep.subr.bf16.mxu1 %v2000_v1 }
  0x37   : > { %722 = vmatpush1.bf16.msra.mxu0 %v1892_v15  ;;  %1867 = vmatpush1.bf16.msra.mxu1 %v1892_v15  ;;  %v1990_v15 = vld [vmem:[%s2058_s28 + $0xf0] ss:$8 sps:$4 sm:$0xff]  }
  0x38   : > { %723 = vmatprep.subr.bf16.mxu0 %v2000_v1  ;;  %1852 = vmatprep.subr.bf16.mxu1 %v2000_v1 }
  0x3b   : > { %724 = vmatpush1.bf16.msra.mxu0 %v1893_v16  ;;  %1868 = vmatpush1.bf16.msra.mxu1 %v1893_v16  ;;  %v1991_v16 = vld [vmem:[%s2058_s28 + $0x1f0] ss:$8 sps:$4 sm:$0xff]  }
  0x3c   : > { %725 = vmatprep.subr.bf16.mxu0 %v2000_v1  ;;  %1853 = vmatprep.subr.bf16.mxu1 %v2000_v1 }
  0x3f   : > { %726 = vmatpush1.bf16.msra.mxu0 %v1894_v17  ;;  %1869 = vmatpush1.bf16.msra.mxu1 %v1894_v17  ;;  %v2184_v17 = vld [vmem:[%s2293_s2] ss:$0 sm:$0xff] }
  0x40   : > { %727 = vmatprep.subr.bf16.mxu0 %v2000_v1  ;;  %1854 = vmatprep.subr.bf16.mxu1 %v2000_v1  ;;  %v1968_v1 = vld [vmem:[%s2058_s28 + $0xc4] ss:$8 sps:$4 sm:$0xff]  }
  0x43   : > { %728 = vmatpush1.bf16.msra.mxu0 %v1895_v18  ;;  %1870 = vmatpush1.bf16.msra.mxu1 %v1895_v18 }
  0x46   : > { %730 = vmatmul.mubr.bf16.vlgmr.msra.gmra.mrb[0].mxu0 %v1896_v19  ;;  %858 = vmatmul.mubr.bf16.vlgmr.msra.gmra.mrb[0].mxu1 %v1899_v20 }
  0x47   : > { %737 = vmatprep.mubr.bf16.mxu0 %v1902_v21  ;;  %865 = vmatprep.mubr.bf16.mxu1 %v1904_v22 }
  0x4e   : > { %738 = vmatmul.mubr.bf16.gmra.mrb[4].mxu0 %v1906_v23  ;;  %866 = vmatmul.mubr.bf16.gmra.mrb[4].mxu1 %v1907_v24 }
  0x4f   : > { %745 = vmatprep.mubr.bf16.mxu0 %v1908_v25  ;;  %873 = vmatprep.mubr.bf16.mxu1 %v1910_v26 }
  0x56   : > { %746 = vmatmul.mubr.bf16.gmra.mrb[8].mxu0 %v1912_v27  ;;  %874 = vmatmul.mubr.bf16.gmra.mrb[8].mxu1 %v1913_v28 }
  0x57   : > { %753 = vmatprep.mubr.bf16.mxu0 %v1914_v29  ;;  %881 = vmatprep.mubr.bf16.mxu1 %v1916_v30 }
  0x5e   : > { %754 = vmatmul.mubr.bf16.gmra.mrb[12].mxu0 %v1918_v31  ;;  %882 = vmatmul.mubr.bf16.gmra.mrb[12].mxu1 %v1919_v32 }
  0x5f   : > { %761 = vmatprep.mubr.bf16.mxu0 %v1920_v33  ;;  %889 = vmatprep.mubr.bf16.mxu1 %v1922_v34 }
  0x66   : > { %762 = vmatmul.mubr.bf16.gmra.mrb[16].mxu0 %v1924_v35  ;;  %890 = vmatmul.mubr.bf16.gmra.mrb[16].mxu1 %v1925_v36 }
  0x67   : > { %769 = vmatprep.mubr.bf16.mxu0 %v1926_v37  ;;  %897 = vmatprep.mubr.bf16.mxu1 %v1928_v38 }
  0x6e   : > { %770 = vmatmul.mubr.bf16.gmra.mrb[20].mxu0 %v1930_v39  ;;  %898 = vmatmul.mubr.bf16.gmra.mrb[20].mxu1 %v1931_v40 }
  0x6f   : > { %777 = vmatprep.mubr.bf16.mxu0 %v1932_v41  ;;  %905 = vmatprep.mubr.bf16.mxu1 %v1934_v42 }
  0x76   : > { %778 = vmatmul.mubr.bf16.gmra.mrb[24].mxu0 %v1936_v43  ;;  %906 = vmatmul.mubr.bf16.gmra.mrb[24].mxu1 %v1937_v44 }
  0x77   : > { %785 = vmatprep.mubr.bf16.mxu0 %v1938_v45  ;;  %913 = vmatprep.mubr.bf16.mxu1 %v1940_v46 }
  0x7e   : > { %786 = vmatmul.mubr.bf16.gmra.mrb[28].mxu0 %v1942_v47  ;;  %914 = vmatmul.mubr.bf16.gmra.mrb[28].mxu1 %v1943_v48 }
  0x7f   : > { %793 = vmatprep.mubr.bf16.mxu0 %v1944_v49  ;;  %921 = vmatprep.mubr.bf16.mxu1 %v1946_v50 }
  0x86   : > { %794 = vmatmul.mubr.bf16.gmra.mrb[32].mxu0 %v1948_v51  ;;  %922 = vmatmul.mubr.bf16.gmra.mrb[32].mxu1 %v1949_v52 }
  0x87   : > { %801 = vmatprep.mubr.bf16.mxu0 %v1950_v53  ;;  %929 = vmatprep.mubr.bf16.mxu1 %v1952_v54 }
  0x8e   : > { %802 = vmatmul.mubr.bf16.gmra.mrb[36].mxu0 %v1954_v55  ;;  %930 = vmatmul.mubr.bf16.gmra.mrb[36].mxu1 %v1955_v56 }
  0x8f   : > { %809 = vmatprep.mubr.bf16.mxu0 %v1956_v57  ;;  %937 = vmatprep.mubr.bf16.mxu1 %v1958_v58 }
  0x96   : > { %810 = vmatmul.mubr.bf16.gmra.mrb[40].mxu0 %v1960_v59  ;;  %938 = vmatmul.mubr.bf16.gmra.mrb[40].mxu1 %v1961_v60 }
  0x97   : > { %817 = vmatprep.mubr.bf16.mxu0 %v1962_v61  ;;  %945 = vmatprep.mubr.bf16.mxu1 %v1964_v62 }
  0x9e   : > { %818 = vmatmul.mubr.bf16.gmra.mrb[44].mxu0 %v1966_v63  ;;  %946 = vmatmul.mubr.bf16.gmra.mrb[44].mxu1 %v1967_v0 }
  0x9f   : > { %825 = vmatprep.mubr.bf16.mxu0 %v1968_v1  ;;  %953 = vmatprep.mubr.bf16.mxu1 %v1970_v2 }
  0xa6   : > { %826 = vmatmul.mubr.bf16.gmra.mrb[48].mxu0 %v1972_v3  ;;  %954 = vmatmul.mubr.bf16.gmra.mrb[48].mxu1 %v1973_v4 }
  0xa7   : > { %833 = vmatprep.mubr.bf16.mxu0 %v1974_v5  ;;  %961 = vmatprep.mubr.bf16.mxu1 %v1976_v6 }
  0xae   : > { %834 = vmatmul.mubr.bf16.gmra.mrb[52].mxu0 %v1978_v7  ;;  %962 = vmatmul.mubr.bf16.gmra.mrb[52].mxu1 %v1979_v8 }
  0xaf   : > { %841 = vmatprep.mubr.bf16.mxu0 %v1980_v9  ;;  %969 = vmatprep.mubr.bf16.mxu1 %v1982_v10 }
  0xb6   : > { %842 = vmatmul.mubr.bf16.gmra.mrb[56].mxu0 %v1984_v11  ;;  %970 = vmatmul.mubr.bf16.gmra.mrb[56].mxu1 %v1985_v12 }
  0xb7   : > { %849 = vmatprep.mubr.bf16.mxu0 %v1986_v13  ;;  %977 = vmatprep.mubr.bf16.mxu1 %v1988_v14 }
  0xbe   : > { %850 = vmatmul.mubr.bf16.gmra.mrb[60].mxu0 %v1990_v15  ;;  %978 = vmatmul.mubr.bf16.gmra.mrb[60].mxu1 %v1991_v16 }
 0x119   : > { %v731_v18 = vpop.f32.mrb[0].mxu0  ;;  %v859_v19 = vpop.f32.mrb[0].mxu1 }
 0x11a   : > { %v732_v20 = vadd.f32 %v2184_v17, %v731_v18  ;;  %v860_v21 = vadd.f32 %v2184_v17, %v859_v19  ;;  %v733_v22 = vpop.f32.mrb[1].mxu0  ;;  %v861_v23 = vpop.f32.mrb[1].mxu1 }
 0x11b   : > { %v734_v24 = vpop.f32.mrb[2].mxu0  ;;  %v862_v25 = vpop.f32.mrb[2].mxu1 }
 0x11c   : > { %v735_v26 = vadd.f32 %v2184_v17, %v734_v24  ;;  %v863_v27 = vadd.f32 %v2184_v17, %v862_v25  ;;  %v736_v28 = vpop.f32.mrb[3].mxu0  ;;  %v864_v29 = vpop.f32.mrb[3].mxu1  ;;  %v986_v30 = vmax.f32 %v732_v20, 0.0  ;;  %v1018_v31 = vmax.f32 %v860_v21, 0.0 }
 0x11e   : > { %v987_v32 = vmax.f32 %v735_v26, 0.0  ;;  %v1019_v33 = vmax.f32 %v863_v27, 0.0 }
 0x120   : > { %v1651_v34 = vpack.c.bf16 %v987_v32, %v986_v30  ;;  %v1731_v35 = vpack.c.bf16 %v1019_v33, %v1018_v31 }
 0x121   : > { %v739_v36 = vpop.f32.mrb[4].mxu0  ;;  %v867_v37 = vpop.f32.mrb[4].mxu1 }
 0x122   : > { %1652 = vst [vmem:[%s2194_s4] sm:$0xff] %v1651_v34   ;;  %1823 = vst [vmem:[%s2194_s4 + $0x80] sm:$0xff] %v1731_v35   ;;  %v740_v38 = vadd.f32 %v2184_v17, %v739_v36  ;;  %v868_v39 = vadd.f32 %v2184_v17, %v867_v37  ;;  %v741_v40 = vpop.f32.mrb[5].mxu0  ;;  %v869_v41 = vpop.f32.mrb[5].mxu1 }
 0x123   : > { %v742_v42 = vpop.f32.mrb[6].mxu0  ;;  %v870_v43 = vpop.f32.mrb[6].mxu1 }
 0x124   : > { %v743_v44 = vadd.f32 %v2184_v17, %v742_v42  ;;  %v871_v45 = vadd.f32 %v2184_v17, %v870_v43  ;;  %v744_v46 = vpop.f32.mrb[7].mxu0  ;;  %v872_v47 = vpop.f32.mrb[7].mxu1  ;;  %v988_v48 = vmax.f32 %v740_v38, 0.0  ;;  %v1020_v49 = vmax.f32 %v868_v39, 0.0 }
 0x126   : > { %v989_v50 = vmax.f32 %v743_v44, 0.0  ;;  %v1021_v51 = vmax.f32 %v871_v45, 0.0 }
 0x128   : > { %v1656_v52 = vpack.c.bf16 %v989_v50, %v988_v48  ;;  %v1736_v53 = vpack.c.bf16 %v1021_v51, %v1020_v49 }
 0x129   : > { %v747_v54 = vpop.f32.mrb[8].mxu0  ;;  %v875_v55 = vpop.f32.mrb[8].mxu1 }
 0x12a   : > { %1808 = vst [vmem:[%s2194_s4 + $0x8] sm:$0xff] %v1656_v52   ;;  %1824 = vst [vmem:[%s2194_s4 + $0x88] sm:$0xff] %v1736_v53   ;;  %v748_v56 = vadd.f32 %v2184_v17, %v747_v54  ;;  %v876_v57 = vadd.f32 %v2184_v17, %v875_v55  ;;  %v749_v58 = vpop.f32.mrb[9].mxu0  ;;  %v877_v59 = vpop.f32.mrb[9].mxu1 }
 0x12b   : > { %v750_v60 = vpop.f32.mrb[10].mxu0  ;;  %v878_v61 = vpop.f32.mrb[10].mxu1 }
 0x12c   : > { %v751_v62 = vadd.f32 %v2184_v17, %v750_v60  ;;  %v879_v63 = vadd.f32 %v2184_v17, %v878_v61  ;;  %v752_v0 = vpop.f32.mrb[11].mxu0  ;;  %v880_v1 = vpop.f32.mrb[11].mxu1  ;;  %v990_v2 = vmax.f32 %v748_v56, 0.0  ;;  %v1022_v3 = vmax.f32 %v876_v57, 0.0 }
 0x12e   : > { %v991_v4 = vmax.f32 %v751_v62, 0.0  ;;  %v1023_v5 = vmax.f32 %v879_v63, 0.0 }
 0x130   : > { %v1661_v6 = vpack.c.bf16 %v991_v4, %v990_v2  ;;  %v1741_v7 = vpack.c.bf16 %v1023_v5, %v1022_v3 }
 0x131   : > { %v755_v8 = vpop.f32.mrb[12].mxu0  ;;  %v883_v9 = vpop.f32.mrb[12].mxu1 }
 0x132   : > { %1809 = vst [vmem:[%s2194_s4 + $0x10] sm:$0xff] %v1661_v6   ;;  %1825 = vst [vmem:[%s2194_s4 + $0x90] sm:$0xff] %v1741_v7   ;;  %v756_v10 = vadd.f32 %v2184_v17, %v755_v8  ;;  %v884_v11 = vadd.f32 %v2184_v17, %v883_v9  ;;  %v757_v12 = vpop.f32.mrb[13].mxu0  ;;  %v885_v13 = vpop.f32.mrb[13].mxu1 }
 0x133   : > { %v758_v14 = vpop.f32.mrb[14].mxu0  ;;  %v886_v15 = vpop.f32.mrb[14].mxu1 }
 0x134   : > { %v759_v16 = vadd.f32 %v2184_v17, %v758_v14  ;;  %v887_v18 = vadd.f32 %v2184_v17, %v886_v15  ;;  %v760_v19 = vpop.f32.mrb[15].mxu0  ;;  %v888_v20 = vpop.f32.mrb[15].mxu1  ;;  %v992_v21 = vmax.f32 %v756_v10, 0.0  ;;  %v1024_v22 = vmax.f32 %v884_v11, 0.0 }
 0x136   : > { %v993_v23 = vmax.f32 %v759_v16, 0.0  ;;  %v1025_v24 = vmax.f32 %v887_v18, 0.0 }
 0x138   : > { %v1666_v25 = vpack.c.bf16 %v993_v23, %v992_v21  ;;  %v1746_v26 = vpack.c.bf16 %v1025_v24, %v1024_v22 }
 0x139   : > { %v763_v27 = vpop.f32.mrb[16].mxu0  ;;  %v891_v28 = vpop.f32.mrb[16].mxu1 }
 0x13a   : > { %1810 = vst [vmem:[%s2194_s4 + $0x18] sm:$0xff] %v1666_v25   ;;  %1826 = vst [vmem:[%s2194_s4 + $0x98] sm:$0xff] %v1746_v26   ;;  %v764_v29 = vadd.f32 %v2184_v17, %v763_v27  ;;  %v892_v30 = vadd.f32 %v2184_v17, %v891_v28  ;;  %v765_v31 = vpop.f32.mrb[17].mxu0  ;;  %v893_v32 = vpop.f32.mrb[17].mxu1 }
 0x13b   : > { %v766_v33 = vpop.f32.mrb[18].mxu0  ;;  %v894_v34 = vpop.f32.mrb[18].mxu1 }
 0x13c   : > { %v767_v35 = vadd.f32 %v2184_v17, %v766_v33  ;;  %v895_v36 = vadd.f32 %v2184_v17, %v894_v34  ;;  %v768_v37 = vpop.f32.mrb[19].mxu0  ;;  %v896_v38 = vpop.f32.mrb[19].mxu1  ;;  %v994_v39 = vmax.f32 %v764_v29, 0.0  ;;  %v1026_v40 = vmax.f32 %v892_v30, 0.0 }
 0x13e   : > { %v995_v41 = vmax.f32 %v767_v35, 0.0  ;;  %v1027_v42 = vmax.f32 %v895_v36, 0.0 }
 0x140   : > { %v1671_v43 = vpack.c.bf16 %v995_v41, %v994_v39  ;;  %v1751_v44 = vpack.c.bf16 %v1027_v42, %v1026_v40 }
 0x141   : > { %v771_v45 = vpop.f32.mrb[20].mxu0  ;;  %v899_v46 = vpop.f32.mrb[20].mxu1 }
 0x142   : > { %1811 = vst [vmem:[%s2194_s4 + $0x20] sm:$0xff] %v1671_v43   ;;  %1827 = vst [vmem:[%s2194_s4 + $0xa0] sm:$0xff] %v1751_v44   ;;  %v772_v47 = vadd.f32 %v2184_v17, %v771_v45  ;;  %v900_v48 = vadd.f32 %v2184_v17, %v899_v46  ;;  %v773_v49 = vpop.f32.mrb[21].mxu0  ;;  %v901_v50 = vpop.f32.mrb[21].mxu1 }
 0x143   : > { %v774_v51 = vpop.f32.mrb[22].mxu0  ;;  %v902_v52 = vpop.f32.mrb[22].mxu1 }
 0x144   : > { %v775_v53 = vadd.f32 %v2184_v17, %v774_v51  ;;  %v903_v54 = vadd.f32 %v2184_v17, %v902_v52  ;;  %v776_v55 = vpop.f32.mrb[23].mxu0  ;;  %v904_v56 = vpop.f32.mrb[23].mxu1  ;;  %v996_v57 = vmax.f32 %v772_v47, 0.0  ;;  %v1028_v58 = vmax.f32 %v900_v48, 0.0 }
 0x146   : > { %v997_v59 = vmax.f32 %v775_v53, 0.0  ;;  %v1029_v60 = vmax.f32 %v903_v54, 0.0 }
 0x148   : > { %v1676_v61 = vpack.c.bf16 %v997_v59, %v996_v57  ;;  %v1756_v62 = vpack.c.bf16 %v1029_v60, %v1028_v58 }
 0x149   : > { %v779_v63 = vpop.f32.mrb[24].mxu0  ;;  %v907_v0 = vpop.f32.mrb[24].mxu1 }
 0x14a   : > { %1812 = vst [vmem:[%s2194_s4 + $0x28] sm:$0xff] %v1676_v61   ;;  %1828 = vst [vmem:[%s2194_s4 + $0xa8] sm:$0xff] %v1756_v62   ;;  %v780_v1 = vadd.f32 %v2184_v17, %v779_v63  ;;  %v908_v2 = vadd.f32 %v2184_v17, %v907_v0  ;;  %v781_v3 = vpop.f32.mrb[25].mxu0  ;;  %v909_v4 = vpop.f32.mrb[25].mxu1 }
 0x14b   : > { %v782_v5 = vpop.f32.mrb[26].mxu0  ;;  %v910_v6 = vpop.f32.mrb[26].mxu1 }
 0x14c   : > { %v783_v7 = vadd.f32 %v2184_v17, %v782_v5  ;;  %v911_v8 = vadd.f32 %v2184_v17, %v910_v6  ;;  %v784_v9 = vpop.f32.mrb[27].mxu0  ;;  %v912_v10 = vpop.f32.mrb[27].mxu1  ;;  %v998_v11 = vmax.f32 %v780_v1, 0.0  ;;  %v1030_v12 = vmax.f32 %v908_v2, 0.0 }
 0x14e   : > { %v999_v13 = vmax.f32 %v783_v7, 0.0  ;;  %v1031_v14 = vmax.f32 %v911_v8, 0.0 }
 0x150   : > { %v1681_v15 = vpack.c.bf16 %v999_v13, %v998_v11  ;;  %v1761_v16 = vpack.c.bf16 %v1031_v14, %v1030_v12 }
 0x151   : > { %v787_v18 = vpop.f32.mrb[28].mxu0  ;;  %v915_v19 = vpop.f32.mrb[28].mxu1 }
 0x152   : > { %1813 = vst [vmem:[%s2194_s4 + $0x30] sm:$0xff] %v1681_v15   ;;  %1829 = vst [vmem:[%s2194_s4 + $0xb0] sm:$0xff] %v1761_v16   ;;  %v788_v20 = vadd.f32 %v2184_v17, %v787_v18  ;;  %v916_v21 = vadd.f32 %v2184_v17, %v915_v19  ;;  %v789_v22 = vpop.f32.mrb[29].mxu0  ;;  %v917_v23 = vpop.f32.mrb[29].mxu1 }
 0x153   : > { %v790_v24 = vpop.f32.mrb[30].mxu0  ;;  %v918_v25 = vpop.f32.mrb[30].mxu1 }
 0x154   : > { %v791_v26 = vadd.f32 %v2184_v17, %v790_v24  ;;  %v919_v27 = vadd.f32 %v2184_v17, %v918_v25  ;;  %v792_v28 = vpop.f32.mrb[31].mxu0  ;;  %v920_v29 = vpop.f32.mrb[31].mxu1  ;;  %v1000_v30 = vmax.f32 %v788_v20, 0.0  ;;  %v1032_v31 = vmax.f32 %v916_v21, 0.0 }
 0x156   : > { %v1001_v32 = vmax.f32 %v791_v26, 0.0  ;;  %v1033_v33 = vmax.f32 %v919_v27, 0.0 }
 0x158   : > { %v1686_v34 = vpack.c.bf16 %v1001_v32, %v1000_v30  ;;  %v1766_v35 = vpack.c.bf16 %v1033_v33, %v1032_v31 }
 0x159   : > { %v795_v36 = vpop.f32.mrb[32].mxu0  ;;  %v923_v37 = vpop.f32.mrb[32].mxu1 }
 0x15a   : > { %1814 = vst [vmem:[%s2194_s4 + $0x38] sm:$0xff] %v1686_v34   ;;  %1830 = vst [vmem:[%s2194_s4 + $0xb8] sm:$0xff] %v1766_v35   ;;  %v796_v38 = vadd.f32 %v2184_v17, %v795_v36  ;;  %v924_v39 = vadd.f32 %v2184_v17, %v923_v37  ;;  %v797_v40 = vpop.f32.mrb[33].mxu0  ;;  %v925_v41 = vpop.f32.mrb[33].mxu1 }
 0x15b   : > { %v798_v42 = vpop.f32.mrb[34].mxu0  ;;  %v926_v43 = vpop.f32.mrb[34].mxu1 }
 0x15c   : > { %v799_v44 = vadd.f32 %v2184_v17, %v798_v42  ;;  %v927_v45 = vadd.f32 %v2184_v17, %v926_v43  ;;  %v800_v46 = vpop.f32.mrb[35].mxu0  ;;  %v928_v47 = vpop.f32.mrb[35].mxu1  ;;  %v1002_v48 = vmax.f32 %v796_v38, 0.0  ;;  %v1034_v49 = vmax.f32 %v924_v39, 0.0 }
 0x15e   : > { %v1003_v50 = vmax.f32 %v799_v44, 0.0  ;;  %v1035_v51 = vmax.f32 %v927_v45, 0.0 }
 0x160   : > { %v1691_v52 = vpack.c.bf16 %v1003_v50, %v1002_v48  ;;  %v1771_v53 = vpack.c.bf16 %v1035_v51, %v1034_v49 }
 0x161   : > { %v803_v54 = vpop.f32.mrb[36].mxu0  ;;  %v931_v55 = vpop.f32.mrb[36].mxu1 }
 0x162   : > { %1815 = vst [vmem:[%s2194_s4 + $0x40] sm:$0xff] %v1691_v52   ;;  %1831 = vst [vmem:[%s2194_s4 + $0xc0] sm:$0xff] %v1771_v53   ;;  %v804_v56 = vadd.f32 %v2184_v17, %v803_v54  ;;  %v932_v57 = vadd.f32 %v2184_v17, %v931_v55  ;;  %v805_v58 = vpop.f32.mrb[37].mxu0  ;;  %v933_v59 = vpop.f32.mrb[37].mxu1 }
 0x163   : > { %v806_v60 = vpop.f32.mrb[38].mxu0  ;;  %v934_v61 = vpop.f32.mrb[38].mxu1 }
 0x164   : > { %v807_v62 = vadd.f32 %v2184_v17, %v806_v60  ;;  %v935_v63 = vadd.f32 %v2184_v17, %v934_v61  ;;  %v808_v0 = vpop.f32.mrb[39].mxu0  ;;  %v936_v1 = vpop.f32.mrb[39].mxu1  ;;  %v1004_v2 = vmax.f32 %v804_v56, 0.0  ;;  %v1036_v3 = vmax.f32 %v932_v57, 0.0 }
 0x166   : > { %v1005_v4 = vmax.f32 %v807_v62, 0.0  ;;  %v1037_v5 = vmax.f32 %v935_v63, 0.0 }
 0x168   : > { %v1696_v6 = vpack.c.bf16 %v1005_v4, %v1004_v2  ;;  %v1776_v7 = vpack.c.bf16 %v1037_v5, %v1036_v3 }
 0x169   : > { %v811_v8 = vpop.f32.mrb[40].mxu0  ;;  %v939_v9 = vpop.f32.mrb[40].mxu1 }
 0x16a   : > { %1816 = vst [vmem:[%s2194_s4 + $0x48] sm:$0xff] %v1696_v6   ;;  %1832 = vst [vmem:[%s2194_s4 + $0xc8] sm:$0xff] %v1776_v7   ;;  %v812_v10 = vadd.f32 %v2184_v17, %v811_v8  ;;  %v940_v11 = vadd.f32 %v2184_v17, %v939_v9  ;;  %v813_v12 = vpop.f32.mrb[41].mxu0  ;;  %v941_v13 = vpop.f32.mrb[41].mxu1 }
 0x16b   : > { %v814_v14 = vpop.f32.mrb[42].mxu0  ;;  %v942_v15 = vpop.f32.mrb[42].mxu1 }
 0x16c   : > { %v815_v16 = vadd.f32 %v2184_v17, %v814_v14  ;;  %v943_v18 = vadd.f32 %v2184_v17, %v942_v15  ;;  %v816_v19 = vpop.f32.mrb[43].mxu0  ;;  %v944_v20 = vpop.f32.mrb[43].mxu1  ;;  %v1006_v21 = vmax.f32 %v812_v10, 0.0  ;;  %v1038_v22 = vmax.f32 %v940_v11, 0.0 }
 0x16e   : > { %v1007_v23 = vmax.f32 %v815_v16, 0.0  ;;  %v1039_v24 = vmax.f32 %v943_v18, 0.0 }
 0x170   : > { %v1701_v25 = vpack.c.bf16 %v1007_v23, %v1006_v21  ;;  %v1781_v26 = vpack.c.bf16 %v1039_v24, %v1038_v22 }
 0x171   : > { %v819_v27 = vpop.f32.mrb[44].mxu0  ;;  %v947_v28 = vpop.f32.mrb[44].mxu1 }
 0x172   : > { %1817 = vst [vmem:[%s2194_s4 + $0x50] sm:$0xff] %v1701_v25   ;;  %1833 = vst [vmem:[%s2194_s4 + $0xd0] sm:$0xff] %v1781_v26   ;;  %v820_v29 = vadd.f32 %v2184_v17, %v819_v27  ;;  %v948_v30 = vadd.f32 %v2184_v17, %v947_v28  ;;  %v821_v31 = vpop.f32.mrb[45].mxu0  ;;  %v949_v32 = vpop.f32.mrb[45].mxu1 }
 0x173   : > { %v822_v33 = vpop.f32.mrb[46].mxu0  ;;  %v950_v34 = vpop.f32.mrb[46].mxu1 }
 0x174   : > { %v823_v35 = vadd.f32 %v2184_v17, %v822_v33  ;;  %v951_v36 = vadd.f32 %v2184_v17, %v950_v34  ;;  %v824_v37 = vpop.f32.mrb[47].mxu0  ;;  %v952_v38 = vpop.f32.mrb[47].mxu1  ;;  %v1008_v39 = vmax.f32 %v820_v29, 0.0  ;;  %v1040_v40 = vmax.f32 %v948_v30, 0.0 }
 0x176   : > { %v1009_v41 = vmax.f32 %v823_v35, 0.0  ;;  %v1041_v42 = vmax.f32 %v951_v36, 0.0 }
 0x178   : > { %v1706_v43 = vpack.c.bf16 %v1009_v41, %v1008_v39  ;;  %v1786_v44 = vpack.c.bf16 %v1041_v42, %v1040_v40 }
 0x179   : > { %v827_v45 = vpop.f32.mrb[48].mxu0  ;;  %v955_v46 = vpop.f32.mrb[48].mxu1 }
 0x17a   : > { %1818 = vst [vmem:[%s2194_s4 + $0x58] sm:$0xff] %v1706_v43   ;;  %1834 = vst [vmem:[%s2194_s4 + $0xd8] sm:$0xff] %v1786_v44   ;;  %v828_v47 = vadd.f32 %v2184_v17, %v827_v45  ;;  %v956_v48 = vadd.f32 %v2184_v17, %v955_v46  ;;  %v829_v49 = vpop.f32.mrb[49].mxu0  ;;  %v957_v50 = vpop.f32.mrb[49].mxu1 }
 0x17b   : > { %v830_v51 = vpop.f32.mrb[50].mxu0  ;;  %v958_v52 = vpop.f32.mrb[50].mxu1 }
 0x17c   : > { %v831_v53 = vadd.f32 %v2184_v17, %v830_v51  ;;  %v959_v54 = vadd.f32 %v2184_v17, %v958_v52  ;;  %v832_v55 = vpop.f32.mrb[51].mxu0  ;;  %v960_v56 = vpop.f32.mrb[51].mxu1  ;;  %v1010_v57 = vmax.f32 %v828_v47, 0.0  ;;  %v1042_v58 = vmax.f32 %v956_v48, 0.0 }
 0x17e   : > { %v1011_v59 = vmax.f32 %v831_v53, 0.0  ;;  %v1043_v60 = vmax.f32 %v959_v54, 0.0 }
 0x180   : > { %v1711_v61 = vpack.c.bf16 %v1011_v59, %v1010_v57  ;;  %v1791_v62 = vpack.c.bf16 %v1043_v60, %v1042_v58 }
 0x181   : > { %v835_v63 = vpop.f32.mrb[52].mxu0  ;;  %v963_v0 = vpop.f32.mrb[52].mxu1 }
 0x182   : > { %1819 = vst [vmem:[%s2194_s4 + $0x60] sm:$0xff] %v1711_v61   ;;  %1835 = vst [vmem:[%s2194_s4 + $0xe0] sm:$0xff] %v1791_v62   ;;  %v836_v1 = vadd.f32 %v2184_v17, %v835_v63  ;;  %v964_v2 = vadd.f32 %v2184_v17, %v963_v0  ;;  %v837_v3 = vpop.f32.mrb[53].mxu0  ;;  %v965_v4 = vpop.f32.mrb[53].mxu1 }
 0x183   : > { %v838_v5 = vpop.f32.mrb[54].mxu0  ;;  %v966_v6 = vpop.f32.mrb[54].mxu1 }
 0x184   : > { %v839_v7 = vadd.f32 %v2184_v17, %v838_v5  ;;  %v967_v8 = vadd.f32 %v2184_v17, %v966_v6  ;;  %v840_v9 = vpop.f32.mrb[55].mxu0  ;;  %v968_v10 = vpop.f32.mrb[55].mxu1  ;;  %v1012_v11 = vmax.f32 %v836_v1, 0.0  ;;  %v1044_v12 = vmax.f32 %v964_v2, 0.0 }
 0x186   : > { %v1013_v13 = vmax.f32 %v839_v7, 0.0  ;;  %v1045_v14 = vmax.f32 %v967_v8, 0.0 }
 0x188   : > { %v1716_v15 = vpack.c.bf16 %v1013_v13, %v1012_v11  ;;  %v1796_v16 = vpack.c.bf16 %v1045_v14, %v1044_v12 }
 0x189   : > { %v843_v18 = vpop.f32.mrb[56].mxu0  ;;  %v971_v19 = vpop.f32.mrb[56].mxu1 }
 0x18a   : > { %1820 = vst [vmem:[%s2194_s4 + $0x68] sm:$0xff] %v1716_v15   ;;  %1836 = vst [vmem:[%s2194_s4 + $0xe8] sm:$0xff] %v1796_v16   ;;  %v844_v20 = vadd.f32 %v2184_v17, %v843_v18  ;;  %v972_v21 = vadd.f32 %v2184_v17, %v971_v19  ;;  %v845_v22 = vpop.f32.mrb[57].mxu0  ;;  %v973_v23 = vpop.f32.mrb[57].mxu1 }
 0x18b   : > { %v846_v24 = vpop.f32.mrb[58].mxu0  ;;  %v974_v25 = vpop.f32.mrb[58].mxu1 }
 0x18c   : > { %v847_v26 = vadd.f32 %v2184_v17, %v846_v24  ;;  %v975_v27 = vadd.f32 %v2184_v17, %v974_v25  ;;  %v848_v28 = vpop.f32.mrb[59].mxu0  ;;  %v976_v29 = vpop.f32.mrb[59].mxu1  ;;  %v1014_v30 = vmax.f32 %v844_v20, 0.0  ;;  %v1046_v31 = vmax.f32 %v972_v21, 0.0 }
 0x18e   : > { %v1015_v32 = vmax.f32 %v847_v26, 0.0  ;;  %v1047_v33 = vmax.f32 %v975_v27, 0.0 }
 0x190   : > { %v1721_v34 = vpack.c.bf16 %v1015_v32, %v1014_v30  ;;  %v1801_v35 = vpack.c.bf16 %v1047_v33, %v1046_v31 }
 0x191   : > { %v851_v36 = vpop.f32.mrb[60].mxu0  ;;  %v979_v37 = vpop.f32.mrb[60].mxu1 }
 0x192   : > { %1821 = vst [vmem:[%s2194_s4 + $0x70] sm:$0xff] %v1721_v34   ;;  %1837 = vst [vmem:[%s2194_s4 + $0xf0] sm:$0xff] %v1801_v35   ;;  %v852_v38 = vadd.f32 %v2184_v17, %v851_v36  ;;  %v980_v39 = vadd.f32 %v2184_v17, %v979_v37  ;;  %v853_v40 = vpop.f32.mrb[61].mxu0  ;;  %v981_v41 = vpop.f32.mrb[61].mxu1 }
 0x193   : > { %v854_v42 = vpop.f32.mrb[62].mxu0  ;;  %v982_v43 = vpop.f32.mrb[62].mxu1 }
 0x194   : > { %v855_v44 = vadd.f32 %v2184_v17, %v854_v42  ;;  %v983_v45 = vadd.f32 %v2184_v17, %v982_v43  ;;  %v856_v46 = vpop.f32.mrb[63].mxu0  ;;  %v984_v47 = vpop.f32.mrb[63].mxu1  ;;  %v1016_v48 = vmax.f32 %v852_v38, 0.0  ;;  %v1048_v49 = vmax.f32 %v980_v39, 0.0 }
 0x196   : > { %v1017_v50 = vmax.f32 %v855_v44, 0.0  ;;  %v1049_v51 = vmax.f32 %v983_v45, 0.0 }
 0x198   : > { %v1726_v52 = vpack.c.bf16 %v1017_v50, %v1016_v48  ;;  %v1806_v53 = vpack.c.bf16 %v1049_v51, %v1048_v49 }
 0x19a   : > { %1822 = vst [vmem:[%s2194_s4 + $0x78] sm:$0xff] %v1726_v52   ;;  %1838 = vst [vmem:[%s2194_s4 + $0xf8] sm:$0xff] %v1806_v53  }
 0x19b PF: > { %s13_s12 = sadd.s32 1, %s1998_s12  }
 0x19c   : > { %p10_p4 = scmp.ge.s32.totalorder %s13_s12, 10  }
 0x19e   :  { %12 = sbr.rel (!%p10_p4) target bundleno = 1 (0x1), region = 62 }

// kernel: minkunet_forward.23
= control target key start
LH: loop header
LB: loop body
LE: loop exit
PB: predicated region body
PF: predicated region fallthrough
CT: control target
= control target key end

     0   :  { %s1957_s12 = smov 0   ;;  %s2227_s0 = inlined_call_operand.vmem [shape: bf16[4096,256], index: 0, kind: input, shape index: {}]   ;;  %s2228_s1 = inlined_call_operand.vmem [shape: bf16[256,128], index: 1, kind: input, shape index: {}]   ;;  %s2229_s2 = inlined_call_operand.vmem [shape: f32[1,128], index: 2, kind: input, shape index: {}]   ;;  %s2230_s3 = inlined_call_operand.vmem [shape: bf16[4096,128], index: 3, kind: output, shape index: {}]  }
   0x1 LB: > { %s1362_s13 = sadd.s32 4294967295, %s1934_s12   ;;  %p1366_p0 = scmp.ge.s32.totalorder %s1934_s12, 1  ;;  %s1934_s12 = sphi %s1957_s12, %s13_s12  }
   0x2   : > { %p139_p1 = scmp.lt.s32.totalorder %s1934_s12, 9 }
   0x4   : > { %p140_p2 = pnand %p1366_p0, %p139_p1 }
   0x5   : > { %v1816_v0 = vld [vmem:[%s2228_s1] sm:$0xff] (!%p140_p2)   ;;  %v1936_v1 = vmov (!%p140_p2), 0   ;;  %s1367_s16 = sshll.u32 (!%p140_p2), %s1362_s13, 6  ;;  %v1817_v2 = vld [vmem:[%s2228_s1 + $0x8] sm:$0xff] (!%p140_p2)   ;;  %v1818_v3 = vld [vmem:[%s2228_s1 + $0x10] sm:$0xff] (!%p140_p2)  }
   0x6   : > { %143 = sbr.rel (%p140_p2) target bundleno = 409 (0x199), region = 32  ;;  %697 = vmatprep.subr.bf16.mxu0 (!%p140_p2), %v1936_v1  ;;  %1775 = vmatprep.subr.bf16.mxu1 (!%p140_p2), %v1936_v1  ;;  %p165_p3 = scmp.lt.s32.totalorder (!%p140_p2), %s1367_s16, 511  ;;  %v1819_v4 = vld [vmem:[%s2228_s1 + $0x18] sm:$0xff] (!%p140_p2)   ;;  %v1820_v5 = vld [vmem:[%s2228_s1 + $0x20] sm:$0xff] (!%p140_p2)   ;;  %v1821_v7 = vld [vmem:[%s2228_s1 + $0x28] sm:$0xff] (!%p140_p2)  }
   0x7   : > { %698 = vmatpush1.bf16.msra.mxu0 (!%p140_p2), %v1816_v0  ;;  %1791 = vmatpush1.bf16.msra.mxu1 (!%p140_p2), %v1816_v0  ;;  %v1822_v9 = vld [vmem:[%s2228_s1 + $0x30] sm:$0xff] (!%p140_p2)   ;;  %v1823_v10 = vld [vmem:[%s2228_s1 + $0x38] sm:$0xff] (!%p140_p2)   ;;  %v1824_v11 = vld [vmem:[%s2228_s1 + $0x40] sm:$0xff] (!%p140_p2)  }
   0x8   : > { %699 = vmatprep.subr.bf16.mxu0 (!%p140_p2), %v1936_v1  ;;  %1776 = vmatprep.subr.bf16.mxu1 (!%p140_p2), %v1936_v1  ;;  %v1825_v12 = vld [vmem:[%s2228_s1 + $0x48] sm:$0xff] (!%p140_p2)   ;;  %v1826_v13 = vld [vmem:[%s2228_s1 + $0x50] sm:$0xff] (!%p140_p2)   ;;  %v1827_v14 = vld [vmem:[%s2228_s1 + $0x58] sm:$0xff] (!%p140_p2)  }
   0x9   : > { %v1828_v15 = vld [vmem:[%s2228_s1 + $0x60] sm:$0xff] (!%p140_p2)   ;;  %v1829_v16 = vld [vmem:[%s2228_s1 + $0x68] sm:$0xff] (!%p140_p2)   ;;  %v1830_v17 = vld [vmem:[%s2228_s1 + $0x70] sm:$0xff] (!%p140_p2)  }
   0xa   : > { %v1831_v18 = vld [vmem:[%s2228_s1 + $0x78] sm:$0xff] (!%p140_p2)  }
   0xb   : > { %700 = vmatpush1.bf16.msra.mxu0 (!%p140_p2), %v1817_v2  ;;  %1792 = vmatpush1.bf16.msra.mxu1 (!%p140_p2), %v1817_v2 }
   0xc   : > { %701 = vmatprep.subr.bf16.mxu0 (!%p140_p2), %v1936_v1  ;;  %1777 = vmatprep.subr.bf16.mxu1 (!%p140_p2), %v1936_v1 }
   0xd   : > { %s2232_s16 = smov (!%p165_p3, %s1367_s16), 511 }
   0xe   : > { %s1519_s23 = sshll.u32 %s2232_s16, 3  ;;  %s1371_s29 = sshll.u32 %s2232_s16, 2 }
   0xf   : > { %702 = vmatpush1.bf16.msra.mxu0 %v1818_v3  ;;  %1793 = vmatpush1.bf16.msra.mxu1 %v1818_v3  ;;  %s1994_s28 = scalar_lea.vmem %s2227_s0, %s1519_s23  ;;  %s2130_s4 = scalar_lea.vmem %s2230_s3, %s1371_s29 }
  0x10   : > { %703 = vmatprep.subr.bf16.mxu0 %v1936_v1  ;;  %1778 = vmatprep.subr.bf16.mxu1 %v1936_v1  ;;  %v1834_v6 = vld [vmem:[%s1994_s28 + $0x4] ss:$8 sps:$4 sm:$0xff]   ;;  %v1832_v19 = vld [vmem:[%s1994_s28] ss:$8 sps:$4 sm:$0xff]   ;;  %v1838_v21 = vld [vmem:[%s1994_s28 + $0x14] ss:$8 sps:$4 sm:$0xff]  }
  0x11   : > { %v1837_v8 = vld [vmem:[%s1994_s28 + $0x104] ss:$8 sps:$4 sm:$0xff]   ;;  %729 = vmatprep.mubr.bf16.mxu0 %v1834_v6  ;;  %v1835_v20 = vld [vmem:[%s1994_s28 + $0x100] ss:$8 sps:$4 sm:$0xff]   ;;  %v1840_v22 = vld [vmem:[%s1994_s28 + $0x114] ss:$8 sps:$4 sm:$0xff]  }
  0x12   : > { %857 = vmatprep.mubr.bf16.mxu1 %v1837_v8  ;;  %v1842_v23 = vld [vmem:[%s1994_s28 + $0x10] ss:$8 sps:$4 sm:$0xff]   ;;  %v1844_v25 = vld [vmem:[%s1994_s28 + $0x24] ss:$8 sps:$4 sm:$0xff]   ;;  %v1848_v27 = vld [vmem:[%s1994_s28 + $0x20] ss:$8 sps:$4 sm:$0xff]  }
  0x13   : > { %704 = vmatpush1.bf16.msra.mxu0 %v1819_v4  ;;  %1794 = vmatpush1.bf16.msra.mxu1 %v1819_v4  ;;  %v1843_v24 = vld [vmem:[%s1994_s28 + $0x110] ss:$8 sps:$4 sm:$0xff]   ;;  %v1846_v26 = vld [vmem:[%s1994_s28 + $0x124] ss:$8 sps:$4 sm:$0xff]   ;;  %v1849_v28 = vld [vmem:[%s1994_s28 + $0x120] ss:$8 sps:$4 sm:$0xff]  }
  0x14   : > { %705 = vmatprep.subr.bf16.mxu0 %v1936_v1  ;;  %1779 = vmatprep.subr.bf16.mxu1 %v1936_v1  ;;  %v1850_v29 = vld [vmem:[%s1994_s28 + $0x34] ss:$8 sps:$4 sm:$0xff]   ;;  %v1854_v31 = vld [vmem:[%s1994_s28 + $0x30] ss:$8 sps:$4 sm:$0xff]   ;;  %v1856_v33 = vld [vmem:[%s1994_s28 + $0x44] ss:$8 sps:$4 sm:$0xff]  }
  0x15   : > { %v1852_v30 = vld [vmem:[%s1994_s28 + $0x134] ss:$8 sps:$4 sm:$0xff]   ;;  %v1855_v32 = vld [vmem:[%s1994_s28 + $0x130] ss:$8 sps:$4 sm:$0xff]   ;;  %v1858_v34 = vld [vmem:[%s1994_s28 + $0x144] ss:$8 sps:$4 sm:$0xff]  }
  0x16   : > { %v1860_v35 = vld [vmem:[%s1994_s28 + $0x40] ss:$8 sps:$4 sm:$0xff]   ;;  %v1862_v37 = vld [vmem:[%s1994_s28 + $0x54] ss:$8 sps:$4 sm:$0xff]   ;;  %v1866_v39 = vld [vmem:[%s1994_s28 + $0x50] ss:$8 sps:$4 sm:$0xff]  }
  0x17   : > { %706 = vmatpush1.bf16.msra.mxu0 %v1820_v5  ;;  %1795 = vmatpush1.bf16.msra.mxu1 %v1820_v5  ;;  %v1861_v36 = vld [vmem:[%s1994_s28 + $0x140] ss:$8 sps:$4 sm:$0xff]   ;;  %v1864_v38 = vld [vmem:[%s1994_s28 + $0x154] ss:$8 sps:$4 sm:$0xff]   ;;  %v1867_v40 = vld [vmem:[%s1994_s28 + $0x150] ss:$8 sps:$4 sm:$0xff]  }
  0x18   : > { %707 = vmatprep.subr.bf16.mxu0 %v1936_v1  ;;  %1780 = vmatprep.subr.bf16.mxu1 %v1936_v1  ;;  %v1868_v41 = vld [vmem:[%s1994_s28 + $0x64] ss:$8 sps:$4 sm:$0xff]   ;;  %v1872_v43 = vld [vmem:[%s1994_s28 + $0x60] ss:$8 sps:$4 sm:$0xff]   ;;  %v1874_v45 = vld [vmem:[%s1994_s28 + $0x74] ss:$8 sps:$4 sm:$0xff]  }
  0x19   : > { %v1870_v42 = vld [vmem:[%s1994_s28 + $0x164] ss:$8 sps:$4 sm:$0xff]   ;;  %v1873_v44 = vld [vmem:[%s1994_s28 + $0x160] ss:$8 sps:$4 sm:$0xff]   ;;  %v1876_v46 = vld [vmem:[%s1994_s28 + $0x174] ss:$8 sps:$4 sm:$0xff]  }
  0x1a   : > { %v1878_v47 = vld [vmem:[%s1994_s28 + $0x70] ss:$8 sps:$4 sm:$0xff]   ;;  %v1880_v49 = vld [vmem:[%s1994_s28 + $0x84] ss:$8 sps:$4 sm:$0xff]   ;;  %v1884_v51 = vld [vmem:[%s1994_s28 + $0x80] ss:$8 sps:$4 sm:$0xff]  }
  0x1b   : > { %708 = vmatpush1.bf16.msra.mxu0 %v1821_v7  ;;  %1796 = vmatpush1.bf16.msra.mxu1 %v1821_v7  ;;  %v1879_v48 = vld [vmem:[%s1994_s28 + $0x170] ss:$8 sps:$4 sm:$0xff]   ;;  %v1882_v50 = vld [vmem:[%s1994_s28 + $0x184] ss:$8 sps:$4 sm:$0xff]   ;;  %v1885_v52 = vld [vmem:[%s1994_s28 + $0x180] ss:$8 sps:$4 sm:$0xff]  }
  0x1c   : > { %709 = vmatprep.subr.bf16.mxu0 %v1936_v1  ;;  %1781 = vmatprep.subr.bf16.mxu1 %v1936_v1  ;;  %v1886_v53 = vld [vmem:[%s1994_s28 + $0x94] ss:$8 sps:$4 sm:$0xff]   ;;  %v1890_v55 = vld [vmem:[%s1994_s28 + $0x90] ss:$8 sps:$4 sm:$0xff]   ;;  %v1892_v57 = vld [vmem:[%s1994_s28 + $0xa4] ss:$8 sps:$4 sm:$0xff]  }
  0x1d   : > { %v1888_v54 = vld [vmem:[%s1994_s28 + $0x194] ss:$8 sps:$4 sm:$0xff]   ;;  %v1891_v56 = vld [vmem:[%s1994_s28 + $0x190] ss:$8 sps:$4 sm:$0xff]   ;;  %v1894_v58 = vld [vmem:[%s1994_s28 + $0x1a4] ss:$8 sps:$4 sm:$0xff]  }
  0x1e   : > { %v1896_v59 = vld [vmem:[%s1994_s28 + $0xa0] ss:$8 sps:$4 sm:$0xff]   ;;  %v1898_v61 = vld [vmem:[%s1994_s28 + $0xb4] ss:$8 sps:$4 sm:$0xff]   ;;  %v1902_v63 = vld [vmem:[%s1994_s28 + $0xb0] ss:$8 sps:$4 sm:$0xff]  }
  0x1f   : > { %710 = vmatpush1.bf16.msra.mxu0 %v1822_v9  ;;  %1797 = vmatpush1.bf16.msra.mxu1 %v1822_v9  ;;  %v1897_v60 = vld [vmem:[%s1994_s28 + $0x1a0] ss:$8 sps:$4 sm:$0xff]   ;;  %v1900_v62 = vld [vmem:[%s1994_s28 + $0x1b4] ss:$8 sps:$4 sm:$0xff]   ;;  %v1903_v0 = vld [vmem:[%s1994_s28 + $0x1b0] ss:$8 sps:$4 sm:$0xff]  }
  0x20   : > { %711 = vmatprep.subr.bf16.mxu0 %v1936_v1  ;;  %1782 = vmatprep.subr.bf16.mxu1 %v1936_v1  ;;  %v1906_v2 = vld [vmem:[%s1994_s28 + $0x1c4] ss:$8 sps:$4 sm:$0xff]   ;;  %v1908_v3 = vld [vmem:[%s1994_s28 + $0xc0] ss:$8 sps:$4 sm:$0xff]   ;;  %v1910_v5 = vld [vmem:[%s1994_s28 + $0xd4] ss:$8 sps:$4 sm:$0xff]  }
  0x21   : > { %v1909_v4 = vld [vmem:[%s1994_s28 + $0x1c0] ss:$8 sps:$4 sm:$0xff]   ;;  %v1912_v6 = vld [vmem:[%s1994_s28 + $0x1d4] ss:$8 sps:$4 sm:$0xff]   ;;  %v1914_v7 = vld [vmem:[%s1994_s28 + $0xd0] ss:$8 sps:$4 sm:$0xff]  }
  0x22   : > { %v1915_v8 = vld [vmem:[%s1994_s28 + $0x1d0] ss:$8 sps:$4 sm:$0xff]   ;;  %v1916_v9 = vld [vmem:[%s1994_s28 + $0xe4] ss:$8 sps:$4 sm:$0xff]  }
  0x23   : > { %712 = vmatpush1.bf16.msra.mxu0 %v1823_v10  ;;  %1798 = vmatpush1.bf16.msra.mxu1 %v1823_v10  ;;  %v1918_v10 = vld [vmem:[%s1994_s28 + $0x1e4] ss:$8 sps:$4 sm:$0xff]  }
  0x24   : > { %713 = vmatprep.subr.bf16.mxu0 %v1936_v1  ;;  %1783 = vmatprep.subr.bf16.mxu1 %v1936_v1 }
  0x27   : > { %714 = vmatpush1.bf16.msra.mxu0 %v1824_v11  ;;  %1799 = vmatpush1.bf16.msra.mxu1 %v1824_v11  ;;  %v1920_v11 = vld [vmem:[%s1994_s28 + $0xe0] ss:$8 sps:$4 sm:$0xff]  }
  0x28   : > { %715 = vmatprep.subr.bf16.mxu0 %v1936_v1  ;;  %1784 = vmatprep.subr.bf16.mxu1 %v1936_v1 }
  0x2b   : > { %716 = vmatpush1.bf16.msra.mxu0 %v1825_v12  ;;  %1800 = vmatpush1.bf16.msra.mxu1 %v1825_v12  ;;  %v1921_v12 = vld [vmem:[%s1994_s28 + $0x1e0] ss:$8 sps:$4 sm:$0xff]  }
  0x2c   : > { %717 = vmatprep.subr.bf16.mxu0 %v1936_v1  ;;  %1785 = vmatprep.subr.bf16.mxu1 %v1936_v1 }
  0x2f   : > { %718 = vmatpush1.bf16.msra.mxu0 %v1826_v13  ;;  %1801 = vmatpush1.bf16.msra.mxu1 %v1826_v13  ;;  %v1922_v13 = vld [vmem:[%s1994_s28 + $0xf4] ss:$8 sps:$4 sm:$0xff]  }
  0x30   : > { %719 = vmatprep.subr.bf16.mxu0 %v1936_v1  ;;  %1786 = vmatprep.subr.bf16.mxu1 %v1936_v1 }
  0x33   : > { %720 = vmatpush1.bf16.msra.mxu0 %v1827_v14  ;;  %1802 = vmatpush1.bf16.msra.mxu1 %v1827_v14  ;;  %v1924_v14 = vld [vmem:[%s1994_s28 + $0x1f4] ss:$8 sps:$4 sm:$0xff]  }
  0x34   : > { %721 = vmatprep.subr.bf16.mxu0 %v1936_v1  ;;  %1787 = vmatprep.subr.bf16.mxu1 %v1936_v1 }
  0x37   : > { %722 = vmatpush1.bf16.msra.mxu0 %v1828_v15  ;;  %1803 = vmatpush1.bf16.msra.mxu1 %v1828_v15  ;;  %v1926_v15 = vld [vmem:[%s1994_s28 + $0xf0] ss:$8 sps:$4 sm:$0xff]  }
  0x38   : > { %723 = vmatprep.subr.bf16.mxu0 %v1936_v1  ;;  %1788 = vmatprep.subr.bf16.mxu1 %v1936_v1 }
  0x3b   : > { %724 = vmatpush1.bf16.msra.mxu0 %v1829_v16  ;;  %1804 = vmatpush1.bf16.msra.mxu1 %v1829_v16  ;;  %v1927_v16 = vld [vmem:[%s1994_s28 + $0x1f0] ss:$8 sps:$4 sm:$0xff]  }
  0x3c   : > { %725 = vmatprep.subr.bf16.mxu0 %v1936_v1  ;;  %1789 = vmatprep.subr.bf16.mxu1 %v1936_v1 }
  0x3f   : > { %726 = vmatpush1.bf16.msra.mxu0 %v1830_v17  ;;  %1805 = vmatpush1.bf16.msra.mxu1 %v1830_v17  ;;  %v2120_v17 = vld [vmem:[%s2229_s2] ss:$0 sm:$0xff] }
  0x40   : > { %727 = vmatprep.subr.bf16.mxu0 %v1936_v1  ;;  %1790 = vmatprep.subr.bf16.mxu1 %v1936_v1  ;;  %v1904_v1 = vld [vmem:[%s1994_s28 + $0xc4] ss:$8 sps:$4 sm:$0xff]  }
  0x43   : > { %728 = vmatpush1.bf16.msra.mxu0 %v1831_v18  ;;  %1806 = vmatpush1.bf16.msra.mxu1 %v1831_v18 }
  0x46   : > { %730 = vmatmul.mubr.bf16.vlgmr.msra.gmra.mrb[0].mxu0 %v1832_v19  ;;  %858 = vmatmul.mubr.bf16.vlgmr.msra.gmra.mrb[0].mxu1 %v1835_v20 }
  0x47   : > { %737 = vmatprep.mubr.bf16.mxu0 %v1838_v21  ;;  %865 = vmatprep.mubr.bf16.mxu1 %v1840_v22 }
  0x4e   : > { %738 = vmatmul.mubr.bf16.gmra.mrb[4].mxu0 %v1842_v23  ;;  %866 = vmatmul.mubr.bf16.gmra.mrb[4].mxu1 %v1843_v24 }
  0x4f   : > { %745 = vmatprep.mubr.bf16.mxu0 %v1844_v25  ;;  %873 = vmatprep.mubr.bf16.mxu1 %v1846_v26 }
  0x56   : > { %746 = vmatmul.mubr.bf16.gmra.mrb[8].mxu0 %v1848_v27  ;;  %874 = vmatmul.mubr.bf16.gmra.mrb[8].mxu1 %v1849_v28 }
  0x57   : > { %753 = vmatprep.mubr.bf16.mxu0 %v1850_v29  ;;  %881 = vmatprep.mubr.bf16.mxu1 %v1852_v30 }
  0x5e   : > { %754 = vmatmul.mubr.bf16.gmra.mrb[12].mxu0 %v1854_v31  ;;  %882 = vmatmul.mubr.bf16.gmra.mrb[12].mxu1 %v1855_v32 }
  0x5f   : > { %761 = vmatprep.mubr.bf16.mxu0 %v1856_v33  ;;  %889 = vmatprep.mubr.bf16.mxu1 %v1858_v34 }
  0x66   : > { %762 = vmatmul.mubr.bf16.gmra.mrb[16].mxu0 %v1860_v35  ;;  %890 = vmatmul.mubr.bf16.gmra.mrb[16].mxu1 %v1861_v36 }
  0x67   : > { %769 = vmatprep.mubr.bf16.mxu0 %v1862_v37  ;;  %897 = vmatprep.mubr.bf16.mxu1 %v1864_v38 }
  0x6e   : > { %770 = vmatmul.mubr.bf16.gmra.mrb[20].mxu0 %v1866_v39  ;;  %898 = vmatmul.mubr.bf16.gmra.mrb[20].mxu1 %v1867_v40 }
  0x6f   : > { %777 = vmatprep.mubr.bf16.mxu0 %v1868_v41  ;;  %905 = vmatprep.mubr.bf16.mxu1 %v1870_v42 }
  0x76   : > { %778 = vmatmul.mubr.bf16.gmra.mrb[24].mxu0 %v1872_v43  ;;  %906 = vmatmul.mubr.bf16.gmra.mrb[24].mxu1 %v1873_v44 }
  0x77   : > { %785 = vmatprep.mubr.bf16.mxu0 %v1874_v45  ;;  %913 = vmatprep.mubr.bf16.mxu1 %v1876_v46 }
  0x7e   : > { %786 = vmatmul.mubr.bf16.gmra.mrb[28].mxu0 %v1878_v47  ;;  %914 = vmatmul.mubr.bf16.gmra.mrb[28].mxu1 %v1879_v48 }
  0x7f   : > { %793 = vmatprep.mubr.bf16.mxu0 %v1880_v49  ;;  %921 = vmatprep.mubr.bf16.mxu1 %v1882_v50 }
  0x86   : > { %794 = vmatmul.mubr.bf16.gmra.mrb[32].mxu0 %v1884_v51  ;;  %922 = vmatmul.mubr.bf16.gmra.mrb[32].mxu1 %v1885_v52 }
  0x87   : > { %801 = vmatprep.mubr.bf16.mxu0 %v1886_v53  ;;  %929 = vmatprep.mubr.bf16.mxu1 %v1888_v54 }
  0x8e   : > { %802 = vmatmul.mubr.bf16.gmra.mrb[36].mxu0 %v1890_v55  ;;  %930 = vmatmul.mubr.bf16.gmra.mrb[36].mxu1 %v1891_v56 }
  0x8f   : > { %809 = vmatprep.mubr.bf16.mxu0 %v1892_v57  ;;  %937 = vmatprep.mubr.bf16.mxu1 %v1894_v58 }
  0x96   : > { %810 = vmatmul.mubr.bf16.gmra.mrb[40].mxu0 %v1896_v59  ;;  %938 = vmatmul.mubr.bf16.gmra.mrb[40].mxu1 %v1897_v60 }
  0x97   : > { %817 = vmatprep.mubr.bf16.mxu0 %v1898_v61  ;;  %945 = vmatprep.mubr.bf16.mxu1 %v1900_v62 }
  0x9e   : > { %818 = vmatmul.mubr.bf16.gmra.mrb[44].mxu0 %v1902_v63  ;;  %946 = vmatmul.mubr.bf16.gmra.mrb[44].mxu1 %v1903_v0 }
  0x9f   : > { %825 = vmatprep.mubr.bf16.mxu0 %v1904_v1  ;;  %953 = vmatprep.mubr.bf16.mxu1 %v1906_v2 }
  0xa6   : > { %826 = vmatmul.mubr.bf16.gmra.mrb[48].mxu0 %v1908_v3  ;;  %954 = vmatmul.mubr.bf16.gmra.mrb[48].mxu1 %v1909_v4 }
  0xa7   : > { %833 = vmatprep.mubr.bf16.mxu0 %v1910_v5  ;;  %961 = vmatprep.mubr.bf16.mxu1 %v1912_v6 }
  0xae   : > { %834 = vmatmul.mubr.bf16.gmra.mrb[52].mxu0 %v1914_v7  ;;  %962 = vmatmul.mubr.bf16.gmra.mrb[52].mxu1 %v1915_v8 }
  0xaf   : > { %841 = vmatprep.mubr.bf16.mxu0 %v1916_v9  ;;  %969 = vmatprep.mubr.bf16.mxu1 %v1918_v10 }
  0xb6   : > { %842 = vmatmul.mubr.bf16.gmra.mrb[56].mxu0 %v1920_v11  ;;  %970 = vmatmul.mubr.bf16.gmra.mrb[56].mxu1 %v1921_v12 }
  0xb7   : > { %849 = vmatprep.mubr.bf16.mxu0 %v1922_v13  ;;  %977 = vmatprep.mubr.bf16.mxu1 %v1924_v14 }
  0xbe   : > { %850 = vmatmul.mubr.bf16.gmra.mrb[60].mxu0 %v1926_v15  ;;  %978 = vmatmul.mubr.bf16.gmra.mrb[60].mxu1 %v1927_v16 }
 0x119   : > { %v731_v18 = vpop.f32.mrb[0].mxu0  ;;  %v859_v19 = vpop.f32.mrb[0].mxu1 }
 0x11a   : > { %v733_v20 = vpop.f32.mrb[1].mxu0  ;;  %v861_v21 = vpop.f32.mrb[1].mxu1  ;;  %v732_v24 = vadd.f32 %v2120_v17, %v731_v18  ;;  %v860_v25 = vadd.f32 %v2120_v17, %v859_v19 }
 0x11b   : > { %v734_v22 = vpop.f32.mrb[2].mxu0  ;;  %v862_v23 = vpop.f32.mrb[2].mxu1 }
 0x11c   : > { %v735_v26 = vadd.f32 %v2120_v17, %v734_v22  ;;  %v863_v27 = vadd.f32 %v2120_v17, %v862_v23  ;;  %v736_v28 = vpop.f32.mrb[3].mxu0  ;;  %v864_v29 = vpop.f32.mrb[3].mxu1 }
 0x11e   : > { %v1587_v30 = vpack.c.bf16 %v735_v26, %v732_v24  ;;  %v1667_v31 = vpack.c.bf16 %v863_v27, %v860_v25 }
 0x120   : > { %1588 = vst [vmem:[%s2130_s4] sm:$0xff] %v1587_v30   ;;  %1759 = vst [vmem:[%s2130_s4 + $0x80] sm:$0xff] %v1667_v31  }
 0x121   : > { %v739_v32 = vpop.f32.mrb[4].mxu0  ;;  %v867_v33 = vpop.f32.mrb[4].mxu1 }
 0x122   : > { %v741_v34 = vpop.f32.mrb[5].mxu0  ;;  %v869_v35 = vpop.f32.mrb[5].mxu1  ;;  %v740_v38 = vadd.f32 %v2120_v17, %v739_v32  ;;  %v868_v39 = vadd.f32 %v2120_v17, %v867_v33 }
 0x123   : > { %v742_v36 = vpop.f32.mrb[6].mxu0  ;;  %v870_v37 = vpop.f32.mrb[6].mxu1 }
 0x124   : > { %v743_v40 = vadd.f32 %v2120_v17, %v742_v36  ;;  %v871_v41 = vadd.f32 %v2120_v17, %v870_v37  ;;  %v744_v42 = vpop.f32.mrb[7].mxu0  ;;  %v872_v43 = vpop.f32.mrb[7].mxu1 }
 0x126   : > { %v1592_v44 = vpack.c.bf16 %v743_v40, %v740_v38  ;;  %v1672_v45 = vpack.c.bf16 %v871_v41, %v868_v39 }
 0x128   : > { %1744 = vst [vmem:[%s2130_s4 + $0x8] sm:$0xff] %v1592_v44   ;;  %1760 = vst [vmem:[%s2130_s4 + $0x88] sm:$0xff] %v1672_v45  }
 0x129   : > { %v747_v46 = vpop.f32.mrb[8].mxu0  ;;  %v875_v47 = vpop.f32.mrb[8].mxu1 }
 0x12a   : > { %v749_v48 = vpop.f32.mrb[9].mxu0  ;;  %v877_v49 = vpop.f32.mrb[9].mxu1  ;;  %v748_v52 = vadd.f32 %v2120_v17, %v747_v46  ;;  %v876_v53 = vadd.f32 %v2120_v17, %v875_v47 }
 0x12b   : > { %v750_v50 = vpop.f32.mrb[10].mxu0  ;;  %v878_v51 = vpop.f32.mrb[10].mxu1 }
 0x12c   : > { %v751_v54 = vadd.f32 %v2120_v17, %v750_v50  ;;  %v879_v55 = vadd.f32 %v2120_v17, %v878_v51  ;;  %v752_v56 = vpop.f32.mrb[11].mxu0  ;;  %v880_v57 = vpop.f32.mrb[11].mxu1 }
 0x12e   : > { %v1597_v58 = vpack.c.bf16 %v751_v54, %v748_v52  ;;  %v1677_v59 = vpack.c.bf16 %v879_v55, %v876_v53 }
 0x130   : > { %1745 = vst [vmem:[%s2130_s4 + $0x10] sm:$0xff] %v1597_v58   ;;  %1761 = vst [vmem:[%s2130_s4 + $0x90] sm:$0xff] %v1677_v59  }
 0x131   : > { %v755_v60 = vpop.f32.mrb[12].mxu0  ;;  %v883_v61 = vpop.f32.mrb[12].mxu1 }
 0x132   : > { %v757_v62 = vpop.f32.mrb[13].mxu0  ;;  %v885_v63 = vpop.f32.mrb[13].mxu1  ;;  %v756_v2 = vadd.f32 %v2120_v17, %v755_v60  ;;  %v884_v3 = vadd.f32 %v2120_v17, %v883_v61 }
 0x133   : > { %v758_v0 = vpop.f32.mrb[14].mxu0  ;;  %v886_v1 = vpop.f32.mrb[14].mxu1 }
 0x134   : > { %v759_v4 = vadd.f32 %v2120_v17, %v758_v0  ;;  %v887_v5 = vadd.f32 %v2120_v17, %v886_v1  ;;  %v760_v6 = vpop.f32.mrb[15].mxu0  ;;  %v888_v7 = vpop.f32.mrb[15].mxu1 }
 0x136   : > { %v1602_v8 = vpack.c.bf16 %v759_v4, %v756_v2  ;;  %v1682_v9 = vpack.c.bf16 %v887_v5, %v884_v3 }
 0x138   : > { %1746 = vst [vmem:[%s2130_s4 + $0x18] sm:$0xff] %v1602_v8   ;;  %1762 = vst [vmem:[%s2130_s4 + $0x98] sm:$0xff] %v1682_v9  }
 0x139   : > { %v763_v10 = vpop.f32.mrb[16].mxu0  ;;  %v891_v11 = vpop.f32.mrb[16].mxu1 }
 0x13a   : > { %v765_v12 = vpop.f32.mrb[17].mxu0  ;;  %v893_v13 = vpop.f32.mrb[17].mxu1  ;;  %v764_v16 = vadd.f32 %v2120_v17, %v763_v10  ;;  %v892_v18 = vadd.f32 %v2120_v17, %v891_v11 }
 0x13b   : > { %v766_v14 = vpop.f32.mrb[18].mxu0  ;;  %v894_v15 = vpop.f32.mrb[18].mxu1 }
 0x13c   : > { %v767_v19 = vadd.f32 %v2120_v17, %v766_v14  ;;  %v895_v20 = vadd.f32 %v2120_v17, %v894_v15  ;;  %v768_v21 = vpop.f32.mrb[19].mxu0  ;;  %v896_v22 = vpop.f32.mrb[19].mxu1 }
 0x13e   : > { %v1607_v23 = vpack.c.bf16 %v767_v19, %v764_v16  ;;  %v1687_v24 = vpack.c.bf16 %v895_v20, %v892_v18 }
 0x140   : > { %1747 = vst [vmem:[%s2130_s4 + $0x20] sm:$0xff] %v1607_v23   ;;  %1763 = vst [vmem:[%s2130_s4 + $0xa0] sm:$0xff] %v1687_v24  }
 0x141   : > { %v771_v25 = vpop.f32.mrb[20].mxu0  ;;  %v899_v26 = vpop.f32.mrb[20].mxu1 }
 0x142   : > { %v773_v27 = vpop.f32.mrb[21].mxu0  ;;  %v901_v28 = vpop.f32.mrb[21].mxu1  ;;  %v772_v31 = vadd.f32 %v2120_v17, %v771_v25  ;;  %v900_v32 = vadd.f32 %v2120_v17, %v899_v26 }
 0x143   : > { %v774_v29 = vpop.f32.mrb[22].mxu0  ;;  %v902_v30 = vpop.f32.mrb[22].mxu1 }
 0x144   : > { %v775_v33 = vadd.f32 %v2120_v17, %v774_v29  ;;  %v903_v34 = vadd.f32 %v2120_v17, %v902_v30  ;;  %v776_v35 = vpop.f32.mrb[23].mxu0  ;;  %v904_v36 = vpop.f32.mrb[23].mxu1 }
 0x146   : > { %v1612_v37 = vpack.c.bf16 %v775_v33, %v772_v31  ;;  %v1692_v38 = vpack.c.bf16 %v903_v34, %v900_v32 }
 0x148   : > { %1748 = vst [vmem:[%s2130_s4 + $0x28] sm:$0xff] %v1612_v37   ;;  %1764 = vst [vmem:[%s2130_s4 + $0xa8] sm:$0xff] %v1692_v38  }
 0x149   : > { %v779_v39 = vpop.f32.mrb[24].mxu0  ;;  %v907_v40 = vpop.f32.mrb[24].mxu1 }
 0x14a   : > { %v781_v41 = vpop.f32.mrb[25].mxu0  ;;  %v909_v42 = vpop.f32.mrb[25].mxu1  ;;  %v780_v45 = vadd.f32 %v2120_v17, %v779_v39  ;;  %v908_v46 = vadd.f32 %v2120_v17, %v907_v40 }
 0x14b   : > { %v782_v43 = vpop.f32.mrb[26].mxu0  ;;  %v910_v44 = vpop.f32.mrb[26].mxu1 }
 0x14c   : > { %v783_v47 = vadd.f32 %v2120_v17, %v782_v43  ;;  %v911_v48 = vadd.f32 %v2120_v17, %v910_v44  ;;  %v784_v49 = vpop.f32.mrb[27].mxu0  ;;  %v912_v50 = vpop.f32.mrb[27].mxu1 }
 0x14e   : > { %v1617_v51 = vpack.c.bf16 %v783_v47, %v780_v45  ;;  %v1697_v52 = vpack.c.bf16 %v911_v48, %v908_v46 }
 0x150   : > { %1749 = vst [vmem:[%s2130_s4 + $0x30] sm:$0xff] %v1617_v51   ;;  %1765 = vst [vmem:[%s2130_s4 + $0xb0] sm:$0xff] %v1697_v52  }
 0x151   : > { %v787_v53 = vpop.f32.mrb[28].mxu0  ;;  %v915_v54 = vpop.f32.mrb[28].mxu1 }
 0x152   : > { %v789_v55 = vpop.f32.mrb[29].mxu0  ;;  %v917_v56 = vpop.f32.mrb[29].mxu1  ;;  %v788_v59 = vadd.f32 %v2120_v17, %v787_v53  ;;  %v916_v60 = vadd.f32 %v2120_v17, %v915_v54 }
 0x153   : > { %v790_v57 = vpop.f32.mrb[30].mxu0  ;;  %v918_v58 = vpop.f32.mrb[30].mxu1 }
 0x154   : > { %v791_v61 = vadd.f32 %v2120_v17, %v790_v57  ;;  %v919_v62 = vadd.f32 %v2120_v17, %v918_v58  ;;  %v792_v63 = vpop.f32.mrb[31].mxu0  ;;  %v920_v0 = vpop.f32.mrb[31].mxu1 }
 0x156   : > { %v1622_v1 = vpack.c.bf16 %v791_v61, %v788_v59  ;;  %v1702_v2 = vpack.c.bf16 %v919_v62, %v916_v60 }
 0x158   : > { %1750 = vst [vmem:[%s2130_s4 + $0x38] sm:$0xff] %v1622_v1   ;;  %1766 = vst [vmem:[%s2130_s4 + $0xb8] sm:$0xff] %v1702_v2  }
 0x159   : > { %v795_v3 = vpop.f32.mrb[32].mxu0  ;;  %v923_v4 = vpop.f32.mrb[32].mxu1 }
 0x15a   : > { %v797_v5 = vpop.f32.mrb[33].mxu0  ;;  %v925_v6 = vpop.f32.mrb[33].mxu1  ;;  %v796_v9 = vadd.f32 %v2120_v17, %v795_v3  ;;  %v924_v10 = vadd.f32 %v2120_v17, %v923_v4 }
 0x15b   : > { %v798_v7 = vpop.f32.mrb[34].mxu0  ;;  %v926_v8 = vpop.f32.mrb[34].mxu1 }
 0x15c   : > { %v799_v11 = vadd.f32 %v2120_v17, %v798_v7  ;;  %v927_v12 = vadd.f32 %v2120_v17, %v926_v8  ;;  %v800_v13 = vpop.f32.mrb[35].mxu0  ;;  %v928_v14 = vpop.f32.mrb[35].mxu1 }
 0x15e   : > { %v1627_v15 = vpack.c.bf16 %v799_v11, %v796_v9  ;;  %v1707_v16 = vpack.c.bf16 %v927_v12, %v924_v10 }
 0x160   : > { %1751 = vst [vmem:[%s2130_s4 + $0x40] sm:$0xff] %v1627_v15   ;;  %1767 = vst [vmem:[%s2130_s4 + $0xc0] sm:$0xff] %v1707_v16  }
 0x161   : > { %v803_v18 = vpop.f32.mrb[36].mxu0  ;;  %v931_v19 = vpop.f32.mrb[36].mxu1 }
 0x162   : > { %v805_v20 = vpop.f32.mrb[37].mxu0  ;;  %v933_v21 = vpop.f32.mrb[37].mxu1  ;;  %v804_v24 = vadd.f32 %v2120_v17, %v803_v18  ;;  %v932_v25 = vadd.f32 %v2120_v17, %v931_v19 }
 0x163   : > { %v806_v22 = vpop.f32.mrb[38].mxu0  ;;  %v934_v23 = vpop.f32.mrb[38].mxu1 }
 0x164   : > { %v807_v26 = vadd.f32 %v2120_v17, %v806_v22  ;;  %v935_v27 = vadd.f32 %v2120_v17, %v934_v23  ;;  %v808_v28 = vpop.f32.mrb[39].mxu0  ;;  %v936_v29 = vpop.f32.mrb[39].mxu1 }
 0x166   : > { %v1632_v30 = vpack.c.bf16 %v807_v26, %v804_v24  ;;  %v1712_v31 = vpack.c.bf16 %v935_v27, %v932_v25 }
 0x168   : > { %1752 = vst [vmem:[%s2130_s4 + $0x48] sm:$0xff] %v1632_v30   ;;  %1768 = vst [vmem:[%s2130_s4 + $0xc8] sm:$0xff] %v1712_v31  }
 0x169   : > { %v811_v32 = vpop.f32.mrb[40].mxu0  ;;  %v939_v33 = vpop.f32.mrb[40].mxu1 }
 0x16a   : > { %v813_v34 = vpop.f32.mrb[41].mxu0  ;;  %v941_v35 = vpop.f32.mrb[41].mxu1  ;;  %v812_v38 = vadd.f32 %v2120_v17, %v811_v32  ;;  %v940_v39 = vadd.f32 %v2120_v17, %v939_v33 }
 0x16b   : > { %v814_v36 = vpop.f32.mrb[42].mxu0  ;;  %v942_v37 = vpop.f32.mrb[42].mxu1 }
 0x16c   : > { %v815_v40 = vadd.f32 %v2120_v17, %v814_v36  ;;  %v943_v41 = vadd.f32 %v2120_v17, %v942_v37  ;;  %v816_v42 = vpop.f32.mrb[43].mxu0  ;;  %v944_v43 = vpop.f32.mrb[43].mxu1 }
 0x16e   : > { %v1637_v44 = vpack.c.bf16 %v815_v40, %v812_v38  ;;  %v1717_v45 = vpack.c.bf16 %v943_v41, %v940_v39 }
 0x170   : > { %1753 = vst [vmem:[%s2130_s4 + $0x50] sm:$0xff] %v1637_v44   ;;  %1769 = vst [vmem:[%s2130_s4 + $0xd0] sm:$0xff] %v1717_v45  }
 0x171   : > { %v819_v46 = vpop.f32.mrb[44].mxu0  ;;  %v947_v47 = vpop.f32.mrb[44].mxu1 }
 0x172   : > { %v821_v48 = vpop.f32.mrb[45].mxu0  ;;  %v949_v49 = vpop.f32.mrb[45].mxu1  ;;  %v820_v52 = vadd.f32 %v2120_v17, %v819_v46  ;;  %v948_v53 = vadd.f32 %v2120_v17, %v947_v47 }
 0x173   : > { %v822_v50 = vpop.f32.mrb[46].mxu0  ;;  %v950_v51 = vpop.f32.mrb[46].mxu1 }
 0x174   : > { %v823_v54 = vadd.f32 %v2120_v17, %v822_v50  ;;  %v951_v55 = vadd.f32 %v2120_v17, %v950_v51  ;;  %v824_v56 = vpop.f32.mrb[47].mxu0  ;;  %v952_v57 = vpop.f32.mrb[47].mxu1 }
 0x176   : > { %v1642_v58 = vpack.c.bf16 %v823_v54, %v820_v52  ;;  %v1722_v59 = vpack.c.bf16 %v951_v55, %v948_v53 }
 0x178   : > { %1754 = vst [vmem:[%s2130_s4 + $0x58] sm:$0xff] %v1642_v58   ;;  %1770 = vst [vmem:[%s2130_s4 + $0xd8] sm:$0xff] %v1722_v59  }
 0x179   : > { %v827_v60 = vpop.f32.mrb[48].mxu0  ;;  %v955_v61 = vpop.f32.mrb[48].mxu1 }
 0x17a   : > { %v829_v62 = vpop.f32.mrb[49].mxu0  ;;  %v957_v63 = vpop.f32.mrb[49].mxu1  ;;  %v828_v2 = vadd.f32 %v2120_v17, %v827_v60  ;;  %v956_v3 = vadd.f32 %v2120_v17, %v955_v61 }
 0x17b   : > { %v830_v0 = vpop.f32.mrb[50].mxu0  ;;  %v958_v1 = vpop.f32.mrb[50].mxu1 }
 0x17c   : > { %v831_v4 = vadd.f32 %v2120_v17, %v830_v0  ;;  %v959_v5 = vadd.f32 %v2120_v17, %v958_v1  ;;  %v832_v6 = vpop.f32.mrb[51].mxu0  ;;  %v960_v7 = vpop.f32.mrb[51].mxu1 }
 0x17e   : > { %v1647_v8 = vpack.c.bf16 %v831_v4, %v828_v2  ;;  %v1727_v9 = vpack.c.bf16 %v959_v5, %v956_v3 }
 0x180   : > { %1755 = vst [vmem:[%s2130_s4 + $0x60] sm:$0xff] %v1647_v8   ;;  %1771 = vst [vmem:[%s2130_s4 + $0xe0] sm:$0xff] %v1727_v9  }
 0x181   : > { %v835_v10 = vpop.f32.mrb[52].mxu0  ;;  %v963_v11 = vpop.f32.mrb[52].mxu1 }
 0x182   : > { %v837_v12 = vpop.f32.mrb[53].mxu0  ;;  %v965_v13 = vpop.f32.mrb[53].mxu1  ;;  %v836_v16 = vadd.f32 %v2120_v17, %v835_v10  ;;  %v964_v18 = vadd.f32 %v2120_v17, %v963_v11 }
 0x183   : > { %v838_v14 = vpop.f32.mrb[54].mxu0  ;;  %v966_v15 = vpop.f32.mrb[54].mxu1 }
 0x184   : > { %v839_v19 = vadd.f32 %v2120_v17, %v838_v14  ;;  %v967_v20 = vadd.f32 %v2120_v17, %v966_v15  ;;  %v840_v21 = vpop.f32.mrb[55].mxu0  ;;  %v968_v22 = vpop.f32.mrb[55].mxu1 }
 0x186   : > { %v1652_v23 = vpack.c.bf16 %v839_v19, %v836_v16  ;;  %v1732_v24 = vpack.c.bf16 %v967_v20, %v964_v18 }
 0x188   : > { %1756 = vst [vmem:[%s2130_s4 + $0x68] sm:$0xff] %v1652_v23   ;;  %1772 = vst [vmem:[%s2130_s4 + $0xe8] sm:$0xff] %v1732_v24  }
 0x189   : > { %v843_v25 = vpop.f32.mrb[56].mxu0  ;;  %v971_v26 = vpop.f32.mrb[56].mxu1 }
 0x18a   : > { %v845_v27 = vpop.f32.mrb[57].mxu0  ;;  %v973_v28 = vpop.f32.mrb[57].mxu1  ;;  %v844_v31 = vadd.f32 %v2120_v17, %v843_v25  ;;  %v972_v32 = vadd.f32 %v2120_v17, %v971_v26 }
 0x18b   : > { %v846_v29 = vpop.f32.mrb[58].mxu0  ;;  %v974_v30 = vpop.f32.mrb[58].mxu1 }
 0x18c   : > { %v847_v33 = vadd.f32 %v2120_v17, %v846_v29  ;;  %v975_v34 = vadd.f32 %v2120_v17, %v974_v30  ;;  %v848_v35 = vpop.f32.mrb[59].mxu0  ;;  %v976_v36 = vpop.f32.mrb[59].mxu1 }
 0x18e   : > { %v1657_v37 = vpack.c.bf16 %v847_v33, %v844_v31  ;;  %v1737_v38 = vpack.c.bf16 %v975_v34, %v972_v32 }
 0x190   : > { %1757 = vst [vmem:[%s2130_s4 + $0x70] sm:$0xff] %v1657_v37   ;;  %1773 = vst [vmem:[%s2130_s4 + $0xf0] sm:$0xff] %v1737_v38  }
 0x191   : > { %v851_v39 = vpop.f32.mrb[60].mxu0  ;;  %v979_v40 = vpop.f32.mrb[60].mxu1 }
 0x192   : > { %v853_v41 = vpop.f32.mrb[61].mxu0  ;;  %v981_v42 = vpop.f32.mrb[61].mxu1  ;;  %v852_v45 = vadd.f32 %v2120_v17, %v851_v39  ;;  %v980_v46 = vadd.f32 %v2120_v17, %v979_v40 }
 0x193   : > { %v854_v43 = vpop.f32.mrb[62].mxu0  ;;  %v982_v44 = vpop.f32.mrb[62].mxu1 }
 0x194   : > { %v855_v47 = vadd.f32 %v2120_v17, %v854_v43  ;;  %v983_v48 = vadd.f32 %v2120_v17, %v982_v44  ;;  %v856_v49 = vpop.f32.mrb[63].mxu0  ;;  %v984_v50 = vpop.f32.mrb[63].mxu1 }
 0x196   : > { %v1662_v51 = vpack.c.bf16 %v855_v47, %v852_v45  ;;  %v1742_v52 = vpack.c.bf16 %v983_v48, %v980_v46 }
 0x198   : > { %1758 = vst [vmem:[%s2130_s4 + $0x78] sm:$0xff] %v1662_v51   ;;  %1774 = vst [vmem:[%s2130_s4 + $0xf8] sm:$0xff] %v1742_v52  }
 0x199 PF: > { %s13_s12 = sadd.s32 1, %s1934_s12  }
 0x19a   : > { %p10_p4 = scmp.ge.s32.totalorder %s13_s12, 10  }
 0x19c   :  { %12 = sbr.rel (!%p10_p4) target bundleno = 1 (0x1), region = 62 }

// kernel: minkunet_forward.24
= control target key start
LH: loop header
LB: loop body
LE: loop exit
PB: predicated region body
PF: predicated region fallthrough
CT: control target
= control target key end

     0   :  { %s1363_s12 = smov 0   ;;  %s1521_s0 = inlined_call_operand.vmem [shape: bf16[512,256], index: 0, kind: input, shape index: {}]   ;;  %s1522_s1 = inlined_call_operand.vmem [shape: bf16[256,128], index: 1, kind: input, shape index: {}]   ;;  %s1523_s2 = inlined_call_operand.vmem [shape: f32[1,128], index: 2, kind: input, shape index: {}]   ;;  %s1524_s3 = inlined_call_operand.vmem [shape: bf16[512,128], index: 3, kind: output, shape index: {}]  }
   0x1 LB: > { %s914_s13 = sadd.s32 4294967295, %s1341_s12   ;;  %p918_p0 = scmp.ge.s32.totalorder %s1341_s12, 1  ;;  %s1341_s12 = sphi %s1363_s12, %s13_s12  }
   0x2   : > { %p139_p1 = scmp.lt.s32.totalorder %s1341_s12, 3 }
   0x4   : > { %p140_p2 = pnand %p918_p0, %p139_p1 }
   0x5   : > { %v1271_v0 = vld [vmem:[%s1522_s1 + $0x40] sm:$0xff] (!%p140_p2)   ;;  %s919_s16 = sshll.u32 (!%p140_p2), %s914_s13, 5  ;;  %v1273_v2 = vld [vmem:[%s1522_s1 + $0x48] sm:$0xff] (!%p140_p2)   ;;  %v1275_v4 = vld [vmem:[%s1522_s1 + $0x50] sm:$0xff] (!%p140_p2)  }
   0x6   : > { %143 = sbr.rel (%p140_p2) target bundleno = 319 (0x13f), region = 32  ;;  %v1272_v1 = vld [vmem:[%s1522_s1] sm:$0xff] (!%p140_p2)   ;;  %1135 = vmatprep.subr.bf16.mxu0 (!%p140_p2), %v1271_v0  ;;  %1247 = vmatprep.subr.bf16.mxu1 (!%p140_p2), %v1271_v0  ;;  %v1274_v3 = vld [vmem:[%s1522_s1 + $0x8] sm:$0xff] (!%p140_p2)   ;;  %p165_p3 = scmp.lt.s32.totalorder (!%p140_p2), %s919_s16, 63  ;;  %v1276_v5 = vld [vmem:[%s1522_s1 + $0x10] sm:$0xff] (!%p140_p2)  }
   0x7   : > { %1136 = vmatpush3.bf16.msra.mxu0 (!%p140_p2), %v1272_v1  ;;  %1255 = vmatpush3.bf16.msra.mxu1 (!%p140_p2), %v1272_v1  ;;  %v1277_v6 = vld [vmem:[%s1522_s1 + $0x58] sm:$0xff] (!%p140_p2)   ;;  %v1279_v8 = vld [vmem:[%s1522_s1 + $0x60] sm:$0xff] (!%p140_p2)   ;;  %v1281_v10 = vld [vmem:[%s1522_s1 + $0x68] sm:$0xff] (!%p140_p2)  }
   0x8   : > { %1137 = vmatprep.subr.bf16.mxu0 (!%p140_p2), %v1273_v2  ;;  %1248 = vmatprep.subr.bf16.mxu1 (!%p140_p2), %v1273_v2  ;;  %v1278_v7 = vld [vmem:[%s1522_s1 + $0x18] sm:$0xff] (!%p140_p2)   ;;  %v1280_v9 = vld [vmem:[%s1522_s1 + $0x20] sm:$0xff] (!%p140_p2)   ;;  %v1282_v13 = vld [vmem:[%s1522_s1 + $0x28] sm:$0xff] (!%p140_p2)  }
   0x9   : > { %v1283_v14 = vld [vmem:[%s1522_s1 + $0x70] sm:$0xff] (!%p140_p2)   ;;  %v1285_v16 = vld [vmem:[%s1522_s1 + $0x78] sm:$0xff] (!%p140_p2)   ;;  %v1462_v50 = vld [vmem:[%s1523_s2] ss:$0 sm:$0xff] (!%p140_p2) }
   0xa   : > { %v1284_v15 = vld [vmem:[%s1522_s1 + $0x30] sm:$0xff] (!%p140_p2)   ;;  %v1286_v17 = vld [vmem:[%s1522_s1 + $0x38] sm:$0xff] (!%p140_p2)  }
   0xb   : > { %1138 = vmatpush3.bf16.msra.mxu0 (!%p140_p2), %v1274_v3  ;;  %1256 = vmatpush3.bf16.msra.mxu1 (!%p140_p2), %v1274_v3 }
   0xc   : > { %1139 = vmatprep.subr.bf16.mxu0 (!%p140_p2), %v1275_v4  ;;  %1249 = vmatprep.subr.bf16.mxu1 (!%p140_p2), %v1275_v4 }
   0xd   : > { %s1526_s16 = smov (!%p165_p3, %s919_s16), 63 }
   0xe   : > { %s1007_s4 = sshll.u32 %s1526_s16, 3  ;;  %s923_s28 = sshll.u32 %s1526_s16, 2 }
   0xf   : > { %1140 = vmatpush3.bf16.msra.mxu0 %v1276_v5  ;;  %1257 = vmatpush3.bf16.msra.mxu1 %v1276_v5  ;;  %s1404_s9 = scalar_lea.vmem %s1521_s0, %s1007_s4  ;;  %s1472_s4 = scalar_lea.vmem %s1524_s3, %s923_s28 }
  0x10   : > { %1141 = vmatprep.subr.bf16.mxu0 %v1277_v6  ;;  %1250 = vmatprep.subr.bf16.mxu1 %v1277_v6  ;;  %v1289_v11 = vld [vmem:[%s1404_s9 + $0x4] ss:$8 sps:$4 sm:$0xff]   ;;  %v1287_v18 = vld [vmem:[%s1404_s9] ss:$8 sps:$4 sm:$0xff]   ;;  %v1293_v20 = vld [vmem:[%s1404_s9 + $0x14] ss:$8 sps:$4 sm:$0xff]  }
  0x11   : > { %v1292_v12 = vld [vmem:[%s1404_s9 + $0x84] ss:$8 sps:$4 sm:$0xff]   ;;  %537 = vmatprep.mubr.bf16.mxu0 %v1289_v11  ;;  %v1290_v19 = vld [vmem:[%s1404_s9 + $0x80] ss:$8 sps:$4 sm:$0xff]   ;;  %v1295_v21 = vld [vmem:[%s1404_s9 + $0x94] ss:$8 sps:$4 sm:$0xff]  }
  0x12   : > { %601 = vmatprep.mubr.bf16.mxu1 %v1292_v12  ;;  %v1297_v22 = vld [vmem:[%s1404_s9 + $0x10] ss:$8 sps:$4 sm:$0xff]   ;;  %v1299_v24 = vld [vmem:[%s1404_s9 + $0x24] ss:$8 sps:$4 sm:$0xff]   ;;  %v1303_v26 = vld [vmem:[%s1404_s9 + $0x20] ss:$8 sps:$4 sm:$0xff]  }
  0x13   : > { %1142 = vmatpush3.bf16.msra.mxu0 %v1278_v7  ;;  %1258 = vmatpush3.bf16.msra.mxu1 %v1278_v7  ;;  %v1298_v23 = vld [vmem:[%s1404_s9 + $0x90] ss:$8 sps:$4 sm:$0xff]   ;;  %v1301_v25 = vld [vmem:[%s1404_s9 + $0xa4] ss:$8 sps:$4 sm:$0xff]   ;;  %v1304_v27 = vld [vmem:[%s1404_s9 + $0xa0] ss:$8 sps:$4 sm:$0xff]  }
  0x14   : > { %1143 = vmatprep.subr.bf16.mxu0 %v1279_v8  ;;  %1251 = vmatprep.subr.bf16.mxu1 %v1279_v8  ;;  %v1305_v28 = vld [vmem:[%s1404_s9 + $0x34] ss:$8 sps:$4 sm:$0xff]   ;;  %v1309_v30 = vld [vmem:[%s1404_s9 + $0x30] ss:$8 sps:$4 sm:$0xff]   ;;  %v1311_v32 = vld [vmem:[%s1404_s9 + $0x44] ss:$8 sps:$4 sm:$0xff]  }
  0x15   : > { %v1307_v29 = vld [vmem:[%s1404_s9 + $0xb4] ss:$8 sps:$4 sm:$0xff]   ;;  %v1310_v31 = vld [vmem:[%s1404_s9 + $0xb0] ss:$8 sps:$4 sm:$0xff]   ;;  %v1313_v33 = vld [vmem:[%s1404_s9 + $0xc4] ss:$8 sps:$4 sm:$0xff]  }
  0x16   : > { %v1315_v34 = vld [vmem:[%s1404_s9 + $0x40] ss:$8 sps:$4 sm:$0xff]   ;;  %v1317_v36 = vld [vmem:[%s1404_s9 + $0x54] ss:$8 sps:$4 sm:$0xff]   ;;  %v1321_v38 = vld [vmem:[%s1404_s9 + $0x50] ss:$8 sps:$4 sm:$0xff]  }
  0x17   : > { %1144 = vmatpush3.bf16.msra.mxu0 %v1280_v9  ;;  %1259 = vmatpush3.bf16.msra.mxu1 %v1280_v9  ;;  %v1316_v35 = vld [vmem:[%s1404_s9 + $0xc0] ss:$8 sps:$4 sm:$0xff]   ;;  %v1319_v37 = vld [vmem:[%s1404_s9 + $0xd4] ss:$8 sps:$4 sm:$0xff]   ;;  %v1322_v39 = vld [vmem:[%s1404_s9 + $0xd0] ss:$8 sps:$4 sm:$0xff]  }
  0x18   : > { %1145 = vmatprep.subr.bf16.mxu0 %v1281_v10  ;;  %1252 = vmatprep.subr.bf16.mxu1 %v1281_v10  ;;  %v1323_v40 = vld [vmem:[%s1404_s9 + $0x64] ss:$8 sps:$4 sm:$0xff]   ;;  %v1327_v42 = vld [vmem:[%s1404_s9 + $0x60] ss:$8 sps:$4 sm:$0xff]   ;;  %v1329_v44 = vld [vmem:[%s1404_s9 + $0x74] ss:$8 sps:$4 sm:$0xff]  }
  0x19   : > { %v1325_v41 = vld [vmem:[%s1404_s9 + $0xe4] ss:$8 sps:$4 sm:$0xff]   ;;  %v1328_v43 = vld [vmem:[%s1404_s9 + $0xe0] ss:$8 sps:$4 sm:$0xff]   ;;  %v1331_v45 = vld [vmem:[%s1404_s9 + $0xf4] ss:$8 sps:$4 sm:$0xff]  }
  0x1a   : > { %v1333_v46 = vld [vmem:[%s1404_s9 + $0x70] ss:$8 sps:$4 sm:$0xff]  }
  0x1b   : > { %1146 = vmatpush3.bf16.msra.mxu0 %v1282_v13  ;;  %1260 = vmatpush3.bf16.msra.mxu1 %v1282_v13  ;;  %v1334_v47 = vld [vmem:[%s1404_s9 + $0xf0] ss:$8 sps:$4 sm:$0xff]  }
  0x1c   : > { %1147 = vmatprep.subr.bf16.mxu0 %v1283_v14  ;;  %1253 = vmatprep.subr.bf16.mxu1 %v1283_v14 }
  0x1f   : > { %1148 = vmatpush3.bf16.msra.mxu0 %v1284_v15  ;;  %1261 = vmatpush3.bf16.msra.mxu1 %v1284_v15 }
  0x20   : > { %1149 = vmatprep.subr.bf16.mxu0 %v1285_v16  ;;  %1254 = vmatprep.subr.bf16.mxu1 %v1285_v16 }
  0x23   : > { %1150 = vmatpush3.bf16.msra.mxu0 %v1286_v17  ;;  %1262 = vmatpush3.bf16.msra.mxu1 %v1286_v17 }
  0x26   : > { %538 = vmatmul.mubr.bf16.vlgmr.msra.gmra.mrb[0].mxu0 %v1287_v18  ;;  %602 = vmatmul.mubr.bf16.vlgmr.msra.gmra.mrb[0].mxu1 %v1290_v19 }
  0x27   : > { %545 = vmatprep.mubr.bf16.mxu0 %v1293_v20  ;;  %609 = vmatprep.mubr.bf16.mxu1 %v1295_v21 }
  0x2e   : > { %546 = vmatmul.mubr.bf16.gmra.mrb[4].mxu0 %v1297_v22  ;;  %610 = vmatmul.mubr.bf16.gmra.mrb[4].mxu1 %v1298_v23 }
  0x2f   : > { %553 = vmatprep.mubr.bf16.mxu0 %v1299_v24  ;;  %617 = vmatprep.mubr.bf16.mxu1 %v1301_v25 }
  0x36   : > { %554 = vmatmul.mubr.bf16.gmra.mrb[8].mxu0 %v1303_v26  ;;  %618 = vmatmul.mubr.bf16.gmra.mrb[8].mxu1 %v1304_v27 }
  0x37   : > { %561 = vmatprep.mubr.bf16.mxu0 %v1305_v28  ;;  %625 = vmatprep.mubr.bf16.mxu1 %v1307_v29 }
  0x3e   : > { %562 = vmatmul.mubr.bf16.gmra.mrb[12].mxu0 %v1309_v30  ;;  %626 = vmatmul.mubr.bf16.gmra.mrb[12].mxu1 %v1310_v31 }
  0x3f   : > { %569 = vmatprep.mubr.bf16.mxu0 %v1311_v32  ;;  %633 = vmatprep.mubr.bf16.mxu1 %v1313_v33 }
  0x46   : > { %570 = vmatmul.mubr.bf16.gmra.mrb[16].mxu0 %v1315_v34  ;;  %634 = vmatmul.mubr.bf16.gmra.mrb[16].mxu1 %v1316_v35 }
  0x47   : > { %577 = vmatprep.mubr.bf16.mxu0 %v1317_v36  ;;  %641 = vmatprep.mubr.bf16.mxu1 %v1319_v37 }
  0x4e   : > { %578 = vmatmul.mubr.bf16.gmra.mrb[20].mxu0 %v1321_v38  ;;  %642 = vmatmul.mubr.bf16.gmra.mrb[20].mxu1 %v1322_v39 }
  0x4f   : > { %585 = vmatprep.mubr.bf16.mxu0 %v1323_v40  ;;  %649 = vmatprep.mubr.bf16.mxu1 %v1325_v41 }
  0x56   : > { %586 = vmatmul.mubr.bf16.gmra.mrb[24].mxu0 %v1327_v42  ;;  %650 = vmatmul.mubr.bf16.gmra.mrb[24].mxu1 %v1328_v43 }
  0x57   : > { %593 = vmatprep.mubr.bf16.mxu0 %v1329_v44  ;;  %657 = vmatprep.mubr.bf16.mxu1 %v1331_v45 }
  0x5e   : > { %594 = vmatmul.mubr.bf16.gmra.mrb[28].mxu0 %v1333_v46  ;;  %658 = vmatmul.mubr.bf16.gmra.mrb[28].mxu1 %v1334_v47 }
  0xf9   : > { %v1151_v48 = vpop.f32.mrb[0].mxu0  ;;  %v1199_v49 = vpop.f32.mrb[0].mxu1 }
  0xfa   : > { %v1152_v51 = vpop.f32.mrb[1].mxu0  ;;  %v1200_v52 = vpop.f32.mrb[1].mxu1 }
  0xfb   : > { %v1153_v53 = vadd.f32 %v1152_v51, %v1151_v48  ;;  %v1201_v54 = vadd.f32 %v1200_v52, %v1199_v49  ;;  %v1154_v55 = vpop.f32.mrb[2].mxu0  ;;  %v1202_v56 = vpop.f32.mrb[2].mxu1 }
  0xfc   : > { %v1155_v57 = vpop.f32.mrb[3].mxu0  ;;  %v1203_v58 = vpop.f32.mrb[3].mxu1 }
  0xfd   : > { %v540_v59 = vadd.f32 %v1153_v53, %v1462_v50  ;;  %v604_v60 = vadd.f32 %v1201_v54, %v1462_v50  ;;  %v1156_v61 = vadd.f32 %v1155_v57, %v1154_v55  ;;  %v1204_v62 = vadd.f32 %v1203_v58, %v1202_v56 }
  0xff   : > { %v543_v63 = vadd.f32 %v1156_v61, %v1462_v50  ;;  %v607_v0 = vadd.f32 %v1204_v62, %v1462_v50  ;;  %v666_v1 = vmax.f32 %v540_v59, 0.0  ;;  %v682_v2 = vmax.f32 %v604_v60, 0.0 }
 0x101   : > { %v667_v3 = vmax.f32 %v543_v63, 0.0  ;;  %v683_v4 = vmax.f32 %v607_v0, 0.0  ;;  %v1157_v5 = vpop.f32.mrb[4].mxu0  ;;  %v1205_v6 = vpop.f32.mrb[4].mxu1 }
 0x102   : > { %v1158_v7 = vpop.f32.mrb[5].mxu0  ;;  %v1206_v8 = vpop.f32.mrb[5].mxu1 }
 0x103   : > { %v1043_v9 = vpack.c.bf16 %v667_v3, %v666_v1  ;;  %v1083_v10 = vpack.c.bf16 %v683_v4, %v682_v2  ;;  %v1159_v11 = vadd.f32 %v1158_v7, %v1157_v5  ;;  %v1207_v12 = vadd.f32 %v1206_v8, %v1205_v6  ;;  %v1160_v13 = vpop.f32.mrb[6].mxu0  ;;  %v1208_v14 = vpop.f32.mrb[6].mxu1 }
 0x104   : > { %v1161_v15 = vpop.f32.mrb[7].mxu0  ;;  %v1209_v16 = vpop.f32.mrb[7].mxu1 }
 0x105   : > { %1044 = vst [vmem:[%s1472_s4] sm:$0xff] %v1043_v9   ;;  %1127 = vst [vmem:[%s1472_s4 + $0x40] sm:$0xff] %v1083_v10   ;;  %v548_v17 = vadd.f32 %v1159_v11, %v1462_v50  ;;  %v612_v18 = vadd.f32 %v1207_v12, %v1462_v50  ;;  %v1162_v19 = vadd.f32 %v1161_v15, %v1160_v13 }
 0x106   : > { %v1210_v20 = vadd.f32 %v1209_v16, %v1208_v14 }
 0x107   : > { %v551_v21 = vadd.f32 %v1162_v19, %v1462_v50  ;;  %v668_v23 = vmax.f32 %v548_v17, 0.0  ;;  %v684_v24 = vmax.f32 %v612_v18, 0.0 }
 0x108   : > { %v615_v22 = vadd.f32 %v1210_v20, %v1462_v50 }
 0x109   : > { %v669_v25 = vmax.f32 %v551_v21, 0.0  ;;  %v1163_v27 = vpop.f32.mrb[8].mxu0  ;;  %v1211_v28 = vpop.f32.mrb[8].mxu1 }
 0x10a   : > { %v685_v26 = vmax.f32 %v615_v22, 0.0  ;;  %v1164_v29 = vpop.f32.mrb[9].mxu0  ;;  %v1212_v30 = vpop.f32.mrb[9].mxu1 }
 0x10b   : > { %v1048_v31 = vpack.c.bf16 %v669_v25, %v668_v23  ;;  %v1165_v33 = vadd.f32 %v1164_v29, %v1163_v27  ;;  %v1213_v34 = vadd.f32 %v1212_v30, %v1211_v28  ;;  %v1166_v35 = vpop.f32.mrb[10].mxu0  ;;  %v1214_v36 = vpop.f32.mrb[10].mxu1 }
 0x10c   : > { %v1088_v32 = vpack.c.bf16 %v685_v26, %v684_v24  ;;  %v1167_v37 = vpop.f32.mrb[11].mxu0  ;;  %v1215_v38 = vpop.f32.mrb[11].mxu1 }
 0x10d   : > { %1120 = vst [vmem:[%s1472_s4 + $0x8] sm:$0xff] %v1048_v31   ;;  %v556_v39 = vadd.f32 %v1165_v33, %v1462_v50  ;;  %v620_v40 = vadd.f32 %v1213_v34, %v1462_v50  ;;  %v1168_v41 = vadd.f32 %v1167_v37, %v1166_v35  ;;  %v1216_v42 = vadd.f32 %v1215_v38, %v1214_v36 }
 0x10e   : > { %1128 = vst [vmem:[%s1472_s4 + $0x48] sm:$0xff] %v1088_v32  }
 0x10f   : > { %v559_v43 = vadd.f32 %v1168_v41, %v1462_v50  ;;  %v623_v44 = vadd.f32 %v1216_v42, %v1462_v50  ;;  %v670_v45 = vmax.f32 %v556_v39, 0.0  ;;  %v686_v46 = vmax.f32 %v620_v40, 0.0 }
 0x111   : > { %v671_v47 = vmax.f32 %v559_v43, 0.0  ;;  %v687_v48 = vmax.f32 %v623_v44, 0.0  ;;  %v1169_v49 = vpop.f32.mrb[12].mxu0  ;;  %v1217_v51 = vpop.f32.mrb[12].mxu1 }
 0x112   : > { %v1170_v52 = vpop.f32.mrb[13].mxu0  ;;  %v1218_v53 = vpop.f32.mrb[13].mxu1 }
 0x113   : > { %v1053_v54 = vpack.c.bf16 %v671_v47, %v670_v45  ;;  %v1093_v55 = vpack.c.bf16 %v687_v48, %v686_v46  ;;  %v1171_v56 = vadd.f32 %v1170_v52, %v1169_v49  ;;  %v1219_v57 = vadd.f32 %v1218_v53, %v1217_v51  ;;  %v1172_v58 = vpop.f32.mrb[14].mxu0  ;;  %v1220_v59 = vpop.f32.mrb[14].mxu1 }
 0x114   : > { %v1173_v60 = vpop.f32.mrb[15].mxu0  ;;  %v1221_v61 = vpop.f32.mrb[15].mxu1 }
 0x115   : > { %1121 = vst [vmem:[%s1472_s4 + $0x10] sm:$0xff] %v1053_v54   ;;  %1129 = vst [vmem:[%s1472_s4 + $0x50] sm:$0xff] %v1093_v55   ;;  %v564_v62 = vadd.f32 %v1171_v56, %v1462_v50  ;;  %v628_v63 = vadd.f32 %v1219_v57, %v1462_v50  ;;  %v1174_v0 = vadd.f32 %v1173_v60, %v1172_v58 }
 0x116   : > { %v1222_v1 = vadd.f32 %v1221_v61, %v1220_v59 }
 0x117   : > { %v567_v2 = vadd.f32 %v1174_v0, %v1462_v50  ;;  %v672_v4 = vmax.f32 %v564_v62, 0.0  ;;  %v688_v5 = vmax.f32 %v628_v63, 0.0 }
 0x118   : > { %v631_v3 = vadd.f32 %v1222_v1, %v1462_v50 }
 0x119   : > { %v673_v6 = vmax.f32 %v567_v2, 0.0  ;;  %v1175_v8 = vpop.f32.mrb[16].mxu0  ;;  %v1223_v9 = vpop.f32.mrb[16].mxu1 }
 0x11a   : > { %v689_v7 = vmax.f32 %v631_v3, 0.0  ;;  %v1176_v10 = vpop.f32.mrb[17].mxu0  ;;  %v1224_v11 = vpop.f32.mrb[17].mxu1 }
 0x11b   : > { %v1058_v12 = vpack.c.bf16 %v673_v6, %v672_v4  ;;  %v1177_v14 = vadd.f32 %v1176_v10, %v1175_v8  ;;  %v1225_v15 = vadd.f32 %v1224_v11, %v1223_v9  ;;  %v1178_v16 = vpop.f32.mrb[18].mxu0  ;;  %v1226_v17 = vpop.f32.mrb[18].mxu1 }
 0x11c   : > { %v1098_v13 = vpack.c.bf16 %v689_v7, %v688_v5  ;;  %v1179_v18 = vpop.f32.mrb[19].mxu0  ;;  %v1227_v19 = vpop.f32.mrb[19].mxu1 }
 0x11d   : > { %1122 = vst [vmem:[%s1472_s4 + $0x18] sm:$0xff] %v1058_v12   ;;  %v572_v20 = vadd.f32 %v1177_v14, %v1462_v50  ;;  %v636_v21 = vadd.f32 %v1225_v15, %v1462_v50  ;;  %v1180_v22 = vadd.f32 %v1179_v18, %v1178_v16  ;;  %v1228_v23 = vadd.f32 %v1227_v19, %v1226_v17 }
 0x11e   : > { %1130 = vst [vmem:[%s1472_s4 + $0x58] sm:$0xff] %v1098_v13  }
 0x11f   : > { %v575_v24 = vadd.f32 %v1180_v22, %v1462_v50  ;;  %v639_v25 = vadd.f32 %v1228_v23, %v1462_v50  ;;  %v674_v26 = vmax.f32 %v572_v20, 0.0  ;;  %v690_v27 = vmax.f32 %v636_v21, 0.0 }
 0x121   : > { %v675_v28 = vmax.f32 %v575_v24, 0.0  ;;  %v691_v29 = vmax.f32 %v639_v25, 0.0  ;;  %v1181_v30 = vpop.f32.mrb[20].mxu0  ;;  %v1229_v31 = vpop.f32.mrb[20].mxu1 }
 0x122   : > { %v1182_v32 = vpop.f32.mrb[21].mxu0  ;;  %v1230_v33 = vpop.f32.mrb[21].mxu1 }
 0x123   : > { %v1063_v34 = vpack.c.bf16 %v675_v28, %v674_v26  ;;  %v1103_v35 = vpack.c.bf16 %v691_v29, %v690_v27  ;;  %v1183_v36 = vadd.f32 %v1182_v32, %v1181_v30  ;;  %v1231_v37 = vadd.f32 %v1230_v33, %v1229_v31  ;;  %v1184_v38 = vpop.f32.mrb[22].mxu0  ;;  %v1232_v39 = vpop.f32.mrb[22].mxu1 }
 0x124   : > { %v1185_v40 = vpop.f32.mrb[23].mxu0  ;;  %v1233_v41 = vpop.f32.mrb[23].mxu1 }
 0x125   : > { %1123 = vst [vmem:[%s1472_s4 + $0x20] sm:$0xff] %v1063_v34   ;;  %1131 = vst [vmem:[%s1472_s4 + $0x60] sm:$0xff] %v1103_v35   ;;  %v580_v42 = vadd.f32 %v1183_v36, %v1462_v50  ;;  %v644_v43 = vadd.f32 %v1231_v37, %v1462_v50  ;;  %v1186_v44 = vadd.f32 %v1185_v40, %v1184_v38 }
 0x126   : > { %v1234_v45 = vadd.f32 %v1233_v41, %v1232_v39 }
 0x127   : > { %v583_v46 = vadd.f32 %v1186_v44, %v1462_v50  ;;  %v676_v48 = vmax.f32 %v580_v42, 0.0  ;;  %v692_v49 = vmax.f32 %v644_v43, 0.0 }
 0x128   : > { %v647_v47 = vadd.f32 %v1234_v45, %v1462_v50 }
 0x129   : > { %v677_v51 = vmax.f32 %v583_v46, 0.0  ;;  %v1187_v53 = vpop.f32.mrb[24].mxu0  ;;  %v1235_v54 = vpop.f32.mrb[24].mxu1 }
 0x12a   : > { %v693_v52 = vmax.f32 %v647_v47, 0.0  ;;  %v1188_v55 = vpop.f32.mrb[25].mxu0  ;;  %v1236_v56 = vpop.f32.mrb[25].mxu1 }
 0x12b   : > { %v1068_v57 = vpack.c.bf16 %v677_v51, %v676_v48  ;;  %v1189_v59 = vadd.f32 %v1188_v55, %v1187_v53  ;;  %v1237_v60 = vadd.f32 %v1236_v56, %v1235_v54  ;;  %v1190_v61 = vpop.f32.mrb[26].mxu0  ;;  %v1238_v62 = vpop.f32.mrb[26].mxu1 }
 0x12c   : > { %v1108_v58 = vpack.c.bf16 %v693_v52, %v692_v49  ;;  %v1191_v63 = vpop.f32.mrb[27].mxu0  ;;  %v1239_v0 = vpop.f32.mrb[27].mxu1 }
 0x12d   : > { %1124 = vst [vmem:[%s1472_s4 + $0x28] sm:$0xff] %v1068_v57   ;;  %v588_v1 = vadd.f32 %v1189_v59, %v1462_v50  ;;  %v652_v2 = vadd.f32 %v1237_v60, %v1462_v50  ;;  %v1192_v3 = vadd.f32 %v1191_v63, %v1190_v61  ;;  %v1240_v4 = vadd.f32 %v1239_v0, %v1238_v62 }
 0x12e   : > { %1132 = vst [vmem:[%s1472_s4 + $0x68] sm:$0xff] %v1108_v58  }
 0x12f   : > { %v591_v5 = vadd.f32 %v1192_v3, %v1462_v50  ;;  %v655_v6 = vadd.f32 %v1240_v4, %v1462_v50  ;;  %v678_v7 = vmax.f32 %v588_v1, 0.0  ;;  %v694_v8 = vmax.f32 %v652_v2, 0.0 }
 0x131   : > { %v679_v9 = vmax.f32 %v591_v5, 0.0  ;;  %v695_v10 = vmax.f32 %v655_v6, 0.0  ;;  %v1193_v11 = vpop.f32.mrb[28].mxu0  ;;  %v1241_v12 = vpop.f32.mrb[28].mxu1 }
 0x132   : > { %v1194_v13 = vpop.f32.mrb[29].mxu0  ;;  %v1242_v14 = vpop.f32.mrb[29].mxu1 }
 0x133   : > { %v1073_v15 = vpack.c.bf16 %v679_v9, %v678_v7  ;;  %v1113_v16 = vpack.c.bf16 %v695_v10, %v694_v8  ;;  %v1195_v17 = vadd.f32 %v1194_v13, %v1193_v11  ;;  %v1243_v18 = vadd.f32 %v1242_v14, %v1241_v12  ;;  %v1196_v19 = vpop.f32.mrb[30].mxu0  ;;  %v1244_v20 = vpop.f32.mrb[30].mxu1 }
 0x134   : > { %v1197_v21 = vpop.f32.mrb[31].mxu0  ;;  %v1245_v22 = vpop.f32.mrb[31].mxu1 }
 0x135   : > { %1125 = vst [vmem:[%s1472_s4 + $0x30] sm:$0xff] %v1073_v15   ;;  %1133 = vst [vmem:[%s1472_s4 + $0x70] sm:$0xff] %v1113_v16   ;;  %v596_v23 = vadd.f32 %v1195_v17, %v1462_v50  ;;  %v660_v24 = vadd.f32 %v1243_v18, %v1462_v50  ;;  %v1198_v25 = vadd.f32 %v1197_v21, %v1196_v19 }
 0x136   : > { %v1246_v26 = vadd.f32 %v1245_v22, %v1244_v20 }
 0x137   : > { %v599_v27 = vadd.f32 %v1198_v25, %v1462_v50  ;;  %v680_v29 = vmax.f32 %v596_v23, 0.0  ;;  %v696_v30 = vmax.f32 %v660_v24, 0.0 }
 0x138   : > { %v663_v28 = vadd.f32 %v1246_v26, %v1462_v50 }
 0x139   : > { %v681_v31 = vmax.f32 %v599_v27, 0.0 }
 0x13a   : > { %v697_v32 = vmax.f32 %v663_v28, 0.0 }
 0x13b   : > { %v1078_v33 = vpack.c.bf16 %v681_v31, %v680_v29 }
 0x13c   : > { %v1118_v34 = vpack.c.bf16 %v697_v32, %v696_v30 }
 0x13d   : > { %1126 = vst [vmem:[%s1472_s4 + $0x38] sm:$0xff] %v1078_v33  }
 0x13e   : > { %1134 = vst [vmem:[%s1472_s4 + $0x78] sm:$0xff] %v1118_v34  }
 0x13f PF: > { %s13_s12 = sadd.s32 1, %s1341_s12  }
 0x140   : > { %p10_p4 = scmp.ge.s32.totalorder %s13_s12, 4  }
 0x142   :  { %12 = sbr.rel (!%p10_p4) target bundleno = 1 (0x1), region = 62 }

// kernel: minkunet_forward.25
= control target key start
LH: loop header
LB: loop body
LE: loop exit
PB: predicated region body
PF: predicated region fallthrough
CT: control target
= control target key end

     0   :  { %s2052_s12 = smov 0   ;;  %s2292_s0 = inlined_call_operand.vmem [shape: bf16[512,512], index: 0, kind: input, shape index: {}]   ;;  %s2293_s1 = inlined_call_operand.vmem [shape: bf16[512,128], index: 1, kind: input, shape index: {}]   ;;  %s2294_s2 = inlined_call_operand.vmem [shape: f32[1,128], index: 2, kind: input, shape index: {}]   ;;  %s2295_s3 = inlined_call_operand.vmem [shape: bf16[512,128], index: 3, kind: output, shape index: {}]  }
   0x1 LB: > { %s1395_s13 = sadd.s32 4294967295, %s2030_s12   ;;  %p1399_p0 = scmp.ge.s32.totalorder %s2030_s12, 1  ;;  %s2030_s12 = sphi %s2052_s12, %s13_s12  }
   0x2   : > { %p139_p1 = scmp.lt.s32.totalorder %s2030_s12, 3 }
   0x4   : > { %p140_p2 = pnand %p1399_p0, %p139_p1 }
   0x5   : > { %v1896_v0 = vld [vmem:[%s2293_s1 + $0x40] sm:$0xff] (!%p140_p2)   ;;  %v1900_v4 = vld [vmem:[%s2293_s1 + $0x48] sm:$0xff] (!%p140_p2)   ;;  %v1904_v8 = vld [vmem:[%s2293_s1 + $0x50] sm:$0xff] (!%p140_p2)   ;;  %s1400_s21 = sshll.u32 (!%p140_p2), %s1395_s13, 5 }
   0x6   : > { %143 = sbr.rel (%p140_p2) target bundleno = 385 (0x181), region = 32  ;;  %v1897_v1 = vld [vmem:[%s2293_s1 + $0xc0] sm:$0xff] (!%p140_p2)   ;;  %1664 = vmatprep.subr.bf16.mxu0 (!%p140_p2), %v1896_v0  ;;  %v1901_v5 = vld [vmem:[%s2293_s1 + $0xc8] sm:$0xff] (!%p140_p2)   ;;  %v1905_v9 = vld [vmem:[%s2293_s1 + $0xd0] sm:$0xff] (!%p140_p2)   ;;  %p165_p3 = scmp.lt.s32.totalorder (!%p140_p2), %s1400_s21, 63 }
   0x7   : > { %v1898_v2 = vld [vmem:[%s2293_s1] sm:$0xff] (!%p140_p2)   ;;  %1776 = vmatprep.subr.bf16.mxu1 (!%p140_p2), %v1897_v1  ;;  %v1902_v6 = vld [vmem:[%s2293_s1 + $0x8] sm:$0xff] (!%p140_p2)   ;;  %v1906_v10 = vld [vmem:[%s2293_s1 + $0x10] sm:$0xff] (!%p140_p2)  }
   0x8   : > { %v1899_v3 = vld [vmem:[%s2293_s1 + $0x80] sm:$0xff] (!%p140_p2)   ;;  %1665 = vmatpush3.bf16.msra.mxu0 (!%p140_p2), %v1898_v2  ;;  %v1903_v7 = vld [vmem:[%s2293_s1 + $0x88] sm:$0xff] (!%p140_p2)   ;;  %v1907_v11 = vld [vmem:[%s2293_s1 + $0x90] sm:$0xff] (!%p140_p2)  }
   0x9   : > { %1777 = vmatpush3.bf16.msra.mxu1 (!%p140_p2), %v1899_v3  ;;  %1666 = vmatprep.subr.bf16.mxu0 (!%p140_p2), %v1900_v4  ;;  %v1908_v12 = vld [vmem:[%s2293_s1 + $0x58] sm:$0xff] (!%p140_p2)   ;;  %v1912_v16 = vld [vmem:[%s2293_s1 + $0x60] sm:$0xff] (!%p140_p2)   ;;  %v1916_v20 = vld [vmem:[%s2293_s1 + $0x68] sm:$0xff] (!%p140_p2)  }
   0xa   : > { %1778 = vmatprep.subr.bf16.mxu1 (!%p140_p2), %v1901_v5  ;;  %v1909_v13 = vld [vmem:[%s2293_s1 + $0xd8] sm:$0xff] (!%p140_p2)   ;;  %v1913_v17 = vld [vmem:[%s2293_s1 + $0xe0] sm:$0xff] (!%p140_p2)   ;;  %v1917_v21 = vld [vmem:[%s2293_s1 + $0xe8] sm:$0xff] (!%p140_p2)  }
   0xb   : > { %v1910_v14 = vld [vmem:[%s2293_s1 + $0x18] sm:$0xff] (!%p140_p2)   ;;  %v1914_v18 = vld [vmem:[%s2293_s1 + $0x20] sm:$0xff] (!%p140_p2)   ;;  %v1918_v22 = vld [vmem:[%s2293_s1 + $0x28] sm:$0xff] (!%p140_p2)  }
   0xc   : > { %1667 = vmatpush3.bf16.msra.mxu0 (!%p140_p2), %v1902_v6  ;;  %v1911_v15 = vld [vmem:[%s2293_s1 + $0x98] sm:$0xff] (!%p140_p2)   ;;  %v1915_v19 = vld [vmem:[%s2293_s1 + $0xa0] sm:$0xff] (!%p140_p2)   ;;  %v1919_v23 = vld [vmem:[%s2293_s1 + $0xa8] sm:$0xff] (!%p140_p2)  }
   0xd   : > { %1779 = vmatpush3.bf16.msra.mxu1 %v1903_v7  ;;  %1668 = vmatprep.subr.bf16.mxu0 %v1904_v8  ;;  %s2297_s21 = smov (!%p165_p3, %s1400_s21), 63  ;;  %v1920_v24 = vld [vmem:[%s2293_s1 + $0x70] sm:$0xff]   ;;  %v1924_v28 = vld [vmem:[%s2293_s1 + $0x78] sm:$0xff]  }
   0xe   : > { %1780 = vmatprep.subr.bf16.mxu1 %v1905_v9  ;;  %v1921_v25 = vld [vmem:[%s2293_s1 + $0xf0] sm:$0xff]   ;;  %s1536_s18 = sshll.u32 %s2297_s21, 4  ;;  %v1925_v29 = vld [vmem:[%s2293_s1 + $0xf8] sm:$0xff]   ;;  %s1404_s7 = sshll.u32 %s2297_s21, 2 }
   0xf   : > { %v1922_v26 = vld [vmem:[%s2293_s1 + $0x30] sm:$0xff]   ;;  %s2158_s28 = scalar_lea.vmem %s2292_s0, %s1536_s18  ;;  %v1926_v30 = vld [vmem:[%s2293_s1 + $0x38] sm:$0xff]   ;;  %s2241_s10 = scalar_lea.vmem %s2295_s3, %s1404_s7 }
  0x10   : > { %1669 = vmatpush3.bf16.msra.mxu0 %v1906_v10  ;;  %v1923_v27 = vld [vmem:[%s2293_s1 + $0xb0] sm:$0xff]   ;;  %v1927_v31 = vld [vmem:[%s2293_s1 + $0xb8] sm:$0xff]  }
  0x11   : > { %1781 = vmatpush3.bf16.msra.mxu1 %v1907_v11  ;;  %1670 = vmatprep.subr.bf16.mxu0 %v1908_v12  ;;  %v1928_v32 = vld [vmem:[%s2158_s28] ss:$16 sps:$4 sm:$0xff]   ;;  %v1930_v33 = vld [vmem:[%s2158_s28 + $0x4] ss:$16 sps:$4 sm:$0xff]   ;;  %v1931_v34 = vld [vmem:[%s2158_s28 + $0x8] ss:$16 sps:$4 sm:$0xff]  }
  0x12   : > { %1782 = vmatprep.subr.bf16.mxu1 %v1909_v13  ;;  %v1933_v35 = vld [vmem:[%s2158_s28 + $0xc] ss:$16 sps:$4 sm:$0xff]   ;;  %857 = vmatprep.mubr.bf16.mxu0 %v1930_v33  ;;  %v1934_v36 = vld [vmem:[%s2158_s28 + $0x24] ss:$16 sps:$4 sm:$0xff]   ;;  %v1938_v38 = vld [vmem:[%s2158_s28 + $0x20] ss:$16 sps:$4 sm:$0xff]  }
  0x13   : > { %1018 = vmatprep.mubr.bf16.mxu1 %v1933_v35  ;;  %v1936_v37 = vld [vmem:[%s2158_s28 + $0x2c] ss:$16 sps:$4 sm:$0xff]   ;;  %v1939_v39 = vld [vmem:[%s2158_s28 + $0x28] ss:$16 sps:$4 sm:$0xff]   ;;  %v1940_v40 = vld [vmem:[%s2158_s28 + $0x44] ss:$16 sps:$4 sm:$0xff]  }
  0x14   : > { %1671 = vmatpush3.bf16.msra.mxu0 %v1910_v14  ;;  %v1942_v41 = vld [vmem:[%s2158_s28 + $0x4c] ss:$16 sps:$4 sm:$0xff]   ;;  %v1944_v42 = vld [vmem:[%s2158_s28 + $0x40] ss:$16 sps:$4 sm:$0xff]   ;;  %v1945_v43 = vld [vmem:[%s2158_s28 + $0x48] ss:$16 sps:$4 sm:$0xff]  }
  0x15   : > { %1783 = vmatpush3.bf16.msra.mxu1 %v1911_v15  ;;  %1672 = vmatprep.subr.bf16.mxu0 %v1912_v16  ;;  %v1946_v44 = vld [vmem:[%s2158_s28 + $0x64] ss:$16 sps:$4 sm:$0xff]   ;;  %v1948_v45 = vld [vmem:[%s2158_s28 + $0x6c] ss:$16 sps:$4 sm:$0xff]   ;;  %v1950_v46 = vld [vmem:[%s2158_s28 + $0x60] ss:$16 sps:$4 sm:$0xff]  }
  0x16   : > { %1784 = vmatprep.subr.bf16.mxu1 %v1913_v17  ;;  %v1951_v47 = vld [vmem:[%s2158_s28 + $0x68] ss:$16 sps:$4 sm:$0xff]   ;;  %v1952_v48 = vld [vmem:[%s2158_s28 + $0x84] ss:$16 sps:$4 sm:$0xff]   ;;  %v1954_v49 = vld [vmem:[%s2158_s28 + $0x8c] ss:$16 sps:$4 sm:$0xff]  }
  0x17   : > { %v1956_v50 = vld [vmem:[%s2158_s28 + $0x80] ss:$16 sps:$4 sm:$0xff]   ;;  %v1957_v51 = vld [vmem:[%s2158_s28 + $0x88] ss:$16 sps:$4 sm:$0xff]   ;;  %v1958_v52 = vld [vmem:[%s2158_s28 + $0xa4] ss:$16 sps:$4 sm:$0xff]  }
  0x18   : > { %1673 = vmatpush3.bf16.msra.mxu0 %v1914_v18  ;;  %v1960_v53 = vld [vmem:[%s2158_s28 + $0xac] ss:$16 sps:$4 sm:$0xff]   ;;  %v1962_v54 = vld [vmem:[%s2158_s28 + $0xa0] ss:$16 sps:$4 sm:$0xff]   ;;  %v1963_v55 = vld [vmem:[%s2158_s28 + $0xa8] ss:$16 sps:$4 sm:$0xff]  }
  0x19   : > { %1785 = vmatpush3.bf16.msra.mxu1 %v1915_v19  ;;  %1674 = vmatprep.subr.bf16.mxu0 %v1916_v20  ;;  %v1964_v56 = vld [vmem:[%s2158_s28 + $0xc4] ss:$16 sps:$4 sm:$0xff]   ;;  %v1966_v57 = vld [vmem:[%s2158_s28 + $0xcc] ss:$16 sps:$4 sm:$0xff]   ;;  %v1968_v58 = vld [vmem:[%s2158_s28 + $0xc0] ss:$16 sps:$4 sm:$0xff]  }
  0x1a   : > { %1786 = vmatprep.subr.bf16.mxu1 %v1917_v21  ;;  %v1969_v59 = vld [vmem:[%s2158_s28 + $0xc8] ss:$16 sps:$4 sm:$0xff]   ;;  %v1970_v60 = vld [vmem:[%s2158_s28 + $0xe4] ss:$16 sps:$4 sm:$0xff]   ;;  %v1972_v61 = vld [vmem:[%s2158_s28 + $0xec] ss:$16 sps:$4 sm:$0xff]  }
  0x1b   : > { %v1974_v62 = vld [vmem:[%s2158_s28 + $0xe0] ss:$16 sps:$4 sm:$0xff]   ;;  %v1975_v63 = vld [vmem:[%s2158_s28 + $0xe8] ss:$16 sps:$4 sm:$0xff]   ;;  %v1976_v0 = vld [vmem:[%s2158_s28 + $0x104] ss:$16 sps:$4 sm:$0xff]  }
  0x1c   : > { %1675 = vmatpush3.bf16.msra.mxu0 %v1918_v22  ;;  %v1978_v1 = vld [vmem:[%s2158_s28 + $0x10c] ss:$16 sps:$4 sm:$0xff]   ;;  %v1980_v2 = vld [vmem:[%s2158_s28 + $0x100] ss:$16 sps:$4 sm:$0xff]   ;;  %v1981_v3 = vld [vmem:[%s2158_s28 + $0x108] ss:$16 sps:$4 sm:$0xff]  }
  0x1d   : > { %1787 = vmatpush3.bf16.msra.mxu1 %v1919_v23  ;;  %1676 = vmatprep.subr.bf16.mxu0 %v1920_v24  ;;  %v1982_v4 = vld [vmem:[%s2158_s28 + $0x124] ss:$16 sps:$4 sm:$0xff]   ;;  %v1984_v5 = vld [vmem:[%s2158_s28 + $0x12c] ss:$16 sps:$4 sm:$0xff]   ;;  %v1986_v6 = vld [vmem:[%s2158_s28 + $0x120] ss:$16 sps:$4 sm:$0xff]  }
  0x1e   : > { %1788 = vmatprep.subr.bf16.mxu1 %v1921_v25  ;;  %v1987_v7 = vld [vmem:[%s2158_s28 + $0x128] ss:$16 sps:$4 sm:$0xff]   ;;  %v1988_v8 = vld [vmem:[%s2158_s28 + $0x144] ss:$16 sps:$4 sm:$0xff]   ;;  %v1990_v9 = vld [vmem:[%s2158_s28 + $0x14c] ss:$16 sps:$4 sm:$0xff]  }
  0x1f   : > { %v1992_v10 = vld [vmem:[%s2158_s28 + $0x140] ss:$16 sps:$4 sm:$0xff]   ;;  %v1993_v11 = vld [vmem:[%s2158_s28 + $0x148] ss:$16 sps:$4 sm:$0xff]   ;;  %v1994_v12 = vld [vmem:[%s2158_s28 + $0x164] ss:$16 sps:$4 sm:$0xff]  }
  0x20   : > { %1677 = vmatpush3.bf16.msra.mxu0 %v1922_v26  ;;  %v1996_v13 = vld [vmem:[%s2158_s28 + $0x16c] ss:$16 sps:$4 sm:$0xff]   ;;  %v1998_v14 = vld [vmem:[%s2158_s28 + $0x160] ss:$16 sps:$4 sm:$0xff]   ;;  %v1999_v15 = vld [vmem:[%s2158_s28 + $0x168] ss:$16 sps:$4 sm:$0xff]  }
  0x21   : > { %1789 = vmatpush3.bf16.msra.mxu1 %v1923_v27  ;;  %1678 = vmatprep.subr.bf16.mxu0 %v1924_v28  ;;  %v2000_v16 = vld [vmem:[%s2158_s28 + $0x184] ss:$16 sps:$4 sm:$0xff]   ;;  %v2002_v17 = vld [vmem:[%s2158_s28 + $0x18c] ss:$16 sps:$4 sm:$0xff]   ;;  %v2004_v18 = vld [vmem:[%s2158_s28 + $0x180] ss:$16 sps:$4 sm:$0xff]  }
  0x22   : > { %1790 = vmatprep.subr.bf16.mxu1 %v1925_v29  ;;  %v2005_v19 = vld [vmem:[%s2158_s28 + $0x188] ss:$16 sps:$4 sm:$0xff]   ;;  %v2006_v20 = vld [vmem:[%s2158_s28 + $0x1a4] ss:$16 sps:$4 sm:$0xff]   ;;  %v2008_v21 = vld [vmem:[%s2158_s28 + $0x1ac] ss:$16 sps:$4 sm:$0xff]  }
  0x23   : > { %v2010_v22 = vld [vmem:[%s2158_s28 + $0x1a0] ss:$16 sps:$4 sm:$0xff]   ;;  %v2011_v23 = vld [vmem:[%s2158_s28 + $0x1a8] ss:$16 sps:$4 sm:$0xff]   ;;  %v2012_v24 = vld [vmem:[%s2158_s28 + $0x1c4] ss:$16 sps:$4 sm:$0xff]  }
  0x24   : > { %1679 = vmatpush3.bf16.msra.mxu0 %v1926_v30  ;;  %v2014_v25 = vld [vmem:[%s2158_s28 + $0x1cc] ss:$16 sps:$4 sm:$0xff]   ;;  %v2016_v26 = vld [vmem:[%s2158_s28 + $0x1c0] ss:$16 sps:$4 sm:$0xff]   ;;  %v2017_v27 = vld [vmem:[%s2158_s28 + $0x1c8] ss:$16 sps:$4 sm:$0xff]  }
  0x25   : > { %1791 = vmatpush3.bf16.msra.mxu1 %v1927_v31  ;;  %v2018_v28 = vld [vmem:[%s2158_s28 + $0x1e4] ss:$16 sps:$4 sm:$0xff]   ;;  %v2020_v29 = vld [vmem:[%s2158_s28 + $0x1ec] ss:$16 sps:$4 sm:$0xff]   ;;  %v2022_v30 = vld [vmem:[%s2158_s28 + $0x1e0] ss:$16 sps:$4 sm:$0xff]  }
  0x26   : > { %v2023_v31 = vld [vmem:[%s2158_s28 + $0x1e8] ss:$16 sps:$4 sm:$0xff]  }
  0x27   : > { %858 = vmatmul.mubr.bf16.vlgmr.msra.gmra.mrb[0].mxu0 %v1928_v32 }
  0x28   : > { %1019 = vmatmul.mubr.bf16.vlgmr.msra.gmra.mrb[0].mxu1 %v1931_v34  ;;  %865 = vmatprep.mubr.bf16.mxu0 %v1934_v36  ;;  %v2233_v34 = vld [vmem:[%s2294_s2] ss:$0 sm:$0xff] }
  0x29   : > { %1026 = vmatprep.mubr.bf16.mxu1 %v1936_v37 }
  0x2f   : > { %866 = vmatmul.mubr.bf16.gmra.mrb[4].mxu0 %v1938_v38 }
  0x30   : > { %1027 = vmatmul.mubr.bf16.gmra.mrb[4].mxu1 %v1939_v39  ;;  %873 = vmatprep.mubr.bf16.mxu0 %v1940_v40 }
  0x31   : > { %1034 = vmatprep.mubr.bf16.mxu1 %v1942_v41 }
  0x37   : > { %874 = vmatmul.mubr.bf16.gmra.mrb[8].mxu0 %v1944_v42 }
  0x38   : > { %1035 = vmatmul.mubr.bf16.gmra.mrb[8].mxu1 %v1945_v43  ;;  %881 = vmatprep.mubr.bf16.mxu0 %v1946_v44 }
  0x39   : > { %1042 = vmatprep.mubr.bf16.mxu1 %v1948_v45 }
  0x3f   : > { %882 = vmatmul.mubr.bf16.gmra.mrb[12].mxu0 %v1950_v46 }
  0x40   : > { %1043 = vmatmul.mubr.bf16.gmra.mrb[12].mxu1 %v1951_v47  ;;  %889 = vmatprep.mubr.bf16.mxu0 %v1952_v48 }
  0x41   : > { %1050 = vmatprep.mubr.bf16.mxu1 %v1954_v49 }
  0x47   : > { %890 = vmatmul.mubr.bf16.gmra.mrb[16].mxu0 %v1956_v50 }
  0x48   : > { %1051 = vmatmul.mubr.bf16.gmra.mrb[16].mxu1 %v1957_v51  ;;  %897 = vmatprep.mubr.bf16.mxu0 %v1958_v52 }
  0x49   : > { %1058 = vmatprep.mubr.bf16.mxu1 %v1960_v53 }
  0x4f   : > { %898 = vmatmul.mubr.bf16.gmra.mrb[20].mxu0 %v1962_v54 }
  0x50   : > { %1059 = vmatmul.mubr.bf16.gmra.mrb[20].mxu1 %v1963_v55  ;;  %905 = vmatprep.mubr.bf16.mxu0 %v1964_v56 }
  0x51   : > { %1066 = vmatprep.mubr.bf16.mxu1 %v1966_v57 }
  0x57   : > { %906 = vmatmul.mubr.bf16.gmra.mrb[24].mxu0 %v1968_v58 }
  0x58   : > { %1067 = vmatmul.mubr.bf16.gmra.mrb[24].mxu1 %v1969_v59  ;;  %913 = vmatprep.mubr.bf16.mxu0 %v1970_v60 }
  0x59   : > { %1074 = vmatprep.mubr.bf16.mxu1 %v1972_v61 }
  0x5f   : > { %914 = vmatmul.mubr.bf16.gmra.mrb[28].mxu0 %v1974_v62 }
  0x60   : > { %1075 = vmatmul.mubr.bf16.gmra.mrb[28].mxu1 %v1975_v63  ;;  %921 = vmatprep.mubr.bf16.mxu0 %v1976_v0 }
  0x61   : > { %1082 = vmatprep.mubr.bf16.mxu1 %v1978_v1 }
  0x67   : > { %922 = vmatmul.mubr.bf16.gmra.mrb[32].mxu0 %v1980_v2 }
  0x68   : > { %1083 = vmatmul.mubr.bf16.gmra.mrb[32].mxu1 %v1981_v3  ;;  %929 = vmatprep.mubr.bf16.mxu0 %v1982_v4 }
  0x69   : > { %1090 = vmatprep.mubr.bf16.mxu1 %v1984_v5 }
  0x6f   : > { %930 = vmatmul.mubr.bf16.gmra.mrb[36].mxu0 %v1986_v6 }
  0x70   : > { %1091 = vmatmul.mubr.bf16.gmra.mrb[36].mxu1 %v1987_v7  ;;  %937 = vmatprep.mubr.bf16.mxu0 %v1988_v8 }
  0x71   : > { %1098 = vmatprep.mubr.bf16.mxu1 %v1990_v9 }
  0x77   : > { %938 = vmatmul.mubr.bf16.gmra.mrb[40].mxu0 %v1992_v10 }
  0x78   : > { %1099 = vmatmul.mubr.bf16.gmra.mrb[40].mxu1 %v1993_v11  ;;  %945 = vmatprep.mubr.bf16.mxu0 %v1994_v12 }
  0x79   : > { %1106 = vmatprep.mubr.bf16.mxu1 %v1996_v13 }
  0x7f   : > { %946 = vmatmul.mubr.bf16.gmra.mrb[44].mxu0 %v1998_v14 }
  0x80   : > { %1107 = vmatmul.mubr.bf16.gmra.mrb[44].mxu1 %v1999_v15  ;;  %953 = vmatprep.mubr.bf16.mxu0 %v2000_v16 }
  0x81   : > { %1114 = vmatprep.mubr.bf16.mxu1 %v2002_v17 }
  0x87   : > { %954 = vmatmul.mubr.bf16.gmra.mrb[48].mxu0 %v2004_v18 }
  0x88   : > { %1115 = vmatmul.mubr.bf16.gmra.mrb[48].mxu1 %v2005_v19  ;;  %961 = vmatprep.mubr.bf16.mxu0 %v2006_v20 }
  0x89   : > { %1122 = vmatprep.mubr.bf16.mxu1 %v2008_v21 }
  0x8f   : > { %962 = vmatmul.mubr.bf16.gmra.mrb[52].mxu0 %v2010_v22 }
  0x90   : > { %1123 = vmatmul.mubr.bf16.gmra.mrb[52].mxu1 %v2011_v23  ;;  %969 = vmatprep.mubr.bf16.mxu0 %v2012_v24 }
  0x91   : > { %1130 = vmatprep.mubr.bf16.mxu1 %v2014_v25 }
  0x97   : > { %970 = vmatmul.mubr.bf16.gmra.mrb[56].mxu0 %v2016_v26 }
  0x98   : > { %1131 = vmatmul.mubr.bf16.gmra.mrb[56].mxu1 %v2017_v27  ;;  %977 = vmatprep.mubr.bf16.mxu0 %v2018_v28 }
  0x99   : > { %1138 = vmatprep.mubr.bf16.mxu1 %v2020_v29 }
  0x9f   : > { %978 = vmatmul.mubr.bf16.gmra.mrb[60].mxu0 %v2022_v30 }
  0xa0   : > { %1139 = vmatmul.mubr.bf16.gmra.mrb[60].mxu1 %v2023_v31 }
  0xfa   : > { %v1680_v32 = vpop.f32.mrb[0].mxu0 }
  0xfb   : > { %v1792_v33 = vpop.f32.mrb[0].mxu1  ;;  %v1681_v35 = vpop.f32.mrb[1].mxu0 }
  0xfc   : > { %v1682_v36 = vadd.f32 %v1681_v35, %v1680_v32  ;;  %v1793_v37 = vpop.f32.mrb[1].mxu1  ;;  %v1683_v38 = vpop.f32.mrb[2].mxu0 }
  0xfd   : > { %v1794_v39 = vadd.f32 %v1793_v37, %v1792_v33  ;;  %v1795_v40 = vpop.f32.mrb[2].mxu1  ;;  %v1684_v41 = vpop.f32.mrb[3].mxu0 }
  0xfe   : > { %v860_v42 = vadd.f32 %v1682_v36, %v2233_v34  ;;  %v1685_v43 = vadd.f32 %v1684_v41, %v1683_v38  ;;  %v1796_v44 = vpop.f32.mrb[3].mxu1 }
  0xff   : > { %v1797_v45 = vadd.f32 %v1796_v44, %v1795_v40 }
 0x100   : > { %v1021_v46 = vadd.f32 %v1794_v39, %v860_v42  ;;  %v863_v47 = vadd.f32 %v1685_v43, %v2233_v34 }
 0x102   : > { %v1024_v48 = vadd.f32 %v1797_v45, %v863_v47  ;;  %v1686_v49 = vpop.f32.mrb[4].mxu0  ;;  %v1147_v52 = vmax.f32 %v1021_v46, 0.0 }
 0x103   : > { %v1798_v50 = vpop.f32.mrb[4].mxu1  ;;  %v1687_v51 = vpop.f32.mrb[5].mxu0 }
 0x104   : > { %v1148_v53 = vmax.f32 %v1024_v48, 0.0  ;;  %v1688_v54 = vadd.f32 %v1687_v51, %v1686_v49  ;;  %v1799_v55 = vpop.f32.mrb[5].mxu1  ;;  %v1689_v56 = vpop.f32.mrb[6].mxu0 }
 0x105   : > { %v1800_v57 = vadd.f32 %v1799_v55, %v1798_v50  ;;  %v1801_v58 = vpop.f32.mrb[6].mxu1  ;;  %v1690_v59 = vpop.f32.mrb[7].mxu0 }
 0x106   : > { %v1572_v60 = vpack.c.bf16 %v1148_v53, %v1147_v52  ;;  %v868_v61 = vadd.f32 %v1688_v54, %v2233_v34  ;;  %v1691_v62 = vadd.f32 %v1690_v59, %v1689_v56  ;;  %v1802_v63 = vpop.f32.mrb[7].mxu1 }
 0x107   : > { %v1803_v0 = vadd.f32 %v1802_v63, %v1801_v58 }
 0x108   : > { %1573 = vst [vmem:[%s2241_s10] sm:$0xff] %v1572_v60   ;;  %v1029_v1 = vadd.f32 %v1800_v57, %v868_v61  ;;  %v871_v2 = vadd.f32 %v1691_v62, %v2233_v34 }
 0x10a   : > { %v1032_v3 = vadd.f32 %v1803_v0, %v871_v2  ;;  %v1692_v4 = vpop.f32.mrb[8].mxu0  ;;  %v1149_v7 = vmax.f32 %v1029_v1, 0.0 }
 0x10b   : > { %v1804_v5 = vpop.f32.mrb[8].mxu1  ;;  %v1693_v6 = vpop.f32.mrb[9].mxu0 }
 0x10c   : > { %v1150_v8 = vmax.f32 %v1032_v3, 0.0  ;;  %v1694_v9 = vadd.f32 %v1693_v6, %v1692_v4  ;;  %v1805_v10 = vpop.f32.mrb[9].mxu1  ;;  %v1695_v11 = vpop.f32.mrb[10].mxu0 }
 0x10d   : > { %v1806_v12 = vadd.f32 %v1805_v10, %v1804_v5  ;;  %v1807_v13 = vpop.f32.mrb[10].mxu1  ;;  %v1696_v14 = vpop.f32.mrb[11].mxu0 }
 0x10e   : > { %v1577_v15 = vpack.c.bf16 %v1150_v8, %v1149_v7  ;;  %v876_v16 = vadd.f32 %v1694_v9, %v2233_v34  ;;  %v1697_v17 = vadd.f32 %v1696_v14, %v1695_v11  ;;  %v1808_v18 = vpop.f32.mrb[11].mxu1 }
 0x10f   : > { %v1809_v19 = vadd.f32 %v1808_v18, %v1807_v13 }
 0x110   : > { %1649 = vst [vmem:[%s2241_s10 + $0x8] sm:$0xff] %v1577_v15   ;;  %v1037_v20 = vadd.f32 %v1806_v12, %v876_v16  ;;  %v879_v21 = vadd.f32 %v1697_v17, %v2233_v34 }
 0x112   : > { %v1040_v22 = vadd.f32 %v1809_v19, %v879_v21  ;;  %v1698_v23 = vpop.f32.mrb[12].mxu0  ;;  %v1151_v26 = vmax.f32 %v1037_v20, 0.0 }
 0x113   : > { %v1810_v24 = vpop.f32.mrb[12].mxu1  ;;  %v1699_v25 = vpop.f32.mrb[13].mxu0 }
 0x114   : > { %v1152_v27 = vmax.f32 %v1040_v22, 0.0  ;;  %v1700_v28 = vadd.f32 %v1699_v25, %v1698_v23  ;;  %v1811_v29 = vpop.f32.mrb[13].mxu1  ;;  %v1701_v30 = vpop.f32.mrb[14].mxu0 }
 0x115   : > { %v1812_v31 = vadd.f32 %v1811_v29, %v1810_v24  ;;  %v1813_v32 = vpop.f32.mrb[14].mxu1  ;;  %v1702_v33 = vpop.f32.mrb[15].mxu0 }
 0x116   : > { %v1582_v35 = vpack.c.bf16 %v1152_v27, %v1151_v26  ;;  %v884_v36 = vadd.f32 %v1700_v28, %v2233_v34  ;;  %v1703_v37 = vadd.f32 %v1702_v33, %v1701_v30  ;;  %v1814_v38 = vpop.f32.mrb[15].mxu1 }
 0x117   : > { %v1815_v39 = vadd.f32 %v1814_v38, %v1813_v32 }
 0x118   : > { %1650 = vst [vmem:[%s2241_s10 + $0x10] sm:$0xff] %v1582_v35   ;;  %v1045_v40 = vadd.f32 %v1812_v31, %v884_v36  ;;  %v887_v41 = vadd.f32 %v1703_v37, %v2233_v34 }
 0x11a   : > { %v1048_v42 = vadd.f32 %v1815_v39, %v887_v41  ;;  %v1704_v43 = vpop.f32.mrb[16].mxu0  ;;  %v1153_v46 = vmax.f32 %v1045_v40, 0.0 }
 0x11b   : > { %v1816_v44 = vpop.f32.mrb[16].mxu1  ;;  %v1705_v45 = vpop.f32.mrb[17].mxu0 }
 0x11c   : > { %v1154_v47 = vmax.f32 %v1048_v42, 0.0  ;;  %v1706_v48 = vadd.f32 %v1705_v45, %v1704_v43  ;;  %v1817_v49 = vpop.f32.mrb[17].mxu1  ;;  %v1707_v50 = vpop.f32.mrb[18].mxu0 }
 0x11d   : > { %v1818_v51 = vadd.f32 %v1817_v49, %v1816_v44  ;;  %v1819_v52 = vpop.f32.mrb[18].mxu1  ;;  %v1708_v53 = vpop.f32.mrb[19].mxu0 }
 0x11e   : > { %v1587_v54 = vpack.c.bf16 %v1154_v47, %v1153_v46  ;;  %v892_v55 = vadd.f32 %v1706_v48, %v2233_v34  ;;  %v1709_v56 = vadd.f32 %v1708_v53, %v1707_v50  ;;  %v1820_v57 = vpop.f32.mrb[19].mxu1 }
 0x11f   : > { %v1821_v58 = vadd.f32 %v1820_v57, %v1819_v52 }
 0x120   : > { %1651 = vst [vmem:[%s2241_s10 + $0x18] sm:$0xff] %v1587_v54   ;;  %v1053_v59 = vadd.f32 %v1818_v51, %v892_v55  ;;  %v895_v60 = vadd.f32 %v1709_v56, %v2233_v34 }
 0x122   : > { %v1056_v61 = vadd.f32 %v1821_v58, %v895_v60  ;;  %v1710_v62 = vpop.f32.mrb[20].mxu0  ;;  %v1155_v1 = vmax.f32 %v1053_v59, 0.0 }
 0x123   : > { %v1822_v63 = vpop.f32.mrb[20].mxu1  ;;  %v1711_v0 = vpop.f32.mrb[21].mxu0 }
 0x124   : > { %v1156_v2 = vmax.f32 %v1056_v61, 0.0  ;;  %v1712_v3 = vadd.f32 %v1711_v0, %v1710_v62  ;;  %v1823_v4 = vpop.f32.mrb[21].mxu1  ;;  %v1713_v5 = vpop.f32.mrb[22].mxu0 }
 0x125   : > { %v1824_v6 = vadd.f32 %v1823_v4, %v1822_v63  ;;  %v1825_v7 = vpop.f32.mrb[22].mxu1  ;;  %v1714_v8 = vpop.f32.mrb[23].mxu0 }
 0x126   : > { %v1592_v9 = vpack.c.bf16 %v1156_v2, %v1155_v1  ;;  %v900_v10 = vadd.f32 %v1712_v3, %v2233_v34  ;;  %v1715_v11 = vadd.f32 %v1714_v8, %v1713_v5  ;;  %v1826_v12 = vpop.f32.mrb[23].mxu1 }
 0x127   : > { %v1827_v13 = vadd.f32 %v1826_v12, %v1825_v7 }
 0x128   : > { %1652 = vst [vmem:[%s2241_s10 + $0x20] sm:$0xff] %v1592_v9   ;;  %v1061_v14 = vadd.f32 %v1824_v6, %v900_v10  ;;  %v903_v15 = vadd.f32 %v1715_v11, %v2233_v34 }
 0x12a   : > { %v1064_v16 = vadd.f32 %v1827_v13, %v903_v15  ;;  %v1716_v17 = vpop.f32.mrb[24].mxu0  ;;  %v1157_v20 = vmax.f32 %v1061_v14, 0.0 }
 0x12b   : > { %v1828_v18 = vpop.f32.mrb[24].mxu1  ;;  %v1717_v19 = vpop.f32.mrb[25].mxu0 }
 0x12c   : > { %v1158_v21 = vmax.f32 %v1064_v16, 0.0  ;;  %v1718_v22 = vadd.f32 %v1717_v19, %v1716_v17  ;;  %v1829_v23 = vpop.f32.mrb[25].mxu1  ;;  %v1719_v24 = vpop.f32.mrb[26].mxu0 }
 0x12d   : > { %v1830_v25 = vadd.f32 %v1829_v23, %v1828_v18  ;;  %v1831_v26 = vpop.f32.mrb[26].mxu1  ;;  %v1720_v27 = vpop.f32.mrb[27].mxu0 }
 0x12e   : > { %v1597_v28 = vpack.c.bf16 %v1158_v21, %v1157_v20  ;;  %v908_v29 = vadd.f32 %v1718_v22, %v2233_v34  ;;  %v1721_v30 = vadd.f32 %v1720_v27, %v1719_v24  ;;  %v1832_v31 = vpop.f32.mrb[27].mxu1 }
 0x12f   : > { %v1833_v32 = vadd.f32 %v1832_v31, %v1831_v26 }
 0x130   : > { %1653 = vst [vmem:[%s2241_s10 + $0x28] sm:$0xff] %v1597_v28   ;;  %v1069_v33 = vadd.f32 %v1830_v25, %v908_v29  ;;  %v911_v35 = vadd.f32 %v1721_v30, %v2233_v34 }
 0x132   : > { %v1072_v36 = vadd.f32 %v1833_v32, %v911_v35  ;;  %v1722_v37 = vpop.f32.mrb[28].mxu0  ;;  %v1159_v40 = vmax.f32 %v1069_v33, 0.0 }
 0x133   : > { %v1834_v38 = vpop.f32.mrb[28].mxu1  ;;  %v1723_v39 = vpop.f32.mrb[29].mxu0 }
 0x134   : > { %v1160_v41 = vmax.f32 %v1072_v36, 0.0  ;;  %v1724_v42 = vadd.f32 %v1723_v39, %v1722_v37  ;;  %v1835_v43 = vpop.f32.mrb[29].mxu1  ;;  %v1725_v44 = vpop.f32.mrb[30].mxu0 }
 0x135   : > { %v1836_v45 = vadd.f32 %v1835_v43, %v1834_v38  ;;  %v1837_v46 = vpop.f32.mrb[30].mxu1  ;;  %v1726_v47 = vpop.f32.mrb[31].mxu0 }
 0x136   : > { %v1602_v48 = vpack.c.bf16 %v1160_v41, %v1159_v40  ;;  %v916_v49 = vadd.f32 %v1724_v42, %v2233_v34  ;;  %v1727_v50 = vadd.f32 %v1726_v47, %v1725_v44  ;;  %v1838_v51 = vpop.f32.mrb[31].mxu1 }
 0x137   : > { %v1839_v52 = vadd.f32 %v1838_v51, %v1837_v46 }
 0x138   : > { %1654 = vst [vmem:[%s2241_s10 + $0x30] sm:$0xff] %v1602_v48   ;;  %v1077_v53 = vadd.f32 %v1836_v45, %v916_v49  ;;  %v919_v54 = vadd.f32 %v1727_v50, %v2233_v34 }
 0x13a   : > { %v1080_v55 = vadd.f32 %v1839_v52, %v919_v54  ;;  %v1728_v56 = vpop.f32.mrb[32].mxu0  ;;  %v1161_v59 = vmax.f32 %v1077_v53, 0.0 }
 0x13b   : > { %v1840_v57 = vpop.f32.mrb[32].mxu1  ;;  %v1729_v58 = vpop.f32.mrb[33].mxu0 }
 0x13c   : > { %v1162_v60 = vmax.f32 %v1080_v55, 0.0  ;;  %v1730_v61 = vadd.f32 %v1729_v58, %v1728_v56  ;;  %v1841_v62 = vpop.f32.mrb[33].mxu1  ;;  %v1731_v63 = vpop.f32.mrb[34].mxu0 }
 0x13d   : > { %v1842_v0 = vadd.f32 %v1841_v62, %v1840_v57  ;;  %v1843_v1 = vpop.f32.mrb[34].mxu1  ;;  %v1732_v2 = vpop.f32.mrb[35].mxu0 }
 0x13e   : > { %v1607_v3 = vpack.c.bf16 %v1162_v60, %v1161_v59  ;;  %v924_v4 = vadd.f32 %v1730_v61, %v2233_v34  ;;  %v1733_v5 = vadd.f32 %v1732_v2, %v1731_v63  ;;  %v1844_v6 = vpop.f32.mrb[35].mxu1 }
 0x13f   : > { %v1845_v7 = vadd.f32 %v1844_v6, %v1843_v1 }
 0x140   : > { %1655 = vst [vmem:[%s2241_s10 + $0x38] sm:$0xff] %v1607_v3   ;;  %v1085_v8 = vadd.f32 %v1842_v0, %v924_v4  ;;  %v927_v9 = vadd.f32 %v1733_v5, %v2233_v34 }
 0x142   : > { %v1088_v10 = vadd.f32 %v1845_v7, %v927_v9  ;;  %v1734_v11 = vpop.f32.mrb[36].mxu0  ;;  %v1163_v14 = vmax.f32 %v1085_v8, 0.0 }
 0x143   : > { %v1846_v12 = vpop.f32.mrb[36].mxu1  ;;  %v1735_v13 = vpop.f32.mrb[37].mxu0 }
 0x144   : > { %v1164_v15 = vmax.f32 %v1088_v10, 0.0  ;;  %v1736_v16 = vadd.f32 %v1735_v13, %v1734_v11  ;;  %v1847_v17 = vpop.f32.mrb[37].mxu1  ;;  %v1737_v18 = vpop.f32.mrb[38].mxu0 }
 0x145   : > { %v1848_v19 = vadd.f32 %v1847_v17, %v1846_v12  ;;  %v1849_v20 = vpop.f32.mrb[38].mxu1  ;;  %v1738_v21 = vpop.f32.mrb[39].mxu0 }
 0x146   : > { %v1612_v22 = vpack.c.bf16 %v1164_v15, %v1163_v14  ;;  %v932_v23 = vadd.f32 %v1736_v16, %v2233_v34  ;;  %v1739_v24 = vadd.f32 %v1738_v21, %v1737_v18  ;;  %v1850_v25 = vpop.f32.mrb[39].mxu1 }
 0x147   : > { %v1851_v26 = vadd.f32 %v1850_v25, %v1849_v20 }
 0x148   : > { %1656 = vst [vmem:[%s2241_s10 + $0x40] sm:$0xff] %v1612_v22   ;;  %v1093_v27 = vadd.f32 %v1848_v19, %v932_v23  ;;  %v935_v28 = vadd.f32 %v1739_v24, %v2233_v34 }
 0x14a   : > { %v1096_v29 = vadd.f32 %v1851_v26, %v935_v28  ;;  %v1740_v30 = vpop.f32.mrb[40].mxu0  ;;  %v1165_v33 = vmax.f32 %v1093_v27, 0.0 }
 0x14b   : > { %v1852_v31 = vpop.f32.mrb[40].mxu1  ;;  %v1741_v32 = vpop.f32.mrb[41].mxu0 }
 0x14c   : > { %v1166_v35 = vmax.f32 %v1096_v29, 0.0  ;;  %v1742_v36 = vadd.f32 %v1741_v32, %v1740_v30  ;;  %v1853_v37 = vpop.f32.mrb[41].mxu1  ;;  %v1743_v38 = vpop.f32.mrb[42].mxu0 }
 0x14d   : > { %v1854_v39 = vadd.f32 %v1853_v37, %v1852_v31  ;;  %v1855_v40 = vpop.f32.mrb[42].mxu1  ;;  %v1744_v41 = vpop.f32.mrb[43].mxu0 }
 0x14e   : > { %v1617_v42 = vpack.c.bf16 %v1166_v35, %v1165_v33  ;;  %v940_v43 = vadd.f32 %v1742_v36, %v2233_v34  ;;  %v1745_v44 = vadd.f32 %v1744_v41, %v1743_v38  ;;  %v1856_v45 = vpop.f32.mrb[43].mxu1 }
 0x14f   : > { %v1857_v46 = vadd.f32 %v1856_v45, %v1855_v40 }
 0x150   : > { %1657 = vst [vmem:[%s2241_s10 + $0x48] sm:$0xff] %v1617_v42   ;;  %v1101_v47 = vadd.f32 %v1854_v39, %v940_v43  ;;  %v943_v48 = vadd.f32 %v1745_v44, %v2233_v34 }
 0x152   : > { %v1104_v49 = vadd.f32 %v1857_v46, %v943_v48  ;;  %v1746_v50 = vpop.f32.mrb[44].mxu0  ;;  %v1167_v53 = vmax.f32 %v1101_v47, 0.0 }
 0x153   : > { %v1858_v51 = vpop.f32.mrb[44].mxu1  ;;  %v1747_v52 = vpop.f32.mrb[45].mxu0 }
 0x154   : > { %v1168_v54 = vmax.f32 %v1104_v49, 0.0  ;;  %v1748_v55 = vadd.f32 %v1747_v52, %v1746_v50  ;;  %v1859_v56 = vpop.f32.mrb[45].mxu1  ;;  %v1749_v57 = vpop.f32.mrb[46].mxu0 }
 0x155   : > { %v1860_v58 = vadd.f32 %v1859_v56, %v1858_v51  ;;  %v1861_v59 = vpop.f32.mrb[46].mxu1  ;;  %v1750_v60 = vpop.f32.mrb[47].mxu0 }
 0x156   : > { %v1622_v61 = vpack.c.bf16 %v1168_v54, %v1167_v53  ;;  %v948_v62 = vadd.f32 %v1748_v55, %v2233_v34  ;;  %v1751_v63 = vadd.f32 %v1750_v60, %v1749_v57  ;;  %v1862_v0 = vpop.f32.mrb[47].mxu1 }
 0x157   : > { %v1863_v1 = vadd.f32 %v1862_v0, %v1861_v59 }
 0x158   : > { %1658 = vst [vmem:[%s2241_s10 + $0x50] sm:$0xff] %v1622_v61   ;;  %v1109_v2 = vadd.f32 %v1860_v58, %v948_v62  ;;  %v951_v3 = vadd.f32 %v1751_v63, %v2233_v34 }
 0x15a   : > { %v1112_v4 = vadd.f32 %v1863_v1, %v951_v3  ;;  %v1752_v5 = vpop.f32.mrb[48].mxu0  ;;  %v1169_v8 = vmax.f32 %v1109_v2, 0.0 }
 0x15b   : > { %v1864_v6 = vpop.f32.mrb[48].mxu1  ;;  %v1753_v7 = vpop.f32.mrb[49].mxu0 }
 0x15c   : > { %v1170_v9 = vmax.f32 %v1112_v4, 0.0  ;;  %v1754_v10 = vadd.f32 %v1753_v7, %v1752_v5  ;;  %v1865_v11 = vpop.f32.mrb[49].mxu1  ;;  %v1755_v12 = vpop.f32.mrb[50].mxu0 }
 0x15d   : > { %v1866_v13 = vadd.f32 %v1865_v11, %v1864_v6  ;;  %v1867_v14 = vpop.f32.mrb[50].mxu1  ;;  %v1756_v15 = vpop.f32.mrb[51].mxu0 }
 0x15e   : > { %v1627_v16 = vpack.c.bf16 %v1170_v9, %v1169_v8  ;;  %v956_v17 = vadd.f32 %v1754_v10, %v2233_v34  ;;  %v1757_v18 = vadd.f32 %v1756_v15, %v1755_v12  ;;  %v1868_v19 = vpop.f32.mrb[51].mxu1 }
 0x15f   : > { %v1869_v20 = vadd.f32 %v1868_v19, %v1867_v14 }
 0x160   : > { %1659 = vst [vmem:[%s2241_s10 + $0x58] sm:$0xff] %v1627_v16   ;;  %v1117_v21 = vadd.f32 %v1866_v13, %v956_v17  ;;  %v959_v22 = vadd.f32 %v1757_v18, %v2233_v34 }
 0x162   : > { %v1120_v23 = vadd.f32 %v1869_v20, %v959_v22  ;;  %v1758_v24 = vpop.f32.mrb[52].mxu0  ;;  %v1171_v27 = vmax.f32 %v1117_v21, 0.0 }
 0x163   : > { %v1870_v25 = vpop.f32.mrb[52].mxu1  ;;  %v1759_v26 = vpop.f32.mrb[53].mxu0 }
 0x164   : > { %v1172_v28 = vmax.f32 %v1120_v23, 0.0  ;;  %v1760_v29 = vadd.f32 %v1759_v26, %v1758_v24  ;;  %v1871_v30 = vpop.f32.mrb[53].mxu1  ;;  %v1761_v31 = vpop.f32.mrb[54].mxu0 }
 0x165   : > { %v1872_v32 = vadd.f32 %v1871_v30, %v1870_v25  ;;  %v1873_v33 = vpop.f32.mrb[54].mxu1  ;;  %v1762_v35 = vpop.f32.mrb[55].mxu0 }
 0x166   : > { %v1632_v36 = vpack.c.bf16 %v1172_v28, %v1171_v27  ;;  %v964_v37 = vadd.f32 %v1760_v29, %v2233_v34  ;;  %v1763_v38 = vadd.f32 %v1762_v35, %v1761_v31  ;;  %v1874_v39 = vpop.f32.mrb[55].mxu1 }
 0x167   : > { %v1875_v40 = vadd.f32 %v1874_v39, %v1873_v33 }
 0x168   : > { %1660 = vst [vmem:[%s2241_s10 + $0x60] sm:$0xff] %v1632_v36   ;;  %v1125_v41 = vadd.f32 %v1872_v32, %v964_v37  ;;  %v967_v42 = vadd.f32 %v1763_v38, %v2233_v34 }
 0x16a   : > { %v1128_v43 = vadd.f32 %v1875_v40, %v967_v42  ;;  %v1764_v44 = vpop.f32.mrb[56].mxu0  ;;  %v1173_v47 = vmax.f32 %v1125_v41, 0.0 }
 0x16b   : > { %v1876_v45 = vpop.f32.mrb[56].mxu1  ;;  %v1765_v46 = vpop.f32.mrb[57].mxu0 }
 0x16c   : > { %v1174_v48 = vmax.f32 %v1128_v43, 0.0  ;;  %v1766_v49 = vadd.f32 %v1765_v46, %v1764_v44  ;;  %v1877_v50 = vpop.f32.mrb[57].mxu1  ;;  %v1767_v51 = vpop.f32.mrb[58].mxu0 }
 0x16d   : > { %v1878_v52 = vadd.f32 %v1877_v50, %v1876_v45  ;;  %v1879_v53 = vpop.f32.mrb[58].mxu1  ;;  %v1768_v54 = vpop.f32.mrb[59].mxu0 }
 0x16e   : > { %v1637_v55 = vpack.c.bf16 %v1174_v48, %v1173_v47  ;;  %v972_v56 = vadd.f32 %v1766_v49, %v2233_v34  ;;  %v1769_v57 = vadd.f32 %v1768_v54, %v1767_v51  ;;  %v1880_v58 = vpop.f32.mrb[59].mxu1 }
 0x16f   : > { %v1881_v59 = vadd.f32 %v1880_v58, %v1879_v53 }
 0x170   : > { %1661 = vst [vmem:[%s2241_s10 + $0x68] sm:$0xff] %v1637_v55   ;;  %v1133_v60 = vadd.f32 %v1878_v52, %v972_v56  ;;  %v975_v61 = vadd.f32 %v1769_v57, %v2233_v34 }
 0x172   : > { %v1136_v62 = vadd.f32 %v1881_v59, %v975_v61  ;;  %v1770_v63 = vpop.f32.mrb[60].mxu0  ;;  %v1175_v2 = vmax.f32 %v1133_v60, 0.0 }
 0x173   : > { %v1882_v0 = vpop.f32.mrb[60].mxu1  ;;  %v1771_v1 = vpop.f32.mrb[61].mxu0 }
 0x174   : > { %v1176_v3 = vmax.f32 %v1136_v62, 0.0  ;;  %v1772_v4 = vadd.f32 %v1771_v1, %v1770_v63  ;;  %v1883_v5 = vpop.f32.mrb[61].mxu1  ;;  %v1773_v6 = vpop.f32.mrb[62].mxu0 }
 0x175   : > { %v1884_v7 = vadd.f32 %v1883_v5, %v1882_v0  ;;  %v1885_v8 = vpop.f32.mrb[62].mxu1  ;;  %v1774_v9 = vpop.f32.mrb[63].mxu0 }
 0x176   : > { %v1642_v10 = vpack.c.bf16 %v1176_v3, %v1175_v2  ;;  %v980_v11 = vadd.f32 %v1772_v4, %v2233_v34  ;;  %v1775_v12 = vadd.f32 %v1774_v9, %v1773_v6  ;;  %v1886_v13 = vpop.f32.mrb[63].mxu1 }
 0x177   : > { %v1887_v14 = vadd.f32 %v1886_v13, %v1885_v8 }
 0x178   : > { %1662 = vst [vmem:[%s2241_s10 + $0x70] sm:$0xff] %v1642_v10   ;;  %v1141_v15 = vadd.f32 %v1884_v7, %v980_v11  ;;  %v983_v16 = vadd.f32 %v1775_v12, %v2233_v34 }
 0x17a   : > { %v1144_v17 = vadd.f32 %v1887_v14, %v983_v16  ;;  %v1177_v18 = vmax.f32 %v1141_v15, 0.0 }
 0x17c   : > { %v1178_v19 = vmax.f32 %v1144_v17, 0.0 }
 0x17e   : > { %v1647_v20 = vpack.c.bf16 %v1178_v19, %v1177_v18 }
 0x180   : > { %1663 = vst [vmem:[%s2241_s10 + $0x78] sm:$0xff] %v1647_v20  }
 0x181 PF: > { %s13_s12 = sadd.s32 1, %s2030_s12  }
 0x182   : > { %p10_p4 = scmp.ge.s32.totalorder %s13_s12, 4  }
 0x184   :  { %12 = sbr.rel (!%p10_p4) target bundleno = 1 (0x1), region = 62 }

// kernel: minkunet_forward.26
= control target key start
LH: loop header
LB: loop body
LE: loop exit
PB: predicated region body
PF: predicated region fallthrough
CT: control target
= control target key end

     0   :  { %s2020_s12 = smov 0   ;;  %s2260_s0 = inlined_call_operand.vmem [shape: bf16[512,512], index: 0, kind: input, shape index: {}]   ;;  %s2261_s1 = inlined_call_operand.vmem [shape: bf16[512,128], index: 1, kind: input, shape index: {}]   ;;  %s2262_s2 = inlined_call_operand.vmem [shape: f32[1,128], index: 2, kind: input, shape index: {}]   ;;  %s2263_s3 = inlined_call_operand.vmem [shape: bf16[512,128], index: 3, kind: output, shape index: {}]  }
   0x1 LB: > { %s1363_s13 = sadd.s32 4294967295, %s1998_s12   ;;  %p1367_p0 = scmp.ge.s32.totalorder %s1998_s12, 1  ;;  %s1998_s12 = sphi %s2020_s12, %s13_s12  }
   0x2   : > { %p139_p1 = scmp.lt.s32.totalorder %s1998_s12, 3 }
   0x4   : > { %p140_p2 = pnand %p1367_p0, %p139_p1 }
   0x5   : > { %v1864_v0 = vld [vmem:[%s2261_s1 + $0x40] sm:$0xff] (!%p140_p2)   ;;  %v1868_v4 = vld [vmem:[%s2261_s1 + $0x48] sm:$0xff] (!%p140_p2)   ;;  %v1872_v8 = vld [vmem:[%s2261_s1 + $0x50] sm:$0xff] (!%p140_p2)   ;;  %s1368_s21 = sshll.u32 (!%p140_p2), %s1363_s13, 5 }
   0x6   : > { %143 = sbr.rel (%p140_p2) target bundleno = 383 (0x17f), region = 32  ;;  %v1865_v1 = vld [vmem:[%s2261_s1 + $0xc0] sm:$0xff] (!%p140_p2)   ;;  %1632 = vmatprep.subr.bf16.mxu0 (!%p140_p2), %v1864_v0  ;;  %v1869_v5 = vld [vmem:[%s2261_s1 + $0xc8] sm:$0xff] (!%p140_p2)   ;;  %v1873_v9 = vld [vmem:[%s2261_s1 + $0xd0] sm:$0xff] (!%p140_p2)   ;;  %p165_p3 = scmp.lt.s32.totalorder (!%p140_p2), %s1368_s21, 63 }
   0x7   : > { %v1866_v2 = vld [vmem:[%s2261_s1] sm:$0xff] (!%p140_p2)   ;;  %1744 = vmatprep.subr.bf16.mxu1 (!%p140_p2), %v1865_v1  ;;  %v1870_v6 = vld [vmem:[%s2261_s1 + $0x8] sm:$0xff] (!%p140_p2)   ;;  %v1874_v10 = vld [vmem:[%s2261_s1 + $0x10] sm:$0xff] (!%p140_p2)  }
   0x8   : > { %v1867_v3 = vld [vmem:[%s2261_s1 + $0x80] sm:$0xff] (!%p140_p2)   ;;  %1633 = vmatpush3.bf16.msra.mxu0 (!%p140_p2), %v1866_v2  ;;  %v1871_v7 = vld [vmem:[%s2261_s1 + $0x88] sm:$0xff] (!%p140_p2)   ;;  %v1875_v11 = vld [vmem:[%s2261_s1 + $0x90] sm:$0xff] (!%p140_p2)  }
   0x9   : > { %1745 = vmatpush3.bf16.msra.mxu1 (!%p140_p2), %v1867_v3  ;;  %1634 = vmatprep.subr.bf16.mxu0 (!%p140_p2), %v1868_v4  ;;  %v1876_v12 = vld [vmem:[%s2261_s1 + $0x58] sm:$0xff] (!%p140_p2)   ;;  %v1880_v16 = vld [vmem:[%s2261_s1 + $0x60] sm:$0xff] (!%p140_p2)   ;;  %v1884_v20 = vld [vmem:[%s2261_s1 + $0x68] sm:$0xff] (!%p140_p2)  }
   0xa   : > { %1746 = vmatprep.subr.bf16.mxu1 (!%p140_p2), %v1869_v5  ;;  %v1877_v13 = vld [vmem:[%s2261_s1 + $0xd8] sm:$0xff] (!%p140_p2)   ;;  %v1881_v17 = vld [vmem:[%s2261_s1 + $0xe0] sm:$0xff] (!%p140_p2)   ;;  %v1885_v21 = vld [vmem:[%s2261_s1 + $0xe8] sm:$0xff] (!%p140_p2)  }
   0xb   : > { %v1878_v14 = vld [vmem:[%s2261_s1 + $0x18] sm:$0xff] (!%p140_p2)   ;;  %v1882_v18 = vld [vmem:[%s2261_s1 + $0x20] sm:$0xff] (!%p140_p2)   ;;  %v1886_v22 = vld [vmem:[%s2261_s1 + $0x28] sm:$0xff] (!%p140_p2)  }
   0xc   : > { %1635 = vmatpush3.bf16.msra.mxu0 (!%p140_p2), %v1870_v6  ;;  %v1879_v15 = vld [vmem:[%s2261_s1 + $0x98] sm:$0xff] (!%p140_p2)   ;;  %v1883_v19 = vld [vmem:[%s2261_s1 + $0xa0] sm:$0xff] (!%p140_p2)   ;;  %v1887_v23 = vld [vmem:[%s2261_s1 + $0xa8] sm:$0xff] (!%p140_p2)  }
   0xd   : > { %1747 = vmatpush3.bf16.msra.mxu1 %v1871_v7  ;;  %1636 = vmatprep.subr.bf16.mxu0 %v1872_v8  ;;  %s2265_s21 = smov (!%p165_p3, %s1368_s21), 63  ;;  %v1888_v24 = vld [vmem:[%s2261_s1 + $0x70] sm:$0xff]   ;;  %v1892_v28 = vld [vmem:[%s2261_s1 + $0x78] sm:$0xff]  }
   0xe   : > { %1748 = vmatprep.subr.bf16.mxu1 %v1873_v9  ;;  %v1889_v25 = vld [vmem:[%s2261_s1 + $0xf0] sm:$0xff]   ;;  %s1504_s18 = sshll.u32 %s2265_s21, 4  ;;  %v1893_v29 = vld [vmem:[%s2261_s1 + $0xf8] sm:$0xff]   ;;  %s1372_s7 = sshll.u32 %s2265_s21, 2 }
   0xf   : > { %v1890_v26 = vld [vmem:[%s2261_s1 + $0x30] sm:$0xff]   ;;  %s2126_s28 = scalar_lea.vmem %s2260_s0, %s1504_s18  ;;  %v1894_v30 = vld [vmem:[%s2261_s1 + $0x38] sm:$0xff]   ;;  %s2209_s10 = scalar_lea.vmem %s2263_s3, %s1372_s7 }
  0x10   : > { %1637 = vmatpush3.bf16.msra.mxu0 %v1874_v10  ;;  %v1891_v27 = vld [vmem:[%s2261_s1 + $0xb0] sm:$0xff]   ;;  %v1895_v31 = vld [vmem:[%s2261_s1 + $0xb8] sm:$0xff]  }
  0x11   : > { %1749 = vmatpush3.bf16.msra.mxu1 %v1875_v11  ;;  %1638 = vmatprep.subr.bf16.mxu0 %v1876_v12  ;;  %v1896_v32 = vld [vmem:[%s2126_s28] ss:$16 sps:$4 sm:$0xff]   ;;  %v1898_v33 = vld [vmem:[%s2126_s28 + $0x4] ss:$16 sps:$4 sm:$0xff]   ;;  %v1899_v34 = vld [vmem:[%s2126_s28 + $0x8] ss:$16 sps:$4 sm:$0xff]  }
  0x12   : > { %1750 = vmatprep.subr.bf16.mxu1 %v1877_v13  ;;  %v1901_v35 = vld [vmem:[%s2126_s28 + $0xc] ss:$16 sps:$4 sm:$0xff]   ;;  %857 = vmatprep.mubr.bf16.mxu0 %v1898_v33  ;;  %v1902_v36 = vld [vmem:[%s2126_s28 + $0x24] ss:$16 sps:$4 sm:$0xff]   ;;  %v1906_v38 = vld [vmem:[%s2126_s28 + $0x20] ss:$16 sps:$4 sm:$0xff]  }
  0x13   : > { %1018 = vmatprep.mubr.bf16.mxu1 %v1901_v35  ;;  %v1904_v37 = vld [vmem:[%s2126_s28 + $0x2c] ss:$16 sps:$4 sm:$0xff]   ;;  %v1907_v39 = vld [vmem:[%s2126_s28 + $0x28] ss:$16 sps:$4 sm:$0xff]   ;;  %v1908_v40 = vld [vmem:[%s2126_s28 + $0x44] ss:$16 sps:$4 sm:$0xff]  }
  0x14   : > { %1639 = vmatpush3.bf16.msra.mxu0 %v1878_v14  ;;  %v1910_v41 = vld [vmem:[%s2126_s28 + $0x4c] ss:$16 sps:$4 sm:$0xff]   ;;  %v1912_v42 = vld [vmem:[%s2126_s28 + $0x40] ss:$16 sps:$4 sm:$0xff]   ;;  %v1913_v43 = vld [vmem:[%s2126_s28 + $0x48] ss:$16 sps:$4 sm:$0xff]  }
  0x15   : > { %1751 = vmatpush3.bf16.msra.mxu1 %v1879_v15  ;;  %1640 = vmatprep.subr.bf16.mxu0 %v1880_v16  ;;  %v1914_v44 = vld [vmem:[%s2126_s28 + $0x64] ss:$16 sps:$4 sm:$0xff]   ;;  %v1916_v45 = vld [vmem:[%s2126_s28 + $0x6c] ss:$16 sps:$4 sm:$0xff]   ;;  %v1918_v46 = vld [vmem:[%s2126_s28 + $0x60] ss:$16 sps:$4 sm:$0xff]  }
  0x16   : > { %1752 = vmatprep.subr.bf16.mxu1 %v1881_v17  ;;  %v1919_v47 = vld [vmem:[%s2126_s28 + $0x68] ss:$16 sps:$4 sm:$0xff]   ;;  %v1920_v48 = vld [vmem:[%s2126_s28 + $0x84] ss:$16 sps:$4 sm:$0xff]   ;;  %v1922_v49 = vld [vmem:[%s2126_s28 + $0x8c] ss:$16 sps:$4 sm:$0xff]  }
  0x17   : > { %v1924_v50 = vld [vmem:[%s2126_s28 + $0x80] ss:$16 sps:$4 sm:$0xff]   ;;  %v1925_v51 = vld [vmem:[%s2126_s28 + $0x88] ss:$16 sps:$4 sm:$0xff]   ;;  %v1926_v52 = vld [vmem:[%s2126_s28 + $0xa4] ss:$16 sps:$4 sm:$0xff]  }
  0x18   : > { %1641 = vmatpush3.bf16.msra.mxu0 %v1882_v18  ;;  %v1928_v53 = vld [vmem:[%s2126_s28 + $0xac] ss:$16 sps:$4 sm:$0xff]   ;;  %v1930_v54 = vld [vmem:[%s2126_s28 + $0xa0] ss:$16 sps:$4 sm:$0xff]   ;;  %v1931_v55 = vld [vmem:[%s2126_s28 + $0xa8] ss:$16 sps:$4 sm:$0xff]  }
  0x19   : > { %1753 = vmatpush3.bf16.msra.mxu1 %v1883_v19  ;;  %1642 = vmatprep.subr.bf16.mxu0 %v1884_v20  ;;  %v1932_v56 = vld [vmem:[%s2126_s28 + $0xc4] ss:$16 sps:$4 sm:$0xff]   ;;  %v1934_v57 = vld [vmem:[%s2126_s28 + $0xcc] ss:$16 sps:$4 sm:$0xff]   ;;  %v1936_v58 = vld [vmem:[%s2126_s28 + $0xc0] ss:$16 sps:$4 sm:$0xff]  }
  0x1a   : > { %1754 = vmatprep.subr.bf16.mxu1 %v1885_v21  ;;  %v1937_v59 = vld [vmem:[%s2126_s28 + $0xc8] ss:$16 sps:$4 sm:$0xff]   ;;  %v1938_v60 = vld [vmem:[%s2126_s28 + $0xe4] ss:$16 sps:$4 sm:$0xff]   ;;  %v1940_v61 = vld [vmem:[%s2126_s28 + $0xec] ss:$16 sps:$4 sm:$0xff]  }
  0x1b   : > { %v1942_v62 = vld [vmem:[%s2126_s28 + $0xe0] ss:$16 sps:$4 sm:$0xff]   ;;  %v1943_v63 = vld [vmem:[%s2126_s28 + $0xe8] ss:$16 sps:$4 sm:$0xff]   ;;  %v1944_v0 = vld [vmem:[%s2126_s28 + $0x104] ss:$16 sps:$4 sm:$0xff]  }
  0x1c   : > { %1643 = vmatpush3.bf16.msra.mxu0 %v1886_v22  ;;  %v1946_v1 = vld [vmem:[%s2126_s28 + $0x10c] ss:$16 sps:$4 sm:$0xff]   ;;  %v1948_v2 = vld [vmem:[%s2126_s28 + $0x100] ss:$16 sps:$4 sm:$0xff]   ;;  %v1949_v3 = vld [vmem:[%s2126_s28 + $0x108] ss:$16 sps:$4 sm:$0xff]  }
  0x1d   : > { %1755 = vmatpush3.bf16.msra.mxu1 %v1887_v23  ;;  %1644 = vmatprep.subr.bf16.mxu0 %v1888_v24  ;;  %v1950_v4 = vld [vmem:[%s2126_s28 + $0x124] ss:$16 sps:$4 sm:$0xff]   ;;  %v1952_v5 = vld [vmem:[%s2126_s28 + $0x12c] ss:$16 sps:$4 sm:$0xff]   ;;  %v1954_v6 = vld [vmem:[%s2126_s28 + $0x120] ss:$16 sps:$4 sm:$0xff]  }
  0x1e   : > { %1756 = vmatprep.subr.bf16.mxu1 %v1889_v25  ;;  %v1955_v7 = vld [vmem:[%s2126_s28 + $0x128] ss:$16 sps:$4 sm:$0xff]   ;;  %v1956_v8 = vld [vmem:[%s2126_s28 + $0x144] ss:$16 sps:$4 sm:$0xff]   ;;  %v1958_v9 = vld [vmem:[%s2126_s28 + $0x14c] ss:$16 sps:$4 sm:$0xff]  }
  0x1f   : > { %v1960_v10 = vld [vmem:[%s2126_s28 + $0x140] ss:$16 sps:$4 sm:$0xff]   ;;  %v1961_v11 = vld [vmem:[%s2126_s28 + $0x148] ss:$16 sps:$4 sm:$0xff]   ;;  %v1962_v12 = vld [vmem:[%s2126_s28 + $0x164] ss:$16 sps:$4 sm:$0xff]  }
  0x20   : > { %1645 = vmatpush3.bf16.msra.mxu0 %v1890_v26  ;;  %v1964_v13 = vld [vmem:[%s2126_s28 + $0x16c] ss:$16 sps:$4 sm:$0xff]   ;;  %v1966_v14 = vld [vmem:[%s2126_s28 + $0x160] ss:$16 sps:$4 sm:$0xff]   ;;  %v1967_v15 = vld [vmem:[%s2126_s28 + $0x168] ss:$16 sps:$4 sm:$0xff]  }
  0x21   : > { %1757 = vmatpush3.bf16.msra.mxu1 %v1891_v27  ;;  %1646 = vmatprep.subr.bf16.mxu0 %v1892_v28  ;;  %v1968_v16 = vld [vmem:[%s2126_s28 + $0x184] ss:$16 sps:$4 sm:$0xff]   ;;  %v1970_v17 = vld [vmem:[%s2126_s28 + $0x18c] ss:$16 sps:$4 sm:$0xff]   ;;  %v1972_v18 = vld [vmem:[%s2126_s28 + $0x180] ss:$16 sps:$4 sm:$0xff]  }
  0x22   : > { %1758 = vmatprep.subr.bf16.mxu1 %v1893_v29  ;;  %v1973_v19 = vld [vmem:[%s2126_s28 + $0x188] ss:$16 sps:$4 sm:$0xff]   ;;  %v1974_v20 = vld [vmem:[%s2126_s28 + $0x1a4] ss:$16 sps:$4 sm:$0xff]   ;;  %v1976_v21 = vld [vmem:[%s2126_s28 + $0x1ac] ss:$16 sps:$4 sm:$0xff]  }
  0x23   : > { %v1978_v22 = vld [vmem:[%s2126_s28 + $0x1a0] ss:$16 sps:$4 sm:$0xff]   ;;  %v1979_v23 = vld [vmem:[%s2126_s28 + $0x1a8] ss:$16 sps:$4 sm:$0xff]   ;;  %v1980_v24 = vld [vmem:[%s2126_s28 + $0x1c4] ss:$16 sps:$4 sm:$0xff]  }
  0x24   : > { %1647 = vmatpush3.bf16.msra.mxu0 %v1894_v30  ;;  %v1982_v25 = vld [vmem:[%s2126_s28 + $0x1cc] ss:$16 sps:$4 sm:$0xff]   ;;  %v1984_v26 = vld [vmem:[%s2126_s28 + $0x1c0] ss:$16 sps:$4 sm:$0xff]   ;;  %v1985_v27 = vld [vmem:[%s2126_s28 + $0x1c8] ss:$16 sps:$4 sm:$0xff]  }
  0x25   : > { %1759 = vmatpush3.bf16.msra.mxu1 %v1895_v31  ;;  %v1986_v28 = vld [vmem:[%s2126_s28 + $0x1e4] ss:$16 sps:$4 sm:$0xff]   ;;  %v1988_v29 = vld [vmem:[%s2126_s28 + $0x1ec] ss:$16 sps:$4 sm:$0xff]   ;;  %v1990_v30 = vld [vmem:[%s2126_s28 + $0x1e0] ss:$16 sps:$4 sm:$0xff]  }
  0x26   : > { %v1991_v31 = vld [vmem:[%s2126_s28 + $0x1e8] ss:$16 sps:$4 sm:$0xff]  }
  0x27   : > { %858 = vmatmul.mubr.bf16.vlgmr.msra.gmra.mrb[0].mxu0 %v1896_v32 }
  0x28   : > { %1019 = vmatmul.mubr.bf16.vlgmr.msra.gmra.mrb[0].mxu1 %v1899_v34  ;;  %865 = vmatprep.mubr.bf16.mxu0 %v1902_v36  ;;  %v2201_v34 = vld [vmem:[%s2262_s2] ss:$0 sm:$0xff] }
  0x29   : > { %1026 = vmatprep.mubr.bf16.mxu1 %v1904_v37 }
  0x2f   : > { %866 = vmatmul.mubr.bf16.gmra.mrb[4].mxu0 %v1906_v38 }
  0x30   : > { %1027 = vmatmul.mubr.bf16.gmra.mrb[4].mxu1 %v1907_v39  ;;  %873 = vmatprep.mubr.bf16.mxu0 %v1908_v40 }
  0x31   : > { %1034 = vmatprep.mubr.bf16.mxu1 %v1910_v41 }
  0x37   : > { %874 = vmatmul.mubr.bf16.gmra.mrb[8].mxu0 %v1912_v42 }
  0x38   : > { %1035 = vmatmul.mubr.bf16.gmra.mrb[8].mxu1 %v1913_v43  ;;  %881 = vmatprep.mubr.bf16.mxu0 %v1914_v44 }
  0x39   : > { %1042 = vmatprep.mubr.bf16.mxu1 %v1916_v45 }
  0x3f   : > { %882 = vmatmul.mubr.bf16.gmra.mrb[12].mxu0 %v1918_v46 }
  0x40   : > { %1043 = vmatmul.mubr.bf16.gmra.mrb[12].mxu1 %v1919_v47  ;;  %889 = vmatprep.mubr.bf16.mxu0 %v1920_v48 }
  0x41   : > { %1050 = vmatprep.mubr.bf16.mxu1 %v1922_v49 }
  0x47   : > { %890 = vmatmul.mubr.bf16.gmra.mrb[16].mxu0 %v1924_v50 }
  0x48   : > { %1051 = vmatmul.mubr.bf16.gmra.mrb[16].mxu1 %v1925_v51  ;;  %897 = vmatprep.mubr.bf16.mxu0 %v1926_v52 }
  0x49   : > { %1058 = vmatprep.mubr.bf16.mxu1 %v1928_v53 }
  0x4f   : > { %898 = vmatmul.mubr.bf16.gmra.mrb[20].mxu0 %v1930_v54 }
  0x50   : > { %1059 = vmatmul.mubr.bf16.gmra.mrb[20].mxu1 %v1931_v55  ;;  %905 = vmatprep.mubr.bf16.mxu0 %v1932_v56 }
  0x51   : > { %1066 = vmatprep.mubr.bf16.mxu1 %v1934_v57 }
  0x57   : > { %906 = vmatmul.mubr.bf16.gmra.mrb[24].mxu0 %v1936_v58 }
  0x58   : > { %1067 = vmatmul.mubr.bf16.gmra.mrb[24].mxu1 %v1937_v59  ;;  %913 = vmatprep.mubr.bf16.mxu0 %v1938_v60 }
  0x59   : > { %1074 = vmatprep.mubr.bf16.mxu1 %v1940_v61 }
  0x5f   : > { %914 = vmatmul.mubr.bf16.gmra.mrb[28].mxu0 %v1942_v62 }
  0x60   : > { %1075 = vmatmul.mubr.bf16.gmra.mrb[28].mxu1 %v1943_v63  ;;  %921 = vmatprep.mubr.bf16.mxu0 %v1944_v0 }
  0x61   : > { %1082 = vmatprep.mubr.bf16.mxu1 %v1946_v1 }
  0x67   : > { %922 = vmatmul.mubr.bf16.gmra.mrb[32].mxu0 %v1948_v2 }
  0x68   : > { %1083 = vmatmul.mubr.bf16.gmra.mrb[32].mxu1 %v1949_v3  ;;  %929 = vmatprep.mubr.bf16.mxu0 %v1950_v4 }
  0x69   : > { %1090 = vmatprep.mubr.bf16.mxu1 %v1952_v5 }
  0x6f   : > { %930 = vmatmul.mubr.bf16.gmra.mrb[36].mxu0 %v1954_v6 }
  0x70   : > { %1091 = vmatmul.mubr.bf16.gmra.mrb[36].mxu1 %v1955_v7  ;;  %937 = vmatprep.mubr.bf16.mxu0 %v1956_v8 }
  0x71   : > { %1098 = vmatprep.mubr.bf16.mxu1 %v1958_v9 }
  0x77   : > { %938 = vmatmul.mubr.bf16.gmra.mrb[40].mxu0 %v1960_v10 }
  0x78   : > { %1099 = vmatmul.mubr.bf16.gmra.mrb[40].mxu1 %v1961_v11  ;;  %945 = vmatprep.mubr.bf16.mxu0 %v1962_v12 }
  0x79   : > { %1106 = vmatprep.mubr.bf16.mxu1 %v1964_v13 }
  0x7f   : > { %946 = vmatmul.mubr.bf16.gmra.mrb[44].mxu0 %v1966_v14 }
  0x80   : > { %1107 = vmatmul.mubr.bf16.gmra.mrb[44].mxu1 %v1967_v15  ;;  %953 = vmatprep.mubr.bf16.mxu0 %v1968_v16 }
  0x81   : > { %1114 = vmatprep.mubr.bf16.mxu1 %v1970_v17 }
  0x87   : > { %954 = vmatmul.mubr.bf16.gmra.mrb[48].mxu0 %v1972_v18 }
  0x88   : > { %1115 = vmatmul.mubr.bf16.gmra.mrb[48].mxu1 %v1973_v19  ;;  %961 = vmatprep.mubr.bf16.mxu0 %v1974_v20 }
  0x89   : > { %1122 = vmatprep.mubr.bf16.mxu1 %v1976_v21 }
  0x8f   : > { %962 = vmatmul.mubr.bf16.gmra.mrb[52].mxu0 %v1978_v22 }
  0x90   : > { %1123 = vmatmul.mubr.bf16.gmra.mrb[52].mxu1 %v1979_v23  ;;  %969 = vmatprep.mubr.bf16.mxu0 %v1980_v24 }
  0x91   : > { %1130 = vmatprep.mubr.bf16.mxu1 %v1982_v25 }
  0x97   : > { %970 = vmatmul.mubr.bf16.gmra.mrb[56].mxu0 %v1984_v26 }
  0x98   : > { %1131 = vmatmul.mubr.bf16.gmra.mrb[56].mxu1 %v1985_v27  ;;  %977 = vmatprep.mubr.bf16.mxu0 %v1986_v28 }
  0x99   : > { %1138 = vmatprep.mubr.bf16.mxu1 %v1988_v29 }
  0x9f   : > { %978 = vmatmul.mubr.bf16.gmra.mrb[60].mxu0 %v1990_v30 }
  0xa0   : > { %1139 = vmatmul.mubr.bf16.gmra.mrb[60].mxu1 %v1991_v31 }
  0xfa   : > { %v1648_v32 = vpop.f32.mrb[0].mxu0 }
  0xfb   : > { %v1760_v33 = vpop.f32.mrb[0].mxu1  ;;  %v1649_v35 = vpop.f32.mrb[1].mxu0 }
  0xfc   : > { %v1650_v36 = vadd.f32 %v1649_v35, %v1648_v32  ;;  %v1761_v37 = vpop.f32.mrb[1].mxu1  ;;  %v1651_v38 = vpop.f32.mrb[2].mxu0 }
  0xfd   : > { %v1762_v39 = vadd.f32 %v1761_v37, %v1760_v33  ;;  %v1763_v40 = vpop.f32.mrb[2].mxu1  ;;  %v1652_v41 = vpop.f32.mrb[3].mxu0 }
  0xfe   : > { %v860_v42 = vadd.f32 %v1650_v36, %v2201_v34  ;;  %v1653_v43 = vadd.f32 %v1652_v41, %v1651_v38  ;;  %v1764_v44 = vpop.f32.mrb[3].mxu1 }
  0xff   : > { %v1765_v45 = vadd.f32 %v1764_v44, %v1763_v40 }
 0x100   : > { %v1021_v46 = vadd.f32 %v1762_v39, %v860_v42  ;;  %v863_v47 = vadd.f32 %v1653_v43, %v2201_v34 }
 0x102   : > { %v1024_v48 = vadd.f32 %v1765_v45, %v863_v47  ;;  %v1654_v49 = vpop.f32.mrb[4].mxu0 }
 0x103   : > { %v1766_v50 = vpop.f32.mrb[4].mxu1  ;;  %v1655_v51 = vpop.f32.mrb[5].mxu0 }
 0x104   : > { %v1540_v52 = vpack.c.bf16 %v1024_v48, %v1021_v46  ;;  %v1656_v53 = vadd.f32 %v1655_v51, %v1654_v49  ;;  %v1767_v54 = vpop.f32.mrb[5].mxu1  ;;  %v1657_v55 = vpop.f32.mrb[6].mxu0 }
 0x105   : > { %v1768_v56 = vadd.f32 %v1767_v54, %v1766_v50  ;;  %v1769_v57 = vpop.f32.mrb[6].mxu1  ;;  %v1658_v58 = vpop.f32.mrb[7].mxu0 }
 0x106   : > { %1541 = vst [vmem:[%s2209_s10] sm:$0xff] %v1540_v52   ;;  %v868_v59 = vadd.f32 %v1656_v53, %v2201_v34  ;;  %v1659_v60 = vadd.f32 %v1658_v58, %v1657_v55  ;;  %v1770_v61 = vpop.f32.mrb[7].mxu1 }
 0x107   : > { %v1771_v62 = vadd.f32 %v1770_v61, %v1769_v57 }
 0x108   : > { %v1029_v63 = vadd.f32 %v1768_v56, %v868_v59  ;;  %v871_v0 = vadd.f32 %v1659_v60, %v2201_v34 }
 0x10a   : > { %v1032_v1 = vadd.f32 %v1771_v62, %v871_v0  ;;  %v1660_v2 = vpop.f32.mrb[8].mxu0 }
 0x10b   : > { %v1772_v3 = vpop.f32.mrb[8].mxu1  ;;  %v1661_v4 = vpop.f32.mrb[9].mxu0 }
 0x10c   : > { %v1545_v5 = vpack.c.bf16 %v1032_v1, %v1029_v63  ;;  %v1662_v6 = vadd.f32 %v1661_v4, %v1660_v2  ;;  %v1773_v7 = vpop.f32.mrb[9].mxu1  ;;  %v1663_v8 = vpop.f32.mrb[10].mxu0 }
 0x10d   : > { %v1774_v9 = vadd.f32 %v1773_v7, %v1772_v3  ;;  %v1775_v10 = vpop.f32.mrb[10].mxu1  ;;  %v1664_v11 = vpop.f32.mrb[11].mxu0 }
 0x10e   : > { %1617 = vst [vmem:[%s2209_s10 + $0x8] sm:$0xff] %v1545_v5   ;;  %v876_v12 = vadd.f32 %v1662_v6, %v2201_v34  ;;  %v1665_v13 = vadd.f32 %v1664_v11, %v1663_v8  ;;  %v1776_v14 = vpop.f32.mrb[11].mxu1 }
 0x10f   : > { %v1777_v15 = vadd.f32 %v1776_v14, %v1775_v10 }
 0x110   : > { %v1037_v16 = vadd.f32 %v1774_v9, %v876_v12  ;;  %v879_v17 = vadd.f32 %v1665_v13, %v2201_v34 }
 0x112   : > { %v1040_v18 = vadd.f32 %v1777_v15, %v879_v17  ;;  %v1666_v19 = vpop.f32.mrb[12].mxu0 }
 0x113   : > { %v1778_v20 = vpop.f32.mrb[12].mxu1  ;;  %v1667_v21 = vpop.f32.mrb[13].mxu0 }
 0x114   : > { %v1550_v22 = vpack.c.bf16 %v1040_v18, %v1037_v16  ;;  %v1668_v23 = vadd.f32 %v1667_v21, %v1666_v19  ;;  %v1779_v24 = vpop.f32.mrb[13].mxu1  ;;  %v1669_v25 = vpop.f32.mrb[14].mxu0 }
 0x115   : > { %v1780_v26 = vadd.f32 %v1779_v24, %v1778_v20  ;;  %v1781_v27 = vpop.f32.mrb[14].mxu1  ;;  %v1670_v28 = vpop.f32.mrb[15].mxu0 }
 0x116   : > { %1618 = vst [vmem:[%s2209_s10 + $0x10] sm:$0xff] %v1550_v22   ;;  %v884_v29 = vadd.f32 %v1668_v23, %v2201_v34  ;;  %v1671_v30 = vadd.f32 %v1670_v28, %v1669_v25  ;;  %v1782_v31 = vpop.f32.mrb[15].mxu1 }
 0x117   : > { %v1783_v32 = vadd.f32 %v1782_v31, %v1781_v27 }
 0x118   : > { %v1045_v33 = vadd.f32 %v1780_v26, %v884_v29  ;;  %v887_v35 = vadd.f32 %v1671_v30, %v2201_v34 }
 0x11a   : > { %v1048_v36 = vadd.f32 %v1783_v32, %v887_v35  ;;  %v1672_v37 = vpop.f32.mrb[16].mxu0 }
 0x11b   : > { %v1784_v38 = vpop.f32.mrb[16].mxu1  ;;  %v1673_v39 = vpop.f32.mrb[17].mxu0 }
 0x11c   : > { %v1555_v40 = vpack.c.bf16 %v1048_v36, %v1045_v33  ;;  %v1674_v41 = vadd.f32 %v1673_v39, %v1672_v37  ;;  %v1785_v42 = vpop.f32.mrb[17].mxu1  ;;  %v1675_v43 = vpop.f32.mrb[18].mxu0 }
 0x11d   : > { %v1786_v44 = vadd.f32 %v1785_v42, %v1784_v38  ;;  %v1787_v45 = vpop.f32.mrb[18].mxu1  ;;  %v1676_v46 = vpop.f32.mrb[19].mxu0 }
 0x11e   : > { %1619 = vst [vmem:[%s2209_s10 + $0x18] sm:$0xff] %v1555_v40   ;;  %v892_v47 = vadd.f32 %v1674_v41, %v2201_v34  ;;  %v1677_v48 = vadd.f32 %v1676_v46, %v1675_v43  ;;  %v1788_v49 = vpop.f32.mrb[19].mxu1 }
 0x11f   : > { %v1789_v50 = vadd.f32 %v1788_v49, %v1787_v45 }
 0x120   : > { %v1053_v51 = vadd.f32 %v1786_v44, %v892_v47  ;;  %v895_v52 = vadd.f32 %v1677_v48, %v2201_v34 }
 0x122   : > { %v1056_v53 = vadd.f32 %v1789_v50, %v895_v52  ;;  %v1678_v54 = vpop.f32.mrb[20].mxu0 }
 0x123   : > { %v1790_v55 = vpop.f32.mrb[20].mxu1  ;;  %v1679_v56 = vpop.f32.mrb[21].mxu0 }
 0x124   : > { %v1560_v57 = vpack.c.bf16 %v1056_v53, %v1053_v51  ;;  %v1680_v58 = vadd.f32 %v1679_v56, %v1678_v54  ;;  %v1791_v59 = vpop.f32.mrb[21].mxu1  ;;  %v1681_v60 = vpop.f32.mrb[22].mxu0 }
 0x125   : > { %v1792_v61 = vadd.f32 %v1791_v59, %v1790_v55  ;;  %v1793_v62 = vpop.f32.mrb[22].mxu1  ;;  %v1682_v63 = vpop.f32.mrb[23].mxu0 }
 0x126   : > { %1620 = vst [vmem:[%s2209_s10 + $0x20] sm:$0xff] %v1560_v57   ;;  %v900_v0 = vadd.f32 %v1680_v58, %v2201_v34  ;;  %v1683_v1 = vadd.f32 %v1682_v63, %v1681_v60  ;;  %v1794_v2 = vpop.f32.mrb[23].mxu1 }
 0x127   : > { %v1795_v3 = vadd.f32 %v1794_v2, %v1793_v62 }
 0x128   : > { %v1061_v4 = vadd.f32 %v1792_v61, %v900_v0  ;;  %v903_v5 = vadd.f32 %v1683_v1, %v2201_v34 }
 0x12a   : > { %v1064_v6 = vadd.f32 %v1795_v3, %v903_v5  ;;  %v1684_v7 = vpop.f32.mrb[24].mxu0 }
 0x12b   : > { %v1796_v8 = vpop.f32.mrb[24].mxu1  ;;  %v1685_v9 = vpop.f32.mrb[25].mxu0 }
 0x12c   : > { %v1565_v10 = vpack.c.bf16 %v1064_v6, %v1061_v4  ;;  %v1686_v11 = vadd.f32 %v1685_v9, %v1684_v7  ;;  %v1797_v12 = vpop.f32.mrb[25].mxu1  ;;  %v1687_v13 = vpop.f32.mrb[26].mxu0 }
 0x12d   : > { %v1798_v14 = vadd.f32 %v1797_v12, %v1796_v8  ;;  %v1799_v15 = vpop.f32.mrb[26].mxu1  ;;  %v1688_v16 = vpop.f32.mrb[27].mxu0 }
 0x12e   : > { %1621 = vst [vmem:[%s2209_s10 + $0x28] sm:$0xff] %v1565_v10   ;;  %v908_v17 = vadd.f32 %v1686_v11, %v2201_v34  ;;  %v1689_v18 = vadd.f32 %v1688_v16, %v1687_v13  ;;  %v1800_v19 = vpop.f32.mrb[27].mxu1 }
 0x12f   : > { %v1801_v20 = vadd.f32 %v1800_v19, %v1799_v15 }
 0x130   : > { %v1069_v21 = vadd.f32 %v1798_v14, %v908_v17  ;;  %v911_v22 = vadd.f32 %v1689_v18, %v2201_v34 }
 0x132   : > { %v1072_v23 = vadd.f32 %v1801_v20, %v911_v22  ;;  %v1690_v24 = vpop.f32.mrb[28].mxu0 }
 0x133   : > { %v1802_v25 = vpop.f32.mrb[28].mxu1  ;;  %v1691_v26 = vpop.f32.mrb[29].mxu0 }
 0x134   : > { %v1570_v27 = vpack.c.bf16 %v1072_v23, %v1069_v21  ;;  %v1692_v28 = vadd.f32 %v1691_v26, %v1690_v24  ;;  %v1803_v29 = vpop.f32.mrb[29].mxu1  ;;  %v1693_v30 = vpop.f32.mrb[30].mxu0 }
 0x135   : > { %v1804_v31 = vadd.f32 %v1803_v29, %v1802_v25  ;;  %v1805_v32 = vpop.f32.mrb[30].mxu1  ;;  %v1694_v33 = vpop.f32.mrb[31].mxu0 }
 0x136   : > { %1622 = vst [vmem:[%s2209_s10 + $0x30] sm:$0xff] %v1570_v27   ;;  %v916_v35 = vadd.f32 %v1692_v28, %v2201_v34  ;;  %v1695_v36 = vadd.f32 %v1694_v33, %v1693_v30  ;;  %v1806_v37 = vpop.f32.mrb[31].mxu1 }
 0x137   : > { %v1807_v38 = vadd.f32 %v1806_v37, %v1805_v32 }
 0x138   : > { %v1077_v39 = vadd.f32 %v1804_v31, %v916_v35  ;;  %v919_v40 = vadd.f32 %v1695_v36, %v2201_v34 }
 0x13a   : > { %v1080_v41 = vadd.f32 %v1807_v38, %v919_v40  ;;  %v1696_v42 = vpop.f32.mrb[32].mxu0 }
 0x13b   : > { %v1808_v43 = vpop.f32.mrb[32].mxu1  ;;  %v1697_v44 = vpop.f32.mrb[33].mxu0 }
 0x13c   : > { %v1575_v45 = vpack.c.bf16 %v1080_v41, %v1077_v39  ;;  %v1698_v46 = vadd.f32 %v1697_v44, %v1696_v42  ;;  %v1809_v47 = vpop.f32.mrb[33].mxu1  ;;  %v1699_v48 = vpop.f32.mrb[34].mxu0 }
 0x13d   : > { %v1810_v49 = vadd.f32 %v1809_v47, %v1808_v43  ;;  %v1811_v50 = vpop.f32.mrb[34].mxu1  ;;  %v1700_v51 = vpop.f32.mrb[35].mxu0 }
 0x13e   : > { %1623 = vst [vmem:[%s2209_s10 + $0x38] sm:$0xff] %v1575_v45   ;;  %v924_v52 = vadd.f32 %v1698_v46, %v2201_v34  ;;  %v1701_v53 = vadd.f32 %v1700_v51, %v1699_v48  ;;  %v1812_v54 = vpop.f32.mrb[35].mxu1 }
 0x13f   : > { %v1813_v55 = vadd.f32 %v1812_v54, %v1811_v50 }
 0x140   : > { %v1085_v56 = vadd.f32 %v1810_v49, %v924_v52  ;;  %v927_v57 = vadd.f32 %v1701_v53, %v2201_v34 }
 0x142   : > { %v1088_v58 = vadd.f32 %v1813_v55, %v927_v57  ;;  %v1702_v59 = vpop.f32.mrb[36].mxu0 }
 0x143   : > { %v1814_v60 = vpop.f32.mrb[36].mxu1  ;;  %v1703_v61 = vpop.f32.mrb[37].mxu0 }
 0x144   : > { %v1580_v62 = vpack.c.bf16 %v1088_v58, %v1085_v56  ;;  %v1704_v63 = vadd.f32 %v1703_v61, %v1702_v59  ;;  %v1815_v0 = vpop.f32.mrb[37].mxu1  ;;  %v1705_v1 = vpop.f32.mrb[38].mxu0 }
 0x145   : > { %v1816_v2 = vadd.f32 %v1815_v0, %v1814_v60  ;;  %v1817_v3 = vpop.f32.mrb[38].mxu1  ;;  %v1706_v4 = vpop.f32.mrb[39].mxu0 }
 0x146   : > { %1624 = vst [vmem:[%s2209_s10 + $0x40] sm:$0xff] %v1580_v62   ;;  %v932_v5 = vadd.f32 %v1704_v63, %v2201_v34  ;;  %v1707_v6 = vadd.f32 %v1706_v4, %v1705_v1  ;;  %v1818_v7 = vpop.f32.mrb[39].mxu1 }
 0x147   : > { %v1819_v8 = vadd.f32 %v1818_v7, %v1817_v3 }
 0x148   : > { %v1093_v9 = vadd.f32 %v1816_v2, %v932_v5  ;;  %v935_v10 = vadd.f32 %v1707_v6, %v2201_v34 }
 0x14a   : > { %v1096_v11 = vadd.f32 %v1819_v8, %v935_v10  ;;  %v1708_v12 = vpop.f32.mrb[40].mxu0 }
 0x14b   : > { %v1820_v13 = vpop.f32.mrb[40].mxu1  ;;  %v1709_v14 = vpop.f32.mrb[41].mxu0 }
 0x14c   : > { %v1585_v15 = vpack.c.bf16 %v1096_v11, %v1093_v9  ;;  %v1710_v16 = vadd.f32 %v1709_v14, %v1708_v12  ;;  %v1821_v17 = vpop.f32.mrb[41].mxu1  ;;  %v1711_v18 = vpop.f32.mrb[42].mxu0 }
 0x14d   : > { %v1822_v19 = vadd.f32 %v1821_v17, %v1820_v13  ;;  %v1823_v20 = vpop.f32.mrb[42].mxu1  ;;  %v1712_v21 = vpop.f32.mrb[43].mxu0 }
 0x14e   : > { %1625 = vst [vmem:[%s2209_s10 + $0x48] sm:$0xff] %v1585_v15   ;;  %v940_v22 = vadd.f32 %v1710_v16, %v2201_v34  ;;  %v1713_v23 = vadd.f32 %v1712_v21, %v1711_v18  ;;  %v1824_v24 = vpop.f32.mrb[43].mxu1 }
 0x14f   : > { %v1825_v25 = vadd.f32 %v1824_v24, %v1823_v20 }
 0x150   : > { %v1101_v26 = vadd.f32 %v1822_v19, %v940_v22  ;;  %v943_v27 = vadd.f32 %v1713_v23, %v2201_v34 }
 0x152   : > { %v1104_v28 = vadd.f32 %v1825_v25, %v943_v27  ;;  %v1714_v29 = vpop.f32.mrb[44].mxu0 }
 0x153   : > { %v1826_v30 = vpop.f32.mrb[44].mxu1  ;;  %v1715_v31 = vpop.f32.mrb[45].mxu0 }
 0x154   : > { %v1590_v32 = vpack.c.bf16 %v1104_v28, %v1101_v26  ;;  %v1716_v33 = vadd.f32 %v1715_v31, %v1714_v29  ;;  %v1827_v35 = vpop.f32.mrb[45].mxu1  ;;  %v1717_v36 = vpop.f32.mrb[46].mxu0 }
 0x155   : > { %v1828_v37 = vadd.f32 %v1827_v35, %v1826_v30  ;;  %v1829_v38 = vpop.f32.mrb[46].mxu1  ;;  %v1718_v39 = vpop.f32.mrb[47].mxu0 }
 0x156   : > { %1626 = vst [vmem:[%s2209_s10 + $0x50] sm:$0xff] %v1590_v32   ;;  %v948_v40 = vadd.f32 %v1716_v33, %v2201_v34  ;;  %v1719_v41 = vadd.f32 %v1718_v39, %v1717_v36  ;;  %v1830_v42 = vpop.f32.mrb[47].mxu1 }
 0x157   : > { %v1831_v43 = vadd.f32 %v1830_v42, %v1829_v38 }
 0x158   : > { %v1109_v44 = vadd.f32 %v1828_v37, %v948_v40  ;;  %v951_v45 = vadd.f32 %v1719_v41, %v2201_v34 }
 0x15a   : > { %v1112_v46 = vadd.f32 %v1831_v43, %v951_v45  ;;  %v1720_v47 = vpop.f32.mrb[48].mxu0 }
 0x15b   : > { %v1832_v48 = vpop.f32.mrb[48].mxu1  ;;  %v1721_v49 = vpop.f32.mrb[49].mxu0 }
 0x15c   : > { %v1595_v50 = vpack.c.bf16 %v1112_v46, %v1109_v44  ;;  %v1722_v51 = vadd.f32 %v1721_v49, %v1720_v47  ;;  %v1833_v52 = vpop.f32.mrb[49].mxu1  ;;  %v1723_v53 = vpop.f32.mrb[50].mxu0 }
 0x15d   : > { %v1834_v54 = vadd.f32 %v1833_v52, %v1832_v48  ;;  %v1835_v55 = vpop.f32.mrb[50].mxu1  ;;  %v1724_v56 = vpop.f32.mrb[51].mxu0 }
 0x15e   : > { %1627 = vst [vmem:[%s2209_s10 + $0x58] sm:$0xff] %v1595_v50   ;;  %v956_v57 = vadd.f32 %v1722_v51, %v2201_v34  ;;  %v1725_v58 = vadd.f32 %v1724_v56, %v1723_v53  ;;  %v1836_v59 = vpop.f32.mrb[51].mxu1 }
 0x15f   : > { %v1837_v60 = vadd.f32 %v1836_v59, %v1835_v55 }
 0x160   : > { %v1117_v61 = vadd.f32 %v1834_v54, %v956_v57  ;;  %v959_v62 = vadd.f32 %v1725_v58, %v2201_v34 }
 0x162   : > { %v1120_v63 = vadd.f32 %v1837_v60, %v959_v62  ;;  %v1726_v0 = vpop.f32.mrb[52].mxu0 }
 0x163   : > { %v1838_v1 = vpop.f32.mrb[52].mxu1  ;;  %v1727_v2 = vpop.f32.mrb[53].mxu0 }
 0x164   : > { %v1600_v3 = vpack.c.bf16 %v1120_v63, %v1117_v61  ;;  %v1728_v4 = vadd.f32 %v1727_v2, %v1726_v0  ;;  %v1839_v5 = vpop.f32.mrb[53].mxu1  ;;  %v1729_v6 = vpop.f32.mrb[54].mxu0 }
 0x165   : > { %v1840_v7 = vadd.f32 %v1839_v5, %v1838_v1  ;;  %v1841_v8 = vpop.f32.mrb[54].mxu1  ;;  %v1730_v9 = vpop.f32.mrb[55].mxu0 }
 0x166   : > { %1628 = vst [vmem:[%s2209_s10 + $0x60] sm:$0xff] %v1600_v3   ;;  %v964_v10 = vadd.f32 %v1728_v4, %v2201_v34  ;;  %v1731_v11 = vadd.f32 %v1730_v9, %v1729_v6  ;;  %v1842_v12 = vpop.f32.mrb[55].mxu1 }
 0x167   : > { %v1843_v13 = vadd.f32 %v1842_v12, %v1841_v8 }
 0x168   : > { %v1125_v14 = vadd.f32 %v1840_v7, %v964_v10  ;;  %v967_v15 = vadd.f32 %v1731_v11, %v2201_v34 }
 0x16a   : > { %v1128_v16 = vadd.f32 %v1843_v13, %v967_v15  ;;  %v1732_v17 = vpop.f32.mrb[56].mxu0 }
 0x16b   : > { %v1844_v18 = vpop.f32.mrb[56].mxu1  ;;  %v1733_v19 = vpop.f32.mrb[57].mxu0 }
 0x16c   : > { %v1605_v20 = vpack.c.bf16 %v1128_v16, %v1125_v14  ;;  %v1734_v21 = vadd.f32 %v1733_v19, %v1732_v17  ;;  %v1845_v22 = vpop.f32.mrb[57].mxu1  ;;  %v1735_v23 = vpop.f32.mrb[58].mxu0 }
 0x16d   : > { %v1846_v24 = vadd.f32 %v1845_v22, %v1844_v18  ;;  %v1847_v25 = vpop.f32.mrb[58].mxu1  ;;  %v1736_v26 = vpop.f32.mrb[59].mxu0 }
 0x16e   : > { %1629 = vst [vmem:[%s2209_s10 + $0x68] sm:$0xff] %v1605_v20   ;;  %v972_v27 = vadd.f32 %v1734_v21, %v2201_v34  ;;  %v1737_v28 = vadd.f32 %v1736_v26, %v1735_v23  ;;  %v1848_v29 = vpop.f32.mrb[59].mxu1 }
 0x16f   : > { %v1849_v30 = vadd.f32 %v1848_v29, %v1847_v25 }
 0x170   : > { %v1133_v31 = vadd.f32 %v1846_v24, %v972_v27  ;;  %v975_v32 = vadd.f32 %v1737_v28, %v2201_v34 }
 0x172   : > { %v1136_v33 = vadd.f32 %v1849_v30, %v975_v32  ;;  %v1738_v35 = vpop.f32.mrb[60].mxu0 }
 0x173   : > { %v1850_v36 = vpop.f32.mrb[60].mxu1  ;;  %v1739_v37 = vpop.f32.mrb[61].mxu0 }
 0x174   : > { %v1610_v38 = vpack.c.bf16 %v1136_v33, %v1133_v31  ;;  %v1740_v39 = vadd.f32 %v1739_v37, %v1738_v35  ;;  %v1851_v40 = vpop.f32.mrb[61].mxu1  ;;  %v1741_v41 = vpop.f32.mrb[62].mxu0 }
 0x175   : > { %v1852_v42 = vadd.f32 %v1851_v40, %v1850_v36  ;;  %v1853_v43 = vpop.f32.mrb[62].mxu1  ;;  %v1742_v44 = vpop.f32.mrb[63].mxu0 }
 0x176   : > { %1630 = vst [vmem:[%s2209_s10 + $0x70] sm:$0xff] %v1610_v38   ;;  %v980_v45 = vadd.f32 %v1740_v39, %v2201_v34  ;;  %v1743_v46 = vadd.f32 %v1742_v44, %v1741_v41  ;;  %v1854_v47 = vpop.f32.mrb[63].mxu1 }
 0x177   : > { %v1855_v48 = vadd.f32 %v1854_v47, %v1853_v43 }
 0x178   : > { %v1141_v49 = vadd.f32 %v1852_v42, %v980_v45  ;;  %v983_v50 = vadd.f32 %v1743_v46, %v2201_v34 }
 0x17a   : > { %v1144_v51 = vadd.f32 %v1855_v48, %v983_v50 }
 0x17c   : > { %v1615_v52 = vpack.c.bf16 %v1144_v51, %v1141_v49 }
 0x17e   : > { %1631 = vst [vmem:[%s2209_s10 + $0x78] sm:$0xff] %v1615_v52  }
 0x17f PF: > { %s13_s12 = sadd.s32 1, %s1998_s12  }
 0x180   : > { %p10_p4 = scmp.ge.s32.totalorder %s13_s12, 4  }
 0x182   :  { %12 = sbr.rel (!%p10_p4) target bundleno = 1 (0x1), region = 62 }

// kernel: minkunet_forward.27
= control target key start
LH: loop header
LB: loop body
LE: loop exit
PB: predicated region body
PF: predicated region fallthrough
CT: control target
= control target key end

     0   :  { %s969_s1 = inlined_call_operand.vmem [shape: bf16[512,128], index: 1, kind: input, shape index: {}]   ;;  %s970_s0 = inlined_call_operand.vmem [shape: bf16[64,512], index: 0, kind: input, shape index: {}]   ;;  %s971_s2 = inlined_call_operand.vmem [shape: f32[1,128], index: 2, kind: input, shape index: {}]   ;;  %s972_s3 = inlined_call_operand.vmem [shape: bf16[64,128], index: 3, kind: output, shape index: {}]  }
   0x1   :  { %v724_v0 = vld [vmem:[%s969_s1 + $0x40] sm:$0xff]   ;;  %v728_v4 = vld [vmem:[%s969_s1 + $0x48] sm:$0xff]   ;;  %v732_v8 = vld [vmem:[%s969_s1 + $0x50] sm:$0xff]  }
   0x2   :  { %v725_v1 = vld [vmem:[%s969_s1 + $0xc0] sm:$0xff]   ;;  %644 = vmatprep.subr.bf16.mxu0 %v724_v0  ;;  %v729_v5 = vld [vmem:[%s969_s1 + $0xc8] sm:$0xff]   ;;  %v733_v9 = vld [vmem:[%s969_s1 + $0xd0] sm:$0xff]  }
   0x3   :  { %v726_v2 = vld [vmem:[%s969_s1] sm:$0xff]   ;;  %684 = vmatprep.subr.bf16.mxu1 %v725_v1  ;;  %v730_v6 = vld [vmem:[%s969_s1 + $0x8] sm:$0xff]   ;;  %v734_v10 = vld [vmem:[%s969_s1 + $0x10] sm:$0xff]  }
   0x4   :  { %v727_v3 = vld [vmem:[%s969_s1 + $0x80] sm:$0xff]   ;;  %645 = vmatpush3.bf16.msra.mxu0 %v726_v2  ;;  %v731_v7 = vld [vmem:[%s969_s1 + $0x88] sm:$0xff]   ;;  %v735_v11 = vld [vmem:[%s969_s1 + $0x90] sm:$0xff]  }
   0x5   :  { %685 = vmatpush3.bf16.msra.mxu1 %v727_v3  ;;  %646 = vmatprep.subr.bf16.mxu0 %v728_v4  ;;  %v736_v12 = vld [vmem:[%s969_s1 + $0x58] sm:$0xff]   ;;  %v740_v16 = vld [vmem:[%s969_s1 + $0x60] sm:$0xff]   ;;  %v744_v20 = vld [vmem:[%s969_s1 + $0x68] sm:$0xff]  }
   0x6   :  { %686 = vmatprep.subr.bf16.mxu1 %v729_v5  ;;  %v737_v13 = vld [vmem:[%s969_s1 + $0xd8] sm:$0xff]   ;;  %v741_v17 = vld [vmem:[%s969_s1 + $0xe0] sm:$0xff]   ;;  %v745_v21 = vld [vmem:[%s969_s1 + $0xe8] sm:$0xff]  }
   0x7   :  { %v738_v14 = vld [vmem:[%s969_s1 + $0x18] sm:$0xff]   ;;  %v742_v18 = vld [vmem:[%s969_s1 + $0x20] sm:$0xff]   ;;  %v746_v22 = vld [vmem:[%s969_s1 + $0x28] sm:$0xff]  }
   0x8   :  { %647 = vmatpush3.bf16.msra.mxu0 %v730_v6  ;;  %v739_v15 = vld [vmem:[%s969_s1 + $0x98] sm:$0xff]   ;;  %v743_v19 = vld [vmem:[%s969_s1 + $0xa0] sm:$0xff]   ;;  %v747_v23 = vld [vmem:[%s969_s1 + $0xa8] sm:$0xff]  }
   0x9   :  { %687 = vmatpush3.bf16.msra.mxu1 %v731_v7  ;;  %648 = vmatprep.subr.bf16.mxu0 %v732_v8  ;;  %v748_v24 = vld [vmem:[%s969_s1 + $0x70] sm:$0xff]   ;;  %v752_v28 = vld [vmem:[%s969_s1 + $0x78] sm:$0xff]   ;;  %v947_v50 = vld [vmem:[%s971_s2] ss:$0 sm:$0xff] }
   0xa   :  { %688 = vmatprep.subr.bf16.mxu1 %v733_v9  ;;  %v749_v25 = vld [vmem:[%s969_s1 + $0xf0] sm:$0xff]   ;;  %v753_v29 = vld [vmem:[%s969_s1 + $0xf8] sm:$0xff]  }
   0xb   :  { %v750_v26 = vld [vmem:[%s969_s1 + $0x30] sm:$0xff]   ;;  %v754_v30 = vld [vmem:[%s969_s1 + $0x38] sm:$0xff]  }
   0xc   :  { %649 = vmatpush3.bf16.msra.mxu0 %v734_v10  ;;  %v751_v27 = vld [vmem:[%s969_s1 + $0xb0] sm:$0xff]   ;;  %v755_v31 = vld [vmem:[%s969_s1 + $0xb8] sm:$0xff]  }
   0xd   :  { %689 = vmatpush3.bf16.msra.mxu1 %v735_v11  ;;  %650 = vmatprep.subr.bf16.mxu0 %v736_v12  ;;  %v756_v32 = vld [vmem:[%s970_s0] ss:$16 sps:$4 sm:$0xff]   ;;  %v758_v33 = vld [vmem:[%s970_s0 + $0x4] ss:$16 sps:$4 sm:$0xff]   ;;  %v759_v34 = vld [vmem:[%s970_s0 + $0x8] ss:$16 sps:$4 sm:$0xff]  }
   0xe   :  { %690 = vmatprep.subr.bf16.mxu1 %v737_v13  ;;  %v761_v35 = vld [vmem:[%s970_s0 + $0xc] ss:$16 sps:$4 sm:$0xff]   ;;  %406 = vmatprep.mubr.bf16.mxu0 %v758_v33  ;;  %v762_v36 = vld [vmem:[%s970_s0 + $0x24] ss:$16 sps:$4 sm:$0xff]   ;;  %v766_v38 = vld [vmem:[%s970_s0 + $0x20] ss:$16 sps:$4 sm:$0xff]  }
   0xf   :  { %471 = vmatprep.mubr.bf16.mxu1 %v761_v35  ;;  %v764_v37 = vld [vmem:[%s970_s0 + $0x2c] ss:$16 sps:$4 sm:$0xff]   ;;  %v767_v39 = vld [vmem:[%s970_s0 + $0x28] ss:$16 sps:$4 sm:$0xff]   ;;  %v768_v40 = vld [vmem:[%s970_s0 + $0x44] ss:$16 sps:$4 sm:$0xff]  }
  0x10   :  { %651 = vmatpush3.bf16.msra.mxu0 %v738_v14  ;;  %v770_v41 = vld [vmem:[%s970_s0 + $0x4c] ss:$16 sps:$4 sm:$0xff]   ;;  %v772_v42 = vld [vmem:[%s970_s0 + $0x40] ss:$16 sps:$4 sm:$0xff]   ;;  %v773_v43 = vld [vmem:[%s970_s0 + $0x48] ss:$16 sps:$4 sm:$0xff]  }
  0x11   :  { %691 = vmatpush3.bf16.msra.mxu1 %v739_v15  ;;  %652 = vmatprep.subr.bf16.mxu0 %v740_v16  ;;  %v774_v44 = vld [vmem:[%s970_s0 + $0x64] ss:$16 sps:$4 sm:$0xff]   ;;  %v776_v45 = vld [vmem:[%s970_s0 + $0x6c] ss:$16 sps:$4 sm:$0xff]   ;;  %v778_v46 = vld [vmem:[%s970_s0 + $0x60] ss:$16 sps:$4 sm:$0xff]  }
  0x12   :  { %692 = vmatprep.subr.bf16.mxu1 %v741_v17  ;;  %v779_v47 = vld [vmem:[%s970_s0 + $0x68] ss:$16 sps:$4 sm:$0xff]  }
  0x14   :  { %653 = vmatpush3.bf16.msra.mxu0 %v742_v18 }
  0x15   :  { %693 = vmatpush3.bf16.msra.mxu1 %v743_v19  ;;  %654 = vmatprep.subr.bf16.mxu0 %v744_v20 }
  0x16   :  { %694 = vmatprep.subr.bf16.mxu1 %v745_v21 }
  0x18   :  { %655 = vmatpush3.bf16.msra.mxu0 %v746_v22 }
  0x19   :  { %695 = vmatpush3.bf16.msra.mxu1 %v747_v23  ;;  %656 = vmatprep.subr.bf16.mxu0 %v748_v24 }
  0x1a   :  { %696 = vmatprep.subr.bf16.mxu1 %v749_v25 }
  0x1c   :  { %657 = vmatpush3.bf16.msra.mxu0 %v750_v26 }
  0x1d   :  { %697 = vmatpush3.bf16.msra.mxu1 %v751_v27  ;;  %658 = vmatprep.subr.bf16.mxu0 %v752_v28 }
  0x1e   :  { %698 = vmatprep.subr.bf16.mxu1 %v753_v29 }
  0x20   :  { %659 = vmatpush3.bf16.msra.mxu0 %v754_v30 }
  0x21   :  { %699 = vmatpush3.bf16.msra.mxu1 %v755_v31 }
  0x23   :  { %407 = vmatmul.mubr.bf16.vlgmr.msra.gmra.mrb[0].mxu0 %v756_v32 }
  0x24   :  { %472 = vmatmul.mubr.bf16.vlgmr.msra.gmra.mrb[0].mxu1 %v759_v34  ;;  %414 = vmatprep.mubr.bf16.mxu0 %v762_v36 }
  0x25   :  { %479 = vmatprep.mubr.bf16.mxu1 %v764_v37 }
  0x2b   :  { %415 = vmatmul.mubr.bf16.gmra.mrb[4].mxu0 %v766_v38 }
  0x2c   :  { %480 = vmatmul.mubr.bf16.gmra.mrb[4].mxu1 %v767_v39  ;;  %422 = vmatprep.mubr.bf16.mxu0 %v768_v40 }
  0x2d   :  { %487 = vmatprep.mubr.bf16.mxu1 %v770_v41 }
  0x33   :  { %423 = vmatmul.mubr.bf16.gmra.mrb[8].mxu0 %v772_v42 }
  0x34   :  { %488 = vmatmul.mubr.bf16.gmra.mrb[8].mxu1 %v773_v43  ;;  %430 = vmatprep.mubr.bf16.mxu0 %v774_v44 }
  0x35   :  { %495 = vmatprep.mubr.bf16.mxu1 %v776_v45 }
  0x3b   :  { %431 = vmatmul.mubr.bf16.gmra.mrb[12].mxu0 %v778_v46 }
  0x3c   :  { %496 = vmatmul.mubr.bf16.gmra.mrb[12].mxu1 %v779_v47 }
  0xf6   :  { %v660_v48 = vpop.f32.mrb[0].mxu0 }
  0xf7   :  { %v700_v49 = vpop.f32.mrb[0].mxu1  ;;  %v661_v51 = vpop.f32.mrb[1].mxu0 }
  0xf8   :  { %v662_v52 = vadd.f32 %v661_v51, %v660_v48  ;;  %v701_v53 = vpop.f32.mrb[1].mxu1  ;;  %v663_v54 = vpop.f32.mrb[2].mxu0 }
  0xf9   :  { %v702_v55 = vadd.f32 %v701_v53, %v700_v49  ;;  %v703_v56 = vpop.f32.mrb[2].mxu1  ;;  %v664_v57 = vpop.f32.mrb[3].mxu0 }
  0xfa   :  { %v409_v58 = vadd.f32 %v662_v52, %v947_v50  ;;  %v665_v59 = vadd.f32 %v664_v57, %v663_v54  ;;  %v704_v60 = vpop.f32.mrb[3].mxu1 }
  0xfb   :  { %v705_v61 = vadd.f32 %v704_v60, %v703_v56 }
  0xfc   :  { %v474_v62 = vadd.f32 %v702_v55, %v409_v58  ;;  %v412_v63 = vadd.f32 %v665_v59, %v947_v50 }
  0xfe   :  { %v477_v0 = vadd.f32 %v705_v61, %v412_v63  ;;  %v666_v1 = vpop.f32.mrb[4].mxu0  ;;  %v504_v4 = vmax.f32 %v474_v62, 0.0 }
  0xff   :  { %v706_v2 = vpop.f32.mrb[4].mxu1  ;;  %v667_v3 = vpop.f32.mrb[5].mxu0 }
 0x100   :  { %v505_v5 = vmax.f32 %v477_v0, 0.0  ;;  %v668_v6 = vadd.f32 %v667_v3, %v666_v1  ;;  %v707_v7 = vpop.f32.mrb[5].mxu1  ;;  %v669_v8 = vpop.f32.mrb[6].mxu0 }
 0x101   :  { %v708_v9 = vadd.f32 %v707_v7, %v706_v2  ;;  %v709_v10 = vpop.f32.mrb[6].mxu1  ;;  %v670_v11 = vpop.f32.mrb[7].mxu0 }
 0x102   :  { %v624_v12 = vpack.c.bf16 %v505_v5, %v504_v4  ;;  %v417_v13 = vadd.f32 %v668_v6, %v947_v50  ;;  %v671_v14 = vadd.f32 %v670_v11, %v669_v8  ;;  %v710_v15 = vpop.f32.mrb[7].mxu1 }
 0x103   :  { %v711_v16 = vadd.f32 %v710_v15, %v709_v10 }
 0x104   :  { %625 = vst [vmem:[%s972_s3] sm:$0xff] %v624_v12   ;;  %v482_v17 = vadd.f32 %v708_v9, %v417_v13  ;;  %v420_v18 = vadd.f32 %v671_v14, %v947_v50 }
 0x106   :  { %v485_v19 = vadd.f32 %v711_v16, %v420_v18  ;;  %v672_v20 = vpop.f32.mrb[8].mxu0  ;;  %v506_v23 = vmax.f32 %v482_v17, 0.0 }
 0x107   :  { %v712_v21 = vpop.f32.mrb[8].mxu1  ;;  %v673_v22 = vpop.f32.mrb[9].mxu0 }
 0x108   :  { %v507_v24 = vmax.f32 %v485_v19, 0.0  ;;  %v674_v25 = vadd.f32 %v673_v22, %v672_v20  ;;  %v713_v26 = vpop.f32.mrb[9].mxu1  ;;  %v675_v27 = vpop.f32.mrb[10].mxu0 }
 0x109   :  { %v714_v28 = vadd.f32 %v713_v26, %v712_v21  ;;  %v715_v29 = vpop.f32.mrb[10].mxu1  ;;  %v676_v30 = vpop.f32.mrb[11].mxu0 }
 0x10a   :  { %v629_v31 = vpack.c.bf16 %v507_v24, %v506_v23  ;;  %v425_v32 = vadd.f32 %v674_v25, %v947_v50  ;;  %v677_v33 = vadd.f32 %v676_v30, %v675_v27  ;;  %v716_v34 = vpop.f32.mrb[11].mxu1 }
 0x10b   :  { %v717_v35 = vadd.f32 %v716_v34, %v715_v29 }
 0x10c   :  { %641 = vst [vmem:[%s972_s3 + $0x8] sm:$0xff] %v629_v31   ;;  %v490_v36 = vadd.f32 %v714_v28, %v425_v32  ;;  %v428_v37 = vadd.f32 %v677_v33, %v947_v50 }
 0x10e   :  { %v493_v38 = vadd.f32 %v717_v35, %v428_v37  ;;  %v678_v39 = vpop.f32.mrb[12].mxu0  ;;  %v508_v42 = vmax.f32 %v490_v36, 0.0 }
 0x10f   :  { %v718_v40 = vpop.f32.mrb[12].mxu1  ;;  %v679_v41 = vpop.f32.mrb[13].mxu0 }
 0x110   :  { %v509_v43 = vmax.f32 %v493_v38, 0.0  ;;  %v680_v44 = vadd.f32 %v679_v41, %v678_v39  ;;  %v719_v45 = vpop.f32.mrb[13].mxu1  ;;  %v681_v46 = vpop.f32.mrb[14].mxu0 }
 0x111   :  { %v720_v47 = vadd.f32 %v719_v45, %v718_v40  ;;  %v721_v48 = vpop.f32.mrb[14].mxu1  ;;  %v682_v49 = vpop.f32.mrb[15].mxu0 }
 0x112   :  { %v634_v51 = vpack.c.bf16 %v509_v43, %v508_v42  ;;  %v433_v52 = vadd.f32 %v680_v44, %v947_v50  ;;  %v683_v53 = vadd.f32 %v682_v49, %v681_v46  ;;  %v722_v54 = vpop.f32.mrb[15].mxu1 }
 0x113   :  { %v723_v55 = vadd.f32 %v722_v54, %v721_v48 }
 0x114   :  { %642 = vst [vmem:[%s972_s3 + $0x10] sm:$0xff] %v634_v51   ;;  %v498_v56 = vadd.f32 %v720_v47, %v433_v52  ;;  %v436_v57 = vadd.f32 %v683_v53, %v947_v50 }
 0x116   :  { %v501_v58 = vadd.f32 %v723_v55, %v436_v57  ;;  %v510_v59 = vmax.f32 %v498_v56, 0.0 }
 0x118   :  { %v511_v60 = vmax.f32 %v501_v58, 0.0 }
 0x11a   :  { %v639_v61 = vpack.c.bf16 %v511_v60, %v510_v59 }
 0x11c   :  { %643 = vst [vmem:[%s972_s3 + $0x18] sm:$0xff] %v639_v61  }

// kernel: minkunet_forward.28
= control target key start
LH: loop header
LB: loop body
LE: loop exit
PB: predicated region body
PF: predicated region fallthrough
CT: control target
= control target key end

     0   :  { %s1621_s1 = inlined_call_operand.vmem [shape: bf16[896,128], index: 1, kind: input, shape index: {}]   ;;  %s1622_s0 = inlined_call_operand.vmem [shape: bf16[64,896], index: 0, kind: input, shape index: {}]   ;;  %s1623_s2 = inlined_call_operand.vmem [shape: f32[1,128], index: 2, kind: input, shape index: {}]   ;;  %s1624_s3 = inlined_call_operand.vmem [shape: bf16[64,128], index: 3, kind: output, shape index: {}]  }
   0x1   :  { %v1238_v0 = vld [vmem:[%s1621_s1 + $0x40] sm:$0xff]   ;;  %v1242_v4 = vld [vmem:[%s1621_s1 + $0x48] sm:$0xff]   ;;  %v1246_v8 = vld [vmem:[%s1621_s1 + $0x50] sm:$0xff]  }
   0x2   :  { %v1239_v1 = vld [vmem:[%s1621_s1] sm:$0xff]   ;;  %1082 = vmatprep.subr.bf16.mxu0 %v1238_v0  ;;  %v1243_v5 = vld [vmem:[%s1621_s1 + $0x8] sm:$0xff]   ;;  %v1247_v9 = vld [vmem:[%s1621_s1 + $0x10] sm:$0xff]  }
   0x3   :  { %v1240_v2 = vld [vmem:[%s1621_s1 + $0xc0] sm:$0xff]   ;;  %1083 = vmatpush3.bf16.msra.mxu0 %v1239_v1  ;;  %v1244_v6 = vld [vmem:[%s1621_s1 + $0xc8] sm:$0xff]   ;;  %v1248_v10 = vld [vmem:[%s1621_s1 + $0xd0] sm:$0xff]  }
   0x4   :  { %v1241_v3 = vld [vmem:[%s1621_s1 + $0x80] sm:$0xff]   ;;  %1122 = vmatprep.subr.bf16.mxu1 %v1240_v2  ;;  %1084 = vmatprep.subr.bf16.mxu0 %v1242_v4  ;;  %v1245_v7 = vld [vmem:[%s1621_s1 + $0x88] sm:$0xff]   ;;  %v1249_v11 = vld [vmem:[%s1621_s1 + $0x90] sm:$0xff]  }
   0x5   :  { %1123 = vmatpush3.bf16.msra.mxu1 %v1241_v3  ;;  %v1250_v12 = vld [vmem:[%s1621_s1 + $0x58] sm:$0xff]   ;;  %v1254_v16 = vld [vmem:[%s1621_s1 + $0x60] sm:$0xff]   ;;  %v1258_v20 = vld [vmem:[%s1621_s1 + $0x68] sm:$0xff]  }
   0x6   :  { %1124 = vmatprep.subr.bf16.mxu1 %v1244_v6  ;;  %v1251_v13 = vld [vmem:[%s1621_s1 + $0x18] sm:$0xff]   ;;  %v1255_v17 = vld [vmem:[%s1621_s1 + $0x20] sm:$0xff]   ;;  %v1259_v21 = vld [vmem:[%s1621_s1 + $0x28] sm:$0xff]  }
   0x7   :  { %1085 = vmatpush3.bf16.msra.mxu0 %v1243_v5  ;;  %v1252_v14 = vld [vmem:[%s1621_s1 + $0xd8] sm:$0xff]   ;;  %v1256_v18 = vld [vmem:[%s1621_s1 + $0xe0] sm:$0xff]   ;;  %v1260_v22 = vld [vmem:[%s1621_s1 + $0xe8] sm:$0xff]  }
   0x8   :  { %1086 = vmatprep.subr.bf16.mxu0 %v1246_v8  ;;  %v1253_v15 = vld [vmem:[%s1621_s1 + $0x98] sm:$0xff]   ;;  %v1257_v19 = vld [vmem:[%s1621_s1 + $0xa0] sm:$0xff]   ;;  %v1261_v23 = vld [vmem:[%s1621_s1 + $0xa8] sm:$0xff]  }
   0x9   :  { %1125 = vmatpush3.bf16.msra.mxu1 %v1245_v7  ;;  %v1262_v24 = vld [vmem:[%s1621_s1 + $0x70] sm:$0xff]   ;;  %v1266_v28 = vld [vmem:[%s1621_s1 + $0x78] sm:$0xff]   ;;  %v1271_v32 = vld [vmem:[%s1622_s0 + $0x4] ss:$28 sps:$4 sm:$0xff]  }
   0xa   :  { %1126 = vmatprep.subr.bf16.mxu1 %v1248_v10  ;;  %v1263_v25 = vld [vmem:[%s1621_s1 + $0x30] sm:$0xff]   ;;  %v1267_v29 = vld [vmem:[%s1621_s1 + $0x38] sm:$0xff]   ;;  %678 = vmatprep.mubr.bf16.mxu0 %v1271_v32  ;;  %v1273_v34 = vld [vmem:[%s1621_s1 + $0x140] sm:$0xff]  }
   0xb   :  { %1087 = vmatpush3.bf16.msra.mxu0 %v1247_v9  ;;  %v1264_v26 = vld [vmem:[%s1621_s1 + $0xf0] sm:$0xff]   ;;  %v1268_v30 = vld [vmem:[%s1621_s1 + $0xf8] sm:$0xff]   ;;  %v1274_v35 = vld [vmem:[%s1622_s0 + $0x8] ss:$28 sps:$4 sm:$0xff]  }
   0xc   :  { %1088 = vmatprep.subr.bf16.mxu0 %v1250_v12  ;;  %v1265_v27 = vld [vmem:[%s1621_s1 + $0xb0] sm:$0xff]   ;;  %v1269_v31 = vld [vmem:[%s1622_s0] ss:$28 sps:$4 sm:$0xff]   ;;  %v1276_v36 = vld [vmem:[%s1622_s0 + $0xc] ss:$28 sps:$4 sm:$0xff]  }
   0xd   :  { %1127 = vmatpush3.bf16.msra.mxu1 %v1249_v11  ;;  %v1272_v33 = vld [vmem:[%s1621_s1 + $0xb8] sm:$0xff]   ;;  %v1277_v37 = vld [vmem:[%s1621_s1 + $0x100] sm:$0xff]   ;;  %743 = vmatprep.mubr.bf16.mxu1 %v1276_v36  ;;  %v1278_v38 = vld [vmem:[%s1621_s1 + $0x148] sm:$0xff]  }
   0xe   :  { %1128 = vmatprep.subr.bf16.mxu1 %v1252_v14  ;;  %v1279_v39 = vld [vmem:[%s1621_s1 + $0x180] sm:$0xff]   ;;  %v1280_v40 = vld [vmem:[%s1621_s1 + $0x108] sm:$0xff]   ;;  %v1281_v41 = vld [vmem:[%s1622_s0 + $0x3c] ss:$28 sps:$4 sm:$0xff]  }
   0xf   :  { %1089 = vmatpush3.bf16.msra.mxu0 %v1251_v13  ;;  %v1283_v42 = vld [vmem:[%s1622_s0 + $0x38] ss:$28 sps:$4 sm:$0xff]   ;;  %v1285_v44 = vld [vmem:[%s1621_s1 + $0x188] sm:$0xff]   ;;  %v1286_v45 = vld [vmem:[%s1622_s0 + $0x44] ss:$28 sps:$4 sm:$0xff]  }
  0x10   :  { %1090 = vmatprep.subr.bf16.mxu0 %v1254_v16  ;;  %v1284_v43 = vld [vmem:[%s1621_s1 + $0x150] sm:$0xff]   ;;  %v1289_v47 = vld [vmem:[%s1622_s0 + $0x40] ss:$28 sps:$4 sm:$0xff]   ;;  %v1302_v58 = vld [vmem:[%s1621_s1 + $0x168] sm:$0xff]  }
  0x11   :  { %1129 = vmatpush3.bf16.msra.mxu1 %v1253_v15  ;;  %v1288_v46 = vld [vmem:[%s1621_s1 + $0x110] sm:$0xff]   ;;  %v1290_v48 = vld [vmem:[%s1621_s1 + $0x158] sm:$0xff]   ;;  %v1296_v53 = vld [vmem:[%s1621_s1 + $0x160] sm:$0xff]  }
  0x12   :  { %1130 = vmatprep.subr.bf16.mxu1 %v1256_v18  ;;  %v1291_v49 = vld [vmem:[%s1621_s1 + $0x190] sm:$0xff]   ;;  %v1292_v50 = vld [vmem:[%s1621_s1 + $0x118] sm:$0xff]   ;;  %v1300_v56 = vld [vmem:[%s1621_s1 + $0x120] sm:$0xff]  }
  0x13   :  { %1091 = vmatpush3.bf16.msra.mxu0 %v1255_v17  ;;  %v1293_v51 = vld [vmem:[%s1622_s0 + $0x74] ss:$28 sps:$4 sm:$0xff]   ;;  %v1297_v54 = vld [vmem:[%s1621_s1 + $0x198] sm:$0xff]   ;;  %v1303_v59 = vld [vmem:[%s1621_s1 + $0x1a0] sm:$0xff]  }
  0x14   :  { %1092 = vmatprep.subr.bf16.mxu0 %v1258_v20  ;;  %v1295_v52 = vld [vmem:[%s1622_s0 + $0x70] ss:$28 sps:$4 sm:$0xff]   ;;  %v1298_v55 = vld [vmem:[%s1622_s0 + $0x7c] ss:$28 sps:$4 sm:$0xff]   ;;  %v1307_v62 = vld [vmem:[%s1622_s0 + $0xa8] ss:$28 sps:$4 sm:$0xff]  }
  0x15   :  { %1131 = vmatpush3.bf16.msra.mxu1 %v1257_v19  ;;  %v1301_v57 = vld [vmem:[%s1622_s0 + $0x78] ss:$28 sps:$4 sm:$0xff]   ;;  %v1304_v60 = vld [vmem:[%s1621_s1 + $0x128] sm:$0xff]   ;;  %v1326_v15 = vld [vmem:[%s1622_s0 + $0x84] ss:$28 sps:$4 sm:$0xff]  }
  0x16   :  { %1132 = vmatprep.subr.bf16.mxu1 %v1260_v22  ;;  %v1305_v61 = vld [vmem:[%s1622_s0 + $0xac] ss:$28 sps:$4 sm:$0xff]   ;;  %v1308_v63 = vld [vmem:[%s1621_s1 + $0x170] sm:$0xff]   ;;  %v1314_v4 = vld [vmem:[%s1621_s1 + $0x178] sm:$0xff]  }
  0x17   :  { %1093 = vmatpush3.bf16.msra.mxu0 %v1259_v21  ;;  %v1309_v0 = vld [vmem:[%s1621_s1 + $0x1a8] sm:$0xff]   ;;  %v1310_v1 = vld [vmem:[%s1622_s0 + $0xb4] ss:$28 sps:$4 sm:$0xff]   ;;  %v1316_v6 = vld [vmem:[%s1621_s1 + $0x138] sm:$0xff]  }
  0x18   :  { %1094 = vmatprep.subr.bf16.mxu0 %v1262_v24  ;;  %v1312_v2 = vld [vmem:[%s1621_s1 + $0x130] sm:$0xff]   ;;  %v1320_v9 = vld [vmem:[%s1621_s1 + $0x1b8] sm:$0xff]   ;;  %v1323_v12 = vld [vmem:[%s1622_s0 + $0x4c] ss:$28 sps:$4 sm:$0xff]  }
  0x19   :  { %1133 = vmatpush3.bf16.msra.mxu1 %v1261_v23  ;;  %v1313_v3 = vld [vmem:[%s1622_s0 + $0xb0] ss:$28 sps:$4 sm:$0xff]   ;;  %v1321_v10 = vld [vmem:[%s1622_s0 + $0x18] ss:$28 sps:$4 sm:$0xff]   ;;  %v1329_v13 = vld [vmem:[%s1622_s0 + $0x88] ss:$28 sps:$4 sm:$0xff]  }
  0x1a   :  { %1134 = vmatprep.subr.bf16.mxu1 %v1264_v26  ;;  %v1315_v5 = vld [vmem:[%s1621_s1 + $0x1b0] sm:$0xff]   ;;  %v1325_v14 = vld [vmem:[%s1622_s0 + $0x48] ss:$28 sps:$4 sm:$0xff]   ;;  %v1330_v16 = vld [vmem:[%s1622_s0 + $0xc0] ss:$28 sps:$4 sm:$0xff]  }
  0x1b   :  { %1095 = vmatpush3.bf16.msra.mxu0 %v1263_v25  ;;  %v1317_v7 = vld [vmem:[%s1622_s0 + $0x10] ss:$28 sps:$4 sm:$0xff]   ;;  %v1328_v17 = vld [vmem:[%s1622_s0 + $0x80] ss:$28 sps:$4 sm:$0xff]   ;;  %v1333_v19 = vld [vmem:[%s1622_s0 + $0xb8] ss:$28 sps:$4 sm:$0xff]  }
  0x1c   :  { %1096 = vmatprep.subr.bf16.mxu0 %v1266_v28  ;;  %v1319_v8 = vld [vmem:[%s1622_s0 + $0x14] ss:$28 sps:$4 sm:$0xff]   ;;  %v1331_v18 = vld [vmem:[%s1622_s0 + $0xbc] ss:$28 sps:$4 sm:$0xff]   ;;  %v958_v21 = vld [vmem:[%s1623_s2] ss:$0 sm:$0xff] }
  0x1d   :  { %1135 = vmatpush3.bf16.msra.mxu1 %v1265_v27  ;;  %v1322_v11 = vld [vmem:[%s1622_s0 + $0x50] ss:$28 sps:$4 sm:$0xff]  }
  0x1e   :  { %1136 = vmatprep.subr.bf16.mxu1 %v1268_v30 }
  0x1f   :  { %1097 = vmatpush3.bf16.msra.mxu0 %v1267_v29 }
  0x20   :  { %1162 = vmatprep.subr.bf16.mxu0 %v1273_v34 }
  0x21   :  { %1137 = vmatpush3.bf16.msra.mxu1 %v1272_v33 }
  0x22   :  { %679 = vmatmul.mubr.bf16.vlgmr.msra.gmra.mrb[0].mxu0 %v1269_v31  ;;  %1214 = vmatprep.subr.bf16.mxu1 %v1279_v39 }
  0x23   :  { %1163 = vmatpush3.bf16.msra.mxu0 %v1277_v37  ;;  %686 = vmatprep.mubr.bf16.mxu0 %v1281_v41 }
  0x24   :  { %744 = vmatmul.mubr.bf16.vlgmr.msra.gmra.mrb[0].mxu1 %v1274_v35  ;;  %1164 = vmatprep.subr.bf16.mxu0 %v1278_v38 }
  0x25   :  { %1215 = vmatpush3.bf16.msra.mxu1 %v1279_v39  ;;  %751 = vmatprep.mubr.bf16.mxu1 %v1286_v45 }
  0x26   :  { %1216 = vmatprep.subr.bf16.mxu1 %v1285_v44 }
  0x27   :  { %1165 = vmatpush3.bf16.msra.mxu0 %v1280_v40 }
  0x28   :  { %1166 = vmatprep.subr.bf16.mxu0 %v1284_v43 }
  0x29   :  { %1217 = vmatpush3.bf16.msra.mxu1 %v1285_v44 }
  0x2a   :  { %687 = vmatmul.mubr.bf16.gmra.mrb[4].mxu0 %v1283_v42  ;;  %1218 = vmatprep.subr.bf16.mxu1 %v1291_v49 }
  0x2b   :  { %1167 = vmatpush3.bf16.msra.mxu0 %v1288_v46  ;;  %694 = vmatprep.mubr.bf16.mxu0 %v1293_v51 }
  0x2c   :  { %752 = vmatmul.mubr.bf16.gmra.mrb[4].mxu1 %v1289_v47  ;;  %1168 = vmatprep.subr.bf16.mxu0 %v1290_v48 }
  0x2d   :  { %1219 = vmatpush3.bf16.msra.mxu1 %v1291_v49  ;;  %759 = vmatprep.mubr.bf16.mxu1 %v1298_v55 }
  0x2e   :  { %1220 = vmatprep.subr.bf16.mxu1 %v1297_v54 }
  0x2f   :  { %1169 = vmatpush3.bf16.msra.mxu0 %v1292_v50 }
  0x30   :  { %1170 = vmatprep.subr.bf16.mxu0 %v1296_v53 }
  0x31   :  { %1221 = vmatpush3.bf16.msra.mxu1 %v1297_v54 }
  0x32   :  { %695 = vmatmul.mubr.bf16.gmra.mrb[8].mxu0 %v1295_v52  ;;  %1222 = vmatprep.subr.bf16.mxu1 %v1303_v59 }
  0x33   :  { %1171 = vmatpush3.bf16.msra.mxu0 %v1300_v56  ;;  %702 = vmatprep.mubr.bf16.mxu0 %v1305_v61 }
  0x34   :  { %760 = vmatmul.mubr.bf16.gmra.mrb[8].mxu1 %v1301_v57  ;;  %1172 = vmatprep.subr.bf16.mxu0 %v1302_v58 }
  0x35   :  { %1223 = vmatpush3.bf16.msra.mxu1 %v1303_v59  ;;  %767 = vmatprep.mubr.bf16.mxu1 %v1310_v1 }
  0x36   :  { %1224 = vmatprep.subr.bf16.mxu1 %v1309_v0 }
  0x37   :  { %1173 = vmatpush3.bf16.msra.mxu0 %v1304_v60 }
  0x38   :  { %1174 = vmatprep.subr.bf16.mxu0 %v1308_v63 }
  0x39   :  { %1225 = vmatpush3.bf16.msra.mxu1 %v1309_v0 }
  0x3a   :  { %703 = vmatmul.mubr.bf16.gmra.mrb[12].mxu0 %v1307_v62  ;;  %1226 = vmatprep.subr.bf16.mxu1 %v1315_v5 }
  0x3b   :  { %1175 = vmatpush3.bf16.msra.mxu0 %v1312_v2  ;;  %808 = vmatprep.mubr.bf16.mxu0 %v1319_v8 }
  0x3c   :  { %768 = vmatmul.mubr.bf16.gmra.mrb[12].mxu1 %v1313_v3  ;;  %1176 = vmatprep.subr.bf16.mxu0 %v1314_v4 }
  0x3d   :  { %1227 = vmatpush3.bf16.msra.mxu1 %v1315_v5  ;;  %1230 = vmatprep.mubr.bf16.mxu1 %v1321_v10 }
  0x3e   :  { %1228 = vmatprep.subr.bf16.mxu1 %v1320_v9 }
  0x3f   :  { %1177 = vmatpush3.bf16.msra.mxu0 %v1316_v6 }
  0x41   :  { %1229 = vmatpush3.bf16.msra.mxu1 %v1320_v9 }
  0x42   :  { %809 = vmatmul.mubr.bf16.vlgmr.msra.gmra.mrb[16].mxu0 %v1317_v7 }
  0x43   :  { %816 = vmatprep.mubr.bf16.mxu0 %v1323_v12 }
  0x44   :  { %1231 = vmatmul.mubr.bf16.vlgmr.msra.gmra.mrb[16].mxu1 %v1322_v11 }
  0x45   :  { %1234 = vmatprep.mubr.bf16.mxu1 %v1329_v13 }
  0x4a   :  { %817 = vmatmul.mubr.bf16.gmra.mrb[20].mxu0 %v1325_v14 }
  0x4b   :  { %824 = vmatprep.mubr.bf16.mxu0 %v1326_v15 }
  0x4c   :  { %1235 = vmatmul.mubr.bf16.gmra.mrb[20].mxu1 %v1330_v16 }
  0x52   :  { %825 = vmatmul.mubr.bf16.gmra.mrb[24].mxu0 %v1328_v17 }
  0x53   :  { %832 = vmatprep.mubr.bf16.mxu0 %v1331_v18 }
  0x5a   :  { %833 = vmatmul.mubr.bf16.gmra.mrb[28].mxu0 %v1333_v19 }
  0xf5   :  { %v1098_v20 = vpop.f32.mrb[0].mxu0 }
  0xf6   :  { %v1099_v22 = vpop.f32.mrb[1].mxu0 }
  0xf7   :  { %v1100_v23 = vadd.f32 %v1099_v22, %v1098_v20  ;;  %v1101_v24 = vpop.f32.mrb[2].mxu0  ;;  %v1138_v25 = vpop.f32.mrb[0].mxu1 }
  0xf8   :  { %v1102_v26 = vpop.f32.mrb[3].mxu0  ;;  %v1139_v29 = vpop.f32.mrb[1].mxu1 }
  0xf9   :  { %v681_v27 = vadd.f32 %v1100_v23, %v958_v21  ;;  %v1103_v28 = vadd.f32 %v1102_v26, %v1101_v24  ;;  %v1140_v30 = vadd.f32 %v1139_v29, %v1138_v25  ;;  %v1141_v31 = vpop.f32.mrb[2].mxu1 }
  0xfa   :  { %v1142_v33 = vpop.f32.mrb[3].mxu1 }
  0xfb   :  { %v684_v32 = vadd.f32 %v1103_v28, %v958_v21  ;;  %v746_v34 = vadd.f32 %v1140_v30, %v681_v27  ;;  %v1143_v35 = vadd.f32 %v1142_v33, %v1141_v31 }
  0xfd   :  { %v1104_v36 = vpop.f32.mrb[4].mxu0  ;;  %v749_v37 = vadd.f32 %v1143_v35, %v684_v32 }
  0xfe   :  { %v1105_v38 = vpop.f32.mrb[5].mxu0 }
  0xff   :  { %v1106_v39 = vadd.f32 %v1105_v38, %v1104_v36  ;;  %v1107_v40 = vpop.f32.mrb[6].mxu0  ;;  %v1144_v43 = vpop.f32.mrb[4].mxu1 }
 0x100   :  { %v1108_v41 = vpop.f32.mrb[7].mxu0  ;;  %v1145_v45 = vpop.f32.mrb[5].mxu1 }
 0x101   :  { %v689_v42 = vadd.f32 %v1106_v39, %v958_v21  ;;  %v1109_v44 = vadd.f32 %v1108_v41, %v1107_v40  ;;  %v1146_v47 = vadd.f32 %v1145_v45, %v1144_v43  ;;  %v1147_v48 = vpop.f32.mrb[6].mxu1 }
 0x102   :  { %v1148_v49 = vpop.f32.mrb[7].mxu1 }
 0x103   :  { %v692_v46 = vadd.f32 %v1109_v44, %v958_v21  ;;  %v754_v50 = vadd.f32 %v1146_v47, %v689_v42  ;;  %v1149_v51 = vadd.f32 %v1148_v49, %v1147_v48 }
 0x105   :  { %v1110_v52 = vpop.f32.mrb[8].mxu0  ;;  %v757_v53 = vadd.f32 %v1149_v51, %v692_v46 }
 0x106   :  { %v1111_v54 = vpop.f32.mrb[9].mxu0 }
 0x107   :  { %v1112_v55 = vadd.f32 %v1111_v54, %v1110_v52  ;;  %v1113_v56 = vpop.f32.mrb[10].mxu0  ;;  %v1150_v57 = vpop.f32.mrb[8].mxu1 }
 0x108   :  { %v1114_v58 = vpop.f32.mrb[11].mxu0  ;;  %v1151_v61 = vpop.f32.mrb[9].mxu1 }
 0x109   :  { %v697_v59 = vadd.f32 %v1112_v55, %v958_v21  ;;  %v1115_v60 = vadd.f32 %v1114_v58, %v1113_v56  ;;  %v1152_v62 = vadd.f32 %v1151_v61, %v1150_v57  ;;  %v1153_v63 = vpop.f32.mrb[10].mxu1 }
 0x10a   :  { %v1154_v1 = vpop.f32.mrb[11].mxu1 }
 0x10b   :  { %v700_v0 = vadd.f32 %v1115_v60, %v958_v21  ;;  %v762_v2 = vadd.f32 %v1152_v62, %v697_v59  ;;  %v1155_v3 = vadd.f32 %v1154_v1, %v1153_v63 }
 0x10d   :  { %v1116_v4 = vpop.f32.mrb[12].mxu0  ;;  %v765_v5 = vadd.f32 %v1155_v3, %v700_v0 }
 0x10e   :  { %v1117_v6 = vpop.f32.mrb[13].mxu0 }
 0x10f   :  { %v1118_v7 = vadd.f32 %v1117_v6, %v1116_v4  ;;  %v1119_v8 = vpop.f32.mrb[14].mxu0  ;;  %v1156_v11 = vpop.f32.mrb[12].mxu1 }
 0x110   :  { %v1120_v9 = vpop.f32.mrb[15].mxu0  ;;  %v1157_v13 = vpop.f32.mrb[13].mxu1 }
 0x111   :  { %v705_v10 = vadd.f32 %v1118_v7, %v958_v21  ;;  %v1121_v12 = vadd.f32 %v1120_v9, %v1119_v8  ;;  %v1158_v15 = vadd.f32 %v1157_v13, %v1156_v11  ;;  %v1159_v16 = vpop.f32.mrb[14].mxu1 }
 0x112   :  { %v1160_v17 = vpop.f32.mrb[15].mxu1 }
 0x113   :  { %v708_v14 = vadd.f32 %v1121_v12, %v958_v21  ;;  %v770_v18 = vadd.f32 %v1158_v15, %v705_v10  ;;  %v1161_v19 = vadd.f32 %v1160_v17, %v1159_v16 }
 0x115   :  { %v773_v20 = vadd.f32 %v1161_v19, %v708_v14  ;;  %v1178_v22 = vpop.f32.mrb[16].mxu0 }
 0x116   :  { %v1179_v23 = vpop.f32.mrb[17].mxu0 }
 0x117   :  { %v1180_v24 = vadd.f32 %v1179_v23, %v1178_v22  ;;  %v1181_v25 = vpop.f32.mrb[18].mxu0  ;;  %v1232_v27 = vpop.f32.mrb[16].mxu1 }
 0x118   :  { %v1182_v26 = vpop.f32.mrb[19].mxu0  ;;  %v875_v30 = vpop.f32.mrb[17].mxu1 }
 0x119   :  { %v1183_v28 = vadd.f32 %v1182_v26, %v1181_v25  ;;  %v811_v29 = vadd.f32 %v1180_v24, %v746_v34  ;;  %v1233_v31 = vpop.f32.mrb[18].mxu1 }
 0x11a   :  { %v878_v35 = vpop.f32.mrb[19].mxu1 }
 0x11b   :  { %v876_v32 = vadd.f32 %v875_v30, %v811_v29  ;;  %v814_v33 = vadd.f32 %v1183_v28, %v749_v37 }
 0x11d   :  { %v879_v21 = vadd.f32 %v878_v35, %v814_v33  ;;  %v1184_v36 = vpop.f32.mrb[20].mxu0  ;;  %v906_v39 = vmax.f32 %v876_v32, 0.0 }
 0x11e   :  { %v1185_v38 = vpop.f32.mrb[21].mxu0 }
 0x11f   :  { %v907_v40 = vmax.f32 %v879_v21, 0.0  ;;  %v1186_v41 = vadd.f32 %v1185_v38, %v1184_v36  ;;  %v1187_v42 = vpop.f32.mrb[22].mxu0  ;;  %v1236_v44 = vpop.f32.mrb[20].mxu1 }
 0x120   :  { %v1188_v43 = vpop.f32.mrb[23].mxu0  ;;  %v891_v48 = vpop.f32.mrb[21].mxu1 }
 0x121   :  { %v1062_v45 = vpack.c.bf16 %v907_v40, %v906_v39  ;;  %v819_v46 = vadd.f32 %v1186_v41, %v754_v50  ;;  %v1189_v47 = vadd.f32 %v1188_v43, %v1187_v42  ;;  %v1237_v49 = vpop.f32.mrb[22].mxu1 }
 0x122   :  { %v894_v51 = vpop.f32.mrb[23].mxu1 }
 0x123   :  { %1063 = vst [vmem:[%s1624_s3] sm:$0xff] %v1062_v45   ;;  %v884_v34 = vadd.f32 %v1232_v27, %v819_v46  ;;  %v822_v37 = vadd.f32 %v1189_v47, %v757_v53 }
 0x125   :  { %v887_v52 = vadd.f32 %v1233_v31, %v822_v37  ;;  %v1190_v54 = vpop.f32.mrb[24].mxu0  ;;  %v908_v56 = vmax.f32 %v884_v34, 0.0 }
 0x126   :  { %v1191_v55 = vpop.f32.mrb[25].mxu0 }
 0x127   :  { %v909_v57 = vmax.f32 %v887_v52, 0.0  ;;  %v1192_v58 = vadd.f32 %v1191_v55, %v1190_v54  ;;  %v1193_v59 = vpop.f32.mrb[26].mxu0 }
 0x128   :  { %v1194_v60 = vpop.f32.mrb[27].mxu0 }
 0x129   :  { %v1067_v61 = vpack.c.bf16 %v909_v57, %v908_v56  ;;  %v1195_v50 = vadd.f32 %v1194_v60, %v1193_v59  ;;  %v827_v62 = vadd.f32 %v1192_v58, %v762_v2 }
 0x12b   :  { %1079 = vst [vmem:[%s1624_s3 + $0x8] sm:$0xff] %v1067_v61   ;;  %v892_v63 = vadd.f32 %v891_v48, %v827_v62  ;;  %v830_v0 = vadd.f32 %v1195_v50, %v765_v5 }
 0x12d   :  { %v895_v1 = vadd.f32 %v894_v51, %v830_v0  ;;  %v1196_v53 = vpop.f32.mrb[28].mxu0  ;;  %v910_v4 = vmax.f32 %v892_v63, 0.0 }
 0x12e   :  { %v1197_v3 = vpop.f32.mrb[29].mxu0 }
 0x12f   :  { %v911_v6 = vmax.f32 %v895_v1, 0.0  ;;  %v1198_v7 = vadd.f32 %v1197_v3, %v1196_v53  ;;  %v1199_v8 = vpop.f32.mrb[30].mxu0 }
 0x130   :  { %v1200_v9 = vpop.f32.mrb[31].mxu0 }
 0x131   :  { %v1072_v10 = vpack.c.bf16 %v911_v6, %v910_v4  ;;  %v835_v11 = vadd.f32 %v1198_v7, %v770_v18  ;;  %v1201_v12 = vadd.f32 %v1200_v9, %v1199_v8 }
 0x133   :  { %1080 = vst [vmem:[%s1624_s3 + $0x10] sm:$0xff] %v1072_v10   ;;  %v900_v2 = vadd.f32 %v1236_v44, %v835_v11  ;;  %v838_v13 = vadd.f32 %v1201_v12, %v773_v20 }
 0x135   :  { %v903_v14 = vadd.f32 %v1237_v49, %v838_v13  ;;  %v912_v15 = vmax.f32 %v900_v2, 0.0 }
 0x137   :  { %v913_v5 = vmax.f32 %v903_v14, 0.0 }
 0x139   :  { %v1077_v16 = vpack.c.bf16 %v913_v5, %v912_v15 }
 0x13b   :  { %1081 = vst [vmem:[%s1624_s3 + $0x18] sm:$0xff] %v1077_v16  }

// kernel: minkunet_forward.29
= control target key start
LH: loop header
LB: loop body
LE: loop exit
PB: predicated region body
PF: predicated region fallthrough
CT: control target
= control target key end

     0   :  { %s1613_s1 = inlined_call_operand.vmem [shape: bf16[896,128], index: 1, kind: input, shape index: {}]   ;;  %s1614_s0 = inlined_call_operand.vmem [shape: bf16[64,896], index: 0, kind: input, shape index: {}]   ;;  %s1615_s2 = inlined_call_operand.vmem [shape: f32[1,128], index: 2, kind: input, shape index: {}]   ;;  %s1616_s3 = inlined_call_operand.vmem [shape: bf16[64,128], index: 3, kind: output, shape index: {}]  }
   0x1   :  { %v1230_v0 = vld [vmem:[%s1613_s1 + $0x40] sm:$0xff]   ;;  %v1234_v4 = vld [vmem:[%s1613_s1 + $0x48] sm:$0xff]   ;;  %v1238_v8 = vld [vmem:[%s1613_s1 + $0x50] sm:$0xff]  }
   0x2   :  { %v1231_v1 = vld [vmem:[%s1613_s1] sm:$0xff]   ;;  %1074 = vmatprep.subr.bf16.mxu0 %v1230_v0  ;;  %v1235_v5 = vld [vmem:[%s1613_s1 + $0x8] sm:$0xff]   ;;  %v1239_v9 = vld [vmem:[%s1613_s1 + $0x10] sm:$0xff]  }
   0x3   :  { %v1232_v2 = vld [vmem:[%s1613_s1 + $0xc0] sm:$0xff]   ;;  %1075 = vmatpush3.bf16.msra.mxu0 %v1231_v1  ;;  %v1236_v6 = vld [vmem:[%s1613_s1 + $0xc8] sm:$0xff]   ;;  %v1240_v10 = vld [vmem:[%s1613_s1 + $0xd0] sm:$0xff]  }
   0x4   :  { %v1233_v3 = vld [vmem:[%s1613_s1 + $0x80] sm:$0xff]   ;;  %1114 = vmatprep.subr.bf16.mxu1 %v1232_v2  ;;  %1076 = vmatprep.subr.bf16.mxu0 %v1234_v4  ;;  %v1237_v7 = vld [vmem:[%s1613_s1 + $0x88] sm:$0xff]   ;;  %v1241_v11 = vld [vmem:[%s1613_s1 + $0x90] sm:$0xff]  }
   0x5   :  { %1115 = vmatpush3.bf16.msra.mxu1 %v1233_v3  ;;  %v1242_v12 = vld [vmem:[%s1613_s1 + $0x58] sm:$0xff]   ;;  %v1246_v16 = vld [vmem:[%s1613_s1 + $0x60] sm:$0xff]   ;;  %v1250_v20 = vld [vmem:[%s1613_s1 + $0x68] sm:$0xff]  }
   0x6   :  { %1116 = vmatprep.subr.bf16.mxu1 %v1236_v6  ;;  %v1243_v13 = vld [vmem:[%s1613_s1 + $0x18] sm:$0xff]   ;;  %v1247_v17 = vld [vmem:[%s1613_s1 + $0x20] sm:$0xff]   ;;  %v1251_v21 = vld [vmem:[%s1613_s1 + $0x28] sm:$0xff]  }
   0x7   :  { %1077 = vmatpush3.bf16.msra.mxu0 %v1235_v5  ;;  %v1244_v14 = vld [vmem:[%s1613_s1 + $0xd8] sm:$0xff]   ;;  %v1248_v18 = vld [vmem:[%s1613_s1 + $0xe0] sm:$0xff]   ;;  %v1252_v22 = vld [vmem:[%s1613_s1 + $0xe8] sm:$0xff]  }
   0x8   :  { %1078 = vmatprep.subr.bf16.mxu0 %v1238_v8  ;;  %v1245_v15 = vld [vmem:[%s1613_s1 + $0x98] sm:$0xff]   ;;  %v1249_v19 = vld [vmem:[%s1613_s1 + $0xa0] sm:$0xff]   ;;  %v1253_v23 = vld [vmem:[%s1613_s1 + $0xa8] sm:$0xff]  }
   0x9   :  { %1117 = vmatpush3.bf16.msra.mxu1 %v1237_v7  ;;  %v1254_v24 = vld [vmem:[%s1613_s1 + $0x70] sm:$0xff]   ;;  %v1258_v28 = vld [vmem:[%s1613_s1 + $0x78] sm:$0xff]   ;;  %v1263_v32 = vld [vmem:[%s1614_s0 + $0x4] ss:$28 sps:$4 sm:$0xff]  }
   0xa   :  { %1118 = vmatprep.subr.bf16.mxu1 %v1240_v10  ;;  %v1255_v25 = vld [vmem:[%s1613_s1 + $0x30] sm:$0xff]   ;;  %v1259_v29 = vld [vmem:[%s1613_s1 + $0x38] sm:$0xff]   ;;  %678 = vmatprep.mubr.bf16.mxu0 %v1263_v32  ;;  %v1265_v34 = vld [vmem:[%s1613_s1 + $0x140] sm:$0xff]  }
   0xb   :  { %1079 = vmatpush3.bf16.msra.mxu0 %v1239_v9  ;;  %v1256_v26 = vld [vmem:[%s1613_s1 + $0xf0] sm:$0xff]   ;;  %v1260_v30 = vld [vmem:[%s1613_s1 + $0xf8] sm:$0xff]   ;;  %v1266_v35 = vld [vmem:[%s1614_s0 + $0x8] ss:$28 sps:$4 sm:$0xff]  }
   0xc   :  { %1080 = vmatprep.subr.bf16.mxu0 %v1242_v12  ;;  %v1257_v27 = vld [vmem:[%s1613_s1 + $0xb0] sm:$0xff]   ;;  %v1261_v31 = vld [vmem:[%s1614_s0] ss:$28 sps:$4 sm:$0xff]   ;;  %v1268_v36 = vld [vmem:[%s1614_s0 + $0xc] ss:$28 sps:$4 sm:$0xff]  }
   0xd   :  { %1119 = vmatpush3.bf16.msra.mxu1 %v1241_v11  ;;  %v1264_v33 = vld [vmem:[%s1613_s1 + $0xb8] sm:$0xff]   ;;  %v1269_v37 = vld [vmem:[%s1613_s1 + $0x100] sm:$0xff]   ;;  %743 = vmatprep.mubr.bf16.mxu1 %v1268_v36  ;;  %v1270_v38 = vld [vmem:[%s1613_s1 + $0x148] sm:$0xff]  }
   0xe   :  { %1120 = vmatprep.subr.bf16.mxu1 %v1244_v14  ;;  %v1271_v39 = vld [vmem:[%s1613_s1 + $0x180] sm:$0xff]   ;;  %v1272_v40 = vld [vmem:[%s1613_s1 + $0x108] sm:$0xff]   ;;  %v1273_v41 = vld [vmem:[%s1614_s0 + $0x3c] ss:$28 sps:$4 sm:$0xff]  }
   0xf   :  { %1081 = vmatpush3.bf16.msra.mxu0 %v1243_v13  ;;  %v1275_v42 = vld [vmem:[%s1614_s0 + $0x38] ss:$28 sps:$4 sm:$0xff]   ;;  %v1277_v44 = vld [vmem:[%s1613_s1 + $0x188] sm:$0xff]   ;;  %v1278_v45 = vld [vmem:[%s1614_s0 + $0x44] ss:$28 sps:$4 sm:$0xff]  }
  0x10   :  { %1082 = vmatprep.subr.bf16.mxu0 %v1246_v16  ;;  %v1276_v43 = vld [vmem:[%s1613_s1 + $0x150] sm:$0xff]   ;;  %v1281_v47 = vld [vmem:[%s1614_s0 + $0x40] ss:$28 sps:$4 sm:$0xff]   ;;  %v1294_v58 = vld [vmem:[%s1613_s1 + $0x168] sm:$0xff]  }
  0x11   :  { %1121 = vmatpush3.bf16.msra.mxu1 %v1245_v15  ;;  %v1280_v46 = vld [vmem:[%s1613_s1 + $0x110] sm:$0xff]   ;;  %v1282_v48 = vld [vmem:[%s1613_s1 + $0x158] sm:$0xff]   ;;  %v1288_v53 = vld [vmem:[%s1613_s1 + $0x160] sm:$0xff]  }
  0x12   :  { %1122 = vmatprep.subr.bf16.mxu1 %v1248_v18  ;;  %v1283_v49 = vld [vmem:[%s1613_s1 + $0x190] sm:$0xff]   ;;  %v1284_v50 = vld [vmem:[%s1613_s1 + $0x118] sm:$0xff]   ;;  %v1292_v56 = vld [vmem:[%s1613_s1 + $0x120] sm:$0xff]  }
  0x13   :  { %1083 = vmatpush3.bf16.msra.mxu0 %v1247_v17  ;;  %v1285_v51 = vld [vmem:[%s1614_s0 + $0x74] ss:$28 sps:$4 sm:$0xff]   ;;  %v1289_v54 = vld [vmem:[%s1613_s1 + $0x198] sm:$0xff]   ;;  %v1295_v59 = vld [vmem:[%s1613_s1 + $0x1a0] sm:$0xff]  }
  0x14   :  { %1084 = vmatprep.subr.bf16.mxu0 %v1250_v20  ;;  %v1287_v52 = vld [vmem:[%s1614_s0 + $0x70] ss:$28 sps:$4 sm:$0xff]   ;;  %v1290_v55 = vld [vmem:[%s1614_s0 + $0x7c] ss:$28 sps:$4 sm:$0xff]   ;;  %v1299_v62 = vld [vmem:[%s1614_s0 + $0xa8] ss:$28 sps:$4 sm:$0xff]  }
  0x15   :  { %1123 = vmatpush3.bf16.msra.mxu1 %v1249_v19  ;;  %v1293_v57 = vld [vmem:[%s1614_s0 + $0x78] ss:$28 sps:$4 sm:$0xff]   ;;  %v1296_v60 = vld [vmem:[%s1613_s1 + $0x128] sm:$0xff]   ;;  %v1318_v15 = vld [vmem:[%s1614_s0 + $0x84] ss:$28 sps:$4 sm:$0xff]  }
  0x16   :  { %1124 = vmatprep.subr.bf16.mxu1 %v1252_v22  ;;  %v1297_v61 = vld [vmem:[%s1614_s0 + $0xac] ss:$28 sps:$4 sm:$0xff]   ;;  %v1300_v63 = vld [vmem:[%s1613_s1 + $0x170] sm:$0xff]   ;;  %v1306_v4 = vld [vmem:[%s1613_s1 + $0x178] sm:$0xff]  }
  0x17   :  { %1085 = vmatpush3.bf16.msra.mxu0 %v1251_v21  ;;  %v1301_v0 = vld [vmem:[%s1613_s1 + $0x1a8] sm:$0xff]   ;;  %v1302_v1 = vld [vmem:[%s1614_s0 + $0xb4] ss:$28 sps:$4 sm:$0xff]   ;;  %v1308_v6 = vld [vmem:[%s1613_s1 + $0x138] sm:$0xff]  }
  0x18   :  { %1086 = vmatprep.subr.bf16.mxu0 %v1254_v24  ;;  %v1304_v2 = vld [vmem:[%s1613_s1 + $0x130] sm:$0xff]   ;;  %v1312_v9 = vld [vmem:[%s1613_s1 + $0x1b8] sm:$0xff]   ;;  %v1315_v12 = vld [vmem:[%s1614_s0 + $0x4c] ss:$28 sps:$4 sm:$0xff]  }
  0x19   :  { %1125 = vmatpush3.bf16.msra.mxu1 %v1253_v23  ;;  %v1305_v3 = vld [vmem:[%s1614_s0 + $0xb0] ss:$28 sps:$4 sm:$0xff]   ;;  %v1313_v10 = vld [vmem:[%s1614_s0 + $0x18] ss:$28 sps:$4 sm:$0xff]   ;;  %v1321_v13 = vld [vmem:[%s1614_s0 + $0x88] ss:$28 sps:$4 sm:$0xff]  }
  0x1a   :  { %1126 = vmatprep.subr.bf16.mxu1 %v1256_v26  ;;  %v1307_v5 = vld [vmem:[%s1613_s1 + $0x1b0] sm:$0xff]   ;;  %v1317_v14 = vld [vmem:[%s1614_s0 + $0x48] ss:$28 sps:$4 sm:$0xff]   ;;  %v1322_v16 = vld [vmem:[%s1614_s0 + $0xc0] ss:$28 sps:$4 sm:$0xff]  }
  0x1b   :  { %1087 = vmatpush3.bf16.msra.mxu0 %v1255_v25  ;;  %v1309_v7 = vld [vmem:[%s1614_s0 + $0x10] ss:$28 sps:$4 sm:$0xff]   ;;  %v1320_v17 = vld [vmem:[%s1614_s0 + $0x80] ss:$28 sps:$4 sm:$0xff]   ;;  %v1325_v19 = vld [vmem:[%s1614_s0 + $0xb8] ss:$28 sps:$4 sm:$0xff]  }
  0x1c   :  { %1088 = vmatprep.subr.bf16.mxu0 %v1258_v28  ;;  %v1311_v8 = vld [vmem:[%s1614_s0 + $0x14] ss:$28 sps:$4 sm:$0xff]   ;;  %v1323_v18 = vld [vmem:[%s1614_s0 + $0xbc] ss:$28 sps:$4 sm:$0xff]   ;;  %v950_v21 = vld [vmem:[%s1615_s2] ss:$0 sm:$0xff] }
  0x1d   :  { %1127 = vmatpush3.bf16.msra.mxu1 %v1257_v27  ;;  %v1314_v11 = vld [vmem:[%s1614_s0 + $0x50] ss:$28 sps:$4 sm:$0xff]  }
  0x1e   :  { %1128 = vmatprep.subr.bf16.mxu1 %v1260_v30 }
  0x1f   :  { %1089 = vmatpush3.bf16.msra.mxu0 %v1259_v29 }
  0x20   :  { %1154 = vmatprep.subr.bf16.mxu0 %v1265_v34 }
  0x21   :  { %1129 = vmatpush3.bf16.msra.mxu1 %v1264_v33 }
  0x22   :  { %679 = vmatmul.mubr.bf16.vlgmr.msra.gmra.mrb[0].mxu0 %v1261_v31  ;;  %1206 = vmatprep.subr.bf16.mxu1 %v1271_v39 }
  0x23   :  { %1155 = vmatpush3.bf16.msra.mxu0 %v1269_v37  ;;  %686 = vmatprep.mubr.bf16.mxu0 %v1273_v41 }
  0x24   :  { %744 = vmatmul.mubr.bf16.vlgmr.msra.gmra.mrb[0].mxu1 %v1266_v35  ;;  %1156 = vmatprep.subr.bf16.mxu0 %v1270_v38 }
  0x25   :  { %1207 = vmatpush3.bf16.msra.mxu1 %v1271_v39  ;;  %751 = vmatprep.mubr.bf16.mxu1 %v1278_v45 }
  0x26   :  { %1208 = vmatprep.subr.bf16.mxu1 %v1277_v44 }
  0x27   :  { %1157 = vmatpush3.bf16.msra.mxu0 %v1272_v40 }
  0x28   :  { %1158 = vmatprep.subr.bf16.mxu0 %v1276_v43 }
  0x29   :  { %1209 = vmatpush3.bf16.msra.mxu1 %v1277_v44 }
  0x2a   :  { %687 = vmatmul.mubr.bf16.gmra.mrb[4].mxu0 %v1275_v42  ;;  %1210 = vmatprep.subr.bf16.mxu1 %v1283_v49 }
  0x2b   :  { %1159 = vmatpush3.bf16.msra.mxu0 %v1280_v46  ;;  %694 = vmatprep.mubr.bf16.mxu0 %v1285_v51 }
  0x2c   :  { %752 = vmatmul.mubr.bf16.gmra.mrb[4].mxu1 %v1281_v47  ;;  %1160 = vmatprep.subr.bf16.mxu0 %v1282_v48 }
  0x2d   :  { %1211 = vmatpush3.bf16.msra.mxu1 %v1283_v49  ;;  %759 = vmatprep.mubr.bf16.mxu1 %v1290_v55 }
  0x2e   :  { %1212 = vmatprep.subr.bf16.mxu1 %v1289_v54 }
  0x2f   :  { %1161 = vmatpush3.bf16.msra.mxu0 %v1284_v50 }
  0x30   :  { %1162 = vmatprep.subr.bf16.mxu0 %v1288_v53 }
  0x31   :  { %1213 = vmatpush3.bf16.msra.mxu1 %v1289_v54 }
  0x32   :  { %695 = vmatmul.mubr.bf16.gmra.mrb[8].mxu0 %v1287_v52  ;;  %1214 = vmatprep.subr.bf16.mxu1 %v1295_v59 }
  0x33   :  { %1163 = vmatpush3.bf16.msra.mxu0 %v1292_v56  ;;  %702 = vmatprep.mubr.bf16.mxu0 %v1297_v61 }
  0x34   :  { %760 = vmatmul.mubr.bf16.gmra.mrb[8].mxu1 %v1293_v57  ;;  %1164 = vmatprep.subr.bf16.mxu0 %v1294_v58 }
  0x35   :  { %1215 = vmatpush3.bf16.msra.mxu1 %v1295_v59  ;;  %767 = vmatprep.mubr.bf16.mxu1 %v1302_v1 }
  0x36   :  { %1216 = vmatprep.subr.bf16.mxu1 %v1301_v0 }
  0x37   :  { %1165 = vmatpush3.bf16.msra.mxu0 %v1296_v60 }
  0x38   :  { %1166 = vmatprep.subr.bf16.mxu0 %v1300_v63 }
  0x39   :  { %1217 = vmatpush3.bf16.msra.mxu1 %v1301_v0 }
  0x3a   :  { %703 = vmatmul.mubr.bf16.gmra.mrb[12].mxu0 %v1299_v62  ;;  %1218 = vmatprep.subr.bf16.mxu1 %v1307_v5 }
  0x3b   :  { %1167 = vmatpush3.bf16.msra.mxu0 %v1304_v2  ;;  %808 = vmatprep.mubr.bf16.mxu0 %v1311_v8 }
  0x3c   :  { %768 = vmatmul.mubr.bf16.gmra.mrb[12].mxu1 %v1305_v3  ;;  %1168 = vmatprep.subr.bf16.mxu0 %v1306_v4 }
  0x3d   :  { %1219 = vmatpush3.bf16.msra.mxu1 %v1307_v5  ;;  %1222 = vmatprep.mubr.bf16.mxu1 %v1313_v10 }
  0x3e   :  { %1220 = vmatprep.subr.bf16.mxu1 %v1312_v9 }
  0x3f   :  { %1169 = vmatpush3.bf16.msra.mxu0 %v1308_v6 }
  0x41   :  { %1221 = vmatpush3.bf16.msra.mxu1 %v1312_v9 }
  0x42   :  { %809 = vmatmul.mubr.bf16.vlgmr.msra.gmra.mrb[16].mxu0 %v1309_v7 }
  0x43   :  { %816 = vmatprep.mubr.bf16.mxu0 %v1315_v12 }
  0x44   :  { %1223 = vmatmul.mubr.bf16.vlgmr.msra.gmra.mrb[16].mxu1 %v1314_v11 }
  0x45   :  { %1226 = vmatprep.mubr.bf16.mxu1 %v1321_v13 }
  0x4a   :  { %817 = vmatmul.mubr.bf16.gmra.mrb[20].mxu0 %v1317_v14 }
  0x4b   :  { %824 = vmatprep.mubr.bf16.mxu0 %v1318_v15 }
  0x4c   :  { %1227 = vmatmul.mubr.bf16.gmra.mrb[20].mxu1 %v1322_v16 }
  0x52   :  { %825 = vmatmul.mubr.bf16.gmra.mrb[24].mxu0 %v1320_v17 }
  0x53   :  { %832 = vmatprep.mubr.bf16.mxu0 %v1323_v18 }
  0x5a   :  { %833 = vmatmul.mubr.bf16.gmra.mrb[28].mxu0 %v1325_v19 }
  0xf5   :  { %v1090_v20 = vpop.f32.mrb[0].mxu0 }
  0xf6   :  { %v1091_v22 = vpop.f32.mrb[1].mxu0 }
  0xf7   :  { %v1092_v23 = vadd.f32 %v1091_v22, %v1090_v20  ;;  %v1093_v24 = vpop.f32.mrb[2].mxu0  ;;  %v1130_v25 = vpop.f32.mrb[0].mxu1 }
  0xf8   :  { %v1094_v26 = vpop.f32.mrb[3].mxu0  ;;  %v1131_v29 = vpop.f32.mrb[1].mxu1 }
  0xf9   :  { %v681_v27 = vadd.f32 %v1092_v23, %v950_v21  ;;  %v1095_v28 = vadd.f32 %v1094_v26, %v1093_v24  ;;  %v1132_v30 = vadd.f32 %v1131_v29, %v1130_v25  ;;  %v1133_v31 = vpop.f32.mrb[2].mxu1 }
  0xfa   :  { %v1134_v33 = vpop.f32.mrb[3].mxu1 }
  0xfb   :  { %v684_v32 = vadd.f32 %v1095_v28, %v950_v21  ;;  %v746_v34 = vadd.f32 %v1132_v30, %v681_v27  ;;  %v1135_v35 = vadd.f32 %v1134_v33, %v1133_v31 }
  0xfd   :  { %v1096_v36 = vpop.f32.mrb[4].mxu0  ;;  %v749_v37 = vadd.f32 %v1135_v35, %v684_v32 }
  0xfe   :  { %v1097_v38 = vpop.f32.mrb[5].mxu0 }
  0xff   :  { %v1098_v39 = vadd.f32 %v1097_v38, %v1096_v36  ;;  %v1099_v40 = vpop.f32.mrb[6].mxu0  ;;  %v1136_v43 = vpop.f32.mrb[4].mxu1 }
 0x100   :  { %v1100_v41 = vpop.f32.mrb[7].mxu0  ;;  %v1137_v45 = vpop.f32.mrb[5].mxu1 }
 0x101   :  { %v689_v42 = vadd.f32 %v1098_v39, %v950_v21  ;;  %v1101_v44 = vadd.f32 %v1100_v41, %v1099_v40  ;;  %v1138_v47 = vadd.f32 %v1137_v45, %v1136_v43  ;;  %v1139_v48 = vpop.f32.mrb[6].mxu1 }
 0x102   :  { %v1140_v49 = vpop.f32.mrb[7].mxu1 }
 0x103   :  { %v692_v46 = vadd.f32 %v1101_v44, %v950_v21  ;;  %v754_v50 = vadd.f32 %v1138_v47, %v689_v42  ;;  %v1141_v51 = vadd.f32 %v1140_v49, %v1139_v48 }
 0x105   :  { %v1102_v52 = vpop.f32.mrb[8].mxu0  ;;  %v757_v53 = vadd.f32 %v1141_v51, %v692_v46 }
 0x106   :  { %v1103_v54 = vpop.f32.mrb[9].mxu0 }
 0x107   :  { %v1104_v55 = vadd.f32 %v1103_v54, %v1102_v52  ;;  %v1105_v56 = vpop.f32.mrb[10].mxu0  ;;  %v1142_v57 = vpop.f32.mrb[8].mxu1 }
 0x108   :  { %v1106_v58 = vpop.f32.mrb[11].mxu0  ;;  %v1143_v61 = vpop.f32.mrb[9].mxu1 }
 0x109   :  { %v697_v59 = vadd.f32 %v1104_v55, %v950_v21  ;;  %v1107_v60 = vadd.f32 %v1106_v58, %v1105_v56  ;;  %v1144_v62 = vadd.f32 %v1143_v61, %v1142_v57  ;;  %v1145_v63 = vpop.f32.mrb[10].mxu1 }
 0x10a   :  { %v1146_v1 = vpop.f32.mrb[11].mxu1 }
 0x10b   :  { %v700_v0 = vadd.f32 %v1107_v60, %v950_v21  ;;  %v762_v2 = vadd.f32 %v1144_v62, %v697_v59  ;;  %v1147_v3 = vadd.f32 %v1146_v1, %v1145_v63 }
 0x10d   :  { %v1108_v4 = vpop.f32.mrb[12].mxu0  ;;  %v765_v5 = vadd.f32 %v1147_v3, %v700_v0 }
 0x10e   :  { %v1109_v6 = vpop.f32.mrb[13].mxu0 }
 0x10f   :  { %v1110_v7 = vadd.f32 %v1109_v6, %v1108_v4  ;;  %v1111_v8 = vpop.f32.mrb[14].mxu0  ;;  %v1148_v11 = vpop.f32.mrb[12].mxu1 }
 0x110   :  { %v1112_v9 = vpop.f32.mrb[15].mxu0  ;;  %v1149_v13 = vpop.f32.mrb[13].mxu1 }
 0x111   :  { %v705_v10 = vadd.f32 %v1110_v7, %v950_v21  ;;  %v1113_v12 = vadd.f32 %v1112_v9, %v1111_v8  ;;  %v1150_v15 = vadd.f32 %v1149_v13, %v1148_v11  ;;  %v1151_v16 = vpop.f32.mrb[14].mxu1 }
 0x112   :  { %v1152_v17 = vpop.f32.mrb[15].mxu1 }
 0x113   :  { %v708_v14 = vadd.f32 %v1113_v12, %v950_v21  ;;  %v770_v18 = vadd.f32 %v1150_v15, %v705_v10  ;;  %v1153_v19 = vadd.f32 %v1152_v17, %v1151_v16 }
 0x115   :  { %v773_v20 = vadd.f32 %v1153_v19, %v708_v14  ;;  %v1170_v22 = vpop.f32.mrb[16].mxu0 }
 0x116   :  { %v1171_v23 = vpop.f32.mrb[17].mxu0 }
 0x117   :  { %v1172_v24 = vadd.f32 %v1171_v23, %v1170_v22  ;;  %v1173_v25 = vpop.f32.mrb[18].mxu0  ;;  %v1224_v27 = vpop.f32.mrb[16].mxu1 }
 0x118   :  { %v1174_v26 = vpop.f32.mrb[19].mxu0  ;;  %v875_v30 = vpop.f32.mrb[17].mxu1 }
 0x119   :  { %v1175_v28 = vadd.f32 %v1174_v26, %v1173_v25  ;;  %v811_v29 = vadd.f32 %v1172_v24, %v746_v34  ;;  %v1225_v31 = vpop.f32.mrb[18].mxu1 }
 0x11a   :  { %v878_v35 = vpop.f32.mrb[19].mxu1 }
 0x11b   :  { %v876_v32 = vadd.f32 %v875_v30, %v811_v29  ;;  %v814_v33 = vadd.f32 %v1175_v28, %v749_v37 }
 0x11d   :  { %v879_v21 = vadd.f32 %v878_v35, %v814_v33  ;;  %v1176_v36 = vpop.f32.mrb[20].mxu0 }
 0x11e   :  { %v1177_v38 = vpop.f32.mrb[21].mxu0 }
 0x11f   :  { %v1054_v39 = vpack.c.bf16 %v879_v21, %v876_v32  ;;  %v1178_v40 = vadd.f32 %v1177_v38, %v1176_v36  ;;  %v1179_v41 = vpop.f32.mrb[22].mxu0  ;;  %v1228_v43 = vpop.f32.mrb[20].mxu1 }
 0x120   :  { %v1180_v42 = vpop.f32.mrb[23].mxu0  ;;  %v891_v34 = vpop.f32.mrb[21].mxu1 }
 0x121   :  { %1055 = vst [vmem:[%s1616_s3] sm:$0xff] %v1054_v39   ;;  %v819_v44 = vadd.f32 %v1178_v40, %v754_v50  ;;  %v1181_v45 = vadd.f32 %v1180_v42, %v1179_v41  ;;  %v1229_v46 = vpop.f32.mrb[22].mxu1 }
 0x122   :  { %v894_v37 = vpop.f32.mrb[23].mxu1 }
 0x123   :  { %v884_v47 = vadd.f32 %v1224_v27, %v819_v44  ;;  %v822_v48 = vadd.f32 %v1181_v45, %v757_v53 }
 0x125   :  { %v887_v49 = vadd.f32 %v1225_v31, %v822_v48  ;;  %v1182_v51 = vpop.f32.mrb[24].mxu0 }
 0x126   :  { %v1183_v52 = vpop.f32.mrb[25].mxu0 }
 0x127   :  { %v1059_v54 = vpack.c.bf16 %v887_v49, %v884_v47  ;;  %v1184_v55 = vadd.f32 %v1183_v52, %v1182_v51  ;;  %v1185_v56 = vpop.f32.mrb[26].mxu0 }
 0x128   :  { %v1186_v57 = vpop.f32.mrb[27].mxu0 }
 0x129   :  { %1071 = vst [vmem:[%s1616_s3 + $0x8] sm:$0xff] %v1059_v54   ;;  %v1187_v58 = vadd.f32 %v1186_v57, %v1185_v56  ;;  %v827_v59 = vadd.f32 %v1184_v55, %v762_v2 }
 0x12b   :  { %v892_v50 = vadd.f32 %v891_v34, %v827_v59  ;;  %v830_v60 = vadd.f32 %v1187_v58, %v765_v5 }
 0x12d   :  { %v895_v61 = vadd.f32 %v894_v37, %v830_v60  ;;  %v1188_v62 = vpop.f32.mrb[28].mxu0 }
 0x12e   :  { %v1189_v63 = vpop.f32.mrb[29].mxu0 }
 0x12f   :  { %v1064_v53 = vpack.c.bf16 %v895_v61, %v892_v50  ;;  %v1190_v0 = vadd.f32 %v1189_v63, %v1188_v62  ;;  %v1191_v1 = vpop.f32.mrb[30].mxu0 }
 0x130   :  { %v1192_v3 = vpop.f32.mrb[31].mxu0 }
 0x131   :  { %1072 = vst [vmem:[%s1616_s3 + $0x10] sm:$0xff] %v1064_v53   ;;  %v835_v4 = vadd.f32 %v1190_v0, %v770_v18  ;;  %v1193_v6 = vadd.f32 %v1192_v3, %v1191_v1 }
 0x133   :  { %v900_v7 = vadd.f32 %v1228_v43, %v835_v4  ;;  %v838_v8 = vadd.f32 %v1193_v6, %v773_v20 }
 0x135   :  { %v903_v9 = vadd.f32 %v1229_v46, %v838_v8 }
 0x137   :  { %v1069_v10 = vpack.c.bf16 %v903_v9, %v900_v7 }
 0x139   :  { %1073 = vst [vmem:[%s1616_s3 + $0x18] sm:$0xff] %v1069_v10  }

// kernel: minkunet_forward.34
= control target key start
LH: loop header
LB: loop body
LE: loop exit
PB: predicated region body
PF: predicated region fallthrough
CT: control target
= control target key end

     0   :  { %s414_s1 = inlined_call_operand.vmem [shape: bf16[128,128], index: 1, kind: input, shape index: {}]   ;;  %s415_s0 = inlined_call_operand.vmem [shape: bf16[64,128], index: 0, kind: input, shape index: {}]   ;;  %s416_s2 = inlined_call_operand.vmem [shape: f32[1,128], index: 2, kind: input, shape index: {}]   ;;  %s417_s3 = inlined_call_operand.vmem [shape: bf16[64,128], index: 3, kind: output, shape index: {}]  }
   0x1   :  { %v331_v0 = vld [vmem:[%s414_s1] sm:$0xff]   ;;  %v332_v1 = vld [vmem:[%s414_s1 + $0x8] sm:$0xff]   ;;  %v333_v2 = vld [vmem:[%s414_s1 + $0x10] sm:$0xff]  }
   0x2   :  { %291 = vmatprep.subr.bf16.mxu0 %v331_v0  ;;  %315 = vmatprep.subr.bf16.mxu1 %v331_v0  ;;  %v334_v3 = vld [vmem:[%s414_s1 + $0x18] sm:$0xff]   ;;  %v339_v4 = vld [vmem:[%s415_s0] sm:$0xff]   ;;  %v340_v5 = vld [vmem:[%s415_s0 + $0x10] sm:$0xff]  }
   0x3   :  { %292 = vmatpush3.bf16.msra.mxu0 %v331_v0  ;;  %323 = vmatpush3.bf16.msra.mxu1 %v331_v0  ;;  %v335_v6 = vld [vmem:[%s414_s1 + $0x20] sm:$0xff]   ;;  %v336_v7 = vld [vmem:[%s414_s1 + $0x28] sm:$0xff]   ;;  %v337_v8 = vld [vmem:[%s414_s1 + $0x30] sm:$0xff]  }
   0x4   :  { %293 = vmatprep.subr.bf16.mxu0 %v332_v1  ;;  %316 = vmatprep.subr.bf16.mxu1 %v332_v1  ;;  %v338_v9 = vld [vmem:[%s414_s1 + $0x38] sm:$0xff]   ;;  %v341_v10 = vld [vmem:[%s415_s0 + $0x8] sm:$0xff]   ;;  %v227_v13 = vld [vmem:[%s416_s2] ss:$0 sm:$0xff] }
   0x5   :  { %307 = vmatprep.mubr.bf16.mxu0 %v339_v4  ;;  %311 = vmatprep.mubr.bf16.mxu1 %v340_v5  ;;  %v342_v11 = vld [vmem:[%s415_s0 + $0x18] sm:$0xff]  }
   0x7   :  { %294 = vmatpush3.bf16.msra.mxu0 %v332_v1  ;;  %324 = vmatpush3.bf16.msra.mxu1 %v332_v1 }
   0x8   :  { %295 = vmatprep.subr.bf16.mxu0 %v333_v2  ;;  %317 = vmatprep.subr.bf16.mxu1 %v333_v2 }
   0xb   :  { %296 = vmatpush3.bf16.msra.mxu0 %v333_v2  ;;  %325 = vmatpush3.bf16.msra.mxu1 %v333_v2 }
   0xc   :  { %297 = vmatprep.subr.bf16.mxu0 %v334_v3  ;;  %318 = vmatprep.subr.bf16.mxu1 %v334_v3 }
   0xf   :  { %298 = vmatpush3.bf16.msra.mxu0 %v334_v3  ;;  %326 = vmatpush3.bf16.msra.mxu1 %v334_v3 }
  0x10   :  { %299 = vmatprep.subr.bf16.mxu0 %v335_v6  ;;  %319 = vmatprep.subr.bf16.mxu1 %v335_v6 }
  0x13   :  { %300 = vmatpush3.bf16.msra.mxu0 %v335_v6  ;;  %327 = vmatpush3.bf16.msra.mxu1 %v335_v6 }
  0x14   :  { %301 = vmatprep.subr.bf16.mxu0 %v336_v7  ;;  %320 = vmatprep.subr.bf16.mxu1 %v336_v7 }
  0x17   :  { %302 = vmatpush3.bf16.msra.mxu0 %v336_v7  ;;  %328 = vmatpush3.bf16.msra.mxu1 %v336_v7 }
  0x18   :  { %303 = vmatprep.subr.bf16.mxu0 %v337_v8  ;;  %321 = vmatprep.subr.bf16.mxu1 %v337_v8 }
  0x1b   :  { %304 = vmatpush3.bf16.msra.mxu0 %v337_v8  ;;  %329 = vmatpush3.bf16.msra.mxu1 %v337_v8 }
  0x1c   :  { %305 = vmatprep.subr.bf16.mxu0 %v338_v9  ;;  %322 = vmatprep.subr.bf16.mxu1 %v338_v9 }
  0x1f   :  { %306 = vmatpush3.bf16.msra.mxu0 %v338_v9  ;;  %330 = vmatpush3.bf16.msra.mxu1 %v338_v9 }
  0x22   :  { %308 = vmatmul.mubr.bf16.vlgmr.msra.gmra.mrb[0].mxu0 %v341_v10  ;;  %312 = vmatmul.mubr.bf16.vlgmr.msra.gmra.mrb[0].mxu1 %v342_v11 }
  0xf5   :  { %v309_v12 = vpop.f32.mrb[0].mxu0  ;;  %v313_v14 = vpop.f32.mrb[0].mxu1 }
  0xf6   :  { %v152_v15 = vpop.f32.mrb[1].mxu0  ;;  %v168_v16 = vpop.f32.mrb[1].mxu1  ;;  %v161_v19 = vadd.f32 %v309_v12, %v227_v13  ;;  %v177_v20 = vadd.f32 %v313_v14, %v227_v13 }
  0xf7   :  { %v310_v17 = vpop.f32.mrb[2].mxu0  ;;  %v314_v18 = vpop.f32.mrb[2].mxu1  ;;  %v153_v25 = vadd.f32 %v227_v13, %v152_v15  ;;  %v169_v26 = vadd.f32 %v227_v13, %v168_v16 }
  0xf8   :  { %v164_v21 = vadd.f32 %v310_v17, %v227_v13  ;;  %v180_v22 = vadd.f32 %v314_v18, %v227_v13  ;;  %v155_v23 = vpop.f32.mrb[3].mxu0  ;;  %v171_v24 = vpop.f32.mrb[3].mxu1 }
  0xf9   :  { %v156_v27 = vadd.f32 %v227_v13, %v155_v23  ;;  %v172_v28 = vadd.f32 %v227_v13, %v171_v24 }
  0xfa   :  { %v264_v29 = vpack.c.bf16 %v164_v21, %v161_v19  ;;  %v274_v30 = vpack.c.bf16 %v180_v22, %v177_v20 }
  0xfb   :  { %v259_v31 = vpack.c.bf16 %v156_v27, %v153_v25  ;;  %v269_v32 = vpack.c.bf16 %v172_v28, %v169_v26 }
  0xfc   :  { %276 = vst [vmem:[%s417_s3 + $0x8] sm:$0xff] %v264_v29   ;;  %278 = vst [vmem:[%s417_s3 + $0x18] sm:$0xff] %v274_v30  }
  0xfd   :  { %260 = vst [vmem:[%s417_s3] sm:$0xff] %v259_v31   ;;  %277 = vst [vmem:[%s417_s3 + $0x10] sm:$0xff] %v269_v32  }

// kernel: minkunet_forward.32
= control target key start
LH: loop header
LB: loop body
LE: loop exit
PB: predicated region body
PF: predicated region fallthrough
CT: control target
= control target key end

     0   :  { %s3030_s1 = inlined_call_operand.vmem [shape: bf16[1792,128], index: 1, kind: input, shape index: {}]   ;;  %s3031_s0 = inlined_call_operand.vmem [shape: bf16[64,1792], index: 0, kind: input, shape index: {}]   ;;  %s3032_s2 = inlined_call_operand.vmem [shape: f32[1,128], index: 2, kind: input, shape index: {}]   ;;  %s3033_s3 = inlined_call_operand.vmem [shape: bf16[64,128], index: 3, kind: output, shape index: {}]  }
   0x1   :  { %v2265_v0 = vld [vmem:[%s3030_s1 + $0x40] sm:$0xff]   ;;  %v2269_v4 = vld [vmem:[%s3030_s1 + $0x48] sm:$0xff]   ;;  %v2273_v8 = vld [vmem:[%s3030_s1 + $0x50] sm:$0xff]  }
   0x2   :  { %v2266_v1 = vld [vmem:[%s3030_s1 + $0xc0] sm:$0xff]   ;;  %1969 = vmatprep.subr.bf16.mxu0 %v2265_v0  ;;  %v2270_v5 = vld [vmem:[%s3030_s1 + $0xc8] sm:$0xff]   ;;  %v2274_v9 = vld [vmem:[%s3030_s1 + $0xd0] sm:$0xff]  }
   0x3   :  { %v2267_v2 = vld [vmem:[%s3030_s1] sm:$0xff]   ;;  %2009 = vmatprep.subr.bf16.mxu1 %v2266_v1  ;;  %v2271_v6 = vld [vmem:[%s3030_s1 + $0x8] sm:$0xff]   ;;  %v2275_v10 = vld [vmem:[%s3030_s1 + $0x10] sm:$0xff]  }
   0x4   :  { %v2268_v3 = vld [vmem:[%s3030_s1 + $0x80] sm:$0xff]   ;;  %1970 = vmatpush3.bf16.msra.mxu0 %v2267_v2  ;;  %v2272_v7 = vld [vmem:[%s3030_s1 + $0x88] sm:$0xff]   ;;  %v2276_v11 = vld [vmem:[%s3030_s1 + $0x90] sm:$0xff]  }
   0x5   :  { %2010 = vmatpush3.bf16.msra.mxu1 %v2268_v3  ;;  %1971 = vmatprep.subr.bf16.mxu0 %v2269_v4  ;;  %v2277_v12 = vld [vmem:[%s3030_s1 + $0x58] sm:$0xff]   ;;  %v2281_v16 = vld [vmem:[%s3030_s1 + $0x60] sm:$0xff]   ;;  %v2285_v20 = vld [vmem:[%s3030_s1 + $0x68] sm:$0xff]  }
   0x6   :  { %2011 = vmatprep.subr.bf16.mxu1 %v2270_v5  ;;  %v2278_v13 = vld [vmem:[%s3030_s1 + $0xd8] sm:$0xff]   ;;  %v2282_v17 = vld [vmem:[%s3030_s1 + $0xe0] sm:$0xff]   ;;  %v2286_v21 = vld [vmem:[%s3030_s1 + $0xe8] sm:$0xff]  }
   0x7   :  { %v2279_v14 = vld [vmem:[%s3030_s1 + $0x18] sm:$0xff]   ;;  %v2283_v18 = vld [vmem:[%s3030_s1 + $0x20] sm:$0xff]   ;;  %v2287_v22 = vld [vmem:[%s3030_s1 + $0x28] sm:$0xff]  }
   0x8   :  { %1972 = vmatpush3.bf16.msra.mxu0 %v2271_v6  ;;  %v2280_v15 = vld [vmem:[%s3030_s1 + $0x98] sm:$0xff]   ;;  %v2284_v19 = vld [vmem:[%s3030_s1 + $0xa0] sm:$0xff]   ;;  %v2288_v23 = vld [vmem:[%s3030_s1 + $0xa8] sm:$0xff]  }
   0x9   :  { %2012 = vmatpush3.bf16.msra.mxu1 %v2272_v7  ;;  %1973 = vmatprep.subr.bf16.mxu0 %v2273_v8  ;;  %v2289_v24 = vld [vmem:[%s3030_s1 + $0x70] sm:$0xff]   ;;  %v2293_v28 = vld [vmem:[%s3030_s1 + $0x78] sm:$0xff]   ;;  %v2300_v34 = vld [vmem:[%s3031_s0 + $0x8] ss:$56 sps:$4 sm:$0xff]  }
   0xa   :  { %2013 = vmatprep.subr.bf16.mxu1 %v2274_v9  ;;  %v2290_v25 = vld [vmem:[%s3030_s1 + $0xf0] sm:$0xff]   ;;  %v2294_v29 = vld [vmem:[%s3030_s1 + $0xf8] sm:$0xff]   ;;  %v2302_v35 = vld [vmem:[%s3031_s0 + $0xc] ss:$56 sps:$4 sm:$0xff]  }
   0xb   :  { %v2291_v26 = vld [vmem:[%s3030_s1 + $0x30] sm:$0xff]   ;;  %v2295_v30 = vld [vmem:[%s3030_s1 + $0x38] sm:$0xff]   ;;  %v2303_v36 = vld [vmem:[%s3030_s1 + $0x140] sm:$0xff]   ;;  %1351 = vmatprep.mubr.bf16.mxu1 %v2302_v35 }
   0xc   :  { %1974 = vmatpush3.bf16.msra.mxu0 %v2275_v10  ;;  %v2292_v27 = vld [vmem:[%s3030_s1 + $0xb0] sm:$0xff]   ;;  %v2296_v31 = vld [vmem:[%s3030_s1 + $0xb8] sm:$0xff]   ;;  %v2304_v37 = vld [vmem:[%s3030_s1 + $0x1c0] sm:$0xff]  }
   0xd   :  { %2014 = vmatpush3.bf16.msra.mxu1 %v2276_v11  ;;  %1975 = vmatprep.subr.bf16.mxu0 %v2277_v12  ;;  %v2297_v32 = vld [vmem:[%s3031_s0] ss:$56 sps:$4 sm:$0xff]   ;;  %v2299_v33 = vld [vmem:[%s3031_s0 + $0x4] ss:$56 sps:$4 sm:$0xff]   ;;  %v2307_v40 = vld [vmem:[%s3030_s1 + $0x148] sm:$0xff]  }
   0xe   :  { %2015 = vmatprep.subr.bf16.mxu1 %v2278_v13  ;;  %1286 = vmatprep.mubr.bf16.mxu0 %v2299_v33  ;;  %v2305_v38 = vld [vmem:[%s3030_s1 + $0x100] sm:$0xff]   ;;  %v2308_v41 = vld [vmem:[%s3030_s1 + $0x1c8] sm:$0xff]   ;;  %v2313_v45 = vld [vmem:[%s3031_s0 + $0x7c] ss:$56 sps:$4 sm:$0xff]  }
   0xf   :  { %v2306_v39 = vld [vmem:[%s3030_s1 + $0x180] sm:$0xff]   ;;  %v2309_v42 = vld [vmem:[%s3030_s1 + $0x108] sm:$0xff]   ;;  %v2316_v47 = vld [vmem:[%s3031_s0 + $0x78] ss:$56 sps:$4 sm:$0xff]  }
  0x10   :  { %1976 = vmatpush3.bf16.msra.mxu0 %v2279_v14  ;;  %v2310_v43 = vld [vmem:[%s3030_s1 + $0x188] sm:$0xff]   ;;  %v2317_v48 = vld [vmem:[%s3030_s1 + $0x150] sm:$0xff]   ;;  %v2321_v52 = vld [vmem:[%s3030_s1 + $0x158] sm:$0xff]  }
  0x11   :  { %2016 = vmatpush3.bf16.msra.mxu1 %v2280_v15  ;;  %1977 = vmatprep.subr.bf16.mxu0 %v2281_v16  ;;  %v2311_v44 = vld [vmem:[%s3031_s0 + $0x74] ss:$56 sps:$4 sm:$0xff]   ;;  %v2315_v46 = vld [vmem:[%s3031_s0 + $0x70] ss:$56 sps:$4 sm:$0xff]   ;;  %v2322_v53 = vld [vmem:[%s3030_s1 + $0x1d8] sm:$0xff]  }
  0x12   :  { %2017 = vmatprep.subr.bf16.mxu1 %v2282_v17  ;;  %v2318_v49 = vld [vmem:[%s3030_s1 + $0x1d0] sm:$0xff]   ;;  %v2323_v54 = vld [vmem:[%s3030_s1 + $0x118] sm:$0xff]   ;;  %v2327_v57 = vld [vmem:[%s3031_s0 + $0xec] ss:$56 sps:$4 sm:$0xff]  }
  0x13   :  { %v2319_v50 = vld [vmem:[%s3030_s1 + $0x110] sm:$0xff]   ;;  %v2324_v55 = vld [vmem:[%s3030_s1 + $0x198] sm:$0xff]   ;;  %v2330_v59 = vld [vmem:[%s3031_s0 + $0xe8] ss:$56 sps:$4 sm:$0xff]  }
  0x14   :  { %1978 = vmatpush3.bf16.msra.mxu0 %v2283_v18  ;;  %v2320_v51 = vld [vmem:[%s3030_s1 + $0x190] sm:$0xff]   ;;  %v2325_v56 = vld [vmem:[%s3031_s0 + $0xe4] ss:$56 sps:$4 sm:$0xff]   ;;  %v2329_v58 = vld [vmem:[%s3031_s0 + $0xe0] ss:$56 sps:$4 sm:$0xff]  }
  0x15   :  { %2018 = vmatpush3.bf16.msra.mxu1 %v2284_v19  ;;  %1979 = vmatprep.subr.bf16.mxu0 %v2285_v20  ;;  %v2331_v60 = vld [vmem:[%s3030_s1 + $0x160] sm:$0xff]   ;;  %v2335_v0 = vld [vmem:[%s3030_s1 + $0x168] sm:$0xff]   ;;  %v2341_v5 = vld [vmem:[%s3031_s0 + $0x15c] ss:$56 sps:$4 sm:$0xff]  }
  0x16   :  { %2019 = vmatprep.subr.bf16.mxu1 %v2286_v21  ;;  %v2332_v61 = vld [vmem:[%s3030_s1 + $0x1e0] sm:$0xff]   ;;  %v2336_v1 = vld [vmem:[%s3030_s1 + $0x1e8] sm:$0xff]   ;;  %v2344_v7 = vld [vmem:[%s3031_s0 + $0x158] ss:$56 sps:$4 sm:$0xff]  }
  0x17   :  { %v2333_v62 = vld [vmem:[%s3030_s1 + $0x120] sm:$0xff]   ;;  %v2337_v2 = vld [vmem:[%s3030_s1 + $0x128] sm:$0xff]   ;;  %v2345_v8 = vld [vmem:[%s3030_s1 + $0x170] sm:$0xff]  }
  0x18   :  { %1980 = vmatpush3.bf16.msra.mxu0 %v2287_v22  ;;  %v2334_v63 = vld [vmem:[%s3030_s1 + $0x1a0] sm:$0xff]   ;;  %v2338_v3 = vld [vmem:[%s3030_s1 + $0x1a8] sm:$0xff]   ;;  %v2346_v9 = vld [vmem:[%s3030_s1 + $0x1f0] sm:$0xff]  }
  0x19   :  { %2020 = vmatpush3.bf16.msra.mxu1 %v2288_v23  ;;  %1981 = vmatprep.subr.bf16.mxu0 %v2289_v24  ;;  %v2339_v4 = vld [vmem:[%s3031_s0 + $0x154] ss:$56 sps:$4 sm:$0xff]   ;;  %v2343_v6 = vld [vmem:[%s3031_s0 + $0x150] ss:$56 sps:$4 sm:$0xff]   ;;  %v2349_v12 = vld [vmem:[%s3030_s1 + $0x178] sm:$0xff]  }
  0x1a   :  { %2021 = vmatprep.subr.bf16.mxu1 %v2290_v25  ;;  %v2347_v10 = vld [vmem:[%s3030_s1 + $0x130] sm:$0xff]   ;;  %v2350_v13 = vld [vmem:[%s3030_s1 + $0x1f8] sm:$0xff]   ;;  %v2359_v20 = vld [vmem:[%s3030_s1 + $0x240] sm:$0xff]  }
  0x1b   :  { %v2348_v11 = vld [vmem:[%s3030_s1 + $0x1b0] sm:$0xff]   ;;  %v2351_v14 = vld [vmem:[%s3030_s1 + $0x138] sm:$0xff]   ;;  %v2360_v21 = vld [vmem:[%s3030_s1 + $0x2c0] sm:$0xff]  }
  0x1c   :  { %1982 = vmatpush3.bf16.msra.mxu0 %v2291_v26  ;;  %v2352_v15 = vld [vmem:[%s3030_s1 + $0x1b8] sm:$0xff]   ;;  %v2353_v16 = vld [vmem:[%s3031_s0 + $0x10] ss:$56 sps:$4 sm:$0xff]   ;;  %v2355_v17 = vld [vmem:[%s3031_s0 + $0x14] ss:$56 sps:$4 sm:$0xff]  }
  0x1d   :  { %2022 = vmatpush3.bf16.msra.mxu1 %v2292_v27  ;;  %1983 = vmatprep.subr.bf16.mxu0 %v2293_v28  ;;  %v2356_v18 = vld [vmem:[%s3031_s0 + $0x18] ss:$56 sps:$4 sm:$0xff]   ;;  %v2358_v19 = vld [vmem:[%s3031_s0 + $0x1c] ss:$56 sps:$4 sm:$0xff]   ;;  %v2361_v22 = vld [vmem:[%s3030_s1 + $0x200] sm:$0xff]  }
  0x1e   :  { %2023 = vmatprep.subr.bf16.mxu1 %v2294_v29  ;;  %v2362_v23 = vld [vmem:[%s3030_s1 + $0x280] sm:$0xff]   ;;  %v2363_v24 = vld [vmem:[%s3030_s1 + $0x248] sm:$0xff]   ;;  %v2374_v33 = vld [vmem:[%s3030_s1 + $0x2d0] sm:$0xff]  }
  0x1f   :  { %v2364_v25 = vld [vmem:[%s3030_s1 + $0x2c8] sm:$0xff]   ;;  %v2367_v28 = vld [vmem:[%s3031_s0 + $0x84] ss:$56 sps:$4 sm:$0xff]   ;;  %v2376_v35 = vld [vmem:[%s3030_s1 + $0x290] sm:$0xff]  }
  0x20   :  { %1984 = vmatpush3.bf16.msra.mxu0 %v2295_v30  ;;  %v2365_v26 = vld [vmem:[%s3030_s1 + $0x208] sm:$0xff]   ;;  %v2371_v30 = vld [vmem:[%s3031_s0 + $0x80] ss:$56 sps:$4 sm:$0xff]  }
  0x21   :  { %2024 = vmatpush3.bf16.msra.mxu1 %v2296_v31  ;;  %2049 = vmatprep.subr.bf16.mxu0 %v2303_v36  ;;  %v2366_v27 = vld [vmem:[%s3030_s1 + $0x288] sm:$0xff]   ;;  %v2377_v36 = vld [vmem:[%s3030_s1 + $0x258] sm:$0xff]  }
  0x22   :  { %2089 = vmatprep.subr.bf16.mxu1 %v2304_v37  ;;  %v2369_v29 = vld [vmem:[%s3031_s0 + $0x8c] ss:$56 sps:$4 sm:$0xff]   ;;  %v2372_v31 = vld [vmem:[%s3031_s0 + $0x88] ss:$56 sps:$4 sm:$0xff]   ;;  %v2378_v37 = vld [vmem:[%s3030_s1 + $0x2d8] sm:$0xff]  }
  0x23   :  { %1287 = vmatmul.mubr.bf16.vlgmr.msra.gmra.mrb[0].mxu0 %v2297_v32  ;;  %v2373_v32 = vld [vmem:[%s3030_s1 + $0x250] sm:$0xff]  }
  0x24   :  { %1352 = vmatmul.mubr.bf16.vlgmr.msra.gmra.mrb[0].mxu1 %v2300_v34  ;;  %2050 = vmatpush3.bf16.msra.mxu0 %v2305_v38  ;;  %v2375_v34 = vld [vmem:[%s3030_s1 + $0x210] sm:$0xff]   ;;  %v2379_v38 = vld [vmem:[%s3030_s1 + $0x218] sm:$0xff]  }
  0x25   :  { %2090 = vmatpush3.bf16.msra.mxu1 %v2306_v39  ;;  %2051 = vmatprep.subr.bf16.mxu0 %v2307_v40  ;;  %v2380_v39 = vld [vmem:[%s3030_s1 + $0x298] sm:$0xff]   ;;  %v2381_v40 = vld [vmem:[%s3031_s0 + $0xf4] ss:$56 sps:$4 sm:$0xff]  }
  0x26   :  { %2091 = vmatprep.subr.bf16.mxu1 %v2308_v41  ;;  %1294 = vmatprep.mubr.bf16.mxu0 %v2311_v44  ;;  %v2383_v41 = vld [vmem:[%s3031_s0 + $0xfc] ss:$56 sps:$4 sm:$0xff]   ;;  %v2387_v44 = vld [vmem:[%s3030_s1 + $0x260] sm:$0xff]  }
  0x27   :  { %1359 = vmatprep.mubr.bf16.mxu1 %v2313_v45  ;;  %v2388_v45 = vld [vmem:[%s3030_s1 + $0x2e0] sm:$0xff]  }
  0x28   :  { %2052 = vmatpush3.bf16.msra.mxu0 %v2309_v42  ;;  %v2385_v42 = vld [vmem:[%s3031_s0 + $0xf0] ss:$56 sps:$4 sm:$0xff]  }
  0x29   :  { %2092 = vmatpush3.bf16.msra.mxu1 %v2310_v43  ;;  %2053 = vmatprep.subr.bf16.mxu0 %v2317_v48  ;;  %v2386_v43 = vld [vmem:[%s3031_s0 + $0xf8] ss:$56 sps:$4 sm:$0xff]   ;;  %v2391_v48 = vld [vmem:[%s3030_s1 + $0x268] sm:$0xff]  }
  0x2a   :  { %2093 = vmatprep.subr.bf16.mxu1 %v2318_v49  ;;  %v2392_v49 = vld [vmem:[%s3030_s1 + $0x2e8] sm:$0xff]  }
  0x2b   :  { %1295 = vmatmul.mubr.bf16.gmra.mrb[4].mxu0 %v2315_v46  ;;  %v2389_v46 = vld [vmem:[%s3030_s1 + $0x220] sm:$0xff]  }
  0x2c   :  { %1360 = vmatmul.mubr.bf16.gmra.mrb[4].mxu1 %v2316_v47  ;;  %2054 = vmatpush3.bf16.msra.mxu0 %v2319_v50  ;;  %v2390_v47 = vld [vmem:[%s3030_s1 + $0x2a0] sm:$0xff]   ;;  %v2393_v50 = vld [vmem:[%s3030_s1 + $0x228] sm:$0xff]  }
  0x2d   :  { %2094 = vmatpush3.bf16.msra.mxu1 %v2320_v51  ;;  %2055 = vmatprep.subr.bf16.mxu0 %v2321_v52  ;;  %v2394_v51 = vld [vmem:[%s3030_s1 + $0x2a8] sm:$0xff]   ;;  %v2395_v52 = vld [vmem:[%s3031_s0 + $0x164] ss:$56 sps:$4 sm:$0xff]  }
  0x2e   :  { %2095 = vmatprep.subr.bf16.mxu1 %v2322_v53  ;;  %1302 = vmatprep.mubr.bf16.mxu0 %v2325_v56  ;;  %v2397_v53 = vld [vmem:[%s3031_s0 + $0x16c] ss:$56 sps:$4 sm:$0xff]   ;;  %v2401_v56 = vld [vmem:[%s3030_s1 + $0x270] sm:$0xff]  }
  0x2f   :  { %1367 = vmatprep.mubr.bf16.mxu1 %v2327_v57  ;;  %v2402_v57 = vld [vmem:[%s3030_s1 + $0x2f0] sm:$0xff]  }
  0x30   :  { %2056 = vmatpush3.bf16.msra.mxu0 %v2323_v54  ;;  %v2399_v54 = vld [vmem:[%s3031_s0 + $0x160] ss:$56 sps:$4 sm:$0xff]  }
  0x31   :  { %2096 = vmatpush3.bf16.msra.mxu1 %v2324_v55  ;;  %2057 = vmatprep.subr.bf16.mxu0 %v2331_v60  ;;  %v2400_v55 = vld [vmem:[%s3031_s0 + $0x168] ss:$56 sps:$4 sm:$0xff]   ;;  %v2405_v60 = vld [vmem:[%s3030_s1 + $0x278] sm:$0xff]  }
  0x32   :  { %2097 = vmatprep.subr.bf16.mxu1 %v2332_v61  ;;  %v2406_v61 = vld [vmem:[%s3030_s1 + $0x2f8] sm:$0xff]  }
  0x33   :  { %1303 = vmatmul.mubr.bf16.gmra.mrb[8].mxu0 %v2329_v58  ;;  %v2403_v58 = vld [vmem:[%s3030_s1 + $0x230] sm:$0xff]  }
  0x34   :  { %1368 = vmatmul.mubr.bf16.gmra.mrb[8].mxu1 %v2330_v59  ;;  %2058 = vmatpush3.bf16.msra.mxu0 %v2333_v62  ;;  %v2404_v59 = vld [vmem:[%s3030_s1 + $0x2b0] sm:$0xff]   ;;  %v2407_v62 = vld [vmem:[%s3030_s1 + $0x238] sm:$0xff]  }
  0x35   :  { %2098 = vmatpush3.bf16.msra.mxu1 %v2334_v63  ;;  %2059 = vmatprep.subr.bf16.mxu0 %v2335_v0  ;;  %v2408_v63 = vld [vmem:[%s3030_s1 + $0x2b8] sm:$0xff]  }
  0x36   :  { %2099 = vmatprep.subr.bf16.mxu1 %v2336_v1  ;;  %1310 = vmatprep.mubr.bf16.mxu0 %v2339_v4  ;;  %v2409_v0 = vld [vmem:[%s3031_s0 + $0x20] ss:$56 sps:$4 sm:$0xff]   ;;  %v2411_v1 = vld [vmem:[%s3031_s0 + $0x24] ss:$56 sps:$4 sm:$0xff]  }
  0x37   :  { %1375 = vmatprep.mubr.bf16.mxu1 %v2341_v5  ;;  %v2415_v4 = vld [vmem:[%s3030_s1 + $0x340] sm:$0xff]  }
  0x38   :  { %2060 = vmatpush3.bf16.msra.mxu0 %v2337_v2  ;;  %v2412_v2 = vld [vmem:[%s3031_s0 + $0x28] ss:$56 sps:$4 sm:$0xff]  }
  0x39   :  { %2100 = vmatpush3.bf16.msra.mxu1 %v2338_v3  ;;  %2061 = vmatprep.subr.bf16.mxu0 %v2345_v8  ;;  %v2414_v3 = vld [vmem:[%s3031_s0 + $0x2c] ss:$56 sps:$4 sm:$0xff]  }
  0x3a   :  { %2101 = vmatprep.subr.bf16.mxu1 %v2346_v9  ;;  %v2416_v5 = vld [vmem:[%s3030_s1 + $0x300] sm:$0xff]   ;;  %v2419_v8 = vld [vmem:[%s3031_s0 + $0x94] ss:$56 sps:$4 sm:$0xff]  }
  0x3b   :  { %1311 = vmatmul.mubr.bf16.gmra.mrb[12].mxu0 %v2343_v6  ;;  %v2417_v6 = vld [vmem:[%s3030_s1 + $0x348] sm:$0xff]   ;;  %v2421_v9 = vld [vmem:[%s3031_s0 + $0x9c] ss:$56 sps:$4 sm:$0xff]  }
  0x3c   :  { %1376 = vmatmul.mubr.bf16.gmra.mrb[12].mxu1 %v2344_v7  ;;  %2062 = vmatpush3.bf16.msra.mxu0 %v2347_v10  ;;  %v2418_v7 = vld [vmem:[%s3030_s1 + $0x308] sm:$0xff]  }
  0x3d   :  { %2102 = vmatpush3.bf16.msra.mxu1 %v2348_v11  ;;  %2063 = vmatprep.subr.bf16.mxu0 %v2349_v12  ;;  %v2423_v10 = vld [vmem:[%s3031_s0 + $0x90] ss:$56 sps:$4 sm:$0xff]  }
  0x3e   :  { %2103 = vmatprep.subr.bf16.mxu1 %v2350_v13  ;;  %1416 = vmatprep.mubr.bf16.mxu0 %v2355_v17  ;;  %v2424_v11 = vld [vmem:[%s3031_s0 + $0x98] ss:$56 sps:$4 sm:$0xff]   ;;  %v2431_v17 = vld [vmem:[%s3031_s0 + $0x10c] ss:$56 sps:$4 sm:$0xff]  }
  0x3f   :  { %1481 = vmatprep.mubr.bf16.mxu1 %v2358_v19  ;;  %v2425_v12 = vld [vmem:[%s3030_s1 + $0x350] sm:$0xff]   ;;  %v2434_v19 = vld [vmem:[%s3031_s0 + $0x108] ss:$56 sps:$4 sm:$0xff]  }
  0x40   :  { %2064 = vmatpush3.bf16.msra.mxu0 %v2351_v14  ;;  %v2426_v13 = vld [vmem:[%s3030_s1 + $0x310] sm:$0xff]   ;;  %v2427_v14 = vld [vmem:[%s3030_s1 + $0x358] sm:$0xff]  }
  0x41   :  { %2104 = vmatpush3.bf16.msra.mxu1 %v2352_v15  ;;  %2129 = vmatprep.subr.bf16.mxu0 %v2359_v20  ;;  %v2428_v15 = vld [vmem:[%s3030_s1 + $0x318] sm:$0xff]   ;;  %v2435_v20 = vld [vmem:[%s3030_s1 + $0x360] sm:$0xff]  }
  0x42   :  { %2169 = vmatprep.subr.bf16.mxu1 %v2360_v21  ;;  %v2436_v21 = vld [vmem:[%s3030_s1 + $0x320] sm:$0xff]  }
  0x43   :  { %1417 = vmatmul.mubr.bf16.vlgmr.msra.gmra.mrb[16].mxu0 %v2353_v16  ;;  %v2429_v16 = vld [vmem:[%s3031_s0 + $0x104] ss:$56 sps:$4 sm:$0xff]  }
  0x44   :  { %1482 = vmatmul.mubr.bf16.vlgmr.msra.gmra.mrb[16].mxu1 %v2356_v18  ;;  %2130 = vmatpush3.bf16.msra.mxu0 %v2361_v22  ;;  %v2433_v18 = vld [vmem:[%s3031_s0 + $0x100] ss:$56 sps:$4 sm:$0xff]   ;;  %v2437_v22 = vld [vmem:[%s3030_s1 + $0x368] sm:$0xff]  }
  0x45   :  { %2170 = vmatpush3.bf16.msra.mxu1 %v2362_v23  ;;  %2131 = vmatprep.subr.bf16.mxu0 %v2363_v24  ;;  %v2439_v23 = vld [vmem:[%s3031_s0 + $0x174] ss:$56 sps:$4 sm:$0xff]  }
  0x46   :  { %2171 = vmatprep.subr.bf16.mxu1 %v2364_v25  ;;  %1424 = vmatprep.mubr.bf16.mxu0 %v2367_v28  ;;  %v2438_v24 = vld [vmem:[%s3030_s1 + $0x328] sm:$0xff]   ;;  %v2441_v25 = vld [vmem:[%s3031_s0 + $0x17c] ss:$56 sps:$4 sm:$0xff]   ;;  %v2444_v28 = vld [vmem:[%s3031_s0 + $0x178] ss:$56 sps:$4 sm:$0xff]  }
  0x47   :  { %1489 = vmatprep.mubr.bf16.mxu1 %v2369_v29  ;;  %v2446_v29 = vld [vmem:[%s3030_s1 + $0x330] sm:$0xff]  }
  0x48   :  { %2132 = vmatpush3.bf16.msra.mxu0 %v2365_v26  ;;  %v2445_v26 = vld [vmem:[%s3030_s1 + $0x370] sm:$0xff]  }
  0x49   :  { %2172 = vmatpush3.bf16.msra.mxu1 %v2366_v27  ;;  %2133 = vmatprep.subr.bf16.mxu0 %v2373_v32  ;;  %v2443_v27 = vld [vmem:[%s3031_s0 + $0x170] ss:$56 sps:$4 sm:$0xff]   ;;  %v2454_v32 = vld [vmem:[%s3031_s0 + $0x114] ss:$56 sps:$4 sm:$0xff]  }
  0x4a   :  { %2173 = vmatprep.subr.bf16.mxu1 %v2374_v33  ;;  %v2448_v33 = vld [vmem:[%s3030_s1 + $0x338] sm:$0xff]  }
  0x4b   :  { %1425 = vmatmul.mubr.bf16.gmra.mrb[20].mxu0 %v2371_v30  ;;  %v2447_v30 = vld [vmem:[%s3030_s1 + $0x378] sm:$0xff]  }
  0x4c   :  { %1490 = vmatmul.mubr.bf16.gmra.mrb[20].mxu1 %v2372_v31  ;;  %2134 = vmatpush3.bf16.msra.mxu0 %v2375_v34  ;;  %v2451_v31 = vld [vmem:[%s3031_s0 + $0x34] ss:$56 sps:$4 sm:$0xff]   ;;  %v2449_v34 = vld [vmem:[%s3031_s0 + $0x30] ss:$56 sps:$4 sm:$0xff]  }
  0x4d   :  { %2174 = vmatpush3.bf16.msra.mxu1 %v2376_v35  ;;  %2135 = vmatprep.subr.bf16.mxu0 %v2377_v36  ;;  %v2452_v35 = vld [vmem:[%s3031_s0 + $0x110] ss:$56 sps:$4 sm:$0xff]   ;;  %v2455_v36 = vld [vmem:[%s3031_s0 + $0xa4] ss:$56 sps:$4 sm:$0xff]  }
  0x4e   :  { %2175 = vmatprep.subr.bf16.mxu1 %v2378_v37  ;;  %1432 = vmatprep.mubr.bf16.mxu0 %v2381_v40  ;;  %v2457_v37 = vld [vmem:[%s3031_s0 + $0x184] ss:$56 sps:$4 sm:$0xff]  }
  0x4f   :  { %1497 = vmatprep.mubr.bf16.mxu1 %v2383_v41 }
  0x50   :  { %2136 = vmatpush3.bf16.msra.mxu0 %v2379_v38  ;;  %v2459_v38 = vld [vmem:[%s3031_s0 + $0xa0] ss:$56 sps:$4 sm:$0xff]  }
  0x51   :  { %2176 = vmatpush3.bf16.msra.mxu1 %v2380_v39  ;;  %2137 = vmatprep.subr.bf16.mxu0 %v2387_v44  ;;  %v2460_v39 = vld [vmem:[%s3031_s0 + $0x180] ss:$56 sps:$4 sm:$0xff]  }
  0x52   :  { %2177 = vmatprep.subr.bf16.mxu1 %v2388_v45 }
  0x53   :  { %1433 = vmatmul.mubr.bf16.gmra.mrb[24].mxu0 %v2385_v42  ;;  %v1761_v42 = vld [vmem:[%s3032_s2] ss:$0 sm:$0xff] }
  0x54   :  { %1498 = vmatmul.mubr.bf16.gmra.mrb[24].mxu1 %v2386_v43  ;;  %2138 = vmatpush3.bf16.msra.mxu0 %v2389_v46 }
  0x55   :  { %2178 = vmatpush3.bf16.msra.mxu1 %v2390_v47  ;;  %2139 = vmatprep.subr.bf16.mxu0 %v2391_v48 }
  0x56   :  { %2179 = vmatprep.subr.bf16.mxu1 %v2392_v49  ;;  %1440 = vmatprep.mubr.bf16.mxu0 %v2395_v52 }
  0x57   :  { %1505 = vmatprep.mubr.bf16.mxu1 %v2397_v53 }
  0x58   :  { %2140 = vmatpush3.bf16.msra.mxu0 %v2393_v50 }
  0x59   :  { %2180 = vmatpush3.bf16.msra.mxu1 %v2394_v51  ;;  %2141 = vmatprep.subr.bf16.mxu0 %v2401_v56 }
  0x5a   :  { %2181 = vmatprep.subr.bf16.mxu1 %v2402_v57 }
  0x5b   :  { %1441 = vmatmul.mubr.bf16.gmra.mrb[28].mxu0 %v2399_v54 }
  0x5c   :  { %1506 = vmatmul.mubr.bf16.gmra.mrb[28].mxu1 %v2400_v55  ;;  %2142 = vmatpush3.bf16.msra.mxu0 %v2403_v58 }
  0x5d   :  { %2182 = vmatpush3.bf16.msra.mxu1 %v2404_v59  ;;  %2143 = vmatprep.subr.bf16.mxu0 %v2405_v60 }
  0x5e   :  { %2183 = vmatprep.subr.bf16.mxu1 %v2406_v61  ;;  %1546 = vmatprep.mubr.bf16.mxu0 %v2411_v1 }
  0x5f   :  { %1611 = vmatprep.mubr.bf16.mxu1 %v2414_v3 }
  0x60   :  { %2144 = vmatpush3.bf16.msra.mxu0 %v2407_v62 }
  0x61   :  { %2184 = vmatpush3.bf16.msra.mxu1 %v2408_v63  ;;  %2209 = vmatprep.subr.bf16.mxu0 %v2415_v4 }
  0x62   :  { %2249 = vmatprep.subr.bf16.mxu1 %v2415_v4 }
  0x63   :  { %1547 = vmatmul.mubr.bf16.vlgmr.msra.gmra.mrb[32].mxu0 %v2409_v0 }
  0x64   :  { %1612 = vmatmul.mubr.bf16.vlgmr.msra.gmra.mrb[32].mxu1 %v2412_v2  ;;  %2210 = vmatpush3.bf16.msra.mxu0 %v2416_v5 }
  0x65   :  { %2257 = vmatpush3.bf16.msra.mxu1 %v2416_v5  ;;  %2211 = vmatprep.subr.bf16.mxu0 %v2417_v6 }
  0x66   :  { %2250 = vmatprep.subr.bf16.mxu1 %v2417_v6  ;;  %1554 = vmatprep.mubr.bf16.mxu0 %v2419_v8 }
  0x67   :  { %1619 = vmatprep.mubr.bf16.mxu1 %v2421_v9 }
  0x68   :  { %2212 = vmatpush3.bf16.msra.mxu0 %v2418_v7 }
  0x69   :  { %2258 = vmatpush3.bf16.msra.mxu1 %v2418_v7  ;;  %2213 = vmatprep.subr.bf16.mxu0 %v2425_v12 }
  0x6a   :  { %2251 = vmatprep.subr.bf16.mxu1 %v2425_v12 }
  0x6b   :  { %1555 = vmatmul.mubr.bf16.gmra.mrb[36].mxu0 %v2423_v10 }
  0x6c   :  { %1620 = vmatmul.mubr.bf16.gmra.mrb[36].mxu1 %v2424_v11  ;;  %2214 = vmatpush3.bf16.msra.mxu0 %v2426_v13 }
  0x6d   :  { %2259 = vmatpush3.bf16.msra.mxu1 %v2426_v13  ;;  %2215 = vmatprep.subr.bf16.mxu0 %v2427_v14 }
  0x6e   :  { %2252 = vmatprep.subr.bf16.mxu1 %v2427_v14  ;;  %1562 = vmatprep.mubr.bf16.mxu0 %v2429_v16 }
  0x6f   :  { %1627 = vmatprep.mubr.bf16.mxu1 %v2431_v17 }
  0x70   :  { %2216 = vmatpush3.bf16.msra.mxu0 %v2428_v15 }
  0x71   :  { %2260 = vmatpush3.bf16.msra.mxu1 %v2428_v15  ;;  %2217 = vmatprep.subr.bf16.mxu0 %v2435_v20 }
  0x72   :  { %2253 = vmatprep.subr.bf16.mxu1 %v2435_v20 }
  0x73   :  { %1563 = vmatmul.mubr.bf16.gmra.mrb[40].mxu0 %v2433_v18 }
  0x74   :  { %1628 = vmatmul.mubr.bf16.gmra.mrb[40].mxu1 %v2434_v19  ;;  %2218 = vmatpush3.bf16.msra.mxu0 %v2436_v21 }
  0x75   :  { %2261 = vmatpush3.bf16.msra.mxu1 %v2436_v21  ;;  %2219 = vmatprep.subr.bf16.mxu0 %v2437_v22 }
  0x76   :  { %2254 = vmatprep.subr.bf16.mxu1 %v2437_v22  ;;  %1570 = vmatprep.mubr.bf16.mxu0 %v2439_v23 }
  0x77   :  { %1635 = vmatprep.mubr.bf16.mxu1 %v2441_v25 }
  0x78   :  { %2220 = vmatpush3.bf16.msra.mxu0 %v2438_v24 }
  0x79   :  { %2262 = vmatpush3.bf16.msra.mxu1 %v2438_v24  ;;  %2221 = vmatprep.subr.bf16.mxu0 %v2445_v26 }
  0x7a   :  { %2255 = vmatprep.subr.bf16.mxu1 %v2445_v26 }
  0x7b   :  { %1571 = vmatmul.mubr.bf16.gmra.mrb[44].mxu0 %v2443_v27 }
  0x7c   :  { %1636 = vmatmul.mubr.bf16.gmra.mrb[44].mxu1 %v2444_v28  ;;  %2222 = vmatpush3.bf16.msra.mxu0 %v2446_v29 }
  0x7d   :  { %1676 = vmatprep.mubr.bf16.mxu0 %v2451_v31  ;;  %2263 = vmatpush3.bf16.msra.mxu1 %v2446_v29 }
  0x7e   :  { %2223 = vmatprep.subr.bf16.mxu0 %v2447_v30  ;;  %2256 = vmatprep.subr.bf16.mxu1 %v2447_v30 }
  0x7f   :  { %1692 = vmatprep.mubr.bf16.mxu1 %v2454_v32 }
  0x80   :  { %2224 = vmatpush3.bf16.msra.mxu0 %v2448_v33 }
  0x81   :  { %2264 = vmatpush3.bf16.msra.mxu1 %v2448_v33 }
  0x83   :  { %1677 = vmatmul.mubr.bf16.vlgmr.msra.gmra.mrb[48].mxu0 %v2449_v34 }
  0x84   :  { %1693 = vmatmul.mubr.bf16.vlgmr.msra.gmra.mrb[48].mxu1 %v2452_v35  ;;  %1684 = vmatprep.mubr.bf16.mxu0 %v2455_v36 }
  0x85   :  { %1700 = vmatprep.mubr.bf16.mxu1 %v2457_v37 }
  0x8b   :  { %1685 = vmatmul.mubr.bf16.gmra.mrb[52].mxu0 %v2459_v38 }
  0x8c   :  { %1701 = vmatmul.mubr.bf16.gmra.mrb[52].mxu1 %v2460_v39 }
  0xf6   :  { %v1985_v40 = vpop.f32.mrb[0].mxu0 }
  0xf7   :  { %v2025_v41 = vpop.f32.mrb[0].mxu1  ;;  %v1986_v43 = vpop.f32.mrb[1].mxu0 }
  0xf8   :  { %v1987_v44 = vadd.f32 %v1986_v43, %v1985_v40  ;;  %v2026_v45 = vpop.f32.mrb[1].mxu1  ;;  %v1988_v46 = vpop.f32.mrb[2].mxu0 }
  0xf9   :  { %v2027_v47 = vadd.f32 %v2026_v45, %v2025_v41  ;;  %v2028_v48 = vpop.f32.mrb[2].mxu1  ;;  %v1989_v49 = vpop.f32.mrb[3].mxu0 }
  0xfa   :  { %v1289_v50 = vadd.f32 %v1987_v44, %v1761_v42  ;;  %v1990_v51 = vadd.f32 %v1989_v49, %v1988_v46  ;;  %v2029_v52 = vpop.f32.mrb[3].mxu1 }
  0xfb   :  { %v2030_v53 = vadd.f32 %v2029_v52, %v2028_v48 }
  0xfc   :  { %v1354_v54 = vadd.f32 %v2027_v47, %v1289_v50  ;;  %v1292_v55 = vadd.f32 %v1990_v51, %v1761_v42 }
  0xfe   :  { %v1357_v56 = vadd.f32 %v2030_v53, %v1292_v55  ;;  %v1991_v57 = vpop.f32.mrb[4].mxu0 }
  0xff   :  { %v2031_v58 = vpop.f32.mrb[4].mxu1  ;;  %v1992_v59 = vpop.f32.mrb[5].mxu0 }
 0x100   :  { %v1993_v60 = vadd.f32 %v1992_v59, %v1991_v57  ;;  %v2032_v61 = vpop.f32.mrb[5].mxu1  ;;  %v1994_v62 = vpop.f32.mrb[6].mxu0 }
 0x101   :  { %v2033_v63 = vadd.f32 %v2032_v61, %v2031_v58  ;;  %v2034_v0 = vpop.f32.mrb[6].mxu1  ;;  %v1995_v1 = vpop.f32.mrb[7].mxu0 }
 0x102   :  { %v1297_v2 = vadd.f32 %v1993_v60, %v1761_v42  ;;  %v1996_v3 = vadd.f32 %v1995_v1, %v1994_v62  ;;  %v2035_v4 = vpop.f32.mrb[7].mxu1 }
 0x103   :  { %v2036_v5 = vadd.f32 %v2035_v4, %v2034_v0 }
 0x104   :  { %v1362_v6 = vadd.f32 %v2033_v63, %v1297_v2  ;;  %v1300_v7 = vadd.f32 %v1996_v3, %v1761_v42 }
 0x106   :  { %v2988_v8 = vadd.f32 %v2036_v5, %v1300_v7  ;;  %v1997_v9 = vpop.f32.mrb[8].mxu0 }
 0x107   :  { %v2037_v10 = vpop.f32.mrb[8].mxu1  ;;  %v1998_v11 = vpop.f32.mrb[9].mxu0 }
 0x108   :  { %v1999_v12 = vadd.f32 %v1998_v11, %v1997_v9  ;;  %v2038_v13 = vpop.f32.mrb[9].mxu1  ;;  %v2000_v14 = vpop.f32.mrb[10].mxu0 }
 0x109   :  { %v2039_v15 = vadd.f32 %v2038_v13, %v2037_v10  ;;  %v2040_v16 = vpop.f32.mrb[10].mxu1  ;;  %v2001_v17 = vpop.f32.mrb[11].mxu0 }
 0x10a   :  { %v1305_v18 = vadd.f32 %v1999_v12, %v1761_v42  ;;  %v2002_v19 = vadd.f32 %v2001_v17, %v2000_v14  ;;  %v2041_v20 = vpop.f32.mrb[11].mxu1 }
 0x10b   :  { %v2042_v21 = vadd.f32 %v2041_v20, %v2040_v16 }
 0x10c   :  { %v1370_v22 = vadd.f32 %v2039_v15, %v1305_v18  ;;  %v1308_v23 = vadd.f32 %v2002_v19, %v1761_v42 }
 0x10e   :  { %v2990_v24 = vadd.f32 %v2042_v21, %v1308_v23  ;;  %v2003_v25 = vpop.f32.mrb[12].mxu0 }
 0x10f   :  { %v2043_v26 = vpop.f32.mrb[12].mxu1  ;;  %v2004_v27 = vpop.f32.mrb[13].mxu0 }
 0x110   :  { %v2044_v28 = vpop.f32.mrb[13].mxu1  ;;  %v2005_v29 = vadd.f32 %v2004_v27, %v2003_v25  ;;  %v2006_v31 = vpop.f32.mrb[14].mxu0 }
 0x111   :  { %v2045_v30 = vadd.f32 %v2044_v28, %v2043_v26  ;;  %v2046_v32 = vpop.f32.mrb[14].mxu1  ;;  %v2007_v33 = vpop.f32.mrb[15].mxu0 }
 0x112   :  { %v2047_v34 = vpop.f32.mrb[15].mxu1  ;;  %v1313_v35 = vadd.f32 %v2005_v29, %v1761_v42  ;;  %v2008_v36 = vadd.f32 %v2007_v33, %v2006_v31 }
 0x113   :  { %v2048_v37 = vadd.f32 %v2047_v34, %v2046_v32 }
 0x114   :  { %v1378_v38 = vadd.f32 %v2045_v30, %v1313_v35  ;;  %v1316_v39 = vadd.f32 %v2008_v36, %v1761_v42 }
 0x116   :  { %v2992_v40 = vadd.f32 %v2048_v37, %v1316_v39  ;;  %v2065_v41 = vpop.f32.mrb[16].mxu0 }
 0x117   :  { %v2066_v43 = vpop.f32.mrb[17].mxu0  ;;  %v2105_v44 = vpop.f32.mrb[16].mxu1 }
 0x118   :  { %v2067_v45 = vadd.f32 %v2066_v43, %v2065_v41  ;;  %v2068_v46 = vpop.f32.mrb[18].mxu0  ;;  %v2106_v47 = vpop.f32.mrb[17].mxu1 }
 0x119   :  { %v2069_v48 = vpop.f32.mrb[19].mxu0  ;;  %v2107_v50 = vadd.f32 %v2106_v47, %v2105_v44  ;;  %v2108_v51 = vpop.f32.mrb[18].mxu1 }
 0x11a   :  { %v1419_v49 = vadd.f32 %v2067_v45, %v1354_v54  ;;  %v2070_v52 = vadd.f32 %v2069_v48, %v2068_v46  ;;  %v2109_v53 = vpop.f32.mrb[19].mxu1 }
 0x11b   :  { %v2110_v58 = vadd.f32 %v2109_v53, %v2108_v51 }
 0x11c   :  { %v1484_v55 = vadd.f32 %v2107_v50, %v1419_v49  ;;  %v1422_v57 = vadd.f32 %v2070_v52, %v1357_v56 }
 0x11e   :  { %v2994_v59 = vadd.f32 %v2110_v58, %v1422_v57  ;;  %v2071_v42 = vpop.f32.mrb[20].mxu0 }
 0x11f   :  { %v2111_v60 = vpop.f32.mrb[20].mxu1  ;;  %v2072_v61 = vpop.f32.mrb[21].mxu0 }
 0x120   :  { %v2073_v62 = vadd.f32 %v2072_v61, %v2071_v42  ;;  %v2112_v63 = vpop.f32.mrb[21].mxu1  ;;  %v2074_v0 = vpop.f32.mrb[22].mxu0 }
 0x121   :  { %v2113_v1 = vadd.f32 %v2112_v63, %v2111_v60  ;;  %v2114_v2 = vpop.f32.mrb[22].mxu1  ;;  %v2075_v3 = vpop.f32.mrb[23].mxu0 }
 0x122   :  { %v1427_v4 = vadd.f32 %v2073_v62, %v1362_v6  ;;  %v2076_v54 = vadd.f32 %v2075_v3, %v2074_v0  ;;  %v2115_v5 = vpop.f32.mrb[23].mxu1 }
 0x123   :  { %v2116_v7 = vadd.f32 %v2115_v5, %v2114_v2 }
 0x124   :  { %v1492_v9 = vadd.f32 %v2113_v1, %v1427_v4  ;;  %v1430_v10 = vadd.f32 %v2076_v54, %v2988_v8 }
 0x126   :  { %v2997_v56 = vadd.f32 %v2116_v7, %v1430_v10  ;;  %v2077_v11 = vpop.f32.mrb[24].mxu0 }
 0x127   :  { %v2117_v12 = vpop.f32.mrb[24].mxu1  ;;  %v2078_v13 = vpop.f32.mrb[25].mxu0 }
 0x128   :  { %v2118_v14 = vpop.f32.mrb[25].mxu1  ;;  %v2079_v15 = vadd.f32 %v2078_v13, %v2077_v11  ;;  %v2080_v17 = vpop.f32.mrb[26].mxu0 }
 0x129   :  { %v2119_v16 = vadd.f32 %v2118_v14, %v2117_v12  ;;  %v2120_v18 = vpop.f32.mrb[26].mxu1  ;;  %v2081_v19 = vpop.f32.mrb[27].mxu0 }
 0x12a   :  { %v2121_v20 = vpop.f32.mrb[27].mxu1  ;;  %v1435_v21 = vadd.f32 %v2079_v15, %v1370_v22  ;;  %v2082_v6 = vadd.f32 %v2081_v19, %v2080_v17 }
 0x12b   :  { %v2122_v23 = vadd.f32 %v2121_v20, %v2120_v18 }
 0x12c   :  { %v1500_v25 = vadd.f32 %v2119_v16, %v1435_v21  ;;  %v1438_v26 = vadd.f32 %v2082_v6, %v2990_v24 }
 0x12e   :  { %v3000_v27 = vadd.f32 %v2122_v23, %v1438_v26  ;;  %v2083_v8 = vpop.f32.mrb[28].mxu0 }
 0x12f   :  { %v2123_v28 = vpop.f32.mrb[28].mxu1  ;;  %v2084_v29 = vpop.f32.mrb[29].mxu0 }
 0x130   :  { %v2085_v30 = vadd.f32 %v2084_v29, %v2083_v8  ;;  %v2124_v31 = vpop.f32.mrb[29].mxu1  ;;  %v2086_v32 = vpop.f32.mrb[30].mxu0 }
 0x131   :  { %v2125_v33 = vadd.f32 %v2124_v31, %v2123_v28  ;;  %v2126_v34 = vpop.f32.mrb[30].mxu1  ;;  %v2087_v35 = vpop.f32.mrb[31].mxu0 }
 0x132   :  { %v1443_v36 = vadd.f32 %v2085_v30, %v1378_v38  ;;  %v2088_v37 = vadd.f32 %v2087_v35, %v2086_v32  ;;  %v2127_v39 = vpop.f32.mrb[31].mxu1 }
 0x133   :  { %v2128_v22 = vadd.f32 %v2127_v39, %v2126_v34 }
 0x134   :  { %v1508_v41 = vadd.f32 %v2125_v33, %v1443_v36  ;;  %v1446_v43 = vadd.f32 %v2088_v37, %v2992_v40 }
 0x136   :  { %v3003_v44 = vadd.f32 %v2128_v22, %v1446_v43  ;;  %v2145_v24 = vpop.f32.mrb[32].mxu0 }
 0x137   :  { %v2185_v45 = vpop.f32.mrb[32].mxu1  ;;  %v2146_v46 = vpop.f32.mrb[33].mxu0 }
 0x138   :  { %v2147_v47 = vadd.f32 %v2146_v46, %v2145_v24  ;;  %v2186_v48 = vpop.f32.mrb[33].mxu1  ;;  %v2148_v49 = vpop.f32.mrb[34].mxu0 }
 0x139   :  { %v2187_v50 = vadd.f32 %v2186_v48, %v2185_v45  ;;  %v2188_v51 = vpop.f32.mrb[34].mxu1  ;;  %v2149_v52 = vpop.f32.mrb[35].mxu0 }
 0x13a   :  { %v1549_v53 = vadd.f32 %v2147_v47, %v1484_v55  ;;  %v2150_v57 = vadd.f32 %v2149_v52, %v2148_v49  ;;  %v2189_v38 = vpop.f32.mrb[35].mxu1 }
 0x13b   :  { %v2190_v58 = vadd.f32 %v2189_v38, %v2188_v51 }
 0x13c   :  { %v1614_v42 = vadd.f32 %v2187_v50, %v1549_v53  ;;  %v1552_v60 = vadd.f32 %v2150_v57, %v2994_v59 }
 0x13e   :  { %v3006_v61 = vadd.f32 %v2190_v58, %v1552_v60  ;;  %v2151_v40 = vpop.f32.mrb[36].mxu0 }
 0x13f   :  { %v2191_v62 = vpop.f32.mrb[36].mxu1  ;;  %v2152_v63 = vpop.f32.mrb[37].mxu0 }
 0x140   :  { %v2153_v0 = vadd.f32 %v2152_v63, %v2151_v40  ;;  %v2192_v1 = vpop.f32.mrb[37].mxu1  ;;  %v2154_v2 = vpop.f32.mrb[38].mxu0 }
 0x141   :  { %v2193_v3 = vadd.f32 %v2192_v1, %v2191_v62  ;;  %v2194_v4 = vpop.f32.mrb[38].mxu1  ;;  %v2155_v54 = vpop.f32.mrb[39].mxu0 }
 0x142   :  { %v1557_v5 = vadd.f32 %v2153_v0, %v1492_v9  ;;  %v2156_v7 = vadd.f32 %v2155_v54, %v2154_v2  ;;  %v2195_v55 = vpop.f32.mrb[39].mxu1 }
 0x143   :  { %v2196_v10 = vadd.f32 %v2195_v55, %v2194_v4 }
 0x144   :  { %v3008_v11 = vadd.f32 %v2193_v3, %v1557_v5  ;;  %v1560_v12 = vadd.f32 %v2156_v7, %v2997_v56 }
 0x146   :  { %v3011_v59 = vadd.f32 %v2196_v10, %v1560_v12  ;;  %v2157_v13 = vpop.f32.mrb[40].mxu0 }
 0x147   :  { %v2197_v14 = vpop.f32.mrb[40].mxu1  ;;  %v2158_v15 = vpop.f32.mrb[41].mxu0 }
 0x148   :  { %v2159_v16 = vadd.f32 %v2158_v15, %v2157_v13  ;;  %v2198_v17 = vpop.f32.mrb[41].mxu1  ;;  %v2160_v18 = vpop.f32.mrb[42].mxu0 }
 0x149   :  { %v2199_v19 = vadd.f32 %v2198_v17, %v2197_v14  ;;  %v2200_v20 = vpop.f32.mrb[42].mxu1  ;;  %v2161_v21 = vpop.f32.mrb[43].mxu0 }
 0x14a   :  { %v1565_v6 = vadd.f32 %v2159_v16, %v1500_v25  ;;  %v2162_v9 = vadd.f32 %v2161_v21, %v2160_v18  ;;  %v2201_v23 = vpop.f32.mrb[43].mxu1 }
 0x14b   :  { %v2202_v26 = vadd.f32 %v2201_v23, %v2200_v20 }
 0x14c   :  { %v1630_v8 = vadd.f32 %v2199_v19, %v1565_v6  ;;  %v1568_v28 = vadd.f32 %v2162_v9, %v3000_v27 }
 0x14e   :  { %v1633_v29 = vadd.f32 %v2202_v26, %v1568_v28  ;;  %v2163_v56 = vpop.f32.mrb[44].mxu0 }
 0x14f   :  { %v2203_v30 = vpop.f32.mrb[44].mxu1  ;;  %v2164_v31 = vpop.f32.mrb[45].mxu0 }
 0x150   :  { %v2165_v32 = vadd.f32 %v2164_v31, %v2163_v56  ;;  %v2204_v33 = vpop.f32.mrb[45].mxu1  ;;  %v2166_v34 = vpop.f32.mrb[46].mxu0 }
 0x151   :  { %v2205_v35 = vadd.f32 %v2204_v33, %v2203_v30  ;;  %v2206_v36 = vpop.f32.mrb[46].mxu1  ;;  %v2167_v37 = vpop.f32.mrb[47].mxu0 }
 0x152   :  { %v1573_v39 = vadd.f32 %v2165_v32, %v1508_v41  ;;  %v2168_v22 = vadd.f32 %v2167_v37, %v2166_v34  ;;  %v2207_v43 = vpop.f32.mrb[47].mxu1 }
 0x153   :  { %v2208_v25 = vadd.f32 %v2207_v43, %v2206_v36 }
 0x154   :  { %v1638_v24 = vadd.f32 %v2205_v35, %v1573_v39  ;;  %v1576_v45 = vadd.f32 %v2168_v22, %v3003_v44 }
 0x156   :  { %v1641_v46 = vadd.f32 %v2208_v25, %v1576_v45  ;;  %v2225_v47 = vpop.f32.mrb[48].mxu0 }
 0x157   :  { %v2237_v27 = vpop.f32.mrb[48].mxu1  ;;  %v2226_v48 = vpop.f32.mrb[49].mxu0 }
 0x158   :  { %v2227_v49 = vadd.f32 %v2226_v48, %v2225_v47  ;;  %v2238_v50 = vpop.f32.mrb[49].mxu1  ;;  %v2228_v51 = vpop.f32.mrb[50].mxu0 }
 0x159   :  { %v2239_v52 = vadd.f32 %v2238_v50, %v2237_v27  ;;  %v2240_v53 = vpop.f32.mrb[50].mxu1  ;;  %v2229_v57 = vpop.f32.mrb[51].mxu0 }
 0x15a   :  { %v1679_v38 = vadd.f32 %v2227_v49, %v1614_v42  ;;  %v2230_v58 = vadd.f32 %v2229_v57, %v2228_v51  ;;  %v2241_v60 = vpop.f32.mrb[51].mxu1 }
 0x15b   :  { %v1695_v41 = vadd.f32 %v2239_v52, %v1630_v8  ;;  %v2242_v40 = vadd.f32 %v2241_v60, %v2240_v53 }
 0x15c   :  { %v1682_v62 = vadd.f32 %v2230_v58, %v3006_v61  ;;  %v1709_v0 = vmax.f32 %v1679_v38, 0.0 }
 0x15d   :  { %v1698_v63 = vadd.f32 %v2242_v40, %v1633_v29  ;;  %v1713_v2 = vmax.f32 %v1695_v41, 0.0 }
 0x15e   :  { %v1710_v44 = vmax.f32 %v1682_v62, 0.0  ;;  %v2231_v1 = vpop.f32.mrb[52].mxu0 }
 0x15f   :  { %v1714_v3 = vmax.f32 %v1698_v63, 0.0  ;;  %v2243_v4 = vpop.f32.mrb[52].mxu1  ;;  %v2232_v54 = vpop.f32.mrb[53].mxu0 }
 0x160   :  { %v1949_v5 = vpack.c.bf16 %v1710_v44, %v1709_v0  ;;  %v2233_v7 = vadd.f32 %v2232_v54, %v2231_v1  ;;  %v2244_v55 = vpop.f32.mrb[53].mxu1  ;;  %v2234_v10 = vpop.f32.mrb[54].mxu0 }
 0x161   :  { %v1959_v12 = vpack.c.bf16 %v1714_v3, %v1713_v2  ;;  %v2245_v42 = vadd.f32 %v2244_v55, %v2243_v4  ;;  %v2246_v13 = vpop.f32.mrb[54].mxu1  ;;  %v2235_v14 = vpop.f32.mrb[55].mxu0 }
 0x162   :  { %1950 = vst [vmem:[%s3033_s3] sm:$0xff] %v1949_v5   ;;  %v1687_v61 = vadd.f32 %v2233_v7, %v3008_v11  ;;  %v2236_v15 = vadd.f32 %v2235_v14, %v2234_v10  ;;  %v2247_v16 = vpop.f32.mrb[55].mxu1 }
 0x163   :  { %1967 = vst [vmem:[%s3033_s3 + $0x10] sm:$0xff] %v1959_v12   ;;  %v1703_v17 = vadd.f32 %v2245_v42, %v1638_v24  ;;  %v2248_v18 = vadd.f32 %v2247_v16, %v2246_v13 }
 0x164   :  { %v1690_v19 = vadd.f32 %v2236_v15, %v3011_v59  ;;  %v1711_v21 = vmax.f32 %v1687_v61, 0.0 }
 0x165   :  { %v1706_v20 = vadd.f32 %v2248_v18, %v1641_v46  ;;  %v1715_v9 = vmax.f32 %v1703_v17, 0.0 }
 0x166   :  { %v1712_v6 = vmax.f32 %v1690_v19, 0.0 }
 0x167   :  { %v1716_v23 = vmax.f32 %v1706_v20, 0.0 }
 0x168   :  { %v1954_v26 = vpack.c.bf16 %v1712_v6, %v1711_v21 }
 0x169   :  { %v1964_v8 = vpack.c.bf16 %v1716_v23, %v1715_v9 }
 0x16a   :  { %1966 = vst [vmem:[%s3033_s3 + $0x8] sm:$0xff] %v1954_v26  }
 0x16b   :  { %1968 = vst [vmem:[%s3033_s3 + $0x18] sm:$0xff] %v1964_v8  }

// kernel: minkunet_forward.35
= control target key start
LH: loop header
LB: loop body
LE: loop exit
PB: predicated region body
PF: predicated region fallthrough
CT: control target
= control target key end

     0   :  { %s570_s1 = inlined_call_operand.vmem [shape: bf16[256,128], index: 1, kind: input, shape index: {}]   ;;  %s571_s0 = inlined_call_operand.vmem [shape: bf16[64,256], index: 0, kind: input, shape index: {}]   ;;  %s572_s2 = inlined_call_operand.vmem [shape: f32[1,128], index: 2, kind: input, shape index: {}]   ;;  %s573_s3 = inlined_call_operand.vmem [shape: bf16[64,128], index: 3, kind: output, shape index: {}]  }
   0x1   :  { %v435_v0 = vld [vmem:[%s570_s1 + $0x40] sm:$0xff]   ;;  %v437_v2 = vld [vmem:[%s570_s1 + $0x48] sm:$0xff]   ;;  %v439_v4 = vld [vmem:[%s570_s1 + $0x50] sm:$0xff]  }
   0x2   :  { %v436_v1 = vld [vmem:[%s570_s1] sm:$0xff]   ;;  %379 = vmatprep.subr.bf16.mxu0 %v435_v0  ;;  %419 = vmatprep.subr.bf16.mxu1 %v435_v0  ;;  %v438_v3 = vld [vmem:[%s570_s1 + $0x8] sm:$0xff]   ;;  %v440_v5 = vld [vmem:[%s570_s1 + $0x10] sm:$0xff]  }
   0x3   :  { %380 = vmatpush3.bf16.msra.mxu0 %v436_v1  ;;  %427 = vmatpush3.bf16.msra.mxu1 %v436_v1  ;;  %v441_v6 = vld [vmem:[%s570_s1 + $0x58] sm:$0xff]   ;;  %v443_v8 = vld [vmem:[%s570_s1 + $0x60] sm:$0xff]   ;;  %v445_v10 = vld [vmem:[%s570_s1 + $0x68] sm:$0xff]  }
   0x4   :  { %381 = vmatprep.subr.bf16.mxu0 %v437_v2  ;;  %420 = vmatprep.subr.bf16.mxu1 %v437_v2  ;;  %v442_v7 = vld [vmem:[%s570_s1 + $0x18] sm:$0xff]   ;;  %v444_v9 = vld [vmem:[%s570_s1 + $0x20] sm:$0xff]   ;;  %v446_v13 = vld [vmem:[%s570_s1 + $0x28] sm:$0xff]  }
   0x5   :  { %v453_v11 = vld [vmem:[%s571_s0 + $0x4] ss:$8 sps:$4 sm:$0xff]   ;;  %v447_v14 = vld [vmem:[%s570_s1 + $0x70] sm:$0xff]   ;;  %v449_v16 = vld [vmem:[%s570_s1 + $0x78] sm:$0xff]  }
   0x6   :  { %v456_v12 = vld [vmem:[%s571_s0 + $0x24] ss:$8 sps:$4 sm:$0xff]   ;;  %230 = vmatprep.mubr.bf16.mxu0 %v453_v11  ;;  %v448_v15 = vld [vmem:[%s570_s1 + $0x30] sm:$0xff]   ;;  %v450_v17 = vld [vmem:[%s570_s1 + $0x38] sm:$0xff]  }
   0x7   :  { %382 = vmatpush3.bf16.msra.mxu0 %v438_v3  ;;  %428 = vmatpush3.bf16.msra.mxu1 %v438_v3  ;;  %v451_v18 = vld [vmem:[%s571_s0] ss:$8 sps:$4 sm:$0xff]   ;;  %v457_v20 = vld [vmem:[%s571_s0 + $0x14] ss:$8 sps:$4 sm:$0xff]   ;;  %v461_v22 = vld [vmem:[%s571_s0 + $0x10] ss:$8 sps:$4 sm:$0xff]  }
   0x8   :  { %383 = vmatprep.subr.bf16.mxu0 %v439_v4  ;;  %421 = vmatprep.subr.bf16.mxu1 %v439_v4  ;;  %v454_v19 = vld [vmem:[%s571_s0 + $0x20] ss:$8 sps:$4 sm:$0xff]   ;;  %v459_v21 = vld [vmem:[%s571_s0 + $0x34] ss:$8 sps:$4 sm:$0xff]   ;;  %v462_v23 = vld [vmem:[%s571_s0 + $0x30] ss:$8 sps:$4 sm:$0xff]  }
   0x9   :  { %246 = vmatprep.mubr.bf16.mxu1 %v456_v12  ;;  %v315_v26 = vld [vmem:[%s572_s2] ss:$0 sm:$0xff] }
   0xb   :  { %384 = vmatpush3.bf16.msra.mxu0 %v440_v5  ;;  %429 = vmatpush3.bf16.msra.mxu1 %v440_v5 }
   0xc   :  { %385 = vmatprep.subr.bf16.mxu0 %v441_v6  ;;  %422 = vmatprep.subr.bf16.mxu1 %v441_v6 }
   0xf   :  { %386 = vmatpush3.bf16.msra.mxu0 %v442_v7  ;;  %430 = vmatpush3.bf16.msra.mxu1 %v442_v7 }
  0x10   :  { %387 = vmatprep.subr.bf16.mxu0 %v443_v8  ;;  %423 = vmatprep.subr.bf16.mxu1 %v443_v8 }
  0x13   :  { %388 = vmatpush3.bf16.msra.mxu0 %v444_v9  ;;  %431 = vmatpush3.bf16.msra.mxu1 %v444_v9 }
  0x14   :  { %389 = vmatprep.subr.bf16.mxu0 %v445_v10  ;;  %424 = vmatprep.subr.bf16.mxu1 %v445_v10 }
  0x17   :  { %390 = vmatpush3.bf16.msra.mxu0 %v446_v13  ;;  %432 = vmatpush3.bf16.msra.mxu1 %v446_v13 }
  0x18   :  { %391 = vmatprep.subr.bf16.mxu0 %v447_v14  ;;  %425 = vmatprep.subr.bf16.mxu1 %v447_v14 }
  0x1b   :  { %392 = vmatpush3.bf16.msra.mxu0 %v448_v15  ;;  %433 = vmatpush3.bf16.msra.mxu1 %v448_v15 }
  0x1c   :  { %393 = vmatprep.subr.bf16.mxu0 %v449_v16  ;;  %426 = vmatprep.subr.bf16.mxu1 %v449_v16 }
  0x1f   :  { %394 = vmatpush3.bf16.msra.mxu0 %v450_v17  ;;  %434 = vmatpush3.bf16.msra.mxu1 %v450_v17 }
  0x22   :  { %231 = vmatmul.mubr.bf16.vlgmr.msra.gmra.mrb[0].mxu0 %v451_v18  ;;  %247 = vmatmul.mubr.bf16.vlgmr.msra.gmra.mrb[0].mxu1 %v454_v19 }
  0x23   :  { %238 = vmatprep.mubr.bf16.mxu0 %v457_v20  ;;  %254 = vmatprep.mubr.bf16.mxu1 %v459_v21 }
  0x2a   :  { %239 = vmatmul.mubr.bf16.gmra.mrb[4].mxu0 %v461_v22  ;;  %255 = vmatmul.mubr.bf16.gmra.mrb[4].mxu1 %v462_v23 }
  0xf5   :  { %v395_v24 = vpop.f32.mrb[0].mxu0  ;;  %v407_v25 = vpop.f32.mrb[0].mxu1 }
  0xf6   :  { %v396_v27 = vpop.f32.mrb[1].mxu0  ;;  %v408_v28 = vpop.f32.mrb[1].mxu1 }
  0xf7   :  { %v397_v29 = vadd.f32 %v396_v27, %v395_v24  ;;  %v409_v30 = vadd.f32 %v408_v28, %v407_v25  ;;  %v398_v31 = vpop.f32.mrb[2].mxu0  ;;  %v410_v32 = vpop.f32.mrb[2].mxu1 }
  0xf8   :  { %v399_v33 = vpop.f32.mrb[3].mxu0  ;;  %v411_v34 = vpop.f32.mrb[3].mxu1 }
  0xf9   :  { %v233_v35 = vadd.f32 %v397_v29, %v315_v26  ;;  %v249_v36 = vadd.f32 %v409_v30, %v315_v26  ;;  %v400_v37 = vadd.f32 %v399_v33, %v398_v31  ;;  %v412_v38 = vadd.f32 %v411_v34, %v410_v32 }
  0xfb   :  { %v236_v39 = vadd.f32 %v400_v37, %v315_v26  ;;  %v252_v40 = vadd.f32 %v412_v38, %v315_v26  ;;  %v263_v41 = vmax.f32 %v233_v35, 0.0  ;;  %v267_v42 = vmax.f32 %v249_v36, 0.0 }
  0xfd   :  { %v264_v43 = vmax.f32 %v236_v39, 0.0  ;;  %v268_v44 = vmax.f32 %v252_v40, 0.0  ;;  %v401_v45 = vpop.f32.mrb[4].mxu0  ;;  %v413_v46 = vpop.f32.mrb[4].mxu1 }
  0xfe   :  { %v402_v47 = vpop.f32.mrb[5].mxu0  ;;  %v414_v48 = vpop.f32.mrb[5].mxu1 }
  0xff   :  { %v359_v49 = vpack.c.bf16 %v264_v43, %v263_v41  ;;  %v369_v50 = vpack.c.bf16 %v268_v44, %v267_v42  ;;  %v403_v51 = vadd.f32 %v402_v47, %v401_v45  ;;  %v415_v52 = vadd.f32 %v414_v48, %v413_v46  ;;  %v404_v53 = vpop.f32.mrb[6].mxu0  ;;  %v416_v54 = vpop.f32.mrb[6].mxu1 }
 0x100   :  { %v405_v55 = vpop.f32.mrb[7].mxu0  ;;  %v417_v56 = vpop.f32.mrb[7].mxu1 }
 0x101   :  { %360 = vst [vmem:[%s573_s3] sm:$0xff] %v359_v49   ;;  %377 = vst [vmem:[%s573_s3 + $0x10] sm:$0xff] %v369_v50   ;;  %v241_v57 = vadd.f32 %v403_v51, %v315_v26  ;;  %v257_v58 = vadd.f32 %v415_v52, %v315_v26  ;;  %v406_v59 = vadd.f32 %v405_v55, %v404_v53 }
 0x102   :  { %v418_v60 = vadd.f32 %v417_v56, %v416_v54 }
 0x103   :  { %v244_v61 = vadd.f32 %v406_v59, %v315_v26  ;;  %v265_v63 = vmax.f32 %v241_v57, 0.0  ;;  %v269_v0 = vmax.f32 %v257_v58, 0.0 }
 0x104   :  { %v260_v62 = vadd.f32 %v418_v60, %v315_v26 }
 0x105   :  { %v266_v1 = vmax.f32 %v244_v61, 0.0 }
 0x106   :  { %v270_v2 = vmax.f32 %v260_v62, 0.0 }
 0x107   :  { %v364_v3 = vpack.c.bf16 %v266_v1, %v265_v63 }
 0x108   :  { %v374_v4 = vpack.c.bf16 %v270_v2, %v269_v0 }
 0x109   :  { %376 = vst [vmem:[%s573_s3 + $0x8] sm:$0xff] %v364_v3  }
 0x10a   :  { %378 = vst [vmem:[%s573_s3 + $0x18] sm:$0xff] %v374_v4  }

// kernel: minkunet_forward.36
= control target key start
LH: loop header
LB: loop body
LE: loop exit
PB: predicated region body
PF: predicated region fallthrough
CT: control target
= control target key end

     0   :  { %s3245_s12 = smov 0   ;;  %s3813_s0 = inlined_call_operand.vmem [shape: bf16[512,896], index: 0, kind: input, shape index: {}]   ;;  %s3814_s1 = inlined_call_operand.vmem [shape: bf16[896,128], index: 1, kind: input, shape index: {}]   ;;  %s3815_s2 = inlined_call_operand.vmem [shape: f32[1,128], index: 2, kind: input, shape index: {}]   ;;  %s3816_s3 = inlined_call_operand.vmem [shape: bf16[512,128], index: 3, kind: output, shape index: {}]  }
   0x1 LB: > { %s2229_s13 = sadd.s32 4294967295, %s3223_s12   ;;  %p2233_p0 = scmp.ge.s32.totalorder %s3223_s12, 1  ;;  %s3223_s12 = sphi %s3245_s12, %s13_s12  }
   0x2   : > { %p139_p1 = scmp.lt.s32.totalorder %s3223_s12, 3 }
   0x4   : > { %p140_p2 = pnand %p2233_p0, %p139_p1 }
   0x5   : > { %v3001_v0 = vld [vmem:[%s3814_s1 + $0x40] sm:$0xff] (!%p140_p2)   ;;  %s2234_s16 = sshll.u32 (!%p140_p2), %s2229_s13, 5  ;;  %v3003_v2 = vld [vmem:[%s3814_s1 + $0x48] sm:$0xff] (!%p140_p2)   ;;  %v3005_v4 = vld [vmem:[%s3814_s1 + $0x50] sm:$0xff] (!%p140_p2)  }
   0x6   : > { %143 = sbr.rel (%p140_p2) target bundleno = 480 (0x1e0), region = 32  ;;  %v3002_v1 = vld [vmem:[%s3814_s1] sm:$0xff] (!%p140_p2)   ;;  %2568 = vmatprep.subr.bf16.mxu0 (!%p140_p2), %v3001_v0  ;;  %2976 = vmatprep.subr.bf16.mxu1 (!%p140_p2), %v3001_v0  ;;  %p165_p3 = scmp.lt.s32.totalorder (!%p140_p2), %s2234_s16, 63  ;;  %v3004_v3 = vld [vmem:[%s3814_s1 + $0x8] sm:$0xff] (!%p140_p2)   ;;  %v3006_v5 = vld [vmem:[%s3814_s1 + $0x10] sm:$0xff] (!%p140_p2)  }
   0x7   : > { %2569 = vmatpush3.bf16.msra.mxu0 (!%p140_p2), %v3002_v1  ;;  %2984 = vmatpush3.bf16.msra.mxu1 (!%p140_p2), %v3002_v1  ;;  %v3007_v6 = vld [vmem:[%s3814_s1 + $0x58] sm:$0xff] (!%p140_p2)   ;;  %v3009_v8 = vld [vmem:[%s3814_s1 + $0x60] sm:$0xff] (!%p140_p2)   ;;  %v3011_v10 = vld [vmem:[%s3814_s1 + $0x68] sm:$0xff] (!%p140_p2)  }
   0x8   : > { %2570 = vmatprep.subr.bf16.mxu0 (!%p140_p2), %v3003_v2  ;;  %2977 = vmatprep.subr.bf16.mxu1 (!%p140_p2), %v3003_v2  ;;  %v3008_v7 = vld [vmem:[%s3814_s1 + $0x18] sm:$0xff] (!%p140_p2)   ;;  %v3010_v9 = vld [vmem:[%s3814_s1 + $0x20] sm:$0xff] (!%p140_p2)   ;;  %v3012_v13 = vld [vmem:[%s3814_s1 + $0x28] sm:$0xff] (!%p140_p2)  }
   0x9   : > { %v3013_v14 = vld [vmem:[%s3814_s1 + $0x70] sm:$0xff] (!%p140_p2)   ;;  %v3015_v16 = vld [vmem:[%s3814_s1 + $0x78] sm:$0xff] (!%p140_p2)   ;;  %v3023_v18 = vld [vmem:[%s3814_s1 + $0xc0] sm:$0xff] (!%p140_p2)  }
   0xa   : > { %v3014_v15 = vld [vmem:[%s3814_s1 + $0x30] sm:$0xff] (!%p140_p2)   ;;  %v3016_v17 = vld [vmem:[%s3814_s1 + $0x38] sm:$0xff] (!%p140_p2)   ;;  %v3024_v21 = vld [vmem:[%s3814_s1 + $0x140] sm:$0xff] (!%p140_p2)  }
   0xb   : > { %2571 = vmatpush3.bf16.msra.mxu0 (!%p140_p2), %v3004_v3  ;;  %2985 = vmatpush3.bf16.msra.mxu1 (!%p140_p2), %v3004_v3  ;;  %v3025_v22 = vld [vmem:[%s3814_s1 + $0x80] sm:$0xff] (!%p140_p2)   ;;  %v3027_v24 = vld [vmem:[%s3814_s1 + $0xc8] sm:$0xff] (!%p140_p2)   ;;  %v3035_v32 = vld [vmem:[%s3814_s1 + $0xd0] sm:$0xff] (!%p140_p2)  }
   0xc   : > { %2572 = vmatprep.subr.bf16.mxu0 (!%p140_p2), %v3005_v4  ;;  %2978 = vmatprep.subr.bf16.mxu1 (!%p140_p2), %v3005_v4  ;;  %v3026_v23 = vld [vmem:[%s3814_s1 + $0x100] sm:$0xff] (!%p140_p2)   ;;  %v3038_v27 = vld [vmem:[%s3814_s1 + $0x148] sm:$0xff] (!%p140_p2)   ;;  %v3036_v33 = vld [vmem:[%s3814_s1 + $0x90] sm:$0xff] (!%p140_p2)  }
   0xd   : > { %s3818_s16 = smov (!%p165_p3, %s2234_s16), 63  ;;  %v3028_v28 = vld [vmem:[%s3814_s1 + $0x88] sm:$0xff]   ;;  %v3037_v34 = vld [vmem:[%s3814_s1 + $0xd8] sm:$0xff]   ;;  %v3047_v38 = vld [vmem:[%s3814_s1 + $0xe0] sm:$0xff]  }
   0xe   : > { %s2992_s29 = smul.u32 28, %s3818_s16  ;;  %v3040_v29 = vld [vmem:[%s3814_s1 + $0x108] sm:$0xff]   ;;  %v3039_v37 = vld [vmem:[%s3814_s1 + $0x98] sm:$0xff]   ;;  %v3058_v41 = vld [vmem:[%s3814_s1 + $0x150] sm:$0xff]   ;;  %s2237_s8 = sshll.u32 %s3818_s16, 2 }
   0xf   : > { %2573 = vmatpush3.bf16.msra.mxu0 %v3006_v5  ;;  %2986 = vmatpush3.bf16.msra.mxu1 %v3006_v5  ;;  %v3048_v42 = vld [vmem:[%s3814_s1 + $0xa0] sm:$0xff]   ;;  %v3049_v43 = vld [vmem:[%s3814_s1 + $0xe8] sm:$0xff]   ;;  %v3060_v44 = vld [vmem:[%s3814_s1 + $0x110] sm:$0xff]   ;;  %s3755_s13 = scalar_lea.vmem %s3816_s3, %s2237_s8 }
  0x10   : > { %2574 = vmatprep.subr.bf16.mxu0 %v3007_v6  ;;  %2979 = vmatprep.subr.bf16.mxu1 %v3007_v6  ;;  %s3286_s9 = scalar_lea.vmem %s3813_s0, %s2992_s29  ;;  %v3050_v47 = vld [vmem:[%s3814_s1 + $0xa8] sm:$0xff]   ;;  %v3057_v48 = vld [vmem:[%s3814_s1 + $0xf0] sm:$0xff]   ;;  %v3069_v51 = vld [vmem:[%s3814_s1 + $0x158] sm:$0xff]  }
  0x11   : > { %v3019_v11 = vld [vmem:[%s3286_s9 + $0x4] ss:$28 sps:$4 sm:$0xff]   ;;  %v3029_v25 = vld [vmem:[%s3286_s9 + $0x3c] ss:$28 sps:$4 sm:$0xff]   ;;  %v3041_v35 = vld [vmem:[%s3286_s9 + $0x74] ss:$28 sps:$4 sm:$0xff]  }
  0x12   : > { %v3022_v12 = vld [vmem:[%s3286_s9 + $0x2a4] ss:$28 sps:$4 sm:$0xff]   ;;  %1369 = vmatprep.mubr.bf16.mxu0 %v3019_v11  ;;  %v3031_v26 = vld [vmem:[%s3286_s9 + $0x2dc] ss:$28 sps:$4 sm:$0xff]   ;;  %v3043_v36 = vld [vmem:[%s3286_s9 + $0x314] ss:$28 sps:$4 sm:$0xff]  }
  0x13   : > { %2575 = vmatpush3.bf16.msra.mxu0 %v3008_v7  ;;  %2987 = vmatpush3.bf16.msra.mxu1 %v3008_v7  ;;  %v3017_v19 = vld [vmem:[%s3286_s9] ss:$28 sps:$4 sm:$0xff]   ;;  %v3033_v30 = vld [vmem:[%s3286_s9 + $0x38] ss:$28 sps:$4 sm:$0xff]   ;;  %v3045_v39 = vld [vmem:[%s3286_s9 + $0x70] ss:$28 sps:$4 sm:$0xff]  }
  0x14   : > { %2576 = vmatprep.subr.bf16.mxu0 %v3009_v8  ;;  %2980 = vmatprep.subr.bf16.mxu1 %v3009_v8  ;;  %v3020_v20 = vld [vmem:[%s3286_s9 + $0x2a0] ss:$28 sps:$4 sm:$0xff]   ;;  %v3034_v31 = vld [vmem:[%s3286_s9 + $0x2d8] ss:$28 sps:$4 sm:$0xff]   ;;  %v3046_v40 = vld [vmem:[%s3286_s9 + $0x310] ss:$28 sps:$4 sm:$0xff]  }
  0x15   : > { %1465 = vmatprep.mubr.bf16.mxu1 %v3022_v12  ;;  %v3051_v45 = vld [vmem:[%s3286_s9 + $0xac] ss:$28 sps:$4 sm:$0xff]   ;;  %v3059_v52 = vld [vmem:[%s3814_s1 + $0xb0] sm:$0xff]   ;;  %v3071_v53 = vld [vmem:[%s3814_s1 + $0x118] sm:$0xff]  }
  0x16   : > { %v3053_v46 = vld [vmem:[%s3286_s9 + $0x34c] ss:$28 sps:$4 sm:$0xff]   ;;  %v3063_v54 = vld [vmem:[%s3286_s9 + $0xe4] ss:$28 sps:$4 sm:$0xff]   ;;  %v3061_v55 = vld [vmem:[%s3814_s1 + $0xf8] sm:$0xff]  }
  0x17   : > { %2577 = vmatpush3.bf16.msra.mxu0 %v3010_v9  ;;  %2988 = vmatpush3.bf16.msra.mxu1 %v3010_v9  ;;  %v3055_v49 = vld [vmem:[%s3286_s9 + $0xa8] ss:$28 sps:$4 sm:$0xff]   ;;  %v3062_v57 = vld [vmem:[%s3814_s1 + $0xb8] sm:$0xff]   ;;  %v3078_v6 = vld [vmem:[%s3286_s9 + $0x154] ss:$28 sps:$4 sm:$0xff]  }
  0x18   : > { %2578 = vmatprep.subr.bf16.mxu0 %v3011_v10  ;;  %2981 = vmatprep.subr.bf16.mxu1 %v3011_v10  ;;  %v3056_v50 = vld [vmem:[%s3286_s9 + $0x348] ss:$28 sps:$4 sm:$0xff]   ;;  %v3068_v62 = vld [vmem:[%s3286_s9 + $0xe0] ss:$28 sps:$4 sm:$0xff]   ;;  %v3076_v4 = vld [vmem:[%s3286_s9 + $0x118] ss:$28 sps:$4 sm:$0xff]  }
  0x19   : > { %v3067_v56 = vld [vmem:[%s3286_s9 + $0xc] ss:$28 sps:$4 sm:$0xff]   ;;  %v3070_v58 = vld [vmem:[%s3814_s1 + $0x180] sm:$0xff]   ;;  %v3072_v63 = vld [vmem:[%s3286_s9 + $0x11c] ss:$28 sps:$4 sm:$0xff]  }
  0x1a   : > { %v3065_v59 = vld [vmem:[%s3286_s9 + $0x8] ss:$28 sps:$4 sm:$0xff]   ;;  %v3077_v5 = vld [vmem:[%s3286_s9 + $0x40] ss:$28 sps:$4 sm:$0xff]   ;;  %v3101_v7 = vld [vmem:[%s3814_s1 + $0x190] sm:$0xff]  }
  0x1b   : > { %2579 = vmatpush3.bf16.msra.mxu0 %v3012_v13  ;;  %2989 = vmatpush3.bf16.msra.mxu1 %v3012_v13  ;;  %v3084_v60 = vld [vmem:[%s3814_s1 + $0x160] sm:$0xff]   ;;  %v3086_v1 = vld [vmem:[%s3814_s1 + $0x188] sm:$0xff]   ;;  %v3080_v8 = vld [vmem:[%s3286_s9 + $0x7c] ss:$28 sps:$4 sm:$0xff]  }
  0x1c   : > { %2580 = vmatprep.subr.bf16.mxu0 %v3013_v14  ;;  %2982 = vmatprep.subr.bf16.mxu1 %v3013_v14  ;;  %v3085_v61 = vld [vmem:[%s3814_s1 + $0x120] sm:$0xff]   ;;  %v3093_v2 = vld [vmem:[%s3814_s1 + $0x168] sm:$0xff]   ;;  %v3108_v9 = vld [vmem:[%s3814_s1 + $0x170] sm:$0xff]  }
  0x1d   : > { %v3074_v0 = vld [vmem:[%s3286_s9 + $0x44] ss:$28 sps:$4 sm:$0xff]   ;;  %v3094_v3 = vld [vmem:[%s3814_s1 + $0x128] sm:$0xff]   ;;  %v3109_v10 = vld [vmem:[%s3814_s1 + $0x130] sm:$0xff]  }
  0x1e   : > { %v3082_v11 = vld [vmem:[%s3286_s9 + $0x150] ss:$28 sps:$4 sm:$0xff]   ;;  %v3083_v12 = vld [vmem:[%s3286_s9 + $0x78] ss:$28 sps:$4 sm:$0xff]  }
  0x1f   : > { %2581 = vmatpush3.bf16.msra.mxu0 %v3014_v15  ;;  %2990 = vmatpush3.bf16.msra.mxu1 %v3014_v15  ;;  %v3087_v13 = vld [vmem:[%s3286_s9 + $0x18c] ss:$28 sps:$4 sm:$0xff]   ;;  %v3089_v14 = vld [vmem:[%s3286_s9 + $0xb4] ss:$28 sps:$4 sm:$0xff]   ;;  %v3116_v15 = vld [vmem:[%s3814_s1 + $0x178] sm:$0xff]  }
  0x20   : > { %2582 = vmatprep.subr.bf16.mxu0 %v3015_v16  ;;  %2983 = vmatprep.subr.bf16.mxu1 %v3015_v16  ;;  %v3117_v16 = vld [vmem:[%s3814_s1 + $0x198] sm:$0xff]  }
  0x23   : > { %2583 = vmatpush3.bf16.msra.mxu0 %v3016_v17  ;;  %2991 = vmatpush3.bf16.msra.mxu1 %v3016_v17  ;;  %v3118_v17 = vld [vmem:[%s3814_s1 + $0x138] sm:$0xff]  }
  0x24   : > { %2680 = vmatprep.subr.bf16.mxu1 %v3023_v18  ;;  %2792 = vmatprep.subr.bf16.mxu0 %v3024_v21  ;;  %v3091_v18 = vld [vmem:[%s3286_s9 + $0x188] ss:$28 sps:$4 sm:$0xff]  }
  0x25   : > { %v3097_v21 = vld [vmem:[%s3286_s9 + $0xec] ss:$28 sps:$4 sm:$0xff]  }
  0x26   : > { %1370 = vmatmul.mubr.bf16.vlgmr.msra.gmra.mrb[0].mxu0 %v3017_v19  ;;  %1466 = vmatmul.mubr.bf16.vlgmr.msra.gmra.mrb[0].mxu1 %v3020_v20  ;;  %v3092_v19 = vld [vmem:[%s3286_s9 + $0xb0] ss:$28 sps:$4 sm:$0xff]   ;;  %v3095_v20 = vld [vmem:[%s3286_s9 + $0x1c4] ss:$28 sps:$4 sm:$0xff]  }
  0x27   : > { %2681 = vmatpush3.bf16.msra.mxu1 %v3025_v22  ;;  %2793 = vmatpush3.bf16.msra.mxu0 %v3026_v23  ;;  %v3131_v22 = vld [vmem:[%s3814_s1 + $0x1a0] sm:$0xff]  }
  0x28   : > { %2682 = vmatprep.subr.bf16.mxu1 %v3027_v24  ;;  %1377 = vmatprep.mubr.bf16.mxu0 %v3029_v25  ;;  %v3099_v23 = vld [vmem:[%s3286_s9 + $0x1c0] ss:$28 sps:$4 sm:$0xff]   ;;  %v3100_v24 = vld [vmem:[%s3286_s9 + $0xe8] ss:$28 sps:$4 sm:$0xff]  }
  0x29   : > { %1473 = vmatprep.mubr.bf16.mxu1 %v3031_v26  ;;  %2794 = vmatprep.subr.bf16.mxu0 %v3038_v27  ;;  %v3144_v25 = vld [vmem:[%s3814_s1 + $0x1a8] sm:$0xff]   ;;  %v3102_v26 = vld [vmem:[%s3286_s9 + $0x1fc] ss:$28 sps:$4 sm:$0xff]   ;;  %v3104_v27 = vld [vmem:[%s3286_s9 + $0x124] ss:$28 sps:$4 sm:$0xff]  }
  0x2b   : > { %2683 = vmatpush3.bf16.msra.mxu1 %v3028_v28  ;;  %2795 = vmatpush3.bf16.msra.mxu0 %v3040_v29  ;;  %v3157_v28 = vld [vmem:[%s3814_s1 + $0x1b0] sm:$0xff]  }
  0x2c   : > { %2684 = vmatprep.subr.bf16.mxu1 %v3035_v32  ;;  %2796 = vmatprep.subr.bf16.mxu0 %v3058_v41  ;;  %v3106_v29 = vld [vmem:[%s3286_s9 + $0x1f8] ss:$28 sps:$4 sm:$0xff]  }
  0x2d   : > { %v3112_v32 = vld [vmem:[%s3286_s9 + $0x15c] ss:$28 sps:$4 sm:$0xff]   ;;  %v3129_v41 = vld [vmem:[%s3286_s9 + $0x14] ss:$28 sps:$4 sm:$0xff]  }
  0x2e   : > { %1378 = vmatmul.mubr.bf16.gmra.mrb[4].mxu0 %v3033_v30  ;;  %1474 = vmatmul.mubr.bf16.gmra.mrb[4].mxu1 %v3034_v31  ;;  %v3107_v30 = vld [vmem:[%s3286_s9 + $0x120] ss:$28 sps:$4 sm:$0xff]   ;;  %v3110_v31 = vld [vmem:[%s3286_s9 + $0x234] ss:$28 sps:$4 sm:$0xff]  }
  0x2f   : > { %2685 = vmatpush3.bf16.msra.mxu1 %v3036_v33  ;;  %1385 = vmatprep.mubr.bf16.mxu0 %v3041_v35  ;;  %v3170_v33 = vld [vmem:[%s3814_s1 + $0x1b8] sm:$0xff]  }
  0x30   : > { %2686 = vmatprep.subr.bf16.mxu1 %v3037_v34  ;;  %1481 = vmatprep.mubr.bf16.mxu1 %v3043_v36  ;;  %v3114_v34 = vld [vmem:[%s3286_s9 + $0x230] ss:$28 sps:$4 sm:$0xff]   ;;  %v3115_v35 = vld [vmem:[%s3286_s9 + $0x158] ss:$28 sps:$4 sm:$0xff]  }
  0x31   : > { %2797 = vmatpush3.bf16.msra.mxu0 %v3060_v44  ;;  %v3119_v36 = vld [vmem:[%s3286_s9 + $0x26c] ss:$28 sps:$4 sm:$0xff]   ;;  %v3132_v44 = vld [vmem:[%s3286_s9 + $0x204] ss:$28 sps:$4 sm:$0xff]  }
  0x32   : > { %2798 = vmatprep.subr.bf16.mxu0 %v3069_v51  ;;  %v3143_v51 = vld [vmem:[%s3286_s9 + $0x80] ss:$28 sps:$4 sm:$0xff]  }
  0x33   : > { %2687 = vmatpush3.bf16.msra.mxu1 %v3039_v37  ;;  %v3121_v37 = vld [vmem:[%s3286_s9 + $0x194] ss:$28 sps:$4 sm:$0xff]  }
  0x34   : > { %2688 = vmatprep.subr.bf16.mxu1 %v3047_v38  ;;  %v3123_v38 = vld [vmem:[%s3286_s9 + $0x268] ss:$28 sps:$4 sm:$0xff]  }
  0x35   : > { %2799 = vmatpush3.bf16.msra.mxu0 %v3071_v53  ;;  %v3147_v53 = vld [vmem:[%s3286_s9 + $0xbc] ss:$28 sps:$4 sm:$0xff]  }
  0x36   : > { %1386 = vmatmul.mubr.bf16.gmra.mrb[8].mxu0 %v3045_v39  ;;  %1482 = vmatmul.mubr.bf16.gmra.mrb[8].mxu1 %v3046_v40  ;;  %v3124_v39 = vld [vmem:[%s3286_s9 + $0x190] ss:$28 sps:$4 sm:$0xff]  }
  0x37   : > { %2689 = vmatpush3.bf16.msra.mxu1 %v3048_v42  ;;  %1393 = vmatprep.mubr.bf16.mxu0 %v3051_v45  ;;  %v3125_v40 = vld [vmem:[%s3286_s9 + $0x1cc] ss:$28 sps:$4 sm:$0xff]  }
  0x38   : > { %2690 = vmatprep.subr.bf16.mxu1 %v3049_v43  ;;  %1489 = vmatprep.mubr.bf16.mxu1 %v3053_v46  ;;  %v3127_v42 = vld [vmem:[%s3286_s9 + $0x10] ss:$28 sps:$4 sm:$0xff]   ;;  %v3130_v43 = vld [vmem:[%s3286_s9 + $0x1c8] ss:$28 sps:$4 sm:$0xff]   ;;  %v3136_v46 = vld [vmem:[%s3286_s9 + $0x200] ss:$28 sps:$4 sm:$0xff]  }
  0x39   : > { %2800 = vmatprep.subr.bf16.mxu0 %v3084_v60  ;;  %v3134_v45 = vld [vmem:[%s3286_s9 + $0x4c] ss:$28 sps:$4 sm:$0xff]   ;;  %v3158_v60 = vld [vmem:[%s3286_s9 + $0x2e4] ss:$28 sps:$4 sm:$0xff]  }
  0x3a   : > { %2801 = vmatpush3.bf16.msra.mxu0 %v3085_v61  ;;  %v3160_v61 = vld [vmem:[%s3286_s9 + $0x12c] ss:$28 sps:$4 sm:$0xff]  }
  0x3b   : > { %2691 = vmatpush3.bf16.msra.mxu1 %v3050_v47  ;;  %2802 = vmatprep.subr.bf16.mxu0 %v3093_v2  ;;  %v3137_v47 = vld [vmem:[%s3286_s9 + $0x48] ss:$28 sps:$4 sm:$0xff]   ;;  %v3168_v2 = vld [vmem:[%s3286_s9 + $0x318] ss:$28 sps:$4 sm:$0xff]  }
  0x3c   : > { %2692 = vmatprep.subr.bf16.mxu1 %v3057_v48  ;;  %v3138_v48 = vld [vmem:[%s3286_s9 + $0x23c] ss:$28 sps:$4 sm:$0xff]  }
  0x3e   : > { %1394 = vmatmul.mubr.bf16.gmra.mrb[12].mxu0 %v3055_v49  ;;  %1490 = vmatmul.mubr.bf16.gmra.mrb[12].mxu1 %v3056_v50  ;;  %v3140_v49 = vld [vmem:[%s3286_s9 + $0x84] ss:$28 sps:$4 sm:$0xff]   ;;  %v3142_v50 = vld [vmem:[%s3286_s9 + $0x238] ss:$28 sps:$4 sm:$0xff]  }
  0x3f   : > { %2693 = vmatpush3.bf16.msra.mxu1 %v3059_v52  ;;  %1401 = vmatprep.mubr.bf16.mxu0 %v3063_v54  ;;  %v3145_v52 = vld [vmem:[%s3286_s9 + $0x274] ss:$28 sps:$4 sm:$0xff]  }
  0x40   : > { %2694 = vmatprep.subr.bf16.mxu1 %v3061_v55  ;;  %1530 = vmatprep.mubr.bf16.mxu1 %v3067_v56  ;;  %v3149_v54 = vld [vmem:[%s3286_s9 + $0x270] ss:$28 sps:$4 sm:$0xff]   ;;  %v3150_v55 = vld [vmem:[%s3286_s9 + $0xb8] ss:$28 sps:$4 sm:$0xff]  }
  0x41   : > { %2803 = vmatpush3.bf16.msra.mxu0 %v3094_v3  ;;  %v3151_v56 = vld [vmem:[%s3286_s9 + $0x2ac] ss:$28 sps:$4 sm:$0xff]   ;;  %v3169_v3 = vld [vmem:[%s3286_s9 + $0x160] ss:$28 sps:$4 sm:$0xff]  }
  0x42   : > { %2804 = vmatprep.subr.bf16.mxu0 %v3108_v9  ;;  %v3179_v9 = vld [vmem:[%s3286_s9 + $0x18] ss:$28 sps:$4 sm:$0xff]  }
  0x43   : > { %2695 = vmatpush3.bf16.msra.mxu1 %v3062_v57  ;;  %v3153_v57 = vld [vmem:[%s3286_s9 + $0xf4] ss:$28 sps:$4 sm:$0xff]  }
  0x44   : > { %2928 = vmatprep.subr.bf16.mxu1 %v3070_v58 }
  0x45   : > { %2805 = vmatpush3.bf16.msra.mxu0 %v3109_v10  ;;  %v3180_v10 = vld [vmem:[%s3286_s9 + $0x1d0] ss:$28 sps:$4 sm:$0xff]  }
  0x46   : > { %1402 = vmatmul.mubr.bf16.gmra.mrb[16].mxu0 %v3068_v62  ;;  %1531 = vmatmul.mubr.bf16.vlgmr.msra.gmra.mrb[16].mxu1 %v3065_v59  ;;  %v3156_v59 = vld [vmem:[%s3286_s9 + $0xf0] ss:$28 sps:$4 sm:$0xff]   ;;  %v3162_v62 = vld [vmem:[%s3286_s9 + $0x2e0] ss:$28 sps:$4 sm:$0xff]  }
  0x47   : > { %2929 = vmatpush3.bf16.msra.mxu1 %v3070_v58  ;;  %1409 = vmatprep.mubr.bf16.mxu0 %v3072_v63  ;;  %v3155_v58 = vld [vmem:[%s3286_s9 + $0x2a8] ss:$28 sps:$4 sm:$0xff]  }
  0x48   : > { %1538 = vmatprep.mubr.bf16.mxu1 %v3074_v0  ;;  %2930 = vmatprep.subr.bf16.mxu1 %v3086_v1  ;;  %v3163_v63 = vld [vmem:[%s3286_s9 + $0x128] ss:$28 sps:$4 sm:$0xff]   ;;  %v3164_v0 = vld [vmem:[%s3286_s9 + $0x31c] ss:$28 sps:$4 sm:$0xff]  }
  0x49   : > { %2806 = vmatprep.subr.bf16.mxu0 %v3116_v15  ;;  %v3186_v15 = vld [vmem:[%s3286_s9 + $0xc0] ss:$28 sps:$4 sm:$0xff]  }
  0x4a   : > { %2807 = vmatpush3.bf16.msra.mxu0 %v3118_v17  ;;  %v3189_v17 = vld [vmem:[%s3286_s9 + $0xf8] ss:$28 sps:$4 sm:$0xff]  }
  0x4b   : > { %2931 = vmatpush3.bf16.msra.mxu1 %v3086_v1  ;;  %v3166_v1 = vld [vmem:[%s3286_s9 + $0x164] ss:$28 sps:$4 sm:$0xff]  }
  0x4c   : > { %2932 = vmatprep.subr.bf16.mxu1 %v3101_v7 }
  0x4e   : > { %1410 = vmatmul.mubr.bf16.gmra.mrb[20].mxu0 %v3076_v4  ;;  %1539 = vmatmul.mubr.bf16.gmra.mrb[20].mxu1 %v3077_v5  ;;  %v3171_v4 = vld [vmem:[%s3286_s9 + $0x354] ss:$28 sps:$4 sm:$0xff]   ;;  %v3173_v5 = vld [vmem:[%s3286_s9 + $0x19c] ss:$28 sps:$4 sm:$0xff]  }
  0x4f   : > { %1417 = vmatprep.mubr.bf16.mxu0 %v3078_v6  ;;  %1546 = vmatprep.mubr.bf16.mxu1 %v3080_v8  ;;  %v3175_v6 = vld [vmem:[%s3286_s9 + $0x350] ss:$28 sps:$4 sm:$0xff]  }
  0x50   : > { %2933 = vmatpush3.bf16.msra.mxu1 %v3101_v7  ;;  %v3176_v7 = vld [vmem:[%s3286_s9 + $0x198] ss:$28 sps:$4 sm:$0xff]  }
  0x51   : > { %2934 = vmatprep.subr.bf16.mxu1 %v3117_v16  ;;  %v3177_v8 = vld [vmem:[%s3286_s9 + $0x1d4] ss:$28 sps:$4 sm:$0xff]  }
  0x54   : > { %2935 = vmatpush3.bf16.msra.mxu1 %v3117_v16  ;;  %v3187_v16 = vld [vmem:[%s3286_s9 + $0x244] ss:$28 sps:$4 sm:$0xff]  }
  0x55   : > { %2936 = vmatprep.subr.bf16.mxu1 %v3131_v22 }
  0x56   : > { %1418 = vmatmul.mubr.bf16.gmra.mrb[24].mxu0 %v3082_v11  ;;  %1547 = vmatmul.mubr.bf16.gmra.mrb[24].mxu1 %v3083_v12  ;;  %v3181_v11 = vld [vmem:[%s3286_s9 + $0x50] ss:$28 sps:$4 sm:$0xff]  }
  0x57   : > { %1425 = vmatprep.mubr.bf16.mxu0 %v3087_v13  ;;  %1554 = vmatprep.mubr.bf16.mxu1 %v3089_v14  ;;  %v3182_v12 = vld [vmem:[%s3286_s9 + $0x20c] ss:$28 sps:$4 sm:$0xff]  }
  0x58   : > { %2937 = vmatpush3.bf16.msra.mxu1 %v3131_v22  ;;  %v3184_v13 = vld [vmem:[%s3286_s9 + $0x88] ss:$28 sps:$4 sm:$0xff]   ;;  %v3195_v22 = vld [vmem:[%s3286_s9 + $0x278] ss:$28 sps:$4 sm:$0xff]  }
  0x59   : > { %2938 = vmatprep.subr.bf16.mxu1 %v3144_v25  ;;  %v3185_v14 = vld [vmem:[%s3286_s9 + $0x208] ss:$28 sps:$4 sm:$0xff]  }
  0x5c   : > { %2939 = vmatpush3.bf16.msra.mxu1 %v3144_v25  ;;  %v3199_v25 = vld [vmem:[%s3286_s9 + $0x1d8] ss:$28 sps:$4 sm:$0xff]  }
  0x5d   : > { %2940 = vmatprep.subr.bf16.mxu1 %v3157_v28 }
  0x5e   : > { %1426 = vmatmul.mubr.bf16.gmra.mrb[28].mxu0 %v3091_v18  ;;  %1555 = vmatmul.mubr.bf16.gmra.mrb[28].mxu1 %v3092_v19  ;;  %v3190_v18 = vld [vmem:[%s3286_s9 + $0x240] ss:$28 sps:$4 sm:$0xff]   ;;  %v3191_v19 = vld [vmem:[%s3286_s9 + $0x130] ss:$28 sps:$4 sm:$0xff]  }
  0x5f   : > { %1433 = vmatprep.mubr.bf16.mxu0 %v3095_v20  ;;  %1562 = vmatprep.mubr.bf16.mxu1 %v3097_v21  ;;  %v3192_v20 = vld [vmem:[%s3286_s9 + $0x27c] ss:$28 sps:$4 sm:$0xff]   ;;  %v3194_v21 = vld [vmem:[%s3286_s9 + $0x168] ss:$28 sps:$4 sm:$0xff]  }
  0x60   : > { %2941 = vmatpush3.bf16.msra.mxu1 %v3157_v28  ;;  %v3202_v28 = vld [vmem:[%s3286_s9 + $0x2ec] ss:$28 sps:$4 sm:$0xff]  }
  0x61   : > { %2942 = vmatprep.subr.bf16.mxu1 %v3170_v33 }
  0x64   : > { %2943 = vmatpush3.bf16.msra.mxu1 %v3170_v33  ;;  %v3209_v33 = vld [vmem:[%s3286_s9 + $0x2b8] ss:$28 sps:$4 sm:$0xff]  }
  0x66   : > { %1434 = vmatmul.mubr.bf16.gmra.mrb[32].mxu0 %v3099_v23  ;;  %1563 = vmatmul.mubr.bf16.gmra.mrb[32].mxu1 %v3100_v24  ;;  %v3196_v23 = vld [vmem:[%s3286_s9 + $0x1a0] ss:$28 sps:$4 sm:$0xff]   ;;  %v3197_v24 = vld [vmem:[%s3286_s9 + $0x2b4] ss:$28 sps:$4 sm:$0xff]  }
  0x67   : > { %1441 = vmatprep.mubr.bf16.mxu0 %v3102_v26  ;;  %1570 = vmatprep.mubr.bf16.mxu1 %v3104_v27  ;;  %v3200_v26 = vld [vmem:[%s3286_s9 + $0x2b0] ss:$28 sps:$4 sm:$0xff]  }
  0x68   : > { %v3201_v27 = vld [vmem:[%s3286_s9 + $0x210] ss:$28 sps:$4 sm:$0xff]  }
  0x6e   : > { %1442 = vmatmul.mubr.bf16.gmra.mrb[36].mxu0 %v3106_v29  ;;  %1571 = vmatmul.mubr.bf16.gmra.mrb[36].mxu1 %v3107_v30  ;;  %v3204_v29 = vld [vmem:[%s3286_s9 + $0x248] ss:$28 sps:$4 sm:$0xff]  }
  0x6f   : > { %1449 = vmatprep.mubr.bf16.mxu0 %v3110_v31  ;;  %1578 = vmatprep.mubr.bf16.mxu1 %v3112_v32  ;;  %v3205_v30 = vld [vmem:[%s3286_s9 + $0x2e8] ss:$28 sps:$4 sm:$0xff]   ;;  %v3206_v31 = vld [vmem:[%s3286_s9 + $0x280] ss:$28 sps:$4 sm:$0xff]  }
  0x70   : > { %v3207_v32 = vld [vmem:[%s3286_s9 + $0x324] ss:$28 sps:$4 sm:$0xff]  }
  0x76   : > { %1450 = vmatmul.mubr.bf16.gmra.mrb[40].mxu0 %v3114_v34  ;;  %1579 = vmatmul.mubr.bf16.gmra.mrb[40].mxu1 %v3115_v35  ;;  %v3210_v34 = vld [vmem:[%s3286_s9 + $0x320] ss:$28 sps:$4 sm:$0xff]   ;;  %v3211_v35 = vld [vmem:[%s3286_s9 + $0x2f0] ss:$28 sps:$4 sm:$0xff]  }
  0x77   : > { %1457 = vmatprep.mubr.bf16.mxu0 %v3119_v36  ;;  %1586 = vmatprep.mubr.bf16.mxu1 %v3121_v37  ;;  %v3212_v36 = vld [vmem:[%s3286_s9 + $0x35c] ss:$28 sps:$4 sm:$0xff]   ;;  %v3214_v37 = vld [vmem:[%s3286_s9 + $0x328] ss:$28 sps:$4 sm:$0xff]  }
  0x7e   : > { %1458 = vmatmul.mubr.bf16.gmra.mrb[44].mxu0 %v3123_v38  ;;  %1587 = vmatmul.mubr.bf16.gmra.mrb[44].mxu1 %v3124_v39 }
  0x7f   : > { %1594 = vmatprep.mubr.bf16.mxu1 %v3125_v40  ;;  %1691 = vmatprep.mubr.bf16.mxu0 %v3129_v41 }
  0x86   : > { %1595 = vmatmul.mubr.bf16.gmra.mrb[48].mxu1 %v3130_v43  ;;  %1692 = vmatmul.mubr.bf16.vlgmr.msra.gmra.mrb[48].mxu0 %v3127_v42  ;;  %v3215_v42 = vld [vmem:[%s3286_s9 + $0x358] ss:$28 sps:$4 sm:$0xff]   ;;  %v3216_v43 = vld [vmem:[%s3286_s9 + $0x360] ss:$28 sps:$4 sm:$0xff]  }
  0x87   : > { %1602 = vmatprep.mubr.bf16.mxu1 %v3132_v44  ;;  %1699 = vmatprep.mubr.bf16.mxu0 %v3134_v45 }
  0x8e   : > { %1603 = vmatmul.mubr.bf16.gmra.mrb[52].mxu1 %v3136_v46  ;;  %1700 = vmatmul.mubr.bf16.gmra.mrb[52].mxu0 %v3137_v47 }
  0x8f   : > { %1610 = vmatprep.mubr.bf16.mxu1 %v3138_v48  ;;  %1707 = vmatprep.mubr.bf16.mxu0 %v3140_v49 }
  0x96   : > { %1611 = vmatmul.mubr.bf16.gmra.mrb[56].mxu1 %v3142_v50  ;;  %1708 = vmatmul.mubr.bf16.gmra.mrb[56].mxu0 %v3143_v51 }
  0x97   : > { %1618 = vmatprep.mubr.bf16.mxu1 %v3145_v52  ;;  %1715 = vmatprep.mubr.bf16.mxu0 %v3147_v53 }
  0x9e   : > { %1619 = vmatmul.mubr.bf16.gmra.mrb[60].mxu1 %v3149_v54  ;;  %1716 = vmatmul.mubr.bf16.gmra.mrb[60].mxu0 %v3150_v55 }
  0x9f   : > { %1626 = vmatprep.mubr.bf16.mxu1 %v3151_v56  ;;  %1723 = vmatprep.mubr.bf16.mxu0 %v3153_v57 }
  0xa6   : > { %1627 = vmatmul.mubr.bf16.gmra.mrb[64].mxu1 %v3155_v58  ;;  %1724 = vmatmul.mubr.bf16.gmra.mrb[64].mxu0 %v3156_v59 }
  0xa7   : > { %1634 = vmatprep.mubr.bf16.mxu1 %v3158_v60  ;;  %1731 = vmatprep.mubr.bf16.mxu0 %v3160_v61 }
  0xae   : > { %1635 = vmatmul.mubr.bf16.gmra.mrb[68].mxu1 %v3162_v62  ;;  %1732 = vmatmul.mubr.bf16.gmra.mrb[68].mxu0 %v3163_v63 }
  0xaf   : > { %1642 = vmatprep.mubr.bf16.mxu1 %v3164_v0  ;;  %1739 = vmatprep.mubr.bf16.mxu0 %v3166_v1 }
  0xb6   : > { %1643 = vmatmul.mubr.bf16.gmra.mrb[72].mxu1 %v3168_v2  ;;  %1740 = vmatmul.mubr.bf16.gmra.mrb[72].mxu0 %v3169_v3 }
  0xb7   : > { %1650 = vmatprep.mubr.bf16.mxu1 %v3171_v4  ;;  %1747 = vmatprep.mubr.bf16.mxu0 %v3173_v5 }
  0xbe   : > { %1651 = vmatmul.mubr.bf16.gmra.mrb[76].mxu1 %v3175_v6  ;;  %1748 = vmatmul.mubr.bf16.gmra.mrb[76].mxu0 %v3176_v7 }
  0xbf   : > { %1755 = vmatprep.mubr.bf16.mxu0 %v3177_v8  ;;  %2944 = vmatprep.mubr.bf16.mxu1 %v3179_v9 }
  0xc6   : > { %1756 = vmatmul.mubr.bf16.gmra.mrb[80].mxu0 %v3180_v10  ;;  %2945 = vmatmul.mubr.bf16.vlgmr.msra.gmra.mrb[80].mxu1 %v3181_v11 }
  0xc7   : > { %1763 = vmatprep.mubr.bf16.mxu0 %v3182_v12  ;;  %2948 = vmatprep.mubr.bf16.mxu1 %v3184_v13 }
  0xce   : > { %1764 = vmatmul.mubr.bf16.gmra.mrb[84].mxu0 %v3185_v14  ;;  %2949 = vmatmul.mubr.bf16.gmra.mrb[84].mxu1 %v3186_v15 }
  0xcf   : > { %1771 = vmatprep.mubr.bf16.mxu0 %v3187_v16  ;;  %2952 = vmatprep.mubr.bf16.mxu1 %v3189_v17 }
  0xd6   : > { %1772 = vmatmul.mubr.bf16.gmra.mrb[88].mxu0 %v3190_v18  ;;  %2953 = vmatmul.mubr.bf16.gmra.mrb[88].mxu1 %v3191_v19 }
  0xd7   : > { %1779 = vmatprep.mubr.bf16.mxu0 %v3192_v20  ;;  %2956 = vmatprep.mubr.bf16.mxu1 %v3194_v21 }
  0xde   : > { %1780 = vmatmul.mubr.bf16.gmra.mrb[92].mxu0 %v3195_v22  ;;  %2957 = vmatmul.mubr.bf16.gmra.mrb[92].mxu1 %v3196_v23 }
  0xdf   : > { %1787 = vmatprep.mubr.bf16.mxu0 %v3197_v24  ;;  %2960 = vmatprep.mubr.bf16.mxu1 %v3199_v25  ;;  %v3560_v24 = vld [vmem:[%s3815_s2] ss:$0 sm:$0xff] }
  0xe6   : > { %1788 = vmatmul.mubr.bf16.gmra.mrb[96].mxu0 %v3200_v26  ;;  %2961 = vmatmul.mubr.bf16.gmra.mrb[96].mxu1 %v3201_v27 }
  0xe7   : > { %1795 = vmatprep.mubr.bf16.mxu0 %v3202_v28  ;;  %2964 = vmatprep.mubr.bf16.mxu1 %v3204_v29 }
  0xee   : > { %1796 = vmatmul.mubr.bf16.gmra.mrb[100].mxu0 %v3205_v30  ;;  %2965 = vmatmul.mubr.bf16.gmra.mrb[100].mxu1 %v3206_v31 }
  0xef   : > { %1803 = vmatprep.mubr.bf16.mxu0 %v3207_v32  ;;  %2968 = vmatprep.mubr.bf16.mxu1 %v3209_v33 }
  0xf6   : > { %1804 = vmatmul.mubr.bf16.gmra.mrb[104].mxu0 %v3210_v34  ;;  %2969 = vmatmul.mubr.bf16.gmra.mrb[104].mxu1 %v3211_v35 }
  0xf7   : > { %1811 = vmatprep.mubr.bf16.mxu0 %v3212_v36  ;;  %2972 = vmatprep.mubr.bf16.mxu1 %v3214_v37 }
  0xf9   : > { %v2584_v38 = vpop.f32.mrb[0].mxu0  ;;  %v2656_v39 = vpop.f32.mrb[0].mxu1 }
  0xfa   : > { %v2585_v40 = vpop.f32.mrb[1].mxu0  ;;  %v2657_v41 = vpop.f32.mrb[1].mxu1 }
  0xfb   : > { %v2586_v44 = vadd.f32 %v2585_v40, %v2584_v38  ;;  %v2587_v45 = vpop.f32.mrb[2].mxu0  ;;  %v3541_v46 = vadd.f32 %v2657_v41, %v2656_v39  ;;  %v2659_v47 = vpop.f32.mrb[2].mxu1 }
  0xfc   : > { %v2588_v48 = vpop.f32.mrb[3].mxu0  ;;  %v2660_v49 = vpop.f32.mrb[3].mxu1 }
  0xfd   : > { %v2589_v50 = vadd.f32 %v2588_v48, %v2587_v45  ;;  %v3543_v51 = vadd.f32 %v2660_v49, %v2659_v47  ;;  %v1372_v29 = vadd.f32 %v2586_v44, %v3560_v24 }
  0xfe   : > { %1812 = vmatmul.mubr.bf16.gmra.mrb[108].mxu0 %v3215_v42  ;;  %2973 = vmatmul.mubr.bf16.gmra.mrb[108].mxu1 %v3216_v43 }
  0xff   : > { %v1375_v36 = vadd.f32 %v2589_v50, %v3560_v24 }
 0x101   : > { %v2590_v52 = vpop.f32.mrb[4].mxu0  ;;  %v2662_v53 = vpop.f32.mrb[4].mxu1 }
 0x102   : > { %v2591_v54 = vpop.f32.mrb[5].mxu0  ;;  %v2663_v55 = vpop.f32.mrb[5].mxu1 }
 0x103   : > { %v2592_v56 = vadd.f32 %v2591_v54, %v2590_v52  ;;  %v2593_v57 = vpop.f32.mrb[6].mxu0  ;;  %v3545_v58 = vadd.f32 %v2663_v55, %v2662_v53  ;;  %v2665_v59 = vpop.f32.mrb[6].mxu1 }
 0x104   : > { %v2594_v60 = vpop.f32.mrb[7].mxu0  ;;  %v2666_v61 = vpop.f32.mrb[7].mxu1 }
 0x105   : > { %v2595_v62 = vadd.f32 %v2594_v60, %v2593_v57  ;;  %v3547_v63 = vadd.f32 %v2666_v61, %v2665_v59  ;;  %v1380_v44 = vadd.f32 %v2592_v56, %v3560_v24 }
 0x107   : > { %v1383_v50 = vadd.f32 %v2595_v62, %v3560_v24 }
 0x109   : > { %v2596_v0 = vpop.f32.mrb[8].mxu0  ;;  %v2668_v1 = vpop.f32.mrb[8].mxu1 }
 0x10a   : > { %v2597_v2 = vpop.f32.mrb[9].mxu0  ;;  %v2669_v3 = vpop.f32.mrb[9].mxu1 }
 0x10b   : > { %v2598_v4 = vadd.f32 %v2597_v2, %v2596_v0  ;;  %v2599_v5 = vpop.f32.mrb[10].mxu0  ;;  %v3549_v6 = vadd.f32 %v2669_v3, %v2668_v1  ;;  %v2671_v7 = vpop.f32.mrb[10].mxu1 }
 0x10c   : > { %v2600_v8 = vpop.f32.mrb[11].mxu0  ;;  %v2672_v9 = vpop.f32.mrb[11].mxu1 }
 0x10d   : > { %v2601_v10 = vadd.f32 %v2600_v8, %v2599_v5  ;;  %v3551_v11 = vadd.f32 %v2672_v9, %v2671_v7  ;;  %v1388_v56 = vadd.f32 %v2598_v4, %v3560_v24 }
 0x10f   : > { %v1391_v62 = vadd.f32 %v2601_v10, %v3560_v24 }
 0x111   : > { %v2602_v12 = vpop.f32.mrb[12].mxu0  ;;  %v2674_v13 = vpop.f32.mrb[12].mxu1 }
 0x112   : > { %v2603_v14 = vpop.f32.mrb[13].mxu0  ;;  %v2675_v15 = vpop.f32.mrb[13].mxu1 }
 0x113   : > { %v2604_v16 = vadd.f32 %v2603_v14, %v2602_v12  ;;  %v2605_v17 = vpop.f32.mrb[14].mxu0  ;;  %v3553_v18 = vadd.f32 %v2675_v15, %v2674_v13  ;;  %v2677_v19 = vpop.f32.mrb[14].mxu1 }
 0x114   : > { %v2606_v20 = vpop.f32.mrb[15].mxu0  ;;  %v2678_v21 = vpop.f32.mrb[15].mxu1 }
 0x115   : > { %v2607_v22 = vadd.f32 %v2606_v20, %v2605_v17  ;;  %v3555_v23 = vadd.f32 %v2678_v21, %v2677_v19  ;;  %v1396_v4 = vadd.f32 %v2604_v16, %v3560_v24 }
 0x117   : > { %v1399_v10 = vadd.f32 %v2607_v22, %v3560_v24 }
 0x119   : > { %v2608_v25 = vpop.f32.mrb[16].mxu0  ;;  %v2696_v26 = vpop.f32.mrb[16].mxu1 }
 0x11a   : > { %v2609_v27 = vpop.f32.mrb[17].mxu0  ;;  %v2697_v28 = vpop.f32.mrb[17].mxu1 }
 0x11b   : > { %v3563_v30 = vadd.f32 %v2609_v27, %v2608_v25  ;;  %v2698_v31 = vadd.f32 %v2697_v28, %v2696_v26  ;;  %v2611_v32 = vpop.f32.mrb[18].mxu0  ;;  %v2699_v33 = vpop.f32.mrb[18].mxu1 }
 0x11c   : > { %v2612_v34 = vpop.f32.mrb[19].mxu0  ;;  %v2700_v35 = vpop.f32.mrb[19].mxu1 }
 0x11d   : > { %v3566_v37 = vadd.f32 %v2698_v31, %v1372_v29  ;;  %v2613_v38 = vadd.f32 %v2612_v34, %v2611_v32  ;;  %v2701_v39 = vadd.f32 %v2700_v35, %v2699_v33  ;;  %v1404_v16 = vadd.f32 %v3563_v30, %v3560_v24 }
 0x11f   : > { %v3568_v40 = vadd.f32 %v2701_v39, %v1375_v36 }
 0x121   : > { %v2614_v41 = vpop.f32.mrb[20].mxu0  ;;  %v2702_v42 = vpop.f32.mrb[20].mxu1 }
 0x122   : > { %v2615_v43 = vpop.f32.mrb[21].mxu0  ;;  %v2703_v45 = vpop.f32.mrb[21].mxu1 }
 0x123   : > { %v3571_v47 = vadd.f32 %v2615_v43, %v2614_v41  ;;  %v2704_v48 = vadd.f32 %v2703_v45, %v2702_v42  ;;  %v2617_v49 = vpop.f32.mrb[22].mxu0  ;;  %v2705_v52 = vpop.f32.mrb[22].mxu1 }
 0x124   : > { %v2618_v53 = vpop.f32.mrb[23].mxu0  ;;  %v2706_v54 = vpop.f32.mrb[23].mxu1 }
 0x125   : > { %v3574_v55 = vadd.f32 %v2704_v48, %v1380_v44  ;;  %v2619_v57 = vadd.f32 %v2618_v53, %v2617_v49  ;;  %v2707_v59 = vadd.f32 %v2706_v54, %v2705_v52  ;;  %v1407_v53 = vadd.f32 %v2613_v38, %v3560_v24 }
 0x126   : > { %v1412_v30 = vadd.f32 %v3571_v47, %v3560_v24 }
 0x127   : > { %v3576_v60 = vadd.f32 %v2707_v59, %v1383_v50 }
 0x129   : > { %v2620_v61 = vpop.f32.mrb[24].mxu0  ;;  %v2708_v0 = vpop.f32.mrb[24].mxu1 }
 0x12a   : > { %v2621_v1 = vpop.f32.mrb[25].mxu0  ;;  %v2709_v2 = vpop.f32.mrb[25].mxu1 }
 0x12b   : > { %v3579_v3 = vadd.f32 %v2621_v1, %v2620_v61  ;;  %v2710_v5 = vadd.f32 %v2709_v2, %v2708_v0  ;;  %v2623_v7 = vpop.f32.mrb[26].mxu0  ;;  %v2711_v8 = vpop.f32.mrb[26].mxu1 }
 0x12c   : > { %v2624_v9 = vpop.f32.mrb[27].mxu0  ;;  %v2712_v12 = vpop.f32.mrb[27].mxu1 }
 0x12d   : > { %v3582_v13 = vadd.f32 %v2710_v5, %v1388_v56  ;;  %v2625_v14 = vadd.f32 %v2624_v9, %v2623_v7  ;;  %v2713_v15 = vadd.f32 %v2712_v12, %v2711_v8  ;;  %v1420_v47 = vadd.f32 %v3579_v3, %v3560_v24 }
 0x12f   : > { %v3584_v17 = vadd.f32 %v2713_v15, %v1391_v62  ;;  %v1415_v62 = vadd.f32 %v2619_v57, %v3560_v24 }
 0x131   : > { %v2626_v19 = vpop.f32.mrb[28].mxu0  ;;  %v2714_v20 = vpop.f32.mrb[28].mxu1 }
 0x132   : > { %v2627_v21 = vpop.f32.mrb[29].mxu0  ;;  %v2715_v25 = vpop.f32.mrb[29].mxu1 }
 0x133   : > { %v3587_v26 = vadd.f32 %v2627_v21, %v2626_v19  ;;  %v2716_v27 = vadd.f32 %v2715_v25, %v2714_v20  ;;  %v2629_v28 = vpop.f32.mrb[30].mxu0  ;;  %v2717_v29 = vpop.f32.mrb[30].mxu1 }
 0x134   : > { %v2630_v31 = vpop.f32.mrb[31].mxu0  ;;  %v2718_v32 = vpop.f32.mrb[31].mxu1 }
 0x135   : > { %v3590_v33 = vadd.f32 %v2716_v27, %v1396_v4  ;;  %v2631_v34 = vadd.f32 %v2630_v31, %v2629_v28  ;;  %v2719_v35 = vadd.f32 %v2718_v32, %v2717_v29 }
 0x137   : > { %v3592_v36 = vadd.f32 %v2719_v35, %v1399_v10 }
 0x139   : > { %v2632_v39 = vpop.f32.mrb[32].mxu0  ;;  %v2720_v41 = vpop.f32.mrb[32].mxu1 }
 0x13a   : > { %v2633_v42 = vpop.f32.mrb[33].mxu0  ;;  %v2721_v43 = vpop.f32.mrb[33].mxu1 }
 0x13b   : > { %v3596_v45 = vadd.f32 %v2633_v42, %v2632_v39  ;;  %v2722_v44 = vadd.f32 %v2721_v43, %v2720_v41  ;;  %v2635_v48 = vpop.f32.mrb[34].mxu0  ;;  %v2723_v49 = vpop.f32.mrb[34].mxu1  ;;  %v1423_v39 = vadd.f32 %v2625_v14, %v3560_v24 }
 0x13c   : > { %v2636_v52 = vpop.f32.mrb[35].mxu0  ;;  %v2724_v22 = vpop.f32.mrb[35].mxu1 }
 0x13d   : > { %v3599_v54 = vadd.f32 %v2722_v44, %v1404_v16  ;;  %v2637_v50 = vadd.f32 %v2636_v52, %v2635_v48  ;;  %v2725_v59 = vadd.f32 %v2724_v22, %v2723_v49  ;;  %v1428_v52 = vadd.f32 %v3587_v26, %v3560_v24 }
 0x13f   : > { %v3601_v61 = vadd.f32 %v2725_v59, %v1407_v53 }
 0x141   : > { %v2638_v0 = vpop.f32.mrb[36].mxu0  ;;  %v2726_v1 = vpop.f32.mrb[36].mxu1 }
 0x142   : > { %v2639_v2 = vpop.f32.mrb[37].mxu0  ;;  %v2727_v56 = vpop.f32.mrb[37].mxu1 }
 0x143   : > { %v3605_v5 = vadd.f32 %v2639_v2, %v2638_v0  ;;  %v2728_v7 = vadd.f32 %v2727_v56, %v2726_v1  ;;  %v2641_v8 = vpop.f32.mrb[38].mxu0  ;;  %v2729_v9 = vpop.f32.mrb[38].mxu1  ;;  %v1431_v2 = vadd.f32 %v2631_v34, %v3560_v24  ;;  %v1439_v34 = vadd.f32 %v2637_v50, %v3560_v24 }
 0x144   : > { %v2642_v12 = vpop.f32.mrb[39].mxu0  ;;  %v2730_v38 = vpop.f32.mrb[39].mxu1 }
 0x145   : > { %v3608_v15 = vadd.f32 %v2728_v7, %v1412_v30  ;;  %v2643_v19 = vadd.f32 %v2642_v12, %v2641_v8  ;;  %v2731_v20 = vadd.f32 %v2730_v38, %v2729_v9  ;;  %v1444_v50 = vadd.f32 %v3605_v5, %v3560_v24 }
 0x147   : > { %v3610_v21 = vadd.f32 %v2731_v20, %v1415_v62  ;;  %v1436_v62 = vadd.f32 %v3596_v45, %v3560_v24 }
 0x149   : > { %v2644_v25 = vpop.f32.mrb[40].mxu0  ;;  %v2732_v4 = vpop.f32.mrb[40].mxu1 }
 0x14a   : > { %v2645_v27 = vpop.f32.mrb[41].mxu0  ;;  %v2733_v28 = vpop.f32.mrb[41].mxu1 }
 0x14b   : > { %v3614_v29 = vadd.f32 %v2645_v27, %v2644_v25  ;;  %v2734_v31 = vadd.f32 %v2733_v28, %v2732_v4  ;;  %v2647_v32 = vpop.f32.mrb[42].mxu0  ;;  %v2735_v10 = vpop.f32.mrb[42].mxu1 }
 0x14c   : > { %v2648_v35 = vpop.f32.mrb[43].mxu0  ;;  %v2736_v57 = vpop.f32.mrb[43].mxu1 }
 0x14d   : > { %v3617_v41 = vadd.f32 %v2734_v31, %v1420_v47  ;;  %v3619_v42 = vadd.f32 %v2648_v35, %v2647_v32  ;;  %v2737_v43 = vadd.f32 %v2736_v57, %v2735_v10 }
 0x14f   : > { %v3621_v16 = vadd.f32 %v2737_v43, %v1423_v39 }
 0x151   : > { %v2650_v44 = vpop.f32.mrb[44].mxu0  ;;  %v2738_v48 = vpop.f32.mrb[44].mxu1 }
 0x152   : > { %v2651_v49 = vpop.f32.mrb[45].mxu0  ;;  %v2739_v3 = vpop.f32.mrb[45].mxu1 }
 0x153   : > { %v3625_v22 = vadd.f32 %v2651_v49, %v2650_v44  ;;  %v2740_v53 = vadd.f32 %v2739_v3, %v2738_v48  ;;  %v2653_v59 = vpop.f32.mrb[46].mxu0  ;;  %v2741_v0 = vpop.f32.mrb[46].mxu1 }
 0x154   : > { %v2654_v14 = vpop.f32.mrb[47].mxu0  ;;  %v2742_v1 = vpop.f32.mrb[47].mxu1 }
 0x155   : > { %v3628_v56 = vadd.f32 %v2740_v53, %v1428_v52  ;;  %v3630_v30 = vadd.f32 %v2654_v14, %v2653_v59  ;;  %v2743_v7 = vadd.f32 %v2742_v1, %v2741_v0  ;;  %v1447_v59 = vadd.f32 %v2643_v19, %v3560_v24 }
 0x156   : > { %v1452_v19 = vadd.f32 %v3614_v29, %v3560_v24 }
 0x157   : > { %v3632_v8 = vadd.f32 %v2743_v7, %v1431_v2 }
 0x159   : > { %v2744_v9 = vpop.f32.mrb[48].mxu1  ;;  %v2808_v12 = vpop.f32.mrb[48].mxu0 }
 0x15a   : > { %v2745_v38 = vpop.f32.mrb[49].mxu1  ;;  %v2809_v26 = vpop.f32.mrb[49].mxu0 }
 0x15b   : > { %v2746_v20 = vadd.f32 %v2745_v38, %v2744_v9  ;;  %v2810_v25 = vadd.f32 %v2809_v26, %v2808_v12  ;;  %v2747_v4 = vpop.f32.mrb[50].mxu1  ;;  %v2811_v27 = vpop.f32.mrb[50].mxu0 }
 0x15c   : > { %v2748_v28 = vpop.f32.mrb[51].mxu1  ;;  %v2812_v47 = vpop.f32.mrb[51].mxu0 }
 0x15d   : > { %v3637_v31 = vadd.f32 %v2746_v20, %v1436_v62  ;;  %v2749_v32 = vadd.f32 %v2748_v28, %v2747_v4  ;;  %v2813_v10 = vadd.f32 %v2812_v47, %v2811_v27  ;;  %v3640_v35 = vadd.f32 %v2810_v25, %v3566_v37 }
 0x15f   : > { %v3642_v57 = vadd.f32 %v2749_v32, %v1439_v34  ;;  %v3645_v39 = vadd.f32 %v2813_v10, %v3568_v40 }
 0x161   : > { %v2750_v45 = vpop.f32.mrb[52].mxu1  ;;  %v2814_v43 = vpop.f32.mrb[52].mxu0 }
 0x162   : > { %v2751_v44 = vpop.f32.mrb[53].mxu1  ;;  %v2815_v48 = vpop.f32.mrb[53].mxu0 }
 0x163   : > { %v2752_v49 = vadd.f32 %v2751_v44, %v2750_v45  ;;  %v2816_v3 = vadd.f32 %v2815_v48, %v2814_v43  ;;  %v2753_v52 = vpop.f32.mrb[54].mxu1  ;;  %v2817_v53 = vpop.f32.mrb[54].mxu0 }
 0x164   : > { %v2754_v37 = vpop.f32.mrb[55].mxu1  ;;  %v2818_v0 = vpop.f32.mrb[55].mxu0 }
 0x165   : > { %v3650_v14 = vadd.f32 %v2752_v49, %v1444_v50  ;;  %v2755_v1 = vadd.f32 %v2754_v37, %v2753_v52  ;;  %v2819_v40 = vadd.f32 %v2818_v0, %v2817_v53  ;;  %v3653_v2 = vadd.f32 %v2816_v3, %v3574_v55 }
 0x166   : > { %v1455_v55 = vadd.f32 %v3619_v42, %v3560_v24  ;;  %v1460_v42 = vadd.f32 %v3625_v22, %v3560_v24 }
 0x167   : > { %v3655_v7 = vadd.f32 %v2755_v1, %v1447_v59  ;;  %v3658_v9 = vadd.f32 %v2819_v40, %v3576_v60 }
 0x169   : > { %v2756_v5 = vpop.f32.mrb[56].mxu1  ;;  %v2820_v12 = vpop.f32.mrb[56].mxu0 }
 0x16a   : > { %v2757_v38 = vpop.f32.mrb[57].mxu1  ;;  %v2821_v26 = vpop.f32.mrb[57].mxu0 }
 0x16b   : > { %v2758_v62 = vadd.f32 %v2757_v38, %v2756_v5  ;;  %v2822_v20 = vadd.f32 %v2821_v26, %v2820_v12  ;;  %v2759_v25 = vpop.f32.mrb[58].mxu1  ;;  %v2823_v4 = vpop.f32.mrb[58].mxu0 }
 0x16c   : > { %v2760_v27 = vpop.f32.mrb[59].mxu1  ;;  %v2824_v34 = vpop.f32.mrb[59].mxu0 }
 0x16d   : > { %v3664_v28 = vadd.f32 %v2758_v62, %v1452_v19  ;;  %v2761_v60 = vadd.f32 %v2760_v27, %v2759_v25  ;;  %v2825_v47 = vadd.f32 %v2824_v34, %v2823_v4  ;;  %v3667_v32 = vadd.f32 %v2822_v20, %v3582_v13 }
 0x16e   : > { %v1463_v13 = vadd.f32 %v3630_v30, %v3560_v24  ;;  %v1468_v30 = vadd.f32 %v3541_v46, %v3560_v24 }
 0x16f   : > { %v3669_v10 = vadd.f32 %v2761_v60, %v1455_v55  ;;  %v3672_v29 = vadd.f32 %v2825_v47, %v3584_v17 }
 0x171   : > { %v2762_v45 = vpop.f32.mrb[60].mxu1  ;;  %v2826_v43 = vpop.f32.mrb[60].mxu0 }
 0x172   : > { %v2763_v44 = vpop.f32.mrb[61].mxu1  ;;  %v2827_v48 = vpop.f32.mrb[61].mxu0 }
 0x173   : > { %v2764_v50 = vadd.f32 %v2763_v44, %v2762_v45  ;;  %v2828_v49 = vadd.f32 %v2827_v48, %v2826_v43  ;;  %v2765_v3 = vpop.f32.mrb[62].mxu1  ;;  %v2829_v52 = vpop.f32.mrb[62].mxu0 }
 0x174   : > { %v2766_v53 = vpop.f32.mrb[63].mxu1  ;;  %v2830_v59 = vpop.f32.mrb[63].mxu0 }
 0x175   : > { %v3678_v37 = vadd.f32 %v2764_v50, %v1460_v42  ;;  %v2767_v17 = vadd.f32 %v2766_v53, %v2765_v3  ;;  %v2831_v0 = vadd.f32 %v2830_v59, %v2829_v52  ;;  %v3681_v1 = vadd.f32 %v2828_v49, %v3590_v33 }
 0x176   : > { %v1471_v33 = vadd.f32 %v3543_v51, %v3560_v24  ;;  %v1476_v51 = vadd.f32 %v3545_v58, %v3560_v24 }
 0x177   : > { %v3683_v40 = vadd.f32 %v2767_v17, %v1463_v13  ;;  %v3686_v22 = vadd.f32 %v2831_v0, %v3592_v36 }
 0x179   : > { %v2768_v5 = vpop.f32.mrb[64].mxu1  ;;  %v2832_v12 = vpop.f32.mrb[64].mxu0 }
 0x17a   : > { %v2769_v38 = vpop.f32.mrb[65].mxu1  ;;  %v2833_v26 = vpop.f32.mrb[65].mxu0 }
 0x17b   : > { %v2770_v19 = vadd.f32 %v2769_v38, %v2768_v5  ;;  %v2834_v62 = vadd.f32 %v2833_v26, %v2832_v12  ;;  %v2771_v20 = vpop.f32.mrb[66].mxu1  ;;  %v2835_v25 = vpop.f32.mrb[66].mxu0 }
 0x17c   : > { %v2772_v4 = vpop.f32.mrb[67].mxu1  ;;  %v2836_v55 = vpop.f32.mrb[67].mxu0 }
 0x17d   : > { %v3692_v27 = vadd.f32 %v2770_v19, %v1468_v30  ;;  %v2773_v36 = vadd.f32 %v2772_v4, %v2771_v20  ;;  %v2837_v34 = vadd.f32 %v2836_v55, %v2835_v25  ;;  %v3695_v60 = vadd.f32 %v2834_v62, %v3599_v54 }
 0x17e   : > { %v1479_v54 = vadd.f32 %v3547_v63, %v3560_v24  ;;  %v1484_v63 = vadd.f32 %v3549_v6, %v3560_v24 }
 0x17f   : > { %v3697_v47 = vadd.f32 %v2773_v36, %v1471_v33  ;;  %v3700_v46 = vadd.f32 %v2837_v34, %v3601_v61 }
 0x181   : > { %v2774_v45 = vpop.f32.mrb[68].mxu1  ;;  %v2838_v43 = vpop.f32.mrb[68].mxu0 }
 0x182   : > { %v2775_v44 = vpop.f32.mrb[69].mxu1  ;;  %v2839_v48 = vpop.f32.mrb[69].mxu0 }
 0x183   : > { %v2776_v42 = vadd.f32 %v2775_v44, %v2774_v45  ;;  %v2840_v50 = vadd.f32 %v2839_v48, %v2838_v43  ;;  %v2777_v49 = vpop.f32.mrb[70].mxu1  ;;  %v2841_v3 = vpop.f32.mrb[70].mxu0 }
 0x184   : > { %v2778_v52 = vpop.f32.mrb[71].mxu1  ;;  %v2842_v13 = vpop.f32.mrb[71].mxu0 }
 0x185   : > { %v3706_v53 = vadd.f32 %v2776_v42, %v1476_v51  ;;  %v2779_v61 = vadd.f32 %v2778_v52, %v2777_v49  ;;  %v2843_v59 = vadd.f32 %v2842_v13, %v2841_v3  ;;  %v3709_v17 = vadd.f32 %v2840_v50, %v3608_v15 }
 0x186   : > { %v1487_v15 = vadd.f32 %v3551_v11, %v3560_v24  ;;  %v1492_v11 = vadd.f32 %v3553_v18, %v3560_v24 }
 0x187   : > { %v3711_v0 = vadd.f32 %v2779_v61, %v1479_v54  ;;  %v3714_v58 = vadd.f32 %v2843_v59, %v3610_v21 }
 0x189   : > { %v2780_v5 = vpop.f32.mrb[72].mxu1  ;;  %v2844_v12 = vpop.f32.mrb[72].mxu0 }
 0x18a   : > { %v2781_v38 = vpop.f32.mrb[73].mxu1  ;;  %v2845_v26 = vpop.f32.mrb[73].mxu0 }
 0x18b   : > { %v2782_v30 = vadd.f32 %v2781_v38, %v2780_v5  ;;  %v2846_v19 = vadd.f32 %v2845_v26, %v2844_v12  ;;  %v2783_v62 = vpop.f32.mrb[74].mxu1  ;;  %v2847_v20 = vpop.f32.mrb[74].mxu0 }
 0x18c   : > { %v2784_v25 = vpop.f32.mrb[75].mxu1  ;;  %v2848_v33 = vpop.f32.mrb[75].mxu0 }
 0x18d   : > { %v3720_v4 = vadd.f32 %v2782_v30, %v1484_v63  ;;  %v2785_v21 = vadd.f32 %v2784_v25, %v2783_v62  ;;  %v2849_v55 = vadd.f32 %v2848_v33, %v2847_v20  ;;  %v3723_v36 = vadd.f32 %v2846_v19, %v3617_v41 }
 0x18e   : > { %v1495_v41 = vadd.f32 %v3555_v23, %v3560_v24 }
 0x18f   : > { %v3725_v34 = vadd.f32 %v2785_v21, %v1487_v15  ;;  %v3728_v6 = vadd.f32 %v2849_v55, %v3621_v16 }
 0x191   : > { %v2786_v45 = vpop.f32.mrb[76].mxu1  ;;  %v2850_v43 = vpop.f32.mrb[76].mxu0 }
 0x192   : > { %v2787_v44 = vpop.f32.mrb[77].mxu1  ;;  %v2851_v48 = vpop.f32.mrb[77].mxu0 }
 0x193   : > { %v2788_v51 = vadd.f32 %v2787_v44, %v2786_v45  ;;  %v2852_v42 = vadd.f32 %v2851_v48, %v2850_v43  ;;  %v2789_v50 = vpop.f32.mrb[78].mxu1  ;;  %v2853_v49 = vpop.f32.mrb[78].mxu0 }
 0x194   : > { %v2790_v3 = vpop.f32.mrb[79].mxu1  ;;  %v2854_v54 = vpop.f32.mrb[79].mxu0 }
 0x195   : > { %v3734_v52 = vadd.f32 %v2788_v51, %v1492_v11  ;;  %v2791_v16 = vadd.f32 %v2790_v3, %v2789_v50  ;;  %v2855_v13 = vadd.f32 %v2854_v54, %v2853_v49  ;;  %v3737_v61 = vadd.f32 %v2852_v42, %v3628_v56 }
 0x197   : > { %v3739_v59 = vadd.f32 %v2791_v16, %v1495_v41  ;;  %v3742_v18 = vadd.f32 %v2855_v13, %v3632_v8 }
 0x199   : > { %v2856_v5 = vpop.f32.mrb[80].mxu0  ;;  %v2946_v12 = vpop.f32.mrb[80].mxu1 }
 0x19a   : > { %v1863_v38 = vadd.f32 %v2946_v12, %v3653_v2  ;;  %v2857_v23 = vpop.f32.mrb[81].mxu0  ;;  %v1854_v24 = vpop.f32.mrb[81].mxu1 }
 0x19b   : > { %v2858_v26 = vadd.f32 %v2857_v23, %v2856_v5  ;;  %v1855_v63 = vadd.f32 %v1854_v24, %v3640_v35  ;;  %v2859_v30 = vpop.f32.mrb[82].mxu0  ;;  %v2947_v19 = vpop.f32.mrb[82].mxu1 }
 0x19c   : > { %v1866_v56 = vadd.f32 %v2947_v19, %v3658_v9  ;;  %v2860_v62 = vpop.f32.mrb[83].mxu0  ;;  %v1857_v20 = vpop.f32.mrb[83].mxu1  ;;  %v1983_v33 = vmax.f32 %v1863_v38, 0.0 }
 0x19d   : > { %v2861_v15 = vadd.f32 %v2860_v62, %v2859_v30  ;;  %v1858_v8 = vadd.f32 %v1857_v20, %v3645_v39  ;;  %v3750_v25 = vadd.f32 %v2858_v26, %v3637_v31  ;;  %v1981_v21 = vmax.f32 %v1855_v63, 0.0 }
 0x19e   : > { %v1984_v2 = vmax.f32 %v1866_v56, 0.0 }
 0x19f   : > { %v1982_v35 = vmax.f32 %v1858_v8, 0.0  ;;  %v3758_v9 = vadd.f32 %v2861_v15, %v3642_v57 }
 0x1a0   : > { %v2481_v55 = vpack.c.bf16 %v1984_v2, %v1983_v33 }
 0x1a1   : > { %v2476_v45 = vpack.c.bf16 %v1982_v35, %v1981_v21  ;;  %v2862_v39 = vpop.f32.mrb[84].mxu0  ;;  %v2950_v43 = vpop.f32.mrb[84].mxu1 }
 0x1a2   : > { %2553 = vst [vmem:[%s3755_s13 + $0x8] sm:$0xff] %v2481_v55   ;;  %v1879_v31 = vadd.f32 %v2950_v43, %v3681_v1  ;;  %v2863_v44 = vpop.f32.mrb[85].mxu0  ;;  %v1870_v48 = vpop.f32.mrb[85].mxu1 }
 0x1a3   : > { %2477 = vst [vmem:[%s3755_s13] sm:$0xff] %v2476_v45   ;;  %v2864_v11 = vadd.f32 %v2863_v44, %v2862_v39  ;;  %v1871_v51 = vadd.f32 %v1870_v48, %v3667_v32  ;;  %v2865_v42 = vpop.f32.mrb[86].mxu0  ;;  %v2951_v50 = vpop.f32.mrb[86].mxu1 }
 0x1a4   : > { %v1882_v49 = vadd.f32 %v2951_v50, %v3686_v22  ;;  %v2866_v57 = vpop.f32.mrb[87].mxu0  ;;  %v1873_v41 = vpop.f32.mrb[87].mxu1  ;;  %v1987_v1 = vmax.f32 %v1879_v31, 0.0 }
 0x1a5   : > { %v2867_v3 = vadd.f32 %v2866_v57, %v2865_v42  ;;  %v1874_v54 = vadd.f32 %v1873_v41, %v3672_v29  ;;  %v1766_v16 = vadd.f32 %v2864_v11, %v3650_v14  ;;  %v1985_v5 = vmax.f32 %v1871_v51, 0.0 }
 0x1a6   : > { %v1988_v13 = vmax.f32 %v1882_v49, 0.0 }
 0x1a7   : > { %v1986_v12 = vmax.f32 %v1874_v54, 0.0  ;;  %v1769_v38 = vadd.f32 %v2867_v3, %v3655_v7 }
 0x1a8   : > { %v2491_v32 = vpack.c.bf16 %v1988_v13, %v1987_v1 }
 0x1a9   : > { %v2486_v23 = vpack.c.bf16 %v1986_v12, %v1985_v5  ;;  %v2868_v24 = vpop.f32.mrb[88].mxu0  ;;  %v2954_v26 = vpop.f32.mrb[88].mxu1 }
 0x1aa   : > { %2555 = vst [vmem:[%s3755_s13 + $0x18] sm:$0xff] %v2491_v32   ;;  %v1895_v22 = vadd.f32 %v2954_v26, %v3709_v17  ;;  %v2869_v63 = vpop.f32.mrb[89].mxu0  ;;  %v1886_v30 = vpop.f32.mrb[89].mxu1 }
 0x1ab   : > { %2554 = vst [vmem:[%s3755_s13 + $0x10] sm:$0xff] %v2486_v23   ;;  %v2870_v19 = vadd.f32 %v2869_v63, %v2868_v24  ;;  %v1887_v29 = vadd.f32 %v1886_v30, %v3695_v60  ;;  %v2871_v14 = vpop.f32.mrb[90].mxu0  ;;  %v2955_v56 = vpop.f32.mrb[90].mxu1 }
 0x1ac   : > { %v1898_v62 = vadd.f32 %v2955_v56, %v3714_v58  ;;  %v2872_v20 = vpop.f32.mrb[91].mxu0  ;;  %v1889_v7 = vpop.f32.mrb[91].mxu1  ;;  %v1991_v17 = vmax.f32 %v1895_v22, 0.0 }
 0x1ad   : > { %v2873_v15 = vadd.f32 %v2872_v20, %v2871_v14  ;;  %v1890_v8 = vadd.f32 %v1889_v7, %v3700_v46  ;;  %v3775_v33 = vadd.f32 %v2870_v19, %v3664_v28  ;;  %v1989_v21 = vmax.f32 %v1887_v29, 0.0 }
 0x1ae   : > { %v1992_v2 = vmax.f32 %v1898_v62, 0.0 }
 0x1af   : > { %v1990_v35 = vmax.f32 %v1890_v8, 0.0  ;;  %v3778_v60 = vadd.f32 %v2873_v15, %v3669_v10 }
 0x1b0   : > { %v2501_v55 = vpack.c.bf16 %v1992_v2, %v1991_v17 }
 0x1b1   : > { %v2496_v45 = vpack.c.bf16 %v1990_v35, %v1989_v21  ;;  %v2874_v39 = vpop.f32.mrb[92].mxu0  ;;  %v2958_v58 = vpop.f32.mrb[92].mxu1 }
 0x1b2   : > { %2557 = vst [vmem:[%s3755_s13 + $0x28] sm:$0xff] %v2501_v55   ;;  %v1911_v43 = vadd.f32 %v2958_v58, %v3737_v61  ;;  %v2875_v31 = vpop.f32.mrb[93].mxu0  ;;  %v1902_v44 = vpop.f32.mrb[93].mxu1 }
 0x1b3   : > { %2556 = vst [vmem:[%s3755_s13 + $0x20] sm:$0xff] %v2496_v45   ;;  %v2876_v46 = vadd.f32 %v2875_v31, %v2874_v39  ;;  %v1903_v28 = vadd.f32 %v1902_v44, %v3723_v36  ;;  %v2877_v48 = vpop.f32.mrb[94].mxu0  ;;  %v2959_v11 = vpop.f32.mrb[94].mxu1 }
 0x1b4   : > { %v1914_v51 = vadd.f32 %v2959_v11, %v3742_v18  ;;  %v2878_v10 = vpop.f32.mrb[95].mxu0  ;;  %v1905_v42 = vpop.f32.mrb[95].mxu1  ;;  %v1995_v61 = vmax.f32 %v1911_v43, 0.0 }
 0x1b5   : > { %v2879_v50 = vadd.f32 %v2878_v10, %v2877_v48  ;;  %v1906_v49 = vadd.f32 %v1905_v42, %v3728_v6  ;;  %v1782_v57 = vadd.f32 %v2876_v46, %v3678_v37  ;;  %v1993_v3 = vmax.f32 %v1903_v28, 0.0 }
 0x1b6   : > { %v1996_v41 = vmax.f32 %v1914_v51, 0.0 }
 0x1b7   : > { %v1994_v54 = vmax.f32 %v1906_v49, 0.0  ;;  %v1785_v1 = vadd.f32 %v2879_v50, %v3683_v40 }
 0x1b8   : > { %v2511_v36 = vpack.c.bf16 %v1996_v41, %v1995_v61 }
 0x1b9   : > { %v2506_v13 = vpack.c.bf16 %v1994_v54, %v1993_v3  ;;  %v2880_v5 = vpop.f32.mrb[96].mxu0  ;;  %v2962_v12 = vpop.f32.mrb[96].mxu1 }
 0x1ba   : > { %2559 = vst [vmem:[%s3755_s13 + $0x38] sm:$0xff] %v2511_v36   ;;  %v1927_v18 = vadd.f32 %v2962_v12, %v1766_v16  ;;  %v2881_v32 = vpop.f32.mrb[97].mxu0  ;;  %v1918_v23 = vpop.f32.mrb[97].mxu1 }
 0x1bb   : > { %2558 = vst [vmem:[%s3755_s13 + $0x30] sm:$0xff] %v2506_v13   ;;  %v2882_v24 = vadd.f32 %v2881_v32, %v2880_v5  ;;  %v1919_v6 = vadd.f32 %v1918_v23, %v3750_v25  ;;  %v2883_v26 = vpop.f32.mrb[98].mxu0  ;;  %v2963_v37 = vpop.f32.mrb[98].mxu1 }
 0x1bc   : > { %v1930_v22 = vadd.f32 %v2963_v37, %v1769_v38  ;;  %v2884_v63 = vpop.f32.mrb[99].mxu0  ;;  %v1921_v30 = vpop.f32.mrb[99].mxu1  ;;  %v1999_v14 = vmax.f32 %v1927_v18, 0.0 }
 0x1bd   : > { %v2885_v19 = vadd.f32 %v2884_v63, %v2883_v26  ;;  %v1922_v40 = vadd.f32 %v1921_v30, %v3758_v9  ;;  %v1790_v29 = vadd.f32 %v2882_v24, %v3692_v27  ;;  %v1997_v56 = vmax.f32 %v1919_v6, 0.0 }
 0x1be   : > { %v2000_v16 = vmax.f32 %v1930_v22, 0.0 }
 0x1bf   : > { %v1998_v62 = vmax.f32 %v1922_v40, 0.0  ;;  %v1793_v20 = vadd.f32 %v2885_v19, %v3697_v47 }
 0x1c0   : > { %v2521_v7 = vpack.c.bf16 %v2000_v16, %v1999_v14 }
 0x1c1   : > { %v2516_v25 = vpack.c.bf16 %v1998_v62, %v1997_v56  ;;  %v2886_v15 = vpop.f32.mrb[100].mxu0  ;;  %v2966_v8 = vpop.f32.mrb[100].mxu1 }
 0x1c2   : > { %2561 = vst [vmem:[%s3755_s13 + $0x48] sm:$0xff] %v2521_v7   ;;  %v1943_v38 = vadd.f32 %v2966_v8, %v1782_v57  ;;  %v2887_v17 = vpop.f32.mrb[101].mxu0  ;;  %v1934_v2 = vpop.f32.mrb[101].mxu1 }
 0x1c3   : > { %2560 = vst [vmem:[%s3755_s13 + $0x40] sm:$0xff] %v2516_v25   ;;  %v2888_v21 = vadd.f32 %v2887_v17, %v2886_v15  ;;  %v1935_v9 = vadd.f32 %v1934_v2, %v3775_v33  ;;  %v2889_v35 = vpop.f32.mrb[102].mxu0  ;;  %v2967_v27 = vpop.f32.mrb[102].mxu1 }
 0x1c4   : > { %v1946_v55 = vadd.f32 %v2967_v27, %v1785_v1  ;;  %v2890_v45 = vpop.f32.mrb[103].mxu0  ;;  %v1937_v39 = vpop.f32.mrb[103].mxu1  ;;  %v2003_v31 = vmax.f32 %v1943_v38, 0.0 }
 0x1c5   : > { %v2891_v58 = vadd.f32 %v2890_v45, %v2889_v35  ;;  %v1938_v47 = vadd.f32 %v1937_v39, %v3778_v60  ;;  %v1798_v43 = vadd.f32 %v2888_v21, %v3706_v53  ;;  %v2001_v46 = vmax.f32 %v1935_v9, 0.0 }
 0x1c6   : > { %v2004_v44 = vmax.f32 %v1946_v55, 0.0 }
 0x1c7   : > { %v2002_v28 = vmax.f32 %v1938_v47, 0.0  ;;  %v1801_v48 = vadd.f32 %v2891_v58, %v3711_v0 }
 0x1c8   : > { %v2531_v11 = vpack.c.bf16 %v2004_v44, %v2003_v31 }
 0x1c9   : > { %v2526_v33 = vpack.c.bf16 %v2002_v28, %v2001_v46  ;;  %v2892_v51 = vpop.f32.mrb[104].mxu0  ;;  %v2970_v10 = vpop.f32.mrb[104].mxu1 }
 0x1ca   : > { %2563 = vst [vmem:[%s3755_s13 + $0x58] sm:$0xff] %v2531_v11   ;;  %v1959_v42 = vadd.f32 %v2970_v10, %v1798_v43  ;;  %v2893_v50 = vpop.f32.mrb[105].mxu0  ;;  %v1950_v49 = vpop.f32.mrb[105].mxu1 }
 0x1cb   : > { %2562 = vst [vmem:[%s3755_s13 + $0x50] sm:$0xff] %v2526_v33   ;;  %v2894_v57 = vadd.f32 %v2893_v50, %v2892_v51  ;;  %v1951_v61 = vadd.f32 %v1950_v49, %v1790_v29  ;;  %v2895_v60 = vpop.f32.mrb[106].mxu0  ;;  %v2971_v41 = vpop.f32.mrb[106].mxu1 }
 0x1cc   : > { %v1962_v53 = vadd.f32 %v2971_v41, %v1801_v48  ;;  %v2896_v3 = vpop.f32.mrb[107].mxu0  ;;  %v1953_v54 = vpop.f32.mrb[107].mxu1  ;;  %v2007_v13 = vmax.f32 %v1959_v42, 0.0 }
 0x1cd   : > { %v2897_v1 = vadd.f32 %v2896_v3, %v2895_v60  ;;  %v1954_v0 = vadd.f32 %v1953_v54, %v1793_v20  ;;  %v1806_v36 = vadd.f32 %v2894_v57, %v3720_v4  ;;  %v2005_v12 = vmax.f32 %v1951_v61, 0.0 }
 0x1ce   : > { %v2008_v5 = vmax.f32 %v1962_v53, 0.0 }
 0x1cf   : > { %v2006_v18 = vmax.f32 %v1954_v0, 0.0  ;;  %v1809_v32 = vadd.f32 %v2897_v1, %v3725_v34 }
 0x1d0   : > { %v2541_v23 = vpack.c.bf16 %v2008_v5, %v2007_v13 }
 0x1d1   : > { %v2536_v24 = vpack.c.bf16 %v2006_v18, %v2005_v12  ;;  %v2898_v6 = vpop.f32.mrb[108].mxu0  ;;  %v2974_v26 = vpop.f32.mrb[108].mxu1 }
 0x1d2   : > { %2565 = vst [vmem:[%s3755_s13 + $0x68] sm:$0xff] %v2541_v23   ;;  %v2899_v37 = vpop.f32.mrb[109].mxu0  ;;  %v1966_v22 = vpop.f32.mrb[109].mxu1 }
 0x1d3   : > { %2564 = vst [vmem:[%s3755_s13 + $0x60] sm:$0xff] %v2536_v24   ;;  %v2900_v63 = vadd.f32 %v2899_v37, %v2898_v6  ;;  %v1967_v30 = vadd.f32 %v1966_v22, %v1806_v36  ;;  %v2901_v19 = vpop.f32.mrb[110].mxu0  ;;  %v2975_v40 = vpop.f32.mrb[110].mxu1 }
 0x1d4   : > { %v2902_v4 = vpop.f32.mrb[111].mxu0  ;;  %v1969_v29 = vpop.f32.mrb[111].mxu1 }
 0x1d5   : > { %v1814_v14 = vadd.f32 %v2900_v63, %v3734_v52  ;;  %v2903_v16 = vadd.f32 %v2902_v4, %v2901_v19  ;;  %v1970_v34 = vadd.f32 %v1969_v29, %v1809_v32  ;;  %v2009_v62 = vmax.f32 %v1967_v30, 0.0 }
 0x1d7   : > { %v1975_v56 = vadd.f32 %v2974_v26, %v1814_v14  ;;  %v1817_v20 = vadd.f32 %v2903_v16, %v3739_v59  ;;  %v2010_v7 = vmax.f32 %v1970_v34, 0.0 }
 0x1d9   : > { %v1978_v25 = vadd.f32 %v2975_v40, %v1817_v20  ;;  %v2546_v15 = vpack.c.bf16 %v2010_v7, %v2009_v62  ;;  %v2011_v8 = vmax.f32 %v1975_v56, 0.0 }
 0x1db   : > { %v2012_v38 = vmax.f32 %v1978_v25, 0.0  ;;  %2566 = vst [vmem:[%s3755_s13 + $0x70] sm:$0xff] %v2546_v15  }
 0x1dd   : > { %v2551_v17 = vpack.c.bf16 %v2012_v38, %v2011_v8 }
 0x1df   : > { %2567 = vst [vmem:[%s3755_s13 + $0x78] sm:$0xff] %v2551_v17  }
 0x1e0 PF: > { %s13_s12 = sadd.s32 1, %s3223_s12  }
 0x1e1   : > { %p10_p4 = scmp.ge.s32.totalorder %s13_s12, 4  }
 0x1e3   :  { %12 = sbr.rel (!%p10_p4) target bundleno = 1 (0x1), region = 62 }

// kernel: minkunet_forward.38
= control target key start
LH: loop header
LB: loop body
LE: loop exit
PB: predicated region body
PF: predicated region fallthrough
CT: control target
= control target key end

     0   :  { %s1094_s12 = smov 0   ;;  %s1215_s0 = inlined_call_operand.vmem [shape: bf16[512,128], index: 0, kind: input, shape index: {}]   ;;  %s1216_s1 = inlined_call_operand.vmem [shape: bf16[128,128], index: 1, kind: input, shape index: {}]   ;;  %s1217_s2 = inlined_call_operand.vmem [shape: f32[1,128], index: 2, kind: input, shape index: {}]   ;;  %s1218_s3 = inlined_call_operand.vmem [shape: bf16[512,128], index: 3, kind: output, shape index: {}]  }
   0x1 LB: > { %s751_s13 = sadd.s32 4294967295, %s1072_s12   ;;  %p755_p0 = scmp.ge.s32.totalorder %s1072_s12, 1  ;;  %s1072_s12 = sphi %s1094_s12, %s13_s12  }
   0x2   : > { %p138_p1 = scmp.lt.s32.totalorder %s1072_s12, 3 }
   0x4   : > { %p139_p2 = pnand %p755_p0, %p138_p1 }
   0x5   : > { %v1042_v0 = vld [vmem:[%s1216_s1] sm:$0xff] (!%p139_p2)   ;;  %s756_s16 = sshll.u32 (!%p139_p2), %s751_s13, 5  ;;  %v1043_v1 = vld [vmem:[%s1216_s1 + $0x8] sm:$0xff] (!%p139_p2)   ;;  %v1044_v2 = vld [vmem:[%s1216_s1 + $0x10] sm:$0xff] (!%p139_p2)  }
   0x6   : > { %142 = sbr.rel (%p139_p2) target bundleno = 282 (0x11a), region = 32  ;;  %p163_p3 = scmp.lt.s32.totalorder (!%p139_p2), %s756_s16, 63  ;;  %970 = vmatprep.subr.bf16.mxu0 (!%p139_p2), %v1042_v0  ;;  %1018 = vmatprep.subr.bf16.mxu1 (!%p139_p2), %v1042_v0  ;;  %v1045_v3 = vld [vmem:[%s1216_s1 + $0x18] sm:$0xff] (!%p139_p2)   ;;  %v1046_v6 = vld [vmem:[%s1216_s1 + $0x20] sm:$0xff] (!%p139_p2)   ;;  %v1047_v7 = vld [vmem:[%s1216_s1 + $0x28] sm:$0xff] (!%p139_p2)  }
   0x7   : > { %971 = vmatpush3.bf16.msra.mxu0 (!%p139_p2), %v1042_v0  ;;  %1026 = vmatpush3.bf16.msra.mxu1 (!%p139_p2), %v1042_v0  ;;  %v1048_v8 = vld [vmem:[%s1216_s1 + $0x30] sm:$0xff] (!%p139_p2)   ;;  %v1049_v9 = vld [vmem:[%s1216_s1 + $0x38] sm:$0xff] (!%p139_p2)   ;;  %v1155_v25 = vld [vmem:[%s1217_s2] ss:$0 sm:$0xff] (!%p139_p2) }
   0x8   : > { %972 = vmatprep.subr.bf16.mxu0 (!%p139_p2), %v1043_v1  ;;  %1019 = vmatprep.subr.bf16.mxu1 (!%p139_p2), %v1043_v1 }
   0xb   : > { %973 = vmatpush3.bf16.msra.mxu0 (!%p139_p2), %v1043_v1  ;;  %1027 = vmatpush3.bf16.msra.mxu1 (!%p139_p2), %v1043_v1 }
   0xc   : > { %974 = vmatprep.subr.bf16.mxu0 (!%p139_p2), %v1044_v2  ;;  %1020 = vmatprep.subr.bf16.mxu1 (!%p139_p2), %v1044_v2 }
   0xd   : > { %s1220_s16 = smov (!%p163_p3, %s756_s16), 63 }
   0xe   : > { %s757_s21 = sshll.u32 %s1220_s16, 2 }
   0xf   : > { %s1119_s24 = scalar_lea.vmem %s1215_s0, %s757_s21  ;;  %975 = vmatpush3.bf16.msra.mxu0 %v1044_v2  ;;  %1028 = vmatpush3.bf16.msra.mxu1 %v1044_v2  ;;  %s1168_s13 = scalar_lea.vmem %s1218_s3, %s757_s21 }
  0x10   : > { %v1050_v4 = vld [vmem:[%s1119_s24] sm:$0xff]   ;;  %976 = vmatprep.subr.bf16.mxu0 %v1045_v3  ;;  %1021 = vmatprep.subr.bf16.mxu1 %v1045_v3  ;;  %v1052_v10 = vld [vmem:[%s1119_s24 + $0x8] sm:$0xff]   ;;  %v1054_v12 = vld [vmem:[%s1119_s24 + $0x10] sm:$0xff]  }
  0x11   : > { %v1051_v5 = vld [vmem:[%s1119_s24 + $0x40] sm:$0xff]   ;;  %986 = vmatprep.mubr.bf16.mxu0 %v1050_v4  ;;  %v1053_v11 = vld [vmem:[%s1119_s24 + $0x48] sm:$0xff]   ;;  %v1055_v13 = vld [vmem:[%s1119_s24 + $0x50] sm:$0xff]  }
  0x12   : > { %1002 = vmatprep.mubr.bf16.mxu1 %v1051_v5  ;;  %v1056_v14 = vld [vmem:[%s1119_s24 + $0x18] sm:$0xff]   ;;  %v1058_v16 = vld [vmem:[%s1119_s24 + $0x20] sm:$0xff]   ;;  %v1060_v18 = vld [vmem:[%s1119_s24 + $0x28] sm:$0xff]  }
  0x13   : > { %977 = vmatpush3.bf16.msra.mxu0 %v1045_v3  ;;  %1029 = vmatpush3.bf16.msra.mxu1 %v1045_v3  ;;  %v1057_v15 = vld [vmem:[%s1119_s24 + $0x58] sm:$0xff]   ;;  %v1059_v17 = vld [vmem:[%s1119_s24 + $0x60] sm:$0xff]   ;;  %v1061_v19 = vld [vmem:[%s1119_s24 + $0x68] sm:$0xff]  }
  0x14   : > { %978 = vmatprep.subr.bf16.mxu0 %v1046_v6  ;;  %1022 = vmatprep.subr.bf16.mxu1 %v1046_v6  ;;  %v1062_v20 = vld [vmem:[%s1119_s24 + $0x30] sm:$0xff]   ;;  %v1064_v22 = vld [vmem:[%s1119_s24 + $0x38] sm:$0xff]  }
  0x15   : > { %v1063_v21 = vld [vmem:[%s1119_s24 + $0x70] sm:$0xff]   ;;  %v1065_v23 = vld [vmem:[%s1119_s24 + $0x78] sm:$0xff]  }
  0x17   : > { %979 = vmatpush3.bf16.msra.mxu0 %v1046_v6  ;;  %1030 = vmatpush3.bf16.msra.mxu1 %v1046_v6 }
  0x18   : > { %980 = vmatprep.subr.bf16.mxu0 %v1047_v7  ;;  %1023 = vmatprep.subr.bf16.mxu1 %v1047_v7 }
  0x1b   : > { %981 = vmatpush3.bf16.msra.mxu0 %v1047_v7  ;;  %1031 = vmatpush3.bf16.msra.mxu1 %v1047_v7 }
  0x1c   : > { %982 = vmatprep.subr.bf16.mxu0 %v1048_v8  ;;  %1024 = vmatprep.subr.bf16.mxu1 %v1048_v8 }
  0x1f   : > { %983 = vmatpush3.bf16.msra.mxu0 %v1048_v8  ;;  %1032 = vmatpush3.bf16.msra.mxu1 %v1048_v8 }
  0x20   : > { %984 = vmatprep.subr.bf16.mxu0 %v1049_v9  ;;  %1025 = vmatprep.subr.bf16.mxu1 %v1049_v9 }
  0x23   : > { %985 = vmatpush3.bf16.msra.mxu0 %v1049_v9  ;;  %1033 = vmatpush3.bf16.msra.mxu1 %v1049_v9 }
  0x26   : > { %987 = vmatmul.mubr.bf16.vlgmr.msra.gmra.mrb[0].mxu0 %v1052_v10  ;;  %1003 = vmatmul.mubr.bf16.vlgmr.msra.gmra.mrb[0].mxu1 %v1053_v11 }
  0x27   : > { %990 = vmatprep.mubr.bf16.mxu0 %v1054_v12  ;;  %1006 = vmatprep.mubr.bf16.mxu1 %v1055_v13 }
  0x2e   : > { %991 = vmatmul.mubr.bf16.gmra.mrb[4].mxu0 %v1056_v14  ;;  %1007 = vmatmul.mubr.bf16.gmra.mrb[4].mxu1 %v1057_v15 }
  0x2f   : > { %994 = vmatprep.mubr.bf16.mxu0 %v1058_v16  ;;  %1010 = vmatprep.mubr.bf16.mxu1 %v1059_v17 }
  0x36   : > { %995 = vmatmul.mubr.bf16.gmra.mrb[8].mxu0 %v1060_v18  ;;  %1011 = vmatmul.mubr.bf16.gmra.mrb[8].mxu1 %v1061_v19 }
  0x37   : > { %998 = vmatprep.mubr.bf16.mxu0 %v1062_v20  ;;  %1014 = vmatprep.mubr.bf16.mxu1 %v1063_v21 }
  0x3e   : > { %999 = vmatmul.mubr.bf16.gmra.mrb[12].mxu0 %v1064_v22  ;;  %1015 = vmatmul.mubr.bf16.gmra.mrb[12].mxu1 %v1065_v23 }
  0xf9   : > { %v988_v24 = vpop.f32.mrb[0].mxu0  ;;  %v1004_v26 = vpop.f32.mrb[0].mxu1 }
  0xfa   : > { %v408_v27 = vpop.f32.mrb[1].mxu0  ;;  %v472_v28 = vpop.f32.mrb[1].mxu1  ;;  %v417_v31 = vadd.f32 %v988_v24, %v1155_v25  ;;  %v481_v32 = vadd.f32 %v1004_v26, %v1155_v25 }
  0xfb   : > { %v989_v29 = vpop.f32.mrb[2].mxu0  ;;  %v1005_v30 = vpop.f32.mrb[2].mxu1  ;;  %v409_v37 = vadd.f32 %v1155_v25, %v408_v27  ;;  %v473_v38 = vadd.f32 %v1155_v25, %v472_v28 }
  0xfc   : > { %v420_v33 = vadd.f32 %v989_v29, %v1155_v25  ;;  %v484_v34 = vadd.f32 %v1005_v30, %v1155_v25  ;;  %v411_v35 = vpop.f32.mrb[3].mxu0  ;;  %v475_v36 = vpop.f32.mrb[3].mxu1 }
  0xfd   : > { %v412_v39 = vadd.f32 %v1155_v25, %v411_v35  ;;  %v476_v40 = vadd.f32 %v1155_v25, %v475_v36 }
  0xfe   : > { %v859_v41 = vpack.c.bf16 %v420_v33, %v417_v31  ;;  %v899_v42 = vpack.c.bf16 %v484_v34, %v481_v32 }
  0xff   : > { %v854_v43 = vpack.c.bf16 %v412_v39, %v409_v37  ;;  %v894_v44 = vpack.c.bf16 %v476_v40, %v473_v38 }
 0x100   : > { %931 = vst [vmem:[%s1168_s13 + $0x8] sm:$0xff] %v859_v41   ;;  %939 = vst [vmem:[%s1168_s13 + $0x48] sm:$0xff] %v899_v42  }
 0x101   : > { %855 = vst [vmem:[%s1168_s13] sm:$0xff] %v854_v43   ;;  %938 = vst [vmem:[%s1168_s13 + $0x40] sm:$0xff] %v894_v44   ;;  %v992_v45 = vpop.f32.mrb[4].mxu0  ;;  %v1008_v46 = vpop.f32.mrb[4].mxu1 }
 0x102   : > { %v424_v47 = vpop.f32.mrb[5].mxu0  ;;  %v488_v48 = vpop.f32.mrb[5].mxu1  ;;  %v433_v51 = vadd.f32 %v992_v45, %v1155_v25  ;;  %v497_v52 = vadd.f32 %v1008_v46, %v1155_v25 }
 0x103   : > { %v993_v49 = vpop.f32.mrb[6].mxu0  ;;  %v1009_v50 = vpop.f32.mrb[6].mxu1  ;;  %v425_v57 = vadd.f32 %v1155_v25, %v424_v47  ;;  %v489_v58 = vadd.f32 %v1155_v25, %v488_v48 }
 0x104   : > { %v436_v53 = vadd.f32 %v993_v49, %v1155_v25  ;;  %v500_v54 = vadd.f32 %v1009_v50, %v1155_v25  ;;  %v427_v55 = vpop.f32.mrb[7].mxu0  ;;  %v491_v56 = vpop.f32.mrb[7].mxu1 }
 0x105   : > { %v428_v59 = vadd.f32 %v1155_v25, %v427_v55  ;;  %v492_v60 = vadd.f32 %v1155_v25, %v491_v56 }
 0x106   : > { %v869_v61 = vpack.c.bf16 %v436_v53, %v433_v51  ;;  %v909_v62 = vpack.c.bf16 %v500_v54, %v497_v52 }
 0x107   : > { %v864_v63 = vpack.c.bf16 %v428_v59, %v425_v57  ;;  %v904_v0 = vpack.c.bf16 %v492_v60, %v489_v58 }
 0x108   : > { %933 = vst [vmem:[%s1168_s13 + $0x18] sm:$0xff] %v869_v61   ;;  %941 = vst [vmem:[%s1168_s13 + $0x58] sm:$0xff] %v909_v62  }
 0x109   : > { %932 = vst [vmem:[%s1168_s13 + $0x10] sm:$0xff] %v864_v63   ;;  %940 = vst [vmem:[%s1168_s13 + $0x50] sm:$0xff] %v904_v0   ;;  %v996_v1 = vpop.f32.mrb[8].mxu0  ;;  %v1012_v2 = vpop.f32.mrb[8].mxu1 }
 0x10a   : > { %v440_v3 = vpop.f32.mrb[9].mxu0  ;;  %v504_v4 = vpop.f32.mrb[9].mxu1  ;;  %v449_v7 = vadd.f32 %v996_v1, %v1155_v25  ;;  %v513_v8 = vadd.f32 %v1012_v2, %v1155_v25 }
 0x10b   : > { %v997_v5 = vpop.f32.mrb[10].mxu0  ;;  %v1013_v6 = vpop.f32.mrb[10].mxu1  ;;  %v441_v13 = vadd.f32 %v1155_v25, %v440_v3  ;;  %v505_v14 = vadd.f32 %v1155_v25, %v504_v4 }
 0x10c   : > { %v452_v9 = vadd.f32 %v997_v5, %v1155_v25  ;;  %v516_v10 = vadd.f32 %v1013_v6, %v1155_v25  ;;  %v443_v11 = vpop.f32.mrb[11].mxu0  ;;  %v507_v12 = vpop.f32.mrb[11].mxu1 }
 0x10d   : > { %v444_v15 = vadd.f32 %v1155_v25, %v443_v11  ;;  %v508_v16 = vadd.f32 %v1155_v25, %v507_v12 }
 0x10e   : > { %v879_v17 = vpack.c.bf16 %v452_v9, %v449_v7  ;;  %v919_v18 = vpack.c.bf16 %v516_v10, %v513_v8 }
 0x10f   : > { %v874_v19 = vpack.c.bf16 %v444_v15, %v441_v13  ;;  %v914_v20 = vpack.c.bf16 %v508_v16, %v505_v14 }
 0x110   : > { %935 = vst [vmem:[%s1168_s13 + $0x28] sm:$0xff] %v879_v17   ;;  %943 = vst [vmem:[%s1168_s13 + $0x68] sm:$0xff] %v919_v18  }
 0x111   : > { %934 = vst [vmem:[%s1168_s13 + $0x20] sm:$0xff] %v874_v19   ;;  %942 = vst [vmem:[%s1168_s13 + $0x60] sm:$0xff] %v914_v20   ;;  %v1000_v21 = vpop.f32.mrb[12].mxu0  ;;  %v1016_v22 = vpop.f32.mrb[12].mxu1 }
 0x112   : > { %v456_v23 = vpop.f32.mrb[13].mxu0  ;;  %v520_v24 = vpop.f32.mrb[13].mxu1  ;;  %v465_v28 = vadd.f32 %v1000_v21, %v1155_v25  ;;  %v529_v29 = vadd.f32 %v1016_v22, %v1155_v25 }
 0x113   : > { %v1001_v26 = vpop.f32.mrb[14].mxu0  ;;  %v1017_v27 = vpop.f32.mrb[14].mxu1  ;;  %v457_v34 = vadd.f32 %v1155_v25, %v456_v23  ;;  %v521_v35 = vadd.f32 %v1155_v25, %v520_v24 }
 0x114   : > { %v468_v30 = vadd.f32 %v1001_v26, %v1155_v25  ;;  %v532_v31 = vadd.f32 %v1017_v27, %v1155_v25  ;;  %v459_v32 = vpop.f32.mrb[15].mxu0  ;;  %v523_v33 = vpop.f32.mrb[15].mxu1 }
 0x115   : > { %v460_v36 = vadd.f32 %v1155_v25, %v459_v32  ;;  %v524_v37 = vadd.f32 %v1155_v25, %v523_v33 }
 0x116   : > { %v889_v38 = vpack.c.bf16 %v468_v30, %v465_v28  ;;  %v929_v39 = vpack.c.bf16 %v532_v31, %v529_v29 }
 0x117   : > { %v884_v40 = vpack.c.bf16 %v460_v36, %v457_v34  ;;  %v924_v41 = vpack.c.bf16 %v524_v37, %v521_v35 }
 0x118   : > { %937 = vst [vmem:[%s1168_s13 + $0x38] sm:$0xff] %v889_v38   ;;  %945 = vst [vmem:[%s1168_s13 + $0x78] sm:$0xff] %v929_v39  }
 0x119   : > { %936 = vst [vmem:[%s1168_s13 + $0x30] sm:$0xff] %v884_v40   ;;  %944 = vst [vmem:[%s1168_s13 + $0x70] sm:$0xff] %v924_v41  }
 0x11a PF: > { %s13_s12 = sadd.s32 1, %s1072_s12  }
 0x11b   : > { %p10_p4 = scmp.ge.s32.totalorder %s13_s12, 4  }
 0x11d   :  { %12 = sbr.rel (!%p10_p4) target bundleno = 1 (0x1), region = 62 }

// kernel: minkunet_forward.39
= control target key start
LH: loop header
LB: loop body
LE: loop exit
PB: predicated region body
PF: predicated region fallthrough
CT: control target
= control target key end

     0   :  { %s1126_s12 = smov 0   ;;  %s1247_s0 = inlined_call_operand.vmem [shape: bf16[512,128], index: 0, kind: input, shape index: {}]   ;;  %s1248_s1 = inlined_call_operand.vmem [shape: bf16[128,128], index: 1, kind: input, shape index: {}]   ;;  %s1249_s2 = inlined_call_operand.vmem [shape: f32[1,128], index: 2, kind: input, shape index: {}]   ;;  %s1250_s3 = inlined_call_operand.vmem [shape: bf16[512,128], index: 3, kind: output, shape index: {}]  }
   0x1 LB: > { %s783_s13 = sadd.s32 4294967295, %s1104_s12   ;;  %p787_p0 = scmp.ge.s32.totalorder %s1104_s12, 1  ;;  %s1104_s12 = sphi %s1126_s12, %s13_s12  }
   0x2   : > { %p138_p1 = scmp.lt.s32.totalorder %s1104_s12, 3 }
   0x4   : > { %p139_p2 = pnand %p787_p0, %p138_p1 }
   0x5   : > { %v1074_v0 = vld [vmem:[%s1248_s1] sm:$0xff] (!%p139_p2)   ;;  %s788_s16 = sshll.u32 (!%p139_p2), %s783_s13, 5  ;;  %v1075_v1 = vld [vmem:[%s1248_s1 + $0x8] sm:$0xff] (!%p139_p2)   ;;  %v1076_v2 = vld [vmem:[%s1248_s1 + $0x10] sm:$0xff] (!%p139_p2)  }
   0x6   : > { %142 = sbr.rel (%p139_p2) target bundleno = 284 (0x11c), region = 32  ;;  %p163_p3 = scmp.lt.s32.totalorder (!%p139_p2), %s788_s16, 63  ;;  %1002 = vmatprep.subr.bf16.mxu0 (!%p139_p2), %v1074_v0  ;;  %1050 = vmatprep.subr.bf16.mxu1 (!%p139_p2), %v1074_v0  ;;  %v1077_v3 = vld [vmem:[%s1248_s1 + $0x18] sm:$0xff] (!%p139_p2)   ;;  %v1078_v6 = vld [vmem:[%s1248_s1 + $0x20] sm:$0xff] (!%p139_p2)   ;;  %v1079_v7 = vld [vmem:[%s1248_s1 + $0x28] sm:$0xff] (!%p139_p2)  }
   0x7   : > { %1003 = vmatpush3.bf16.msra.mxu0 (!%p139_p2), %v1074_v0  ;;  %1058 = vmatpush3.bf16.msra.mxu1 (!%p139_p2), %v1074_v0  ;;  %v1080_v8 = vld [vmem:[%s1248_s1 + $0x30] sm:$0xff] (!%p139_p2)   ;;  %v1081_v9 = vld [vmem:[%s1248_s1 + $0x38] sm:$0xff] (!%p139_p2)   ;;  %v1187_v24 = vld [vmem:[%s1249_s2] ss:$0 sm:$0xff] (!%p139_p2) }
   0x8   : > { %1004 = vmatprep.subr.bf16.mxu0 (!%p139_p2), %v1075_v1  ;;  %1051 = vmatprep.subr.bf16.mxu1 (!%p139_p2), %v1075_v1 }
   0xb   : > { %1005 = vmatpush3.bf16.msra.mxu0 (!%p139_p2), %v1075_v1  ;;  %1059 = vmatpush3.bf16.msra.mxu1 (!%p139_p2), %v1075_v1 }
   0xc   : > { %1006 = vmatprep.subr.bf16.mxu0 (!%p139_p2), %v1076_v2  ;;  %1052 = vmatprep.subr.bf16.mxu1 (!%p139_p2), %v1076_v2 }
   0xd   : > { %s1252_s16 = smov (!%p163_p3, %s788_s16), 63 }
   0xe   : > { %s789_s21 = sshll.u32 %s1252_s16, 2 }
   0xf   : > { %s1151_s24 = scalar_lea.vmem %s1247_s0, %s789_s21  ;;  %1007 = vmatpush3.bf16.msra.mxu0 %v1076_v2  ;;  %1060 = vmatpush3.bf16.msra.mxu1 %v1076_v2  ;;  %s1202_s13 = scalar_lea.vmem %s1250_s3, %s789_s21 }
  0x10   : > { %v1082_v4 = vld [vmem:[%s1151_s24] sm:$0xff]   ;;  %1008 = vmatprep.subr.bf16.mxu0 %v1077_v3  ;;  %1053 = vmatprep.subr.bf16.mxu1 %v1077_v3  ;;  %v1084_v10 = vld [vmem:[%s1151_s24 + $0x8] sm:$0xff]   ;;  %v1086_v12 = vld [vmem:[%s1151_s24 + $0x10] sm:$0xff]  }
  0x11   : > { %v1083_v5 = vld [vmem:[%s1151_s24 + $0x40] sm:$0xff]   ;;  %1018 = vmatprep.mubr.bf16.mxu0 %v1082_v4  ;;  %v1085_v11 = vld [vmem:[%s1151_s24 + $0x48] sm:$0xff]   ;;  %v1087_v13 = vld [vmem:[%s1151_s24 + $0x50] sm:$0xff]  }
  0x12   : > { %1034 = vmatprep.mubr.bf16.mxu1 %v1083_v5  ;;  %v1088_v14 = vld [vmem:[%s1151_s24 + $0x18] sm:$0xff]   ;;  %v1090_v16 = vld [vmem:[%s1151_s24 + $0x20] sm:$0xff]   ;;  %v1092_v18 = vld [vmem:[%s1151_s24 + $0x28] sm:$0xff]  }
  0x13   : > { %1009 = vmatpush3.bf16.msra.mxu0 %v1077_v3  ;;  %1061 = vmatpush3.bf16.msra.mxu1 %v1077_v3  ;;  %v1089_v15 = vld [vmem:[%s1151_s24 + $0x58] sm:$0xff]   ;;  %v1091_v17 = vld [vmem:[%s1151_s24 + $0x60] sm:$0xff]   ;;  %v1093_v19 = vld [vmem:[%s1151_s24 + $0x68] sm:$0xff]  }
  0x14   : > { %1010 = vmatprep.subr.bf16.mxu0 %v1078_v6  ;;  %1054 = vmatprep.subr.bf16.mxu1 %v1078_v6  ;;  %v1094_v20 = vld [vmem:[%s1151_s24 + $0x30] sm:$0xff]   ;;  %v1096_v22 = vld [vmem:[%s1151_s24 + $0x38] sm:$0xff]  }
  0x15   : > { %v1095_v21 = vld [vmem:[%s1151_s24 + $0x70] sm:$0xff]   ;;  %v1097_v23 = vld [vmem:[%s1151_s24 + $0x78] sm:$0xff]  }
  0x17   : > { %1011 = vmatpush3.bf16.msra.mxu0 %v1078_v6  ;;  %1062 = vmatpush3.bf16.msra.mxu1 %v1078_v6 }
  0x18   : > { %1012 = vmatprep.subr.bf16.mxu0 %v1079_v7  ;;  %1055 = vmatprep.subr.bf16.mxu1 %v1079_v7 }
  0x1b   : > { %1013 = vmatpush3.bf16.msra.mxu0 %v1079_v7  ;;  %1063 = vmatpush3.bf16.msra.mxu1 %v1079_v7 }
  0x1c   : > { %1014 = vmatprep.subr.bf16.mxu0 %v1080_v8  ;;  %1056 = vmatprep.subr.bf16.mxu1 %v1080_v8 }
  0x1f   : > { %1015 = vmatpush3.bf16.msra.mxu0 %v1080_v8  ;;  %1064 = vmatpush3.bf16.msra.mxu1 %v1080_v8 }
  0x20   : > { %1016 = vmatprep.subr.bf16.mxu0 %v1081_v9  ;;  %1057 = vmatprep.subr.bf16.mxu1 %v1081_v9 }
  0x23   : > { %1017 = vmatpush3.bf16.msra.mxu0 %v1081_v9  ;;  %1065 = vmatpush3.bf16.msra.mxu1 %v1081_v9 }
  0x26   : > { %1019 = vmatmul.mubr.bf16.vlgmr.msra.gmra.mrb[0].mxu0 %v1084_v10  ;;  %1035 = vmatmul.mubr.bf16.vlgmr.msra.gmra.mrb[0].mxu1 %v1085_v11 }
  0x27   : > { %1022 = vmatprep.mubr.bf16.mxu0 %v1086_v12  ;;  %1038 = vmatprep.mubr.bf16.mxu1 %v1087_v13 }
  0x2e   : > { %1023 = vmatmul.mubr.bf16.gmra.mrb[4].mxu0 %v1088_v14  ;;  %1039 = vmatmul.mubr.bf16.gmra.mrb[4].mxu1 %v1089_v15 }
  0x2f   : > { %1026 = vmatprep.mubr.bf16.mxu0 %v1090_v16  ;;  %1042 = vmatprep.mubr.bf16.mxu1 %v1091_v17 }
  0x36   : > { %1027 = vmatmul.mubr.bf16.gmra.mrb[8].mxu0 %v1092_v18  ;;  %1043 = vmatmul.mubr.bf16.gmra.mrb[8].mxu1 %v1093_v19 }
  0x37   : > { %1030 = vmatprep.mubr.bf16.mxu0 %v1094_v20  ;;  %1046 = vmatprep.mubr.bf16.mxu1 %v1095_v21 }
  0x3e   : > { %1031 = vmatmul.mubr.bf16.gmra.mrb[12].mxu0 %v1096_v22  ;;  %1047 = vmatmul.mubr.bf16.gmra.mrb[12].mxu1 %v1097_v23 }
  0xf9   : > { %v1020_v25 = vpop.f32.mrb[0].mxu0  ;;  %v1036_v26 = vpop.f32.mrb[0].mxu1 }
  0xfa   : > { %v417_v27 = vadd.f32 %v1020_v25, %v1187_v24  ;;  %v481_v28 = vadd.f32 %v1036_v26, %v1187_v24  ;;  %v408_v29 = vpop.f32.mrb[1].mxu0  ;;  %v472_v30 = vpop.f32.mrb[1].mxu1 }
  0xfb   : > { %v409_v31 = vadd.f32 %v1187_v24, %v408_v29  ;;  %v473_v32 = vadd.f32 %v1187_v24, %v472_v30  ;;  %v1021_v33 = vpop.f32.mrb[2].mxu0  ;;  %v1037_v34 = vpop.f32.mrb[2].mxu1 }
  0xfc   : > { %v420_v35 = vadd.f32 %v1021_v33, %v1187_v24  ;;  %v484_v36 = vadd.f32 %v1037_v34, %v1187_v24  ;;  %v411_v37 = vpop.f32.mrb[3].mxu0  ;;  %v475_v38 = vpop.f32.mrb[3].mxu1  ;;  %v537_v41 = vmax.f32 %v417_v27, 0.0  ;;  %v553_v42 = vmax.f32 %v481_v28, 0.0 }
  0xfd   : > { %v412_v39 = vadd.f32 %v1187_v24, %v411_v37  ;;  %v476_v40 = vadd.f32 %v1187_v24, %v475_v38  ;;  %v535_v45 = vmax.f32 %v409_v31, 0.0  ;;  %v551_v46 = vmax.f32 %v473_v32, 0.0 }
  0xfe   : > { %v538_v43 = vmax.f32 %v420_v35, 0.0  ;;  %v554_v44 = vmax.f32 %v484_v36, 0.0 }
  0xff   : > { %v536_v47 = vmax.f32 %v412_v39, 0.0  ;;  %v552_v48 = vmax.f32 %v476_v40, 0.0 }
 0x100   : > { %v891_v49 = vpack.c.bf16 %v538_v43, %v537_v41  ;;  %v931_v50 = vpack.c.bf16 %v554_v44, %v553_v42 }
 0x101   : > { %v886_v51 = vpack.c.bf16 %v536_v47, %v535_v45  ;;  %v926_v52 = vpack.c.bf16 %v552_v48, %v551_v46  ;;  %v1024_v53 = vpop.f32.mrb[4].mxu0  ;;  %v1040_v54 = vpop.f32.mrb[4].mxu1 }
 0x102   : > { %963 = vst [vmem:[%s1202_s13 + $0x8] sm:$0xff] %v891_v49   ;;  %971 = vst [vmem:[%s1202_s13 + $0x48] sm:$0xff] %v931_v50   ;;  %v433_v55 = vadd.f32 %v1024_v53, %v1187_v24  ;;  %v497_v56 = vadd.f32 %v1040_v54, %v1187_v24  ;;  %v424_v57 = vpop.f32.mrb[5].mxu0  ;;  %v488_v58 = vpop.f32.mrb[5].mxu1 }
 0x103   : > { %887 = vst [vmem:[%s1202_s13] sm:$0xff] %v886_v51   ;;  %970 = vst [vmem:[%s1202_s13 + $0x40] sm:$0xff] %v926_v52   ;;  %v425_v59 = vadd.f32 %v1187_v24, %v424_v57  ;;  %v489_v60 = vadd.f32 %v1187_v24, %v488_v58  ;;  %v1025_v61 = vpop.f32.mrb[6].mxu0  ;;  %v1041_v62 = vpop.f32.mrb[6].mxu1 }
 0x104   : > { %v436_v63 = vadd.f32 %v1025_v61, %v1187_v24  ;;  %v500_v0 = vadd.f32 %v1041_v62, %v1187_v24  ;;  %v427_v1 = vpop.f32.mrb[7].mxu0  ;;  %v491_v2 = vpop.f32.mrb[7].mxu1  ;;  %v541_v5 = vmax.f32 %v433_v55, 0.0  ;;  %v557_v6 = vmax.f32 %v497_v56, 0.0 }
 0x105   : > { %v428_v3 = vadd.f32 %v1187_v24, %v427_v1  ;;  %v492_v4 = vadd.f32 %v1187_v24, %v491_v2  ;;  %v539_v9 = vmax.f32 %v425_v59, 0.0  ;;  %v555_v10 = vmax.f32 %v489_v60, 0.0 }
 0x106   : > { %v542_v7 = vmax.f32 %v436_v63, 0.0  ;;  %v558_v8 = vmax.f32 %v500_v0, 0.0 }
 0x107   : > { %v540_v11 = vmax.f32 %v428_v3, 0.0  ;;  %v556_v12 = vmax.f32 %v492_v4, 0.0 }
 0x108   : > { %v901_v13 = vpack.c.bf16 %v542_v7, %v541_v5  ;;  %v941_v14 = vpack.c.bf16 %v558_v8, %v557_v6 }
 0x109   : > { %v896_v15 = vpack.c.bf16 %v540_v11, %v539_v9  ;;  %v936_v16 = vpack.c.bf16 %v556_v12, %v555_v10  ;;  %v1028_v17 = vpop.f32.mrb[8].mxu0  ;;  %v1044_v18 = vpop.f32.mrb[8].mxu1 }
 0x10a   : > { %965 = vst [vmem:[%s1202_s13 + $0x18] sm:$0xff] %v901_v13   ;;  %973 = vst [vmem:[%s1202_s13 + $0x58] sm:$0xff] %v941_v14   ;;  %v449_v19 = vadd.f32 %v1028_v17, %v1187_v24  ;;  %v513_v20 = vadd.f32 %v1044_v18, %v1187_v24  ;;  %v440_v21 = vpop.f32.mrb[9].mxu0  ;;  %v504_v22 = vpop.f32.mrb[9].mxu1 }
 0x10b   : > { %964 = vst [vmem:[%s1202_s13 + $0x10] sm:$0xff] %v896_v15   ;;  %972 = vst [vmem:[%s1202_s13 + $0x50] sm:$0xff] %v936_v16   ;;  %v441_v23 = vadd.f32 %v1187_v24, %v440_v21  ;;  %v505_v25 = vadd.f32 %v1187_v24, %v504_v22  ;;  %v1029_v26 = vpop.f32.mrb[10].mxu0  ;;  %v1045_v27 = vpop.f32.mrb[10].mxu1 }
 0x10c   : > { %v452_v28 = vadd.f32 %v1029_v26, %v1187_v24  ;;  %v516_v29 = vadd.f32 %v1045_v27, %v1187_v24  ;;  %v443_v30 = vpop.f32.mrb[11].mxu0  ;;  %v507_v31 = vpop.f32.mrb[11].mxu1  ;;  %v545_v34 = vmax.f32 %v449_v19, 0.0  ;;  %v561_v35 = vmax.f32 %v513_v20, 0.0 }
 0x10d   : > { %v444_v32 = vadd.f32 %v1187_v24, %v443_v30  ;;  %v508_v33 = vadd.f32 %v1187_v24, %v507_v31  ;;  %v543_v38 = vmax.f32 %v441_v23, 0.0  ;;  %v559_v39 = vmax.f32 %v505_v25, 0.0 }
 0x10e   : > { %v546_v36 = vmax.f32 %v452_v28, 0.0  ;;  %v562_v37 = vmax.f32 %v516_v29, 0.0 }
 0x10f   : > { %v544_v40 = vmax.f32 %v444_v32, 0.0  ;;  %v560_v41 = vmax.f32 %v508_v33, 0.0 }
 0x110   : > { %v911_v42 = vpack.c.bf16 %v546_v36, %v545_v34  ;;  %v951_v43 = vpack.c.bf16 %v562_v37, %v561_v35 }
 0x111   : > { %v906_v44 = vpack.c.bf16 %v544_v40, %v543_v38  ;;  %v946_v45 = vpack.c.bf16 %v560_v41, %v559_v39  ;;  %v1032_v46 = vpop.f32.mrb[12].mxu0  ;;  %v1048_v47 = vpop.f32.mrb[12].mxu1 }
 0x112   : > { %967 = vst [vmem:[%s1202_s13 + $0x28] sm:$0xff] %v911_v42   ;;  %975 = vst [vmem:[%s1202_s13 + $0x68] sm:$0xff] %v951_v43   ;;  %v465_v48 = vadd.f32 %v1032_v46, %v1187_v24  ;;  %v529_v49 = vadd.f32 %v1048_v47, %v1187_v24  ;;  %v456_v50 = vpop.f32.mrb[13].mxu0  ;;  %v520_v51 = vpop.f32.mrb[13].mxu1 }
 0x113   : > { %966 = vst [vmem:[%s1202_s13 + $0x20] sm:$0xff] %v906_v44   ;;  %974 = vst [vmem:[%s1202_s13 + $0x60] sm:$0xff] %v946_v45   ;;  %v457_v52 = vadd.f32 %v1187_v24, %v456_v50  ;;  %v521_v53 = vadd.f32 %v1187_v24, %v520_v51  ;;  %v1033_v54 = vpop.f32.mrb[14].mxu0  ;;  %v1049_v55 = vpop.f32.mrb[14].mxu1 }
 0x114   : > { %v468_v56 = vadd.f32 %v1033_v54, %v1187_v24  ;;  %v532_v57 = vadd.f32 %v1049_v55, %v1187_v24  ;;  %v459_v58 = vpop.f32.mrb[15].mxu0  ;;  %v523_v59 = vpop.f32.mrb[15].mxu1  ;;  %v549_v62 = vmax.f32 %v465_v48, 0.0  ;;  %v565_v63 = vmax.f32 %v529_v49, 0.0 }
 0x115   : > { %v460_v60 = vadd.f32 %v1187_v24, %v459_v58  ;;  %v524_v61 = vadd.f32 %v1187_v24, %v523_v59  ;;  %v547_v2 = vmax.f32 %v457_v52, 0.0  ;;  %v563_v3 = vmax.f32 %v521_v53, 0.0 }
 0x116   : > { %v550_v0 = vmax.f32 %v468_v56, 0.0  ;;  %v566_v1 = vmax.f32 %v532_v57, 0.0 }
 0x117   : > { %v548_v4 = vmax.f32 %v460_v60, 0.0  ;;  %v564_v5 = vmax.f32 %v524_v61, 0.0 }
 0x118   : > { %v921_v6 = vpack.c.bf16 %v550_v0, %v549_v62  ;;  %v961_v7 = vpack.c.bf16 %v566_v1, %v565_v63 }
 0x119   : > { %v916_v8 = vpack.c.bf16 %v548_v4, %v547_v2  ;;  %v956_v9 = vpack.c.bf16 %v564_v5, %v563_v3 }
 0x11a   : > { %969 = vst [vmem:[%s1202_s13 + $0x38] sm:$0xff] %v921_v6   ;;  %977 = vst [vmem:[%s1202_s13 + $0x78] sm:$0xff] %v961_v7  }
 0x11b   : > { %968 = vst [vmem:[%s1202_s13 + $0x30] sm:$0xff] %v916_v8   ;;  %976 = vst [vmem:[%s1202_s13 + $0x70] sm:$0xff] %v956_v9  }
 0x11c PF: > { %s13_s12 = sadd.s32 1, %s1104_s12  }
 0x11d   : > { %p10_p4 = scmp.ge.s32.totalorder %s13_s12, 4  }
 0x11f   :  { %12 = sbr.rel (!%p10_p4) target bundleno = 1 (0x1), region = 62 }

// kernel: minkunet_forward.40
= control target key start
LH: loop header
LB: loop body
LE: loop exit
PB: predicated region body
PF: predicated region fallthrough
CT: control target
= control target key end

     0   :  { %s1750_s12 = smov 0   ;;  %s1935_s0 = inlined_call_operand.vmem [shape: bf16[4096,128], index: 0, kind: input, shape index: {}]   ;;  %s1936_s1 = inlined_call_operand.vmem [shape: bf16[128,128], index: 1, kind: input, shape index: {}]   ;;  %s1937_s2 = inlined_call_operand.vmem [shape: f32[1,128], index: 2, kind: input, shape index: {}]   ;;  %s1938_s3 = inlined_call_operand.vmem [shape: bf16[4096,128], index: 3, kind: output, shape index: {}]  }
   0x1 LB: > { %s1167_s13 = sadd.s32 4294967295, %s1728_s12   ;;  %p1171_p0 = scmp.ge.s32.totalorder %s1728_s12, 1  ;;  %s1728_s12 = sphi %s1750_s12, %s13_s12  }
   0x2   : > { %p138_p1 = scmp.lt.s32.totalorder %s1728_s12, 9 }
   0x4   : > { %p139_p2 = pnand %p1171_p0, %p138_p1 }
   0x5   : > { %v1682_v0 = vld [vmem:[%s1936_s1] sm:$0xff] (!%p139_p2)   ;;  %s1172_s16 = sshll.u32 (!%p139_p2), %s1167_s13, 6  ;;  %v1683_v1 = vld [vmem:[%s1936_s1 + $0x8] sm:$0xff] (!%p139_p2)   ;;  %v1684_v2 = vld [vmem:[%s1936_s1 + $0x10] sm:$0xff] (!%p139_p2)  }
   0x6   : > { %142 = sbr.rel (%p139_p2) target bundleno = 314 (0x13a), region = 32  ;;  %p163_p3 = scmp.lt.s32.totalorder (!%p139_p2), %s1172_s16, 511  ;;  %1578 = vmatprep.subr.bf16.mxu0 (!%p139_p2), %v1682_v0  ;;  %1658 = vmatprep.subr.bf16.mxu1 (!%p139_p2), %v1682_v0  ;;  %v1685_v3 = vld [vmem:[%s1936_s1 + $0x18] sm:$0xff] (!%p139_p2)   ;;  %v1686_v6 = vld [vmem:[%s1936_s1 + $0x20] sm:$0xff] (!%p139_p2)   ;;  %v1687_v7 = vld [vmem:[%s1936_s1 + $0x28] sm:$0xff] (!%p139_p2)  }
   0x7   : > { %1579 = vmatpush3.bf16.msra.mxu0 (!%p139_p2), %v1682_v0  ;;  %1666 = vmatpush3.bf16.msra.mxu1 (!%p139_p2), %v1682_v0  ;;  %v1688_v8 = vld [vmem:[%s1936_s1 + $0x30] sm:$0xff] (!%p139_p2)   ;;  %v1689_v9 = vld [vmem:[%s1936_s1 + $0x38] sm:$0xff] (!%p139_p2)   ;;  %v1827_v41 = vld [vmem:[%s1937_s2] ss:$0 sm:$0xff] (!%p139_p2) }
   0x8   : > { %1580 = vmatprep.subr.bf16.mxu0 (!%p139_p2), %v1683_v1  ;;  %1659 = vmatprep.subr.bf16.mxu1 (!%p139_p2), %v1683_v1 }
   0xb   : > { %1581 = vmatpush3.bf16.msra.mxu0 (!%p139_p2), %v1683_v1  ;;  %1667 = vmatpush3.bf16.msra.mxu1 (!%p139_p2), %v1683_v1 }
   0xc   : > { %1582 = vmatprep.subr.bf16.mxu0 (!%p139_p2), %v1684_v2  ;;  %1660 = vmatprep.subr.bf16.mxu1 (!%p139_p2), %v1684_v2 }
   0xd   : > { %s1940_s16 = smov (!%p163_p3, %s1172_s16), 511 }
   0xe   : > { %s1173_s21 = sshll.u32 %s1940_s16, 2 }
   0xf   : > { %s1775_s24 = scalar_lea.vmem %s1935_s0, %s1173_s21  ;;  %1583 = vmatpush3.bf16.msra.mxu0 %v1684_v2  ;;  %1668 = vmatpush3.bf16.msra.mxu1 %v1684_v2  ;;  %s1840_s13 = scalar_lea.vmem %s1938_s3, %s1173_s21 }
  0x10   : > { %v1690_v4 = vld [vmem:[%s1775_s24] sm:$0xff]   ;;  %1584 = vmatprep.subr.bf16.mxu0 %v1685_v3  ;;  %1661 = vmatprep.subr.bf16.mxu1 %v1685_v3  ;;  %v1692_v10 = vld [vmem:[%s1775_s24 + $0x8] sm:$0xff]   ;;  %v1694_v12 = vld [vmem:[%s1775_s24 + $0x10] sm:$0xff]  }
  0x11   : > { %v1691_v5 = vld [vmem:[%s1775_s24 + $0x80] sm:$0xff]   ;;  %1594 = vmatprep.mubr.bf16.mxu0 %v1690_v4  ;;  %v1693_v11 = vld [vmem:[%s1775_s24 + $0x88] sm:$0xff]   ;;  %v1695_v13 = vld [vmem:[%s1775_s24 + $0x90] sm:$0xff]  }
  0x12   : > { %1626 = vmatprep.mubr.bf16.mxu1 %v1691_v5  ;;  %v1696_v14 = vld [vmem:[%s1775_s24 + $0x18] sm:$0xff]   ;;  %v1698_v16 = vld [vmem:[%s1775_s24 + $0x20] sm:$0xff]   ;;  %v1700_v18 = vld [vmem:[%s1775_s24 + $0x28] sm:$0xff]  }
  0x13   : > { %1585 = vmatpush3.bf16.msra.mxu0 %v1685_v3  ;;  %1669 = vmatpush3.bf16.msra.mxu1 %v1685_v3  ;;  %v1697_v15 = vld [vmem:[%s1775_s24 + $0x98] sm:$0xff]   ;;  %v1699_v17 = vld [vmem:[%s1775_s24 + $0xa0] sm:$0xff]   ;;  %v1701_v19 = vld [vmem:[%s1775_s24 + $0xa8] sm:$0xff]  }
  0x14   : > { %1586 = vmatprep.subr.bf16.mxu0 %v1686_v6  ;;  %1662 = vmatprep.subr.bf16.mxu1 %v1686_v6  ;;  %v1702_v20 = vld [vmem:[%s1775_s24 + $0x30] sm:$0xff]   ;;  %v1704_v22 = vld [vmem:[%s1775_s24 + $0x38] sm:$0xff]   ;;  %v1706_v24 = vld [vmem:[%s1775_s24 + $0x40] sm:$0xff]  }
  0x15   : > { %v1703_v21 = vld [vmem:[%s1775_s24 + $0xb0] sm:$0xff]   ;;  %v1705_v23 = vld [vmem:[%s1775_s24 + $0xb8] sm:$0xff]   ;;  %v1707_v25 = vld [vmem:[%s1775_s24 + $0xc0] sm:$0xff]  }
  0x16   : > { %v1708_v26 = vld [vmem:[%s1775_s24 + $0x48] sm:$0xff]   ;;  %v1710_v28 = vld [vmem:[%s1775_s24 + $0x50] sm:$0xff]   ;;  %v1712_v30 = vld [vmem:[%s1775_s24 + $0x58] sm:$0xff]  }
  0x17   : > { %1587 = vmatpush3.bf16.msra.mxu0 %v1686_v6  ;;  %1670 = vmatpush3.bf16.msra.mxu1 %v1686_v6  ;;  %v1709_v27 = vld [vmem:[%s1775_s24 + $0xc8] sm:$0xff]   ;;  %v1711_v29 = vld [vmem:[%s1775_s24 + $0xd0] sm:$0xff]   ;;  %v1713_v31 = vld [vmem:[%s1775_s24 + $0xd8] sm:$0xff]  }
  0x18   : > { %1588 = vmatprep.subr.bf16.mxu0 %v1687_v7  ;;  %1663 = vmatprep.subr.bf16.mxu1 %v1687_v7  ;;  %v1714_v32 = vld [vmem:[%s1775_s24 + $0x60] sm:$0xff]   ;;  %v1716_v34 = vld [vmem:[%s1775_s24 + $0x68] sm:$0xff]   ;;  %v1718_v36 = vld [vmem:[%s1775_s24 + $0x70] sm:$0xff]  }
  0x19   : > { %v1715_v33 = vld [vmem:[%s1775_s24 + $0xe0] sm:$0xff]   ;;  %v1717_v35 = vld [vmem:[%s1775_s24 + $0xe8] sm:$0xff]   ;;  %v1719_v37 = vld [vmem:[%s1775_s24 + $0xf0] sm:$0xff]  }
  0x1a   : > { %v1720_v38 = vld [vmem:[%s1775_s24 + $0x78] sm:$0xff]  }
  0x1b   : > { %1589 = vmatpush3.bf16.msra.mxu0 %v1687_v7  ;;  %1671 = vmatpush3.bf16.msra.mxu1 %v1687_v7  ;;  %v1721_v39 = vld [vmem:[%s1775_s24 + $0xf8] sm:$0xff]  }
  0x1c   : > { %1590 = vmatprep.subr.bf16.mxu0 %v1688_v8  ;;  %1664 = vmatprep.subr.bf16.mxu1 %v1688_v8 }
  0x1f   : > { %1591 = vmatpush3.bf16.msra.mxu0 %v1688_v8  ;;  %1672 = vmatpush3.bf16.msra.mxu1 %v1688_v8 }
  0x20   : > { %1592 = vmatprep.subr.bf16.mxu0 %v1689_v9  ;;  %1665 = vmatprep.subr.bf16.mxu1 %v1689_v9 }
  0x23   : > { %1593 = vmatpush3.bf16.msra.mxu0 %v1689_v9  ;;  %1673 = vmatpush3.bf16.msra.mxu1 %v1689_v9 }
  0x26   : > { %1595 = vmatmul.mubr.bf16.vlgmr.msra.gmra.mrb[0].mxu0 %v1692_v10  ;;  %1627 = vmatmul.mubr.bf16.vlgmr.msra.gmra.mrb[0].mxu1 %v1693_v11 }
  0x27   : > { %1598 = vmatprep.mubr.bf16.mxu0 %v1694_v12  ;;  %1630 = vmatprep.mubr.bf16.mxu1 %v1695_v13 }
  0x2e   : > { %1599 = vmatmul.mubr.bf16.gmra.mrb[4].mxu0 %v1696_v14  ;;  %1631 = vmatmul.mubr.bf16.gmra.mrb[4].mxu1 %v1697_v15 }
  0x2f   : > { %1602 = vmatprep.mubr.bf16.mxu0 %v1698_v16  ;;  %1634 = vmatprep.mubr.bf16.mxu1 %v1699_v17 }
  0x36   : > { %1603 = vmatmul.mubr.bf16.gmra.mrb[8].mxu0 %v1700_v18  ;;  %1635 = vmatmul.mubr.bf16.gmra.mrb[8].mxu1 %v1701_v19 }
  0x37   : > { %1606 = vmatprep.mubr.bf16.mxu0 %v1702_v20  ;;  %1638 = vmatprep.mubr.bf16.mxu1 %v1703_v21 }
  0x3e   : > { %1607 = vmatmul.mubr.bf16.gmra.mrb[12].mxu0 %v1704_v22  ;;  %1639 = vmatmul.mubr.bf16.gmra.mrb[12].mxu1 %v1705_v23 }
  0x3f   : > { %1610 = vmatprep.mubr.bf16.mxu0 %v1706_v24  ;;  %1642 = vmatprep.mubr.bf16.mxu1 %v1707_v25 }
  0x46   : > { %1611 = vmatmul.mubr.bf16.gmra.mrb[16].mxu0 %v1708_v26  ;;  %1643 = vmatmul.mubr.bf16.gmra.mrb[16].mxu1 %v1709_v27 }
  0x47   : > { %1614 = vmatprep.mubr.bf16.mxu0 %v1710_v28  ;;  %1646 = vmatprep.mubr.bf16.mxu1 %v1711_v29 }
  0x4e   : > { %1615 = vmatmul.mubr.bf16.gmra.mrb[20].mxu0 %v1712_v30  ;;  %1647 = vmatmul.mubr.bf16.gmra.mrb[20].mxu1 %v1713_v31 }
  0x4f   : > { %1618 = vmatprep.mubr.bf16.mxu0 %v1714_v32  ;;  %1650 = vmatprep.mubr.bf16.mxu1 %v1715_v33 }
  0x56   : > { %1619 = vmatmul.mubr.bf16.gmra.mrb[24].mxu0 %v1716_v34  ;;  %1651 = vmatmul.mubr.bf16.gmra.mrb[24].mxu1 %v1717_v35 }
  0x57   : > { %1622 = vmatprep.mubr.bf16.mxu0 %v1718_v36  ;;  %1654 = vmatprep.mubr.bf16.mxu1 %v1719_v37 }
  0x5e   : > { %1623 = vmatmul.mubr.bf16.gmra.mrb[28].mxu0 %v1720_v38  ;;  %1655 = vmatmul.mubr.bf16.gmra.mrb[28].mxu1 %v1721_v39 }
  0xf9   : > { %v1596_v40 = vpop.f32.mrb[0].mxu0  ;;  %v1628_v42 = vpop.f32.mrb[0].mxu1 }
  0xfa   : > { %v536_v43 = vpop.f32.mrb[1].mxu0  ;;  %v664_v44 = vpop.f32.mrb[1].mxu1  ;;  %v545_v47 = vadd.f32 %v1596_v40, %v1827_v41  ;;  %v673_v48 = vadd.f32 %v1628_v42, %v1827_v41 }
  0xfb   : > { %v1597_v45 = vpop.f32.mrb[2].mxu0  ;;  %v1629_v46 = vpop.f32.mrb[2].mxu1  ;;  %v537_v53 = vadd.f32 %v1827_v41, %v536_v43  ;;  %v665_v54 = vadd.f32 %v1827_v41, %v664_v44 }
  0xfc   : > { %v548_v49 = vadd.f32 %v1597_v45, %v1827_v41  ;;  %v676_v50 = vadd.f32 %v1629_v46, %v1827_v41  ;;  %v539_v51 = vpop.f32.mrb[3].mxu0  ;;  %v667_v52 = vpop.f32.mrb[3].mxu1 }
  0xfd   : > { %v540_v55 = vadd.f32 %v1827_v41, %v539_v51  ;;  %v668_v56 = vadd.f32 %v1827_v41, %v667_v52 }
  0xfe   : > { %v1355_v57 = vpack.c.bf16 %v548_v49, %v545_v47  ;;  %v1435_v58 = vpack.c.bf16 %v676_v50, %v673_v48 }
  0xff   : > { %v1350_v59 = vpack.c.bf16 %v540_v55, %v537_v53  ;;  %v1430_v60 = vpack.c.bf16 %v668_v56, %v665_v54 }
 0x100   : > { %1507 = vst [vmem:[%s1840_s13 + $0x8] sm:$0xff] %v1355_v57   ;;  %1523 = vst [vmem:[%s1840_s13 + $0x88] sm:$0xff] %v1435_v58  }
 0x101   : > { %1351 = vst [vmem:[%s1840_s13] sm:$0xff] %v1350_v59   ;;  %1522 = vst [vmem:[%s1840_s13 + $0x80] sm:$0xff] %v1430_v60   ;;  %v1600_v61 = vpop.f32.mrb[4].mxu0  ;;  %v1632_v62 = vpop.f32.mrb[4].mxu1 }
 0x102   : > { %v552_v63 = vpop.f32.mrb[5].mxu0  ;;  %v680_v0 = vpop.f32.mrb[5].mxu1  ;;  %v561_v3 = vadd.f32 %v1600_v61, %v1827_v41  ;;  %v689_v4 = vadd.f32 %v1632_v62, %v1827_v41 }
 0x103   : > { %v1601_v1 = vpop.f32.mrb[6].mxu0  ;;  %v1633_v2 = vpop.f32.mrb[6].mxu1  ;;  %v553_v9 = vadd.f32 %v1827_v41, %v552_v63  ;;  %v681_v10 = vadd.f32 %v1827_v41, %v680_v0 }
 0x104   : > { %v564_v5 = vadd.f32 %v1601_v1, %v1827_v41  ;;  %v692_v6 = vadd.f32 %v1633_v2, %v1827_v41  ;;  %v555_v7 = vpop.f32.mrb[7].mxu0  ;;  %v683_v8 = vpop.f32.mrb[7].mxu1 }
 0x105   : > { %v556_v11 = vadd.f32 %v1827_v41, %v555_v7  ;;  %v684_v12 = vadd.f32 %v1827_v41, %v683_v8 }
 0x106   : > { %v1365_v13 = vpack.c.bf16 %v564_v5, %v561_v3  ;;  %v1445_v14 = vpack.c.bf16 %v692_v6, %v689_v4 }
 0x107   : > { %v1360_v15 = vpack.c.bf16 %v556_v11, %v553_v9  ;;  %v1440_v16 = vpack.c.bf16 %v684_v12, %v681_v10 }
 0x108   : > { %1509 = vst [vmem:[%s1840_s13 + $0x18] sm:$0xff] %v1365_v13   ;;  %1525 = vst [vmem:[%s1840_s13 + $0x98] sm:$0xff] %v1445_v14  }
 0x109   : > { %1508 = vst [vmem:[%s1840_s13 + $0x10] sm:$0xff] %v1360_v15   ;;  %1524 = vst [vmem:[%s1840_s13 + $0x90] sm:$0xff] %v1440_v16   ;;  %v1604_v17 = vpop.f32.mrb[8].mxu0  ;;  %v1636_v18 = vpop.f32.mrb[8].mxu1 }
 0x10a   : > { %v568_v19 = vpop.f32.mrb[9].mxu0  ;;  %v696_v20 = vpop.f32.mrb[9].mxu1  ;;  %v577_v23 = vadd.f32 %v1604_v17, %v1827_v41  ;;  %v705_v24 = vadd.f32 %v1636_v18, %v1827_v41 }
 0x10b   : > { %v1605_v21 = vpop.f32.mrb[10].mxu0  ;;  %v1637_v22 = vpop.f32.mrb[10].mxu1  ;;  %v569_v29 = vadd.f32 %v1827_v41, %v568_v19  ;;  %v697_v30 = vadd.f32 %v1827_v41, %v696_v20 }
 0x10c   : > { %v580_v25 = vadd.f32 %v1605_v21, %v1827_v41  ;;  %v708_v26 = vadd.f32 %v1637_v22, %v1827_v41  ;;  %v571_v27 = vpop.f32.mrb[11].mxu0  ;;  %v699_v28 = vpop.f32.mrb[11].mxu1 }
 0x10d   : > { %v572_v31 = vadd.f32 %v1827_v41, %v571_v27  ;;  %v700_v32 = vadd.f32 %v1827_v41, %v699_v28 }
 0x10e   : > { %v1375_v33 = vpack.c.bf16 %v580_v25, %v577_v23  ;;  %v1455_v34 = vpack.c.bf16 %v708_v26, %v705_v24 }
 0x10f   : > { %v1370_v35 = vpack.c.bf16 %v572_v31, %v569_v29  ;;  %v1450_v36 = vpack.c.bf16 %v700_v32, %v697_v30 }
 0x110   : > { %1511 = vst [vmem:[%s1840_s13 + $0x28] sm:$0xff] %v1375_v33   ;;  %1527 = vst [vmem:[%s1840_s13 + $0xa8] sm:$0xff] %v1455_v34  }
 0x111   : > { %1510 = vst [vmem:[%s1840_s13 + $0x20] sm:$0xff] %v1370_v35   ;;  %1526 = vst [vmem:[%s1840_s13 + $0xa0] sm:$0xff] %v1450_v36   ;;  %v1608_v37 = vpop.f32.mrb[12].mxu0  ;;  %v1640_v38 = vpop.f32.mrb[12].mxu1 }
 0x112   : > { %v584_v39 = vpop.f32.mrb[13].mxu0  ;;  %v712_v40 = vpop.f32.mrb[13].mxu1  ;;  %v593_v44 = vadd.f32 %v1608_v37, %v1827_v41  ;;  %v721_v45 = vadd.f32 %v1640_v38, %v1827_v41 }
 0x113   : > { %v1609_v42 = vpop.f32.mrb[14].mxu0  ;;  %v1641_v43 = vpop.f32.mrb[14].mxu1  ;;  %v585_v50 = vadd.f32 %v1827_v41, %v584_v39  ;;  %v713_v51 = vadd.f32 %v1827_v41, %v712_v40 }
 0x114   : > { %v596_v46 = vadd.f32 %v1609_v42, %v1827_v41  ;;  %v724_v47 = vadd.f32 %v1641_v43, %v1827_v41  ;;  %v587_v48 = vpop.f32.mrb[15].mxu0  ;;  %v715_v49 = vpop.f32.mrb[15].mxu1 }
 0x115   : > { %v588_v52 = vadd.f32 %v1827_v41, %v587_v48  ;;  %v716_v53 = vadd.f32 %v1827_v41, %v715_v49 }
 0x116   : > { %v1385_v54 = vpack.c.bf16 %v596_v46, %v593_v44  ;;  %v1465_v55 = vpack.c.bf16 %v724_v47, %v721_v45 }
 0x117   : > { %v1380_v56 = vpack.c.bf16 %v588_v52, %v585_v50  ;;  %v1460_v57 = vpack.c.bf16 %v716_v53, %v713_v51 }
 0x118   : > { %1513 = vst [vmem:[%s1840_s13 + $0x38] sm:$0xff] %v1385_v54   ;;  %1529 = vst [vmem:[%s1840_s13 + $0xb8] sm:$0xff] %v1465_v55  }
 0x119   : > { %1512 = vst [vmem:[%s1840_s13 + $0x30] sm:$0xff] %v1380_v56   ;;  %1528 = vst [vmem:[%s1840_s13 + $0xb0] sm:$0xff] %v1460_v57   ;;  %v1612_v58 = vpop.f32.mrb[16].mxu0  ;;  %v1644_v59 = vpop.f32.mrb[16].mxu1 }
 0x11a   : > { %v600_v60 = vpop.f32.mrb[17].mxu0  ;;  %v728_v61 = vpop.f32.mrb[17].mxu1  ;;  %v609_v0 = vadd.f32 %v1612_v58, %v1827_v41  ;;  %v737_v1 = vadd.f32 %v1644_v59, %v1827_v41 }
 0x11b   : > { %v1613_v62 = vpop.f32.mrb[18].mxu0  ;;  %v1645_v63 = vpop.f32.mrb[18].mxu1  ;;  %v601_v6 = vadd.f32 %v1827_v41, %v600_v60  ;;  %v729_v7 = vadd.f32 %v1827_v41, %v728_v61 }
 0x11c   : > { %v612_v2 = vadd.f32 %v1613_v62, %v1827_v41  ;;  %v740_v3 = vadd.f32 %v1645_v63, %v1827_v41  ;;  %v603_v4 = vpop.f32.mrb[19].mxu0  ;;  %v731_v5 = vpop.f32.mrb[19].mxu1 }
 0x11d   : > { %v604_v8 = vadd.f32 %v1827_v41, %v603_v4  ;;  %v732_v9 = vadd.f32 %v1827_v41, %v731_v5 }
 0x11e   : > { %v1395_v10 = vpack.c.bf16 %v612_v2, %v609_v0  ;;  %v1475_v11 = vpack.c.bf16 %v740_v3, %v737_v1 }
 0x11f   : > { %v1390_v12 = vpack.c.bf16 %v604_v8, %v601_v6  ;;  %v1470_v13 = vpack.c.bf16 %v732_v9, %v729_v7 }
 0x120   : > { %1515 = vst [vmem:[%s1840_s13 + $0x48] sm:$0xff] %v1395_v10   ;;  %1531 = vst [vmem:[%s1840_s13 + $0xc8] sm:$0xff] %v1475_v11  }
 0x121   : > { %1514 = vst [vmem:[%s1840_s13 + $0x40] sm:$0xff] %v1390_v12   ;;  %1530 = vst [vmem:[%s1840_s13 + $0xc0] sm:$0xff] %v1470_v13   ;;  %v1616_v14 = vpop.f32.mrb[20].mxu0  ;;  %v1648_v15 = vpop.f32.mrb[20].mxu1 }
 0x122   : > { %v616_v16 = vpop.f32.mrb[21].mxu0  ;;  %v744_v17 = vpop.f32.mrb[21].mxu1  ;;  %v625_v20 = vadd.f32 %v1616_v14, %v1827_v41  ;;  %v753_v21 = vadd.f32 %v1648_v15, %v1827_v41 }
 0x123   : > { %v1617_v18 = vpop.f32.mrb[22].mxu0  ;;  %v1649_v19 = vpop.f32.mrb[22].mxu1  ;;  %v617_v26 = vadd.f32 %v1827_v41, %v616_v16  ;;  %v745_v27 = vadd.f32 %v1827_v41, %v744_v17 }
 0x124   : > { %v628_v22 = vadd.f32 %v1617_v18, %v1827_v41  ;;  %v756_v23 = vadd.f32 %v1649_v19, %v1827_v41  ;;  %v619_v24 = vpop.f32.mrb[23].mxu0  ;;  %v747_v25 = vpop.f32.mrb[23].mxu1 }
 0x125   : > { %v620_v28 = vadd.f32 %v1827_v41, %v619_v24  ;;  %v748_v29 = vadd.f32 %v1827_v41, %v747_v25 }
 0x126   : > { %v1405_v30 = vpack.c.bf16 %v628_v22, %v625_v20  ;;  %v1485_v31 = vpack.c.bf16 %v756_v23, %v753_v21 }
 0x127   : > { %v1400_v32 = vpack.c.bf16 %v620_v28, %v617_v26  ;;  %v1480_v33 = vpack.c.bf16 %v748_v29, %v745_v27 }
 0x128   : > { %1517 = vst [vmem:[%s1840_s13 + $0x58] sm:$0xff] %v1405_v30   ;;  %1533 = vst [vmem:[%s1840_s13 + $0xd8] sm:$0xff] %v1485_v31  }
 0x129   : > { %1516 = vst [vmem:[%s1840_s13 + $0x50] sm:$0xff] %v1400_v32   ;;  %1532 = vst [vmem:[%s1840_s13 + $0xd0] sm:$0xff] %v1480_v33   ;;  %v1620_v34 = vpop.f32.mrb[24].mxu0  ;;  %v1652_v35 = vpop.f32.mrb[24].mxu1 }
 0x12a   : > { %v632_v36 = vpop.f32.mrb[25].mxu0  ;;  %v760_v37 = vpop.f32.mrb[25].mxu1  ;;  %v641_v40 = vadd.f32 %v1620_v34, %v1827_v41  ;;  %v769_v42 = vadd.f32 %v1652_v35, %v1827_v41 }
 0x12b   : > { %v1621_v38 = vpop.f32.mrb[26].mxu0  ;;  %v1653_v39 = vpop.f32.mrb[26].mxu1  ;;  %v633_v47 = vadd.f32 %v1827_v41, %v632_v36  ;;  %v761_v48 = vadd.f32 %v1827_v41, %v760_v37 }
 0x12c   : > { %v644_v43 = vadd.f32 %v1621_v38, %v1827_v41  ;;  %v772_v44 = vadd.f32 %v1653_v39, %v1827_v41  ;;  %v635_v45 = vpop.f32.mrb[27].mxu0  ;;  %v763_v46 = vpop.f32.mrb[27].mxu1 }
 0x12d   : > { %v636_v49 = vadd.f32 %v1827_v41, %v635_v45  ;;  %v764_v50 = vadd.f32 %v1827_v41, %v763_v46 }
 0x12e   : > { %v1415_v51 = vpack.c.bf16 %v644_v43, %v641_v40  ;;  %v1495_v52 = vpack.c.bf16 %v772_v44, %v769_v42 }
 0x12f   : > { %v1410_v53 = vpack.c.bf16 %v636_v49, %v633_v47  ;;  %v1490_v54 = vpack.c.bf16 %v764_v50, %v761_v48 }
 0x130   : > { %1519 = vst [vmem:[%s1840_s13 + $0x68] sm:$0xff] %v1415_v51   ;;  %1535 = vst [vmem:[%s1840_s13 + $0xe8] sm:$0xff] %v1495_v52  }
 0x131   : > { %1518 = vst [vmem:[%s1840_s13 + $0x60] sm:$0xff] %v1410_v53   ;;  %1534 = vst [vmem:[%s1840_s13 + $0xe0] sm:$0xff] %v1490_v54   ;;  %v1624_v55 = vpop.f32.mrb[28].mxu0  ;;  %v1656_v56 = vpop.f32.mrb[28].mxu1 }
 0x132   : > { %v648_v57 = vpop.f32.mrb[29].mxu0  ;;  %v776_v58 = vpop.f32.mrb[29].mxu1  ;;  %v657_v61 = vadd.f32 %v1624_v55, %v1827_v41  ;;  %v785_v62 = vadd.f32 %v1656_v56, %v1827_v41 }
 0x133   : > { %v1625_v59 = vpop.f32.mrb[30].mxu0  ;;  %v1657_v60 = vpop.f32.mrb[30].mxu1  ;;  %v649_v3 = vadd.f32 %v1827_v41, %v648_v57  ;;  %v777_v4 = vadd.f32 %v1827_v41, %v776_v58 }
 0x134   : > { %v660_v63 = vadd.f32 %v1625_v59, %v1827_v41  ;;  %v788_v0 = vadd.f32 %v1657_v60, %v1827_v41  ;;  %v651_v1 = vpop.f32.mrb[31].mxu0  ;;  %v779_v2 = vpop.f32.mrb[31].mxu1 }
 0x135   : > { %v652_v5 = vadd.f32 %v1827_v41, %v651_v1  ;;  %v780_v6 = vadd.f32 %v1827_v41, %v779_v2 }
 0x136   : > { %v1425_v7 = vpack.c.bf16 %v660_v63, %v657_v61  ;;  %v1505_v8 = vpack.c.bf16 %v788_v0, %v785_v62 }
 0x137   : > { %v1420_v9 = vpack.c.bf16 %v652_v5, %v649_v3  ;;  %v1500_v10 = vpack.c.bf16 %v780_v6, %v777_v4 }
 0x138   : > { %1521 = vst [vmem:[%s1840_s13 + $0x78] sm:$0xff] %v1425_v7   ;;  %1537 = vst [vmem:[%s1840_s13 + $0xf8] sm:$0xff] %v1505_v8  }
 0x139   : > { %1520 = vst [vmem:[%s1840_s13 + $0x70] sm:$0xff] %v1420_v9   ;;  %1536 = vst [vmem:[%s1840_s13 + $0xf0] sm:$0xff] %v1500_v10  }
 0x13a PF: > { %s13_s12 = sadd.s32 1, %s1728_s12  }
 0x13b   : > { %p10_p4 = scmp.ge.s32.totalorder %s13_s12, 10  }
 0x13d   :  { %12 = sbr.rel (!%p10_p4) target bundleno = 1 (0x1), region = 62 }

// kernel: minkunet_forward.41
= control target key start
LH: loop header
LB: loop body
LE: loop exit
PB: predicated region body
PF: predicated region fallthrough
CT: control target
= control target key end

     0   :  { %s373_s6 = smov 0   ;;  %s513_s0 = inlined_call_operand.vmem [shape: f32[256,128], index: 0, kind: input, shape index: {}]   ;;  %s514_s1 = inlined_call_operand.vmem [shape: f32[256,128], index: 1, kind: output, shape index: {}]  }
   0x1 LB: > { %s304_s7 = sadd.s32 4294967295, %s361_s6   ;;  %p308_p0 = scmp.ge.s32.totalorder %s361_s6, 1  ;;  %s361_s6 = sphi %s373_s6, %s11_s6  }
   0x2   : > { %p88_p1 = scmp.lt.s32.totalorder %s361_s6, 3 }
   0x4   : > { %p89_p2 = pnand %p308_p0, %p88_p1 }
   0x5   : > { %s309_s8 = sshll.u32 (!%p89_p2), %s304_s7, 4 }
   0x6   : > { %92 = sbr.rel (%p89_p2) target bundleno = 206 (0xce), region = 24  ;;  %p109_p3 = scmp.lt.s32.totalorder (!%p89_p2), %s309_s8, 31 }
   0xd   : > { %s516_s8 = smov (!%p109_p3, %s309_s8), 31 }
   0xe   : > { %s310_s9 = sshll.u32 %s516_s8, 3 }
   0xf   : > { %s389_s12 = scalar_lea.vmem %s513_s0, %s310_s9  ;;  %s476_s15 = scalar_lea.vmem %s514_s1, %s310_s9 }
  0x10   : > { %v392_v0 = vld [vmem:[%s389_s12 + $0x10] sm:$0xff]  ;;  %v395_v1 = vld [vmem:[%s389_s12] sm:$0xff]  ;;  %v398_v2 = vld [vmem:[%s389_s12 + $0x18] sm:$0xff] }
  0x11   : > { %v138_v3 = vmul.f32 %v392_v0, %v392_v0  ;;  %v136_v4 = vmul.f32 %v395_v1, %v395_v1  ;;  %v405_v5 = vld [vmem:[%s389_s12 + $0x8] sm:$0xff]  ;;  %v139_v6 = vmul.f32 %v398_v2, %v398_v2  ;;  %v415_v9 = vld [vmem:[%s389_s12 + $0x20] sm:$0xff]  ;;  %v422_v12 = vld [vmem:[%s389_s12 + $0x38] sm:$0xff] }
  0x12   : > { %v137_v7 = vmul.f32 %v405_v5, %v405_v5  ;;  %v412_v8 = vld [vmem:[%s389_s12 + $0x28] sm:$0xff]  ;;  %v140_v11 = vmul.f32 %v415_v9, %v415_v9  ;;  %v425_v13 = vld [vmem:[%s389_s12 + $0x30] sm:$0xff]  ;;  %v143_v14 = vmul.f32 %v422_v12, %v422_v12  ;;  %v435_v17 = vld [vmem:[%s389_s12 + $0x40] sm:$0xff] }
  0x13   : > { %156 = vadd.xlane.f32.xlu1 %v138_v3  ;;  %152 = vadd.xlane.f32.xlu0 %v136_v4  ;;  %v141_v10 = vmul.f32 %v412_v8, %v412_v8  ;;  %v142_v15 = vmul.f32 %v425_v13, %v425_v13  ;;  %v432_v16 = vld [vmem:[%s389_s12 + $0x48] sm:$0xff]  ;;  %v144_v19 = vmul.f32 %v435_v17, %v435_v17  ;;  %v442_v20 = vld [vmem:[%s389_s12 + $0x58] sm:$0xff]  ;;  %v445_v21 = vld [vmem:[%s389_s12 + $0x50] sm:$0xff] }
  0x14   : > { %v145_v18 = vmul.f32 %v432_v16, %v432_v16  ;;  %v147_v22 = vmul.f32 %v442_v20, %v442_v20  ;;  %v146_v23 = vmul.f32 %v445_v21, %v445_v21  ;;  %v452_v24 = vld [vmem:[%s389_s12 + $0x68] sm:$0xff]  ;;  %v455_v25 = vld [vmem:[%s389_s12 + $0x60] sm:$0xff]  ;;  %v462_v28 = vld [vmem:[%s389_s12 + $0x78] sm:$0xff] }
  0x15   : > { %v149_v26 = vmul.f32 %v452_v24, %v452_v24  ;;  %v148_v27 = vmul.f32 %v455_v25, %v455_v25  ;;  %v465_v29 = vld [vmem:[%s389_s12 + $0x70] sm:$0xff]  ;;  %v151_v30 = vmul.f32 %v462_v28, %v462_v28 }
  0x16   : > { %v150_v31 = vmul.f32 %v465_v29, %v465_v29 }
  0x17   : > { %158 = vadd.xlane.f32.xlu1 %v139_v6  ;;  %154 = vadd.xlane.f32.xlu0 %v137_v7 }
  0x1b   : > { %162 = vadd.xlane.f32.xlu1 %v141_v10  ;;  %160 = vadd.xlane.f32.xlu0 %v140_v11 }
  0x1f   : > { %166 = vadd.xlane.f32.xlu1 %v143_v14  ;;  %164 = vadd.xlane.f32.xlu0 %v142_v15 }
  0x23   : > { %170 = vadd.xlane.f32.xlu1 %v145_v18  ;;  %168 = vadd.xlane.f32.xlu0 %v144_v19 }
  0x27   : > { %174 = vadd.xlane.f32.xlu1 %v147_v22  ;;  %172 = vadd.xlane.f32.xlu0 %v146_v23 }
  0x2b   : > { %178 = vadd.xlane.f32.xlu1 %v149_v26  ;;  %176 = vadd.xlane.f32.xlu0 %v148_v27 }
  0x2f   : > { %182 = vadd.xlane.f32.xlu1 %v151_v30  ;;  %180 = vadd.xlane.f32.xlu0 %v150_v31 }
  0xa0   : > { %v157_v32 = vpop.xlane.xlu1 %156  ;;  %v153_v33 = vpop.xlane.xlu0 %152 }
  0xa1   : > { %v186_v34 = vadd.f32 1e-12, %v157_v32  ;;  %v184_v35 = vadd.f32 1e-12, %v153_v33 }
  0xa3   : > { %323 = vrsqrt.f32 %v186_v34 }
  0xa4   : > { %325 = vrsqrt.f32 %v184_v35  ;;  %v159_v36 = vpop.xlane.xlu1 %158  ;;  %v155_v37 = vpop.xlane.xlu0 %154 }
  0xa5   : > { %v187_v38 = vadd.f32 1e-12, %v159_v36  ;;  %v185_v39 = vadd.f32 1e-12, %v155_v37 }
  0xa7   : > { %327 = vrsqrt.f32 %v187_v38 }
  0xa8   : > { %329 = vrsqrt.f32 %v185_v39  ;;  %v163_v40 = vpop.xlane.xlu1 %162  ;;  %v161_v41 = vpop.xlane.xlu0 %160 }
  0xa9   : > { %v189_v42 = vadd.f32 1e-12, %v163_v40  ;;  %v188_v43 = vadd.f32 1e-12, %v161_v41 }
  0xab   : > { %331 = vrsqrt.f32 %v189_v42 }
  0xac   : > { %333 = vrsqrt.f32 %v188_v43  ;;  %v167_v44 = vpop.xlane.xlu1 %166  ;;  %v165_v45 = vpop.xlane.xlu0 %164 }
  0xad   : > { %v324_v46 = vpop.eup %323  ;;  %v191_v47 = vadd.f32 1e-12, %v167_v44  ;;  %v190_v48 = vadd.f32 1e-12, %v165_v45 }
  0xae   : > { %v326_v49 = vpop.eup %325  ;;  %v218_v50 = vmul.f32 %v324_v46, %v392_v0 }
  0xaf   : > { %v216_v51 = vmul.f32 %v326_v49, %v395_v1  ;;  %335 = vrsqrt.f32 %v191_v47 }
  0xb0   : > { %234 = vst [vmem:[%s476_s15 + $0x10] sm:$0xff] %v218_v50  ;;  %337 = vrsqrt.f32 %v190_v48  ;;  %v171_v52 = vpop.xlane.xlu1 %170  ;;  %v169_v53 = vpop.xlane.xlu0 %168 }
  0xb1   : > { %v328_v54 = vpop.eup %327  ;;  %232 = vst [vmem:[%s476_s15] sm:$0xff] %v216_v51  ;;  %v193_v55 = vadd.f32 1e-12, %v171_v52  ;;  %v192_v56 = vadd.f32 1e-12, %v169_v53 }
  0xb2   : > { %v330_v57 = vpop.eup %329  ;;  %v219_v58 = vmul.f32 %v328_v54, %v398_v2 }
  0xb3   : > { %v217_v59 = vmul.f32 %v330_v57, %v405_v5  ;;  %339 = vrsqrt.f32 %v193_v55 }
  0xb4   : > { %235 = vst [vmem:[%s476_s15 + $0x18] sm:$0xff] %v219_v58  ;;  %341 = vrsqrt.f32 %v192_v56  ;;  %v175_v60 = vpop.xlane.xlu1 %174  ;;  %v173_v61 = vpop.xlane.xlu0 %172 }
  0xb5   : > { %v332_v62 = vpop.eup %331  ;;  %233 = vst [vmem:[%s476_s15 + $0x8] sm:$0xff] %v217_v59  ;;  %v195_v63 = vadd.f32 1e-12, %v175_v60  ;;  %v194_v0 = vadd.f32 1e-12, %v173_v61 }
  0xb6   : > { %v334_v1 = vpop.eup %333  ;;  %v221_v3 = vmul.f32 %v332_v62, %v412_v8 }
  0xb7   : > { %v220_v4 = vmul.f32 %v334_v1, %v415_v9  ;;  %343 = vrsqrt.f32 %v195_v63 }
  0xb8   : > { %237 = vst [vmem:[%s476_s15 + $0x28] sm:$0xff] %v221_v3  ;;  %345 = vrsqrt.f32 %v194_v0  ;;  %v179_v2 = vpop.xlane.xlu1 %178  ;;  %v177_v5 = vpop.xlane.xlu0 %176 }
  0xb9   : > { %v336_v6 = vpop.eup %335  ;;  %236 = vst [vmem:[%s476_s15 + $0x20] sm:$0xff] %v220_v4  ;;  %v197_v7 = vadd.f32 1e-12, %v179_v2  ;;  %v196_v10 = vadd.f32 1e-12, %v177_v5 }
  0xba   : > { %v338_v11 = vpop.eup %337  ;;  %v223_v14 = vmul.f32 %v336_v6, %v422_v12 }
  0xbb   : > { %v222_v15 = vmul.f32 %v338_v11, %v425_v13  ;;  %347 = vrsqrt.f32 %v197_v7 }
  0xbc   : > { %239 = vst [vmem:[%s476_s15 + $0x38] sm:$0xff] %v223_v14  ;;  %349 = vrsqrt.f32 %v196_v10  ;;  %v183_v8 = vpop.xlane.xlu1 %182  ;;  %v181_v9 = vpop.xlane.xlu0 %180 }
  0xbd   : > { %v340_v18 = vpop.eup %339  ;;  %238 = vst [vmem:[%s476_s15 + $0x30] sm:$0xff] %v222_v15  ;;  %v199_v19 = vadd.f32 1e-12, %v183_v8  ;;  %v198_v22 = vadd.f32 1e-12, %v181_v9 }
  0xbe   : > { %v342_v23 = vpop.eup %341  ;;  %v225_v26 = vmul.f32 %v340_v18, %v432_v16 }
  0xbf   : > { %v224_v12 = vmul.f32 %v342_v23, %v435_v17  ;;  %351 = vrsqrt.f32 %v199_v19 }
  0xc0   : > { %241 = vst [vmem:[%s476_s15 + $0x48] sm:$0xff] %v225_v26  ;;  %353 = vrsqrt.f32 %v198_v22 }
  0xc1   : > { %v344_v13 = vpop.eup %343  ;;  %240 = vst [vmem:[%s476_s15 + $0x40] sm:$0xff] %v224_v12 }
  0xc2   : > { %v346_v27 = vpop.eup %345  ;;  %v227_v30 = vmul.f32 %v344_v13, %v442_v20 }
  0xc3   : > { %v226_v31 = vmul.f32 %v346_v27, %v445_v21 }
  0xc4   : > { %243 = vst [vmem:[%s476_s15 + $0x58] sm:$0xff] %v227_v30 }
  0xc5   : > { %v348_v32 = vpop.eup %347  ;;  %242 = vst [vmem:[%s476_s15 + $0x50] sm:$0xff] %v226_v31 }
  0xc6   : > { %v350_v16 = vpop.eup %349  ;;  %v229_v33 = vmul.f32 %v348_v32, %v452_v24 }
  0xc7   : > { %v228_v17 = vmul.f32 %v350_v16, %v455_v25 }
  0xc8   : > { %245 = vst [vmem:[%s476_s15 + $0x68] sm:$0xff] %v229_v33 }
  0xc9   : > { %v352_v34 = vpop.eup %351  ;;  %244 = vst [vmem:[%s476_s15 + $0x60] sm:$0xff] %v228_v17 }
  0xca   : > { %v354_v35 = vpop.eup %353  ;;  %v231_v36 = vmul.f32 %v352_v34, %v462_v28 }
  0xcb   : > { %v230_v37 = vmul.f32 %v354_v35, %v465_v29 }
  0xcc   : > { %247 = vst [vmem:[%s476_s15 + $0x78] sm:$0xff] %v231_v36 }
  0xcd   : > { %246 = vst [vmem:[%s476_s15 + $0x70] sm:$0xff] %v230_v37 }
  0xce PF: > { %s11_s6 = sadd.s32 1, %s361_s6  }
  0xcf   : > { %p8_p4 = scmp.ge.s32.totalorder %s11_s6, 4  }
  0xd1   :  { %10 = sbr.rel (!%p8_p4) target bundleno = 1 (0x1), region = 54 }

</bundles_post_ra>
